<compile_context>
chip_gen: v7x
topology: tpu7x:2x2x1
jax: 0.10.0
libtpu: 0.0.40
codegen_flags: <defaults>
</compile_context>

<pallas_src>
import jax
import jax.numpy as jnp
from jax import lax
from jax.experimental import pallas as pl
from jax.experimental.pallas import tpu as pltpu

FRACTRAL_DEPTH = 6      # ZambaBlock default (Zamba does not override it)
QK_NORM_SCALE = 10.0    # x-transformers default attention scale when qk_norm=True


# --------------------------- in-kernel helpers ------------------------------

def _silu(v):
    return v * (1.0 / (1.0 + jnp.exp(-v)))


def _softplus(v):
    # log(1 + e^v) written in an overflow-safe, Mosaic-friendly form
    return jnp.maximum(v, 0.0) + jnp.log(1.0 + jnp.exp(-jnp.abs(v)))


def _ln(v, g, b):
    mu = jnp.mean(v, axis=-1, keepdims=True)
    vc = v - mu
    var = jnp.mean(vc * vc, axis=-1, keepdims=True)
    return vc * lax.rsqrt(var + 1e-5) * g + b


def _bf16(v):
    return v.astype(jnp.bfloat16)


# ----------------------- fused MambaFractralBlock kernel --------------------

def _fractral_kernel(x_ref, rmsg_ref, inx_ref, inz_ref, convw_ref, convb_ref,
                     xpw_ref, dtw_ref, dtb_ref, alogt_ref, dskip_ref, outw_ref,
                     lng_ref, lnb_ref, o_ref,
                     dbc_sc, d_sc, dx_sc, b_sc, c_sc, ys_sc):
    f32 = jnp.float32
    x = x_ref[0]                                      # (L, D) f32
    L, D = x.shape
    N, ED = alogt_ref.shape
    K = convw_ref.shape[0]
    R = dtw_ref.shape[0]

    # ---- loop-invariant values hoisted out of the depth loop -----------------
    at = -jnp.exp(alogt_ref[...])                               # (N, ED) = A^T
    rmsg = jnp.broadcast_to(rmsg_ref[...], (L, D))
    convb = jnp.broadcast_to(convb_ref[...], (L, ED))
    dtb = jnp.broadcast_to(dtb_ref[...], (L, ED))
    dskip = jnp.broadcast_to(dskip_ref[...], (L, ED))
    convw = [jnp.broadcast_to(convw_ref[j:j + 1, :], (L, ED)) for j in range(K)]
    pad = jnp.zeros((K - 1, ED), f32)

    # ---- selective-scan step: rows read from VMEM scratch, h carried ---------
    def scan_step(t, h):
        d_row = d_sc[pl.ds(t, 1), :]                            # (1, ED)
        dx_row = dx_sc[pl.ds(t, 1), :]                          # (1, ED)
        b_col = jnp.transpose(b_sc[pl.ds(t, 1), :])             # (N, 1)
        c_row = c_sc[pl.ds(t, 1), :]                            # (1, N)
        h = jnp.exp(at * d_row) * h + b_col * dx_row            # (N, ED)
        ys_sc[pl.ds(t, 1), :] = jnp.dot(c_row, h, preferred_element_type=f32)
        return h

    for _ in range(FRACTRAL_DEPTH):
        # --- RMSNorm + in_proj (bf16 MXU operands, f32 accumulation) ----------
        ms = jnp.mean(x * x, axis=-1, keepdims=True)
        xn = _bf16(x * lax.rsqrt(ms + 1e-5) * rmsg)
        xi = jnp.dot(xn, inx_ref[...], preferred_element_type=f32)   # (L, ED)
        z = jnp.dot(xn, inz_ref[...], preferred_element_type=f32)    # (L, ED)
        # --- causal depthwise conv: padded static sublane slices (VPU only) ---
        xp = jnp.concatenate([pad, xi], axis=0)                      # (L+K-1, ED)
        conv = convb
        for j in range(K):
            conv = conv + xp[j:j + L, :] * convw[j]
        xc = _silu(conv)                                             # (L, ED)
        # --- fused x_proj -> scratch, split with static ref slices ------------
        dbc_sc[...] = jnp.dot(_bf16(xc), xpw_ref[...], preferred_element_type=f32)
        dr = dbc_sc[:, 0:R]                                          # (L, R)
        b_sc[...] = dbc_sc[:, R:R + N]                               # (L, N)
        c_sc[...] = dbc_sc[:, R + N:R + 2 * N]                       # (L, N)
        delta = _softplus(jnp.dot(_bf16(dr), dtw_ref[...],
                                  preferred_element_type=f32) + dtb)  # (L, ED)
        d_sc[...] = delta
        dx_sc[...] = delta * xc
        # --- selective scan (fori_loop bounds live ranges, no dA/dBx tensors) -
        lax.fori_loop(0, L, scan_step, jnp.zeros((N, ED), f32))
        # --- D-skip, gate, out_proj, Mamba residual + fractal residual --------
        y = (ys_sc[...] + dskip * xc) * _silu(z)
        x = jnp.dot(_bf16(y), outw_ref[...], preferred_element_type=f32) + 2.0 * x

    # --- final LayerNorm of the fractal block ---------------------------------
    o_ref[0] = _ln(x, lng_ref[...], lnb_ref[...])


def _wspec(arr):
    zeros = (0,) * arr.ndim
    return pl.BlockSpec(arr.shape, lambda b: zeros)


def fused_fractral(x, p):
    B, L, D = x.shape
    m = p['mamba']
    N, ED = m['A_logT'].shape
    R = m['dt_w'].shape[0]
    args = (x, m['rms_g'], m['in_x_w'], m['in_z_w'], m['conv_w'], m['conv_b'],
            m['xp_w'], m['dt_w'], m['dt_b'], m['A_logT'], m['D'], m['out_w'],
            p['norm_g'], p['norm_b'])
    seq_spec = pl.BlockSpec((1, L, D), lambda b: (b, 0, 0))
    return pl.pallas_call(
        _fractral_kernel,
        out_shape=jax.ShapeDtypeStruct((B, L, D), jnp.float32),
        grid=(B,),
        in_specs=[seq_spec] + [_wspec(a) for a in args[1:]],
        out_specs=seq_spec,
        scratch_shapes=[
            pltpu.VMEM((L, R + 2 * N), jnp.float32),   # fused x_proj result
            pltpu.VMEM((L, ED), jnp.float32),          # delta
            pltpu.VMEM((L, ED), jnp.float32),          # delta * x
            pltpu.VMEM((L, N), jnp.float32),           # B
            pltpu.VMEM((L, N), jnp.float32),           # C
            pltpu.VMEM((L, ED), jnp.float32),          # y rows
        ],
        compiler_params=pltpu.CompilerParams(
            dimension_semantics=("parallel",),
            vmem_limit_bytes=32 * 1024 * 1024),
    )(*args)


# ------------------------ fused ZambaSharedBlock kernel ----------------------

def _shared_kernel(skip_ref, y_ref, ow1_ref, ow2_ref, ob_ref,
                   wq_ref, wk_ref, wv_ref, wo_ref, qs_ref, ks_ref,
                   ng_ref, nb_ref, w1_ref, b1_ref, lg_ref, lb_ref,
                   w2_ref, b2_ref, pw_ref, pb_ref, o_ref,
                   q_sc, k_sc, v_sc):
    f32 = jnp.float32
    skip = skip_ref[0]                                 # (S, D)
    yin = y_ref[0]                                     # (S, D)
    H, _, Dh = qs_ref.shape
    Hkv = ks_ref.shape[0]
    group = H // Hkv

    # OmniProj over the concatenated sequence axis: x = W1 @ skip + W2 @ y + b
    x = (jnp.dot(ow1_ref[...], _bf16(skip), preferred_element_type=f32)
         + jnp.dot(ow2_ref[...], _bf16(yin), preferred_element_type=f32)
         + ob_ref[...])                                # (S, D)

    # --- GQA attention: batched lane-dense QKV / output projections ----------
    xb = _bf16(x)
    q_sc[...] = jnp.dot(xb, wq_ref[...], preferred_element_type=f32)   # (S, H*Dh)
    k_sc[...] = jnp.dot(xb, wk_ref[...], preferred_element_type=f32)   # (S, Hkv*Dh)
    v_sc[...] = jnp.dot(xb, wv_ref[...], preferred_element_type=f32)   # (S, Hkv*Dh)

    kn, vs = [], []
    for g in range(Hkv):
        k = k_sc[:, g * Dh:(g + 1) * Dh]
        k = k * lax.rsqrt(jnp.sum(k * k, -1, keepdims=True) + 1e-12) * ks_ref[g]
        kn.append(k)
        vs.append(v_sc[:, g * Dh:(g + 1) * Dh])

    heads_out = []
    for h in range(H):
        q = q_sc[:, h * Dh:(h + 1) * Dh]
        q = q * lax.rsqrt(jnp.sum(q * q, -1, keepdims=True) + 1e-12) * qs_ref[h]
        # scores via dot_general contracting last dims (no explicit transpose)
        s = lax.dot_general(q, kn[h // group], (((1,), (1,)), ((), ())),
                            preferred_element_type=f32) * QK_NORM_SCALE
        s = s - jnp.max(s, axis=-1, keepdims=True)
        p = jnp.exp(s)
        p = p * pl.reciprocal(jnp.sum(p, axis=-1, keepdims=True), approx=True)
        heads_out.append(jnp.dot(p, vs[h // group], preferred_element_type=f32))
    attn = jnp.concatenate(heads_out, axis=-1)                          # (S, H*Dh)
    attn = jnp.dot(_bf16(attn), wo_ref[...], preferred_element_type=f32)

    # --- norm -> FFN (SiLU, post-act LN) -> norm -> final D->D projection ----
    x = _ln(attn, ng_ref[...], nb_ref[...])
    hdn = jnp.dot(_bf16(x), w1_ref[...], preferred_element_type=f32) + b1_ref[...]
    hdn = _ln(_silu(hdn), lg_ref[...], lb_ref[...])
    # TODO(synk): Dropout(0.1) from the reference FFN is identity (eval mode).
    f = jnp.dot(_bf16(hdn), w2_ref[...], preferred_element_type=f32) + b2_ref[...]
    x = _ln(f, ng_ref[...], nb_ref[...])
    o_ref[0] = jnp.dot(_bf16(x), pw_ref[...], preferred_element_type=f32) + pb_ref[...]


def fused_shared(skip, y, omni, sp, proj_w, proj_b):
    B, S, D = skip.shape
    HDh = sp['wq'].shape[1]
    KDh = sp['wk'].shape[1]
    args = (skip, y, omni['wT1'], omni['wT2'], omni['b'],
            sp['wq'], sp['wk'], sp['wv'], sp['wo'], sp['q_scale'], sp['k_scale'],
            sp['norm_g'], sp['norm_b'],
            sp['ffn_w1'], sp['ffn_b1'], sp['ffn_ln_g'], sp['ffn_ln_b'],
            sp['ffn_w2'], sp['ffn_b2'], proj_w, proj_b)
    seq_spec = pl.BlockSpec((1, S, D), lambda b: (b, 0, 0))
    return pl.pallas_call(
        _shared_kernel,
        out_shape=jax.ShapeDtypeStruct((B, S, D), jnp.float32),
        grid=(B,),
        in_specs=[seq_spec, seq_spec] + [_wspec(a) for a in args[2:]],
        out_specs=seq_spec,
        scratch_shapes=[pltpu.VMEM((S, HDh), jnp.float32),
                        pltpu.VMEM((S, KDh), jnp.float32),
                        pltpu.VMEM((S, KDh), jnp.float32)],
        compiler_params=pltpu.CompilerParams(
            dimension_semantics=("parallel",),
            vmem_limit_bytes=32 * 1024 * 1024),
    )(*args)


# --------------------------- small LayerNorm kernel --------------------------

def _layernorm_kernel(x_ref, g_ref, b_ref, o_ref):
    o_ref[...] = _ln(x_ref[...], g_ref[...], b_ref[...])


def layernorm(x, g, b):
    D = x.shape[-1]
    lead = x.shape[:-1]
    x2 = x.reshape(-1, D)
    M = x2.shape[0]
    out = pl.pallas_call(
        _layernorm_kernel,
        out_shape=jax.ShapeDtypeStruct((M, D), jnp.float32),
        grid=(1,),
        in_specs=[pl.BlockSpec((M, D), lambda i: (0, 0)),
                  pl.BlockSpec((1, D), lambda i: (0, 0)),
                  pl.BlockSpec((1, D), lambda i: (0, 0))],
        out_specs=pl.BlockSpec((M, D), lambda i: (0, 0)),
    )(x2, g, b)
    return out.reshape(lead + (D,))


# ------------------------------- model glue ---------------------------------

def zamba_block(x, p):
    skip = x
    x1 = fused_fractral(x, p['fractral'])
    t1 = fused_shared(skip, x1, p['omni1'], p['shared'], p['proj_w'], p['proj_b'])
    x2 = fused_fractral(t1 + x1, p['fractral2'])
    t2 = fused_shared(skip, x2, p['omni2'], p['shared'], p['proj_w'], p['proj_b'])
    x3 = fused_fractral(t2 + x2, p['fractral'])
    return layernorm(x3, p['norm_g'], p['norm_b'])


def zamba_forward(params, tokens):
    x = jnp.take(params['embed'], tokens, axis=0)          # embedding lookup (glue)
    x = layernorm(x, params['norm_g'], params['norm_b'])   # post_embed_norm=True
    out = x
    for lp in params['layers']:
        out = zamba_block(x, lp)   # reference applies every block to the SAME x; keeps last
    # TODO(synk): with output_head_on=True the reference forward returns None (bug);
    # we run the output_head_on=False path and return the last block's output.
    return out


# ------------------------------ parameter init -------------------------------

def init_zamba(key, cfg):
    D, H, Dh = cfg['dim'], cfg['heads'], cfg['dim_head']
    Hkv, N, R, K = cfg['kv_heads'], cfg['d_state'], cfg['dt_rank'], cfg['d_conv']
    ED, V, S = 2 * D, cfg['vocab_size'], cfg['seq']
    kit = iter(jax.random.split(key, 1024))

    def nrm(*shape, scale=0.02):
        return scale * jax.random.normal(next(kit), shape, jnp.float32)

    def nrmb(*shape):
        # MXU-operand weights are stored in bf16 (f32 accumulation in-kernel)
        return nrm(*shape).astype(jnp.bfloat16)

    def mamba_params():
        return dict(
            rms_g=jnp.ones((1, D), jnp.float32),
            in_x_w=nrmb(D, ED), in_z_w=nrmb(D, ED),
            conv_w=nrm(K, ED), conv_b=jnp.zeros((1, ED), jnp.float32),
            xp_w=nrmb(ED, R + 2 * N),      # fused [delta | B | C] projection
            dt_w=nrmb(R, ED), dt_b=jnp.zeros((1, ED), jnp.float32),
            A_logT=jnp.log(jnp.tile(jnp.arange(1, N + 1, dtype=jnp.float32)[:, None],
                                    (1, ED))),
            D=jnp.ones((1, ED), jnp.float32),
            out_w=nrmb(ED, D),
        )

    def fractral_params():
        return dict(mamba=mamba_params(),
                    norm_g=jnp.ones((1, D), jnp.float32),
                    norm_b=jnp.zeros((1, D), jnp.float32))

    def shared_params():
        return dict(wq=nrmb(D, H * Dh), wk=nrmb(D, Hkv * Dh), wv=nrmb(D, Hkv * Dh),
                    wo=nrmb(H * Dh, D),
                    q_scale=jnp.ones((H, 1, Dh), jnp.float32),
                    k_scale=jnp.ones((Hkv, 1, Dh), jnp.float32),
                    norm_g=jnp.ones((1, D), jnp.float32),
                    norm_b=jnp.zeros((1, D), jnp.float32),
                    ffn_w1=nrmb(D, 4 * D), ffn_b1=jnp.zeros((1, 4 * D), jnp.float32),
                    ffn_ln_g=jnp.ones((1, 4 * D), jnp.float32),
                    ffn_ln_b=jnp.zeros((1, 4 * D), jnp.float32),
                    ffn_w2=nrmb(4 * D, D), ffn_b2=jnp.zeros((1, D), jnp.float32))

    def omni_params():
        # TODO(synk): the reference re-instantiates OmniProj with fresh random
        # weights on every forward call; weights are fixed deterministically here.
        return dict(wT1=nrmb(S, S), wT2=nrmb(S, S), b=jnp.zeros((S, 1), jnp.float32))

    def block_params():
        return dict(shared=shared_params(),
                    fractral=fractral_params(),
                    fractral2=fractral_params(),
                    norm_g=jnp.ones((1, D), jnp.float32),
                    norm_b=jnp.zeros((1, D), jnp.float32),
                    proj_w=nrmb(D, D), proj_b=jnp.zeros((1, D), jnp.float32),
                    omni1=omni_params(), omni2=omni_params())

    return dict(embed=jax.random.normal(next(kit), (V, D), jnp.float32),
                norm_g=jnp.ones((1, D), jnp.float32),
                norm_b=jnp.zeros((1, D), jnp.float32),
                layers=[block_params() for _ in range(cfg['depth'])])


# ----------------------------------- main ------------------------------------

if __name__ == "__main__":
    cfg = dict(dim=32, heads=8, dim_head=16, kv_heads=4, d_state=16,
               dt_rank=8, d_conv=4, depth=1, vocab_size=64, seq=8, batch=2)
    key = jax.random.PRNGKey(0)
    pkey, tkey = jax.random.split(key)
    params = init_zamba(pkey, cfg)
    tokens = jax.random.randint(tkey, (cfg['batch'], cfg['seq']), 0,
                                cfg['vocab_size'], dtype=jnp.int32)

    fwd = jax.jit(zamba_forward)
    out = fwd(params, tokens)
    jax.block_until_ready(out)

    assert out.shape == (cfg['batch'], cfg['seq'], cfg['dim']), out.shape
    assert bool(jnp.all(jnp.isfinite(out)))
    print("KERNEL_OK")
</pallas_src>

<mosaic_0001>
module attributes {stable_mosaic.version = 11 : i64} {
  func.func @_layernorm_kernel(%arg0: i32, %arg1: memref<16x32xf32, #tpu.memory_space<vmem>>, %arg2: memref<1x32xf32, #tpu.memory_space<vmem>>, %arg3: memref<1x32xf32, #tpu.memory_space<vmem>>, %arg4: memref<16x32xf32, #tpu.memory_space<vmem>>) attributes {dimension_semantics = [#tpu.dimension_semantics<arbitrary>], iteration_bounds = array<i64: 1>, scalar_prefetch = 0 : i64, scratch_operands = 0 : i64, tpu.core_type = #tpu.core_type<tc>, window_params = [{pipeline_mode = #tpu.pipeline_mode<synchronous>, transform_indices = @transform_0, window_bounds = array<i64: 16, 32>}, {pipeline_mode = #tpu.pipeline_mode<synchronous>, transform_indices = @transform_1, window_bounds = array<i64: 1, 32>}, {pipeline_mode = #tpu.pipeline_mode<synchronous>, transform_indices = @transform_2, window_bounds = array<i64: 1, 32>}, {pipeline_mode = #tpu.pipeline_mode<synchronous>, transform_indices = @transform_3, window_bounds = array<i64: 16, 32>}]} {
    %c0 = arith.constant 0 : index
    %c0_0 = arith.constant 0 : index
    %0 = vector.load %arg1[%c0, %c0_0] : memref<16x32xf32, #tpu.memory_space<vmem>>, vector<16x32xf32>
    %c0_1 = arith.constant 0 : index
    %c0_2 = arith.constant 0 : index
    %1 = vector.load %arg2[%c0_1, %c0_2] : memref<1x32xf32, #tpu.memory_space<vmem>>, vector<1x32xf32>
    %c0_3 = arith.constant 0 : index
    %c0_4 = arith.constant 0 : index
    %2 = vector.load %arg3[%c0_3, %c0_4] : memref<1x32xf32, #tpu.memory_space<vmem>>, vector<1x32xf32>
    %cst = arith.constant dense<0.000000e+00> : vector<16xf32>
    %3 = vector.multi_reduction <add>, %0, %cst [1] : vector<16x32xf32> to vector<16xf32>
    %4 = vector.shape_cast %3 : vector<16xf32> to vector<16x1xf32>
    %cst_5 = arith.constant 3.200000e+01 : f32
    %5 = vector.broadcast %cst_5 : f32 to vector<16x1xf32>
    %6 = arith.divf %4, %5 : vector<16x1xf32>
    %7 = vector.broadcast %6 : vector<16x1xf32> to vector<16x32xf32>
    %8 = arith.subf %0, %7 : vector<16x32xf32>
    %9 = arith.mulf %8, %8 : vector<16x32xf32>
    %cst_6 = arith.constant dense<0.000000e+00> : vector<16xf32>
    %10 = vector.multi_reduction <add>, %9, %cst_6 [1] : vector<16x32xf32> to vector<16xf32>
    %11 = vector.shape_cast %10 : vector<16xf32> to vector<16x1xf32>
    %cst_7 = arith.constant 3.200000e+01 : f32
    %12 = vector.broadcast %cst_7 : f32 to vector<16x1xf32>
    %13 = arith.divf %11, %12 : vector<16x1xf32>
    %cst_8 = arith.constant 9.99999974E-6 : f32
    %14 = vector.broadcast %cst_8 : f32 to vector<16x1xf32>
    %15 = arith.addf %13, %14 : vector<16x1xf32>
    %16 = math.rsqrt %15 : vector<16x1xf32>
    %17 = vector.broadcast %16 : vector<16x1xf32> to vector<16x32xf32>
    %18 = arith.mulf %8, %17 : vector<16x32xf32>
    %19 = vector.broadcast %1 : vector<1x32xf32> to vector<16x32xf32>
    %20 = arith.mulf %18, %19 : vector<16x32xf32>
    %21 = vector.broadcast %2 : vector<1x32xf32> to vector<16x32xf32>
    %22 = arith.addf %20, %21 : vector<16x32xf32>
    %c0_9 = arith.constant 0 : index
    %c0_10 = arith.constant 0 : index
    %23 = vector.load %arg4[%c0_9, %c0_10] : memref<16x32xf32, #tpu.memory_space<vmem>>, vector<16x32xf32>
    tpu.vector_store %arg4[%c0_9, %c0_10], %22 {strides = array<i32>} : memref<16x32xf32, #tpu.memory_space<vmem>>, vector<16x32xf32>,
    return
  }
  func.func @transform_0(%arg0: i32) -> (i32, i32) {
    %c0_i32 = arith.constant 0 : i32
    %c0_i32_0 = arith.constant 0 : i32
    %c0_i32_1 = arith.constant 0 : i32
    return %c0_i32, %c0_i32_0 : i32, i32
  }
  func.func @transform_1(%arg0: i32) -> (i32, i32) {
    %c0_i32 = arith.constant 0 : i32
    %c0_i32_0 = arith.constant 0 : i32
    %c0_i32_1 = arith.constant 0 : i32
    return %c0_i32, %c0_i32_0 : i32, i32
  }
  func.func @transform_2(%arg0: i32) -> (i32, i32) {
    %c0_i32 = arith.constant 0 : i32
    %c0_i32_0 = arith.constant 0 : i32
    %c0_i32_1 = arith.constant 0 : i32
    return %c0_i32, %c0_i32_0 : i32, i32
  }
  func.func @transform_3(%arg0: i32) -> (i32, i32) {
    %c0_i32 = arith.constant 0 : i32
    %c0_i32_0 = arith.constant 0 : i32
    %c0_i32_1 = arith.constant 0 : i32
    return %c0_i32, %c0_i32_0 : i32, i32
  }
}

module attributes {stable_mosaic.version = 11 : i64} {
  func.func @_layernorm_kernel(%arg0: i32, %arg1: memref<16x32xf32, #tpu.memory_space<vmem>>, %arg2: memref<1x32xf32, #tpu.memory_space<vmem>>, %arg3: memref<1x32xf32, #tpu.memory_space<vmem>>, %arg4: memref<16x32xf32, #tpu.memory_space<vmem>>) attributes {dimension_semantics = [#tpu.dimension_semantics<arbitrary>], iteration_bounds = array<i64: 1>, scalar_prefetch = 0 : i64, scratch_operands = 0 : i64, tpu.core_type = #tpu.core_type<tc>, window_params = [{pipeline_mode = #tpu.pipeline_mode<synchronous>, transform_indices = @transform_0, window_bounds = array<i64: 16, 32>}, {pipeline_mode = #tpu.pipeline_mode<synchronous>, transform_indices = @transform_1, window_bounds = array<i64: 1, 32>}, {pipeline_mode = #tpu.pipeline_mode<synchronous>, transform_indices = @transform_2, window_bounds = array<i64: 1, 32>}, {pipeline_mode = #tpu.pipeline_mode<synchronous>, transform_indices = @transform_3, window_bounds = array<i64: 16, 32>}]} {
    %c0 = arith.constant 0 : index
    %c0_0 = arith.constant 0 : index
    %0 = vector.load %arg1[%c0, %c0_0] : memref<16x32xf32, #tpu.memory_space<vmem>>, vector<16x32xf32>
    %c0_1 = arith.constant 0 : index
    %c0_2 = arith.constant 0 : index
    %1 = vector.load %arg2[%c0_1, %c0_2] : memref<1x32xf32, #tpu.memory_space<vmem>>, vector<1x32xf32>
    %c0_3 = arith.constant 0 : index
    %c0_4 = arith.constant 0 : index
    %2 = vector.load %arg3[%c0_3, %c0_4] : memref<1x32xf32, #tpu.memory_space<vmem>>, vector<1x32xf32>
    %cst = arith.constant dense<0.000000e+00> : vector<16xf32>
    %3 = vector.multi_reduction <add>, %0, %cst [1] : vector<16x32xf32> to vector<16xf32>
    %4 = vector.shape_cast %3 : vector<16xf32> to vector<16x1xf32>
    %cst_5 = arith.constant 3.200000e+01 : f32
    %5 = vector.broadcast %cst_5 : f32 to vector<16x1xf32>
    %6 = arith.divf %4, %5 : vector<16x1xf32>
    %7 = vector.broadcast %6 : vector<16x1xf32> to vector<16x32xf32>
    %8 = arith.subf %0, %7 : vector<16x32xf32>
    %9 = arith.mulf %8, %8 : vector<16x32xf32>
    %cst_6 = arith.constant dense<0.000000e+00> : vector<16xf32>
    %10 = vector.multi_reduction <add>, %9, %cst_6 [1] : vector<16x32xf32> to vector<16xf32>
    %11 = vector.shape_cast %10 : vector<16xf32> to vector<16x1xf32>
    %cst_7 = arith.constant 3.200000e+01 : f32
    %12 = vector.broadcast %cst_7 : f32 to vector<16x1xf32>
    %13 = arith.divf %11, %12 : vector<16x1xf32>
    %cst_8 = arith.constant 9.99999974E-6 : f32
    %14 = vector.broadcast %cst_8 : f32 to vector<16x1xf32>
    %15 = arith.addf %13, %14 : vector<16x1xf32>
    %16 = math.rsqrt %15 : vector<16x1xf32>
    %17 = vector.broadcast %16 : vector<16x1xf32> to vector<16x32xf32>
    %18 = arith.mulf %8, %17 : vector<16x32xf32>
    %19 = vector.broadcast %1 : vector<1x32xf32> to vector<16x32xf32>
    %20 = arith.mulf %18, %19 : vector<16x32xf32>
    %21 = vector.broadcast %2 : vector<1x32xf32> to vector<16x32xf32>
    %22 = arith.addf %20, %21 : vector<16x32xf32>
    %c0_9 = arith.constant 0 : index
    %c0_10 = arith.constant 0 : index
    %23 = vector.load %arg4[%c0_9, %c0_10] : memref<16x32xf32, #tpu.memory_space<vmem>>, vector<16x32xf32>
    tpu.vector_store %arg4[%c0_9, %c0_10], %22 {strides = array<i32>} : memref<16x32xf32, #tpu.memory_space<vmem>>, vector<16x32xf32>,
    return
  }
  func.func @transform_0(%arg0: i32) -> (i32, i32) {
    %c0_i32 = arith.constant 0 : i32
    %c0_i32_0 = arith.constant 0 : i32
    %c0_i32_1 = arith.constant 0 : i32
    return %c0_i32, %c0_i32_0 : i32, i32
  }
  func.func @transform_1(%arg0: i32) -> (i32, i32) {
    %c0_i32 = arith.constant 0 : i32
    %c0_i32_0 = arith.constant 0 : i32
    %c0_i32_1 = arith.constant 0 : i32
    return %c0_i32, %c0_i32_0 : i32, i32
  }
  func.func @transform_2(%arg0: i32) -> (i32, i32) {
    %c0_i32 = arith.constant 0 : i32
    %c0_i32_0 = arith.constant 0 : i32
    %c0_i32_1 = arith.constant 0 : i32
    return %c0_i32, %c0_i32_0 : i32, i32
  }
  func.func @transform_3(%arg0: i32) -> (i32, i32) {
    %c0_i32 = arith.constant 0 : i32
    %c0_i32_0 = arith.constant 0 : i32
    %c0_i32_1 = arith.constant 0 : i32
    return %c0_i32, %c0_i32_0 : i32, i32
  }
}

module attributes {stable_mosaic.version = 11 : i64} {
  func.func @_fractral_kernel(%arg0: i32, %arg1: memref<1x8x32xf32, #tpu.memory_space<vmem>>, %arg2: memref<1x32xf32, #tpu.memory_space<vmem>>, %arg3: memref<32x64xbf16, #tpu.memory_space<vmem>>, %arg4: memref<32x64xbf16, #tpu.memory_space<vmem>>, %arg5: memref<4x64xf32, #tpu.memory_space<vmem>>, %arg6: memref<1x64xf32, #tpu.memory_space<vmem>>, %arg7: memref<64x40xbf16, #tpu.memory_space<vmem>>, %arg8: memref<8x64xbf16, #tpu.memory_space<vmem>>, %arg9: memref<1x64xf32, #tpu.memory_space<vmem>>, %arg10: memref<16x64xf32, #tpu.memory_space<vmem>>, %arg11: memref<1x64xf32, #tpu.memory_space<vmem>>, %arg12: memref<64x32xbf16, #tpu.memory_space<vmem>>, %arg13: memref<1x32xf32, #tpu.memory_space<vmem>>, %arg14: memref<1x32xf32, #tpu.memory_space<vmem>>, %arg15: memref<1x8x32xf32, #tpu.memory_space<vmem>>, %arg16: memref<8x40xf32, #tpu.memory_space<vmem>>, %arg17: memref<8x64xf32, #tpu.memory_space<vmem>>, %arg18: memref<8x64xf32, #tpu.memory_space<vmem>>, %arg19: memref<8x16xf32, #tpu.memory_space<vmem>>, %arg20: memref<8x16xf32, #tpu.memory_space<vmem>>, %arg21: memref<8x64xf32, #tpu.memory_space<vmem>>) attributes {dimension_semantics = [#tpu.dimension_semantics<parallel>], iteration_bounds = array<i64: 2>, scalar_prefetch = 0 : i64, scratch_operands = 6 : i64, tpu.core_type = #tpu.core_type<tc>, window_params = [{transform_indices = @transform_0, window_bounds = array<i64: 1, 8, 32>}, {pipeline_mode = #tpu.pipeline_mode<synchronous>, transform_indices = @transform_1, window_bounds = array<i64: 1, 32>}, {pipeline_mode = #tpu.pipeline_mode<synchronous>, transform_indices = @transform_2, window_bounds = array<i64: 32, 64>}, {pipeline_mode = #tpu.pipeline_mode<synchronous>, transform_indices = @transform_3, window_bounds = array<i64: 32, 64>}, {pipeline_mode = #tpu.pipeline_mode<synchronous>, transform_indices = @transform_4, window_bounds = array<i64: 4, 64>}, {pipeline_mode = #tpu.pipeline_mode<synchronous>, transform_indices = @transform_5, window_bounds = array<i64: 1, 64>}, {pipeline_mode = #tpu.pipeline_mode<synchronous>, transform_indices = @transform_6, window_bounds = array<i64: 64, 40>}, {pipeline_mode = #tpu.pipeline_mode<synchronous>, transform_indices = @transform_7, window_bounds = array<i64: 8, 64>}, {pipeline_mode = #tpu.pipeline_mode<synchronous>, transform_indices = @transform_8, window_bounds = array<i64: 1, 64>}, {pipeline_mode = #tpu.pipeline_mode<synchronous>, transform_indices = @transform_9, window_bounds = array<i64: 16, 64>}, {pipeline_mode = #tpu.pipeline_mode<synchronous>, transform_indices = @transform_10, window_bounds = array<i64: 1, 64>}, {pipeline_mode = #tpu.pipeline_mode<synchronous>, transform_indices = @transform_11, window_bounds = array<i64: 64, 32>}, {pipeline_mode = #tpu.pipeline_mode<synchronous>, transform_indices = @transform_12, window_bounds = array<i64: 1, 32>}, {pipeline_mode = #tpu.pipeline_mode<synchronous>, transform_indices = @transform_13, window_bounds = array<i64: 1, 32>}, {transform_indices = @transform_14, window_bounds = array<i64: 1, 8, 32>}]} {
    %c0 = arith.constant 0 : index
    %c0_0 = arith.constant 0 : index
    %c0_1 = arith.constant 0 : index
    %0 = vector.load %arg1[%c0, %c0_0, %c0_1] : memref<1x8x32xf32, #tpu.memory_space<vmem>>, vector<1x8x32xf32>
    %1 = vector.shape_cast %0 : vector<1x8x32xf32> to vector<8x32xf32>
    %c0_2 = arith.constant 0 : index
    %c0_3 = arith.constant 0 : index
    %2 = vector.load %arg10[%c0_2, %c0_3] : memref<16x64xf32, #tpu.memory_space<vmem>>, vector<16x64xf32>
    %3 = math.exp %2 : vector<16x64xf32>
    %cst = arith.constant 0.000000e+00 : f32
    %4 = vector.broadcast %cst : f32 to vector<16x64xf32>
    %5 = arith.subf %4, %3 : vector<16x64xf32>
    %c0_4 = arith.constant 0 : index
    %c0_5 = arith.constant 0 : index
    %6 = vector.load %arg2[%c0_4, %c0_5] : memref<1x32xf32, #tpu.memory_space<vmem>>, vector<1x32xf32>
    %7 = vector.shape_cast %6 : vector<1x32xf32> to vector<1x32xf32>
    %8 = vector.broadcast %7 : vector<1x32xf32> to vector<8x32xf32>
    %c0_6 = arith.constant 0 : index
    %c0_7 = arith.constant 0 : index
    %9 = vector.load %arg6[%c0_6, %c0_7] : memref<1x64xf32, #tpu.memory_space<vmem>>, vector<1x64xf32>
    %10 = vector.shape_cast %9 : vector<1x64xf32> to vector<1x64xf32>
    %11 = vector.broadcast %10 : vector<1x64xf32> to vector<8x64xf32>
    %c0_8 = arith.constant 0 : index
    %c0_9 = arith.constant 0 : index
    %12 = vector.load %arg9[%c0_8, %c0_9] : memref<1x64xf32, #tpu.memory_space<vmem>>, vector<1x64xf32>
    %13 = vector.shape_cast %12 : vector<1x64xf32> to vector<1x64xf32>
    %14 = vector.broadcast %13 : vector<1x64xf32> to vector<8x64xf32>
    %c0_10 = arith.constant 0 : index
    %c0_11 = arith.constant 0 : index
    %15 = vector.load %arg11[%c0_10, %c0_11] : memref<1x64xf32, #tpu.memory_space<vmem>>, vector<1x64xf32>
    %16 = vector.shape_cast %15 : vector<1x64xf32> to vector<1x64xf32>
    %17 = vector.broadcast %16 : vector<1x64xf32> to vector<8x64xf32>
    %c0_12 = arith.constant 0 : index
    %c0_13 = arith.constant 0 : index
    %18 = vector.load %arg5[%c0_12, %c0_13] : memref<4x64xf32, #tpu.memory_space<vmem>>, vector<1x64xf32>
    %19 = vector.shape_cast %18 : vector<1x64xf32> to vector<1x64xf32>
    %20 = vector.broadcast %19 : vector<1x64xf32> to vector<8x64xf32>
    %c1 = arith.constant 1 : index
    %c0_14 = arith.constant 0 : index
    %21 = vector.load %arg5[%c1, %c0_14] : memref<4x64xf32, #tpu.memory_space<vmem>>, vector<1x64xf32>
    %22 = vector.shape_cast %21 : vector<1x64xf32> to vector<1x64xf32>
    %23 = vector.broadcast %22 : vector<1x64xf32> to vector<8x64xf32>
    %c2 = arith.constant 2 : index
    %c0_15 = arith.constant 0 : index
    %24 = vector.load %arg5[%c2, %c0_15] : memref<4x64xf32, #tpu.memory_space<vmem>>, vector<1x64xf32>
    %25 = vector.shape_cast %24 : vector<1x64xf32> to vector<1x64xf32>
    %26 = vector.broadcast %25 : vector<1x64xf32> to vector<8x64xf32>
    %c3 = arith.constant 3 : index
    %c0_16 = arith.constant 0 : index
    %27 = vector.load %arg5[%c3, %c0_16] : memref<4x64xf32, #tpu.memory_space<vmem>>, vector<1x64xf32>
    %28 = vector.shape_cast %27 : vector<1x64xf32> to vector<1x64xf32>
    %29 = vector.broadcast %28 : vector<1x64xf32> to vector<8x64xf32>
    %cst_17 = arith.constant 0.000000e+00 : f32
    %30 = vector.broadcast %cst_17 : f32 to vector<3x64xf32>
    %31 = arith.mulf %1, %1 : vector<8x32xf32>
    %cst_18 = arith.constant dense<0.000000e+00> : vector<8xf32>
    %32 = vector.multi_reduction <add>, %31, %cst_18 [1] : vector<8x32xf32> to vector<8xf32>
    %33 = vector.shape_cast %32 : vector<8xf32> to vector<8x1xf32>
    %cst_19 = arith.constant 3.200000e+01 : f32
    %34 = vector.broadcast %cst_19 : f32 to vector<8x1xf32>
    %35 = arith.divf %33, %34 : vector<8x1xf32>
    %cst_20 = arith.constant 9.99999974E-6 : f32
    %36 = vector.broadcast %cst_20 : f32 to vector<8x1xf32>
    %37 = arith.addf %35, %36 : vector<8x1xf32>
    %38 = math.rsqrt %37 : vector<8x1xf32>
    %39 = vector.broadcast %38 : vector<8x1xf32> to vector<8x32xf32>
    %40 = arith.mulf %1, %39 : vector<8x32xf32>
    %41 = arith.mulf %40, %8 : vector<8x32xf32>
    %42 = arith.truncf %41 : vector<8x32xf32> to vector<8x32xbf16>
    %c0_21 = arith.constant 0 : index
    %c0_22 = arith.constant 0 : index
    %43 = vector.load %arg3[%c0_21, %c0_22] : memref<32x64xbf16, #tpu.memory_space<vmem>>, vector<32x64xbf16>
    %cst_23 = arith.constant dense<0.000000e+00> : vector<8x64xf32>
    %44 = tpu.matmul %42, %43, %cst_23 {dimension_numbers = #tpu.dot_dimension_numbers<[1], [0], [0], [1], [0, 0, 1, 1], [], []>} : vector<8x32xbf16>, vector<32x64xbf16>, vector<8x64xf32> -> vector<8x64xf32>
    %c0_24 = arith.constant 0 : index
    %c0_25 = arith.constant 0 : index
    %45 = vector.load %arg4[%c0_24, %c0_25] : memref<32x64xbf16, #tpu.memory_space<vmem>>, vector<32x64xbf16>
    %cst_26 = arith.constant dense<0.000000e+00> : vector<8x64xf32>
    %46 = tpu.matmul %42, %45, %cst_26 {dimension_numbers = #tpu.dot_dimension_numbers<[1], [0], [0], [1], [0, 0, 1, 1], [], []>} : vector<8x32xbf16>, vector<32x64xbf16>, vector<8x64xf32> -> vector<8x64xf32>
    %47 = tpu.concatenate %30, %44 in 0 : vector<3x64xf32>, vector<8x64xf32> -> vector<11x64xf32>
    %48 = vector.extract_strided_slice %47 {offsets = [0, 0], sizes = [8, 64], strides = [1, 1]} : vector<11x64xf32> to vector<8x64xf32>
    %49 = arith.mulf %48, %20 : vector<8x64xf32>
    %50 = arith.addf %11, %49 : vector<8x64xf32>
    %51 = vector.extract_strided_slice %47 {offsets = [1, 0], sizes = [8, 64], strides = [1, 1]} : vector<11x64xf32> to vector<8x64xf32>
    %52 = arith.mulf %51, %23 : vector<8x64xf32>
    %53 = arith.addf %50, %52 : vector<8x64xf32>
    %54 = vector.extract_strided_slice %47 {offsets = [2, 0], sizes = [8, 64], strides = [1, 1]} : vector<11x64xf32> to vector<8x64xf32>
    %55 = arith.mulf %54, %26 : vector<8x64xf32>
    %56 = arith.addf %53, %55 : vector<8x64xf32>
    %57 = vector.extract_strided_slice %47 {offsets = [3, 0], sizes = [8, 64], strides = [1, 1]} : vector<11x64xf32> to vector<8x64xf32>
    %58 = arith.mulf %57, %29 : vector<8x64xf32>
    %59 = arith.addf %56, %58 : vector<8x64xf32>
    %cst_27 = arith.constant 0.000000e+00 : f32
    %60 = vector.broadcast %cst_27 : f32 to vector<8x64xf32>
    %61 = arith.subf %60, %59 : vector<8x64xf32>
    %62 = math.exp %61 : vector<8x64xf32>
    %cst_28 = arith.constant 1.000000e+00 : f32
    %63 = vector.broadcast %cst_28 : f32 to vector<8x64xf32>
    %64 = arith.addf %63, %62 : vector<8x64xf32>
    %cst_29 = arith.constant 1.000000e+00 : f32
    %65 = vector.broadcast %cst_29 : f32 to vector<8x64xf32>
    %66 = arith.divf %65, %64 : vector<8x64xf32>
    %67 = arith.mulf %59, %66 : vector<8x64xf32>
    %68 = arith.truncf %67 : vector<8x64xf32> to vector<8x64xbf16>
    %c0_30 = arith.constant 0 : index
    %c0_31 = arith.constant 0 : index
    %69 = vector.load %arg7[%c0_30, %c0_31] : memref<64x40xbf16, #tpu.memory_space<vmem>>, vector<64x40xbf16>
    %cst_32 = arith.constant dense<0.000000e+00> : vector<8x40xf32>
    %70 = tpu.matmul %68, %69, %cst_32 {dimension_numbers = #tpu.dot_dimension_numbers<[1], [0], [0], [1], [0, 0, 1, 1], [], []>} : vector<8x64xbf16>, vector<64x40xbf16>, vector<8x40xf32> -> vector<8x40xf32>
    %c0_33 = arith.constant 0 : index
    %c0_34 = arith.constant 0 : index
    %71 = vector.load %arg16[%c0_33, %c0_34] : memref<8x40xf32, #tpu.memory_space<vmem>>, vector<8x40xf32>
    tpu.vector_store %arg16[%c0_33, %c0_34], %70 {strides = array<i32>} : memref<8x40xf32, #tpu.memory_space<vmem>>, vector<8x40xf32>,
    %c0_35 = arith.constant 0 : index
    %c0_36 = arith.constant 0 : index
    %72 = vector.load %arg16[%c0_35, %c0_36] : memref<8x40xf32, #tpu.memory_space<vmem>>, vector<8x8xf32>
    %c0_37 = arith.constant 0 : index
    %c8 = arith.constant 8 : index
    %73 = vector.load %arg16[%c0_37, %c8] : memref<8x40xf32, #tpu.memory_space<vmem>>, vector<8x16xf32>
    %c0_38 = arith.constant 0 : index
    %c0_39 = arith.constant 0 : index
    %74 = vector.load %arg19[%c0_38, %c0_39] : memref<8x16xf32, #tpu.memory_space<vmem>>, vector<8x16xf32>
    tpu.vector_store %arg19[%c0_38, %c0_39], %73 {strides = array<i32>} : memref<8x16xf32, #tpu.memory_space<vmem>>, vector<8x16xf32>,
    %c0_40 = arith.constant 0 : index
    %c24 = arith.constant 24 : index
    %75 = vector.load %arg16[%c0_40, %c24] : memref<8x40xf32, #tpu.memory_space<vmem>>, vector<8x16xf32>
    %c0_41 = arith.constant 0 : index
    %c0_42 = arith.constant 0 : index
    %76 = vector.load %arg20[%c0_41, %c0_42] : memref<8x16xf32, #tpu.memory_space<vmem>>, vector<8x16xf32>
    tpu.vector_store %arg20[%c0_41, %c0_42], %75 {strides = array<i32>} : memref<8x16xf32, #tpu.memory_space<vmem>>, vector<8x16xf32>,
    %77 = arith.truncf %72 : vector<8x8xf32> to vector<8x8xbf16>
    %c0_43 = arith.constant 0 : index
    %c0_44 = arith.constant 0 : index
    %78 = vector.load %arg8[%c0_43, %c0_44] : memref<8x64xbf16, #tpu.memory_space<vmem>>, vector<8x64xbf16>
    %cst_45 = arith.constant dense<0.000000e+00> : vector<8x64xf32>
    %79 = tpu.matmul %77, %78, %cst_45 {dimension_numbers = #tpu.dot_dimension_numbers<[1], [0], [0], [1], [0, 0, 1, 1], [], []>} : vector<8x8xbf16>, vector<8x64xbf16>, vector<8x64xf32> -> vector<8x64xf32>
    %80 = arith.addf %79, %14 : vector<8x64xf32>
    %cst_46 = arith.constant 0.000000e+00 : f32
    %81 = vector.broadcast %cst_46 : f32 to vector<8x64xf32>
    %82 = arith.maximumf %80, %81 : vector<8x64xf32>
    %83 = math.absf %80 : vector<8x64xf32>
    %cst_47 = arith.constant 0.000000e+00 : f32
    %84 = vector.broadcast %cst_47 : f32 to vector<8x64xf32>
    %85 = arith.subf %84, %83 : vector<8x64xf32>
    %86 = math.exp %85 : vector<8x64xf32>
    %cst_48 = arith.constant 1.000000e+00 : f32
    %87 = vector.broadcast %cst_48 : f32 to vector<8x64xf32>
    %88 = arith.addf %87, %86 : vector<8x64xf32>
    %89 = math.log %88 : vector<8x64xf32>
    %90 = arith.addf %82, %89 : vector<8x64xf32>
    %c0_49 = arith.constant 0 : index
    %c0_50 = arith.constant 0 : index
    %91 = vector.load %arg17[%c0_49, %c0_50] : memref<8x64xf32, #tpu.memory_space<vmem>>, vector<8x64xf32>
    tpu.vector_store %arg17[%c0_49, %c0_50], %90 {strides = array<i32>} : memref<8x64xf32, #tpu.memory_space<vmem>>, vector<8x64xf32>,
    %92 = arith.mulf %90, %67 : vector<8x64xf32>
    %c0_51 = arith.constant 0 : index
    %c0_52 = arith.constant 0 : index
    %93 = vector.load %arg18[%c0_51, %c0_52] : memref<8x64xf32, #tpu.memory_space<vmem>>, vector<8x64xf32>
    tpu.vector_store %arg18[%c0_51, %c0_52], %92 {strides = array<i32>} : memref<8x64xf32, #tpu.memory_space<vmem>>, vector<8x64xf32>,
    %cst_53 = arith.constant 0.000000e+00 : f32
    %94 = vector.broadcast %cst_53 : f32 to vector<16x64xf32>
    %c0_i32 = arith.constant 0 : i32
    %c8_i32 = arith.constant 8 : i32
    %95 = arith.addi %c0_i32, %c8_i32 : i32
    %c1_i32 = arith.constant 1 : i32
    %96 = scf.for %arg22 = %c0_i32 to %95 step %c1_i32 iter_args(%arg23 = %94) -> (vector<16x64xf32>)  : i32 {
      %560 = arith.index_cast %arg22 : i32 to index
      %c0_331 = arith.constant 0 : index
      %561 = vector.load %arg17[%560, %c0_331] : memref<8x64xf32, #tpu.memory_space<vmem>>, vector<1x64xf32>
      %562 = arith.index_cast %arg22 : i32 to index
      %c0_332 = arith.constant 0 : index
      %563 = vector.load %arg18[%562, %c0_332] : memref<8x64xf32, #tpu.memory_space<vmem>>, vector<1x64xf32>
      %564 = arith.index_cast %arg22 : i32 to index
      %c0_333 = arith.constant 0 : index
      %565 = vector.load %arg19[%564, %c0_333] : memref<8x16xf32, #tpu.memory_space<vmem>>, vector<1x16xf32>
      %566 = tpu.transpose %565, [1, 0] : vector<1x16xf32> -> vector<16x1xf32>
      %567 = arith.index_cast %arg22 : i32 to index
      %c0_334 = arith.constant 0 : index
      %568 = vector.load %arg20[%567, %c0_334] : memref<8x16xf32, #tpu.memory_space<vmem>>, vector<1x16xf32>
      %569 = vector.broadcast %561 : vector<1x64xf32> to vector<16x64xf32>
      %570 = arith.mulf %5, %569 : vector<16x64xf32>
      %571 = math.exp %570 : vector<16x64xf32>
      %572 = arith.mulf %571, %arg23 : vector<16x64xf32>
      %573 = vector.broadcast %566 : vector<16x1xf32> to vector<16x64xf32>
      %574 = vector.broadcast %563 : vector<1x64xf32> to vector<16x64xf32>
      %575 = arith.mulf %573, %574 : vector<16x64xf32>
      %576 = arith.addf %572, %575 : vector<16x64xf32>
      %cst_335 = arith.constant dense<0.000000e+00> : vector<1x64xf32>
      %577 = tpu.matmul %568, %576, %cst_335 {dimension_numbers = #tpu.dot_dimension_numbers<[1], [0], [0], [1], [0, 0, 1, 1], [], []>} : vector<1x16xf32>, vector<16x64xf32>, vector<1x64xf32> -> vector<1x64xf32>
      %578 = arith.index_cast %arg22 : i32 to index
      %c0_336 = arith.constant 0 : index
      %579 = vector.load %arg21[%578, %c0_336] : memref<8x64xf32, #tpu.memory_space<vmem>>, vector<1x64xf32>
      tpu.vector_store %arg21[%578, %c0_336], %577 {strides = array<i32>} : memref<8x64xf32, #tpu.memory_space<vmem>>, vector<1x64xf32>,
      scf.yield %576 : vector<16x64xf32>
    }
    %c8_i32_54 = arith.constant 8 : i32
    %c0_55 = arith.constant 0 : index
    %c0_56 = arith.constant 0 : index
    %97 = vector.load %arg21[%c0_55, %c0_56] : memref<8x64xf32, #tpu.memory_space<vmem>>, vector<8x64xf32>
    %98 = arith.mulf %17, %67 : vector<8x64xf32>
    %99 = arith.addf %97, %98 : vector<8x64xf32>
    %cst_57 = arith.constant 0.000000e+00 : f32
    %100 = vector.broadcast %cst_57 : f32 to vector<8x64xf32>
    %101 = arith.subf %100, %46 : vector<8x64xf32>
    %102 = math.exp %101 : vector<8x64xf32>
    %cst_58 = arith.constant 1.000000e+00 : f32
    %103 = vector.broadcast %cst_58 : f32 to vector<8x64xf32>
    %104 = arith.addf %103, %102 : vector<8x64xf32>
    %cst_59 = arith.constant 1.000000e+00 : f32
    %105 = vector.broadcast %cst_59 : f32 to vector<8x64xf32>
    %106 = arith.divf %105, %104 : vector<8x64xf32>
    %107 = arith.mulf %46, %106 : vector<8x64xf32>
    %108 = arith.mulf %99, %107 : vector<8x64xf32>
    %109 = arith.truncf %108 : vector<8x64xf32> to vector<8x64xbf16>
    %c0_60 = arith.constant 0 : index
    %c0_61 = arith.constant 0 : index
    %110 = vector.load %arg12[%c0_60, %c0_61] : memref<64x32xbf16, #tpu.memory_space<vmem>>, vector<64x32xbf16>
    %cst_62 = arith.constant dense<0.000000e+00> : vector<8x32xf32>
    %111 = tpu.matmul %109, %110, %cst_62 {dimension_numbers = #tpu.dot_dimension_numbers<[1], [0], [0], [1], [0, 0, 1, 1], [], []>} : vector<8x64xbf16>, vector<64x32xbf16>, vector<8x32xf32> -> vector<8x32xf32>
    %cst_63 = arith.constant 2.000000e+00 : f32
    %112 = vector.broadcast %cst_63 : f32 to vector<8x32xf32>
    %113 = arith.mulf %112, %1 : vector<8x32xf32>
    %114 = arith.addf %111, %113 : vector<8x32xf32>
    %115 = arith.mulf %114, %114 : vector<8x32xf32>
    %cst_64 = arith.constant dense<0.000000e+00> : vector<8xf32>
    %116 = vector.multi_reduction <add>, %115, %cst_64 [1] : vector<8x32xf32> to vector<8xf32>
    %117 = vector.shape_cast %116 : vector<8xf32> to vector<8x1xf32>
    %cst_65 = arith.constant 3.200000e+01 : f32
    %118 = vector.broadcast %cst_65 : f32 to vector<8x1xf32>
    %119 = arith.divf %117, %118 : vector<8x1xf32>
    %cst_66 = arith.constant 9.99999974E-6 : f32
    %120 = vector.broadcast %cst_66 : f32 to vector<8x1xf32>
    %121 = arith.addf %119, %120 : vector<8x1xf32>
    %122 = math.rsqrt %121 : vector<8x1xf32>
    %123 = vector.broadcast %122 : vector<8x1xf32> to vector<8x32xf32>
    %124 = arith.mulf %114, %123 : vector<8x32xf32>
    %125 = arith.mulf %124, %8 : vector<8x32xf32>
    %126 = arith.truncf %125 : vector<8x32xf32> to vector<8x32xbf16>
    %c0_67 = arith.constant 0 : index
    %c0_68 = arith.constant 0 : index
    %127 = vector.load %arg3[%c0_67, %c0_68] : memref<32x64xbf16, #tpu.memory_space<vmem>>, vector<32x64xbf16>
    %cst_69 = arith.constant dense<0.000000e+00> : vector<8x64xf32>
    %128 = tpu.matmul %126, %127, %cst_69 {dimension_numbers = #tpu.dot_dimension_numbers<[1], [0], [0], [1], [0, 0, 1, 1], [], []>} : vector<8x32xbf16>, vector<32x64xbf16>, vector<8x64xf32> -> vector<8x64xf32>
    %c0_70 = arith.constant 0 : index
    %c0_71 = arith.constant 0 : index
    %129 = vector.load %arg4[%c0_70, %c0_71] : memref<32x64xbf16, #tpu.memory_space<vmem>>, vector<32x64xbf16>
    %cst_72 = arith.constant dense<0.000000e+00> : vector<8x64xf32>
    %130 = tpu.matmul %126, %129, %cst_72 {dimension_numbers = #tpu.dot_dimension_numbers<[1], [0], [0], [1], [0, 0, 1, 1], [], []>} : vector<8x32xbf16>, vector<32x64xbf16>, vector<8x64xf32> -> vector<8x64xf32>
    %131 = tpu.concatenate %30, %128 in 0 : vector<3x64xf32>, vector<8x64xf32> -> vector<11x64xf32>
    %132 = vector.extract_strided_slice %131 {offsets = [0, 0], sizes = [8, 64], strides = [1, 1]} : vector<11x64xf32> to vector<8x64xf32>
    %133 = arith.mulf %132, %20 : vector<8x64xf32>
    %134 = arith.addf %11, %133 : vector<8x64xf32>
    %135 = vector.extract_strided_slice %131 {offsets = [1, 0], sizes = [8, 64], strides = [1, 1]} : vector<11x64xf32> to vector<8x64xf32>
    %136 = arith.mulf %135, %23 : vector<8x64xf32>
    %137 = arith.addf %134, %136 : vector<8x64xf32>
    %138 = vector.extract_strided_slice %131 {offsets = [2, 0], sizes = [8, 64], strides = [1, 1]} : vector<11x64xf32> to vector<8x64xf32>
    %139 = arith.mulf %138, %26 : vector<8x64xf32>
    %140 = arith.addf %137, %139 : vector<8x64xf32>
    %141 = vector.extract_strided_slice %131 {offsets = [3, 0], sizes = [8, 64], strides = [1, 1]} : vector<11x64xf32> to vector<8x64xf32>
    %142 = arith.mulf %141, %29 : vector<8x64xf32>
    %143 = arith.addf %140, %142 : vector<8x64xf32>
    %cst_73 = arith.constant 0.000000e+00 : f32
    %144 = vector.broadcast %cst_73 : f32 to vector<8x64xf32>
    %145 = arith.subf %144, %143 : vector<8x64xf32>
    %146 = math.exp %145 : vector<8x64xf32>
    %cst_74 = arith.constant 1.000000e+00 : f32
    %147 = vector.broadcast %cst_74 : f32 to vector<8x64xf32>
    %148 = arith.addf %147, %146 : vector<8x64xf32>
    %cst_75 = arith.constant 1.000000e+00 : f32
    %149 = vector.broadcast %cst_75 : f32 to vector<8x64xf32>
    %150 = arith.divf %149, %148 : vector<8x64xf32>
    %151 = arith.mulf %143, %150 : vector<8x64xf32>
    %152 = arith.truncf %151 : vector<8x64xf32> to vector<8x64xbf16>
    %c0_76 = arith.constant 0 : index
    %c0_77 = arith.constant 0 : index
    %153 = vector.load %arg7[%c0_76, %c0_77] : memref<64x40xbf16, #tpu.memory_space<vmem>>, vector<64x40xbf16>
    %cst_78 = arith.constant dense<0.000000e+00> : vector<8x40xf32>
    %154 = tpu.matmul %152, %153, %cst_78 {dimension_numbers = #tpu.dot_dimension_numbers<[1], [0], [0], [1], [0, 0, 1, 1], [], []>} : vector<8x64xbf16>, vector<64x40xbf16>, vector<8x40xf32> -> vector<8x40xf32>
    %c0_79 = arith.constant 0 : index
    %c0_80 = arith.constant 0 : index
    %155 = vector.load %arg16[%c0_79, %c0_80] : memref<8x40xf32, #tpu.memory_space<vmem>>, vector<8x40xf32>
    tpu.vector_store %arg16[%c0_79, %c0_80], %154 {strides = array<i32>} : memref<8x40xf32, #tpu.memory_space<vmem>>, vector<8x40xf32>,
    %c0_81 = arith.constant 0 : index
    %c0_82 = arith.constant 0 : index
    %156 = vector.load %arg16[%c0_81, %c0_82] : memref<8x40xf32, #tpu.memory_space<vmem>>, vector<8x8xf32>
    %c0_83 = arith.constant 0 : index
    %c8_84 = arith.constant 8 : index
    %157 = vector.load %arg16[%c0_83, %c8_84] : memref<8x40xf32, #tpu.memory_space<vmem>>, vector<8x16xf32>
    %c0_85 = arith.constant 0 : index
    %c0_86 = arith.constant 0 : index
    %158 = vector.load %arg19[%c0_85, %c0_86] : memref<8x16xf32, #tpu.memory_space<vmem>>, vector<8x16xf32>
    tpu.vector_store %arg19[%c0_85, %c0_86], %157 {strides = array<i32>} : memref<8x16xf32, #tpu.memory_space<vmem>>, vector<8x16xf32>,
    %c0_87 = arith.constant 0 : index
    %c24_88 = arith.constant 24 : index
    %159 = vector.load %arg16[%c0_87, %c24_88] : memref<8x40xf32, #tpu.memory_space<vmem>>, vector<8x16xf32>
    %c0_89 = arith.constant 0 : index
    %c0_90 = arith.constant 0 : index
    %160 = vector.load %arg20[%c0_89, %c0_90] : memref<8x16xf32, #tpu.memory_space<vmem>>, vector<8x16xf32>
    tpu.vector_store %arg20[%c0_89, %c0_90], %159 {strides = array<i32>} : memref<8x16xf32, #tpu.memory_space<vmem>>, vector<8x16xf32>,
    %161 = arith.truncf %156 : vector<8x8xf32> to vector<8x8xbf16>
    %c0_91 = arith.constant 0 : index
    %c0_92 = arith.constant 0 : index
    %162 = vector.load %arg8[%c0_91, %c0_92] : memref<8x64xbf16, #tpu.memory_space<vmem>>, vector<8x64xbf16>
    %cst_93 = arith.constant dense<0.000000e+00> : vector<8x64xf32>
    %163 = tpu.matmul %161, %162, %cst_93 {dimension_numbers = #tpu.dot_dimension_numbers<[1], [0], [0], [1], [0, 0, 1, 1], [], []>} : vector<8x8xbf16>, vector<8x64xbf16>, vector<8x64xf32> -> vector<8x64xf32>
    %164 = arith.addf %163, %14 : vector<8x64xf32>
    %cst_94 = arith.constant 0.000000e+00 : f32
    %165 = vector.broadcast %cst_94 : f32 to vector<8x64xf32>
    %166 = arith.maximumf %164, %165 : vector<8x64xf32>
    %167 = math.absf %164 : vector<8x64xf32>
    %cst_95 = arith.constant 0.000000e+00 : f32
    %168 = vector.broadcast %cst_95 : f32 to vector<8x64xf32>
    %169 = arith.subf %168, %167 : vector<8x64xf32>
    %170 = math.exp %169 : vector<8x64xf32>
    %cst_96 = arith.constant 1.000000e+00 : f32
    %171 = vector.broadcast %cst_96 : f32 to vector<8x64xf32>
    %172 = arith.addf %171, %170 : vector<8x64xf32>
    %173 = math.log %172 : vector<8x64xf32>
    %174 = arith.addf %166, %173 : vector<8x64xf32>
    %c0_97 = arith.constant 0 : index
    %c0_98 = arith.constant 0 : index
    %175 = vector.load %arg17[%c0_97, %c0_98] : memref<8x64xf32, #tpu.memory_space<vmem>>, vector<8x64xf32>
    tpu.vector_store %arg17[%c0_97, %c0_98], %174 {strides = array<i32>} : memref<8x64xf32, #tpu.memory_space<vmem>>, vector<8x64xf32>,
    %176 = arith.mulf %174, %151 : vector<8x64xf32>
    %c0_99 = arith.constant 0 : index
    %c0_100 = arith.constant 0 : index
    %177 = vector.load %arg18[%c0_99, %c0_100] : memref<8x64xf32, #tpu.memory_space<vmem>>, vector<8x64xf32>
    tpu.vector_store %arg18[%c0_99, %c0_100], %176 {strides = array<i32>} : memref<8x64xf32, #tpu.memory_space<vmem>>, vector<8x64xf32>,
    %cst_101 = arith.constant 0.000000e+00 : f32
    %178 = vector.broadcast %cst_101 : f32 to vector<16x64xf32>
    %c0_i32_102 = arith.constant 0 : i32
    %c8_i32_103 = arith.constant 8 : i32
    %179 = arith.addi %c0_i32_102, %c8_i32_103 : i32
    %c1_i32_104 = arith.constant 1 : i32
    %180 = scf.for %arg22 = %c0_i32_102 to %179 step %c1_i32_104 iter_args(%arg23 = %178) -> (vector<16x64xf32>)  : i32 {
      %560 = arith.index_cast %arg22 : i32 to index
      %c0_331 = arith.constant 0 : index
      %561 = vector.load %arg17[%560, %c0_331] : memref<8x64xf32, #tpu.memory_space<vmem>>, vector<1x64xf32>
      %562 = arith.index_cast %arg22 : i32 to index
      %c0_332 = arith.constant 0 : index
      %563 = vector.load %arg18[%562, %c0_332] : memref<8x64xf32, #tpu.memory_space<vmem>>, vector<1x64xf32>
      %564 = arith.index_cast %arg22 : i32 to index
      %c0_333 = arith.constant 0 : index
      %565 = vector.load %arg19[%564, %c0_333] : memref<8x16xf32, #tpu.memory_space<vmem>>, vector<1x16xf32>
      %566 = tpu.transpose %565, [1, 0] : vector<1x16xf32> -> vector<16x1xf32>
      %567 = arith.index_cast %arg22 : i32 to index
      %c0_334 = arith.constant 0 : index
      %568 = vector.load %arg20[%567, %c0_334] : memref<8x16xf32, #tpu.memory_space<vmem>>, vector<1x16xf32>
      %569 = vector.broadcast %561 : vector<1x64xf32> to vector<16x64xf32>
      %570 = arith.mulf %5, %569 : vector<16x64xf32>
      %571 = math.exp %570 : vector<16x64xf32>
      %572 = arith.mulf %571, %arg23 : vector<16x64xf32>
      %573 = vector.broadcast %566 : vector<16x1xf32> to vector<16x64xf32>
      %574 = vector.broadcast %563 : vector<1x64xf32> to vector<16x64xf32>
      %575 = arith.mulf %573, %574 : vector<16x64xf32>
      %576 = arith.addf %572, %575 : vector<16x64xf32>
      %cst_335 = arith.constant dense<0.000000e+00> : vector<1x64xf32>
      %577 = tpu.matmul %568, %576, %cst_335 {dimension_numbers = #tpu.dot_dimension_numbers<[1], [0], [0], [1], [0, 0, 1, 1], [], []>} : vector<1x16xf32>, vector<16x64xf32>, vector<1x64xf32> -> vector<1x64xf32>
      %578 = arith.index_cast %arg22 : i32 to index
      %c0_336 = arith.constant 0 : index
      %579 = vector.load %arg21[%578, %c0_336] : memref<8x64xf32, #tpu.memory_space<vmem>>, vector<1x64xf32>
      tpu.vector_store %arg21[%578, %c0_336], %577 {strides = array<i32>} : memref<8x64xf32, #tpu.memory_space<vmem>>, vector<1x64xf32>,
      scf.yield %576 : vector<16x64xf32>
    }
    %c8_i32_105 = arith.constant 8 : i32
    %c0_106 = arith.constant 0 : index
    %c0_107 = arith.constant 0 : index
    %181 = vector.load %arg21[%c0_106, %c0_107] : memref<8x64xf32, #tpu.memory_space<vmem>>, vector<8x64xf32>
    %182 = arith.mulf %17, %151 : vector<8x64xf32>
    %183 = arith.addf %181, %182 : vector<8x64xf32>
    %cst_108 = arith.constant 0.000000e+00 : f32
    %184 = vector.broadcast %cst_108 : f32 to vector<8x64xf32>
    %185 = arith.subf %184, %130 : vector<8x64xf32>
    %186 = math.exp %185 : vector<8x64xf32>
    %cst_109 = arith.constant 1.000000e+00 : f32
    %187 = vector.broadcast %cst_109 : f32 to vector<8x64xf32>
    %188 = arith.addf %187, %186 : vector<8x64xf32>
    %cst_110 = arith.constant 1.000000e+00 : f32
    %189 = vector.broadcast %cst_110 : f32 to vector<8x64xf32>
    %190 = arith.divf %189, %188 : vector<8x64xf32>
    %191 = arith.mulf %130, %190 : vector<8x64xf32>
    %192 = arith.mulf %183, %191 : vector<8x64xf32>
    %193 = arith.truncf %192 : vector<8x64xf32> to vector<8x64xbf16>
    %c0_111 = arith.constant 0 : index
    %c0_112 = arith.constant 0 : index
    %194 = vector.load %arg12[%c0_111, %c0_112] : memref<64x32xbf16, #tpu.memory_space<vmem>>, vector<64x32xbf16>
    %cst_113 = arith.constant dense<0.000000e+00> : vector<8x32xf32>
    %195 = tpu.matmul %193, %194, %cst_113 {dimension_numbers = #tpu.dot_dimension_numbers<[1], [0], [0], [1], [0, 0, 1, 1], [], []>} : vector<8x64xbf16>, vector<64x32xbf16>, vector<8x32xf32> -> vector<8x32xf32>
    %cst_114 = arith.constant 2.000000e+00 : f32
    %196 = vector.broadcast %cst_114 : f32 to vector<8x32xf32>
    %197 = arith.mulf %196, %114 : vector<8x32xf32>
    %198 = arith.addf %195, %197 : vector<8x32xf32>
    %199 = arith.mulf %198, %198 : vector<8x32xf32>
    %cst_115 = arith.constant dense<0.000000e+00> : vector<8xf32>
    %200 = vector.multi_reduction <add>, %199, %cst_115 [1] : vector<8x32xf32> to vector<8xf32>
    %201 = vector.shape_cast %200 : vector<8xf32> to vector<8x1xf32>
    %cst_116 = arith.constant 3.200000e+01 : f32
    %202 = vector.broadcast %cst_116 : f32 to vector<8x1xf32>
    %203 = arith.divf %201, %202 : vector<8x1xf32>
    %cst_117 = arith.constant 9.99999974E-6 : f32
    %204 = vector.broadcast %cst_117 : f32 to vector<8x1xf32>
    %205 = arith.addf %203, %204 : vector<8x1xf32>
    %206 = math.rsqrt %205 : vector<8x1xf32>
    %207 = vector.broadcast %206 : vector<8x1xf32> to vector<8x32xf32>
    %208 = arith.mulf %198, %207 : vector<8x32xf32>
    %209 = arith.mulf %208, %8 : vector<8x32xf32>
    %210 = arith.truncf %209 : vector<8x32xf32> to vector<8x32xbf16>
    %c0_118 = arith.constant 0 : index
    %c0_119 = arith.constant 0 : index
    %211 = vector.load %arg3[%c0_118, %c0_119] : memref<32x64xbf16, #tpu.memory_space<vmem>>, vector<32x64xbf16>
    %cst_120 = arith.constant dense<0.000000e+00> : vector<8x64xf32>
    %212 = tpu.matmul %210, %211, %cst_120 {dimension_numbers = #tpu.dot_dimension_numbers<[1], [0], [0], [1], [0, 0, 1, 1], [], []>} : vector<8x32xbf16>, vector<32x64xbf16>, vector<8x64xf32> -> vector<8x64xf32>
    %c0_121 = arith.constant 0 : index
    %c0_122 = arith.constant 0 : index
    %213 = vector.load %arg4[%c0_121, %c0_122] : memref<32x64xbf16, #tpu.memory_space<vmem>>, vector<32x64xbf16>
    %cst_123 = arith.constant dense<0.000000e+00> : vector<8x64xf32>
    %214 = tpu.matmul %210, %213, %cst_123 {dimension_numbers = #tpu.dot_dimension_numbers<[1], [0], [0], [1], [0, 0, 1, 1], [], []>} : vector<8x32xbf16>, vector<32x64xbf16>, vector<8x64xf32> -> vector<8x64xf32>
    %215 = tpu.concatenate %30, %212 in 0 : vector<3x64xf32>, vector<8x64xf32> -> vector<11x64xf32>
    %216 = vector.extract_strided_slice %215 {offsets = [0, 0], sizes = [8, 64], strides = [1, 1]} : vector<11x64xf32> to vector<8x64xf32>
    %217 = arith.mulf %216, %20 : vector<8x64xf32>
    %218 = arith.addf %11, %217 : vector<8x64xf32>
    %219 = vector.extract_strided_slice %215 {offsets = [1, 0], sizes = [8, 64], strides = [1, 1]} : vector<11x64xf32> to vector<8x64xf32>
    %220 = arith.mulf %219, %23 : vector<8x64xf32>
    %221 = arith.addf %218, %220 : vector<8x64xf32>
    %222 = vector.extract_strided_slice %215 {offsets = [2, 0], sizes = [8, 64], strides = [1, 1]} : vector<11x64xf32> to vector<8x64xf32>
    %223 = arith.mulf %222, %26 : vector<8x64xf32>
    %224 = arith.addf %221, %223 : vector<8x64xf32>
    %225 = vector.extract_strided_slice %215 {offsets = [3, 0], sizes = [8, 64], strides = [1, 1]} : vector<11x64xf32> to vector<8x64xf32>
    %226 = arith.mulf %225, %29 : vector<8x64xf32>
    %227 = arith.addf %224, %226 : vector<8x64xf32>
    %cst_124 = arith.constant 0.000000e+00 : f32
    %228 = vector.broadcast %cst_124 : f32 to vector<8x64xf32>
    %229 = arith.subf %228, %227 : vector<8x64xf32>
    %230 = math.exp %229 : vector<8x64xf32>
    %cst_125 = arith.constant 1.000000e+00 : f32
    %231 = vector.broadcast %cst_125 : f32 to vector<8x64xf32>
    %232 = arith.addf %231, %230 : vector<8x64xf32>
    %cst_126 = arith.constant 1.000000e+00 : f32
    %233 = vector.broadcast %cst_126 : f32 to vector<8x64xf32>
    %234 = arith.divf %233, %232 : vector<8x64xf32>
    %235 = arith.mulf %227, %234 : vector<8x64xf32>
    %236 = arith.truncf %235 : vector<8x64xf32> to vector<8x64xbf16>
    %c0_127 = arith.constant 0 : index
    %c0_128 = arith.constant 0 : index
    %237 = vector.load %arg7[%c0_127, %c0_128] : memref<64x40xbf16, #tpu.memory_space<vmem>>, vector<64x40xbf16>
    %cst_129 = arith.constant dense<0.000000e+00> : vector<8x40xf32>
    %238 = tpu.matmul %236, %237, %cst_129 {dimension_numbers = #tpu.dot_dimension_numbers<[1], [0], [0], [1], [0, 0, 1, 1], [], []>} : vector<8x64xbf16>, vector<64x40xbf16>, vector<8x40xf32> -> vector<8x40xf32>
    %c0_130 = arith.constant 0 : index
    %c0_131 = arith.constant 0 : index
    %239 = vector.load %arg16[%c0_130, %c0_131] : memref<8x40xf32, #tpu.memory_space<vmem>>, vector<8x40xf32>
    tpu.vector_store %arg16[%c0_130, %c0_131], %238 {strides = array<i32>} : memref<8x40xf32, #tpu.memory_space<vmem>>, vector<8x40xf32>,
    %c0_132 = arith.constant 0 : index
    %c0_133 = arith.constant 0 : index
    %240 = vector.load %arg16[%c0_132, %c0_133] : memref<8x40xf32, #tpu.memory_space<vmem>>, vector<8x8xf32>
    %c0_134 = arith.constant 0 : index
    %c8_135 = arith.constant 8 : index
    %241 = vector.load %arg16[%c0_134, %c8_135] : memref<8x40xf32, #tpu.memory_space<vmem>>, vector<8x16xf32>
    %c0_136 = arith.constant 0 : index
    %c0_137 = arith.constant 0 : index
    %242 = vector.load %arg19[%c0_136, %c0_137] : memref<8x16xf32, #tpu.memory_space<vmem>>, vector<8x16xf32>
    tpu.vector_store %arg19[%c0_136, %c0_137], %241 {strides = array<i32>} : memref<8x16xf32, #tpu.memory_space<vmem>>, vector<8x16xf32>,
    %c0_138 = arith.constant 0 : index
    %c24_139 = arith.constant 24 : index
    %243 = vector.load %arg16[%c0_138, %c24_139] : memref<8x40xf32, #tpu.memory_space<vmem>>, vector<8x16xf32>
    %c0_140 = arith.constant 0 : index
    %c0_141 = arith.constant 0 : index
    %244 = vector.load %arg20[%c0_140, %c0_141] : memref<8x16xf32, #tpu.memory_space<vmem>>, vector<8x16xf32>
    tpu.vector_store %arg20[%c0_140, %c0_141], %243 {strides = array<i32>} : memref<8x16xf32, #tpu.memory_space<vmem>>, vector<8x16xf32>,
    %245 = arith.truncf %240 : vector<8x8xf32> to vector<8x8xbf16>
    %c0_142 = arith.constant 0 : index
    %c0_143 = arith.constant 0 : index
    %246 = vector.load %arg8[%c0_142, %c0_143] : memref<8x64xbf16, #tpu.memory_space<vmem>>, vector<8x64xbf16>
    %cst_144 = arith.constant dense<0.000000e+00> : vector<8x64xf32>
    %247 = tpu.matmul %245, %246, %cst_144 {dimension_numbers = #tpu.dot_dimension_numbers<[1], [0], [0], [1], [0, 0, 1, 1], [], []>} : vector<8x8xbf16>, vector<8x64xbf16>, vector<8x64xf32> -> vector<8x64xf32>
    %248 = arith.addf %247, %14 : vector<8x64xf32>
    %cst_145 = arith.constant 0.000000e+00 : f32
    %249 = vector.broadcast %cst_145 : f32 to vector<8x64xf32>
    %250 = arith.maximumf %248, %249 : vector<8x64xf32>
    %251 = math.absf %248 : vector<8x64xf32>
    %cst_146 = arith.constant 0.000000e+00 : f32
    %252 = vector.broadcast %cst_146 : f32 to vector<8x64xf32>
    %253 = arith.subf %252, %251 : vector<8x64xf32>
    %254 = math.exp %253 : vector<8x64xf32>
    %cst_147 = arith.constant 1.000000e+00 : f32
    %255 = vector.broadcast %cst_147 : f32 to vector<8x64xf32>
    %256 = arith.addf %255, %254 : vector<8x64xf32>
    %257 = math.log %256 : vector<8x64xf32>
    %258 = arith.addf %250, %257 : vector<8x64xf32>
    %c0_148 = arith.constant 0 : index
    %c0_149 = arith.constant 0 : index
    %259 = vector.load %arg17[%c0_148, %c0_149] : memref<8x64xf32, #tpu.memory_space<vmem>>, vector<8x64xf32>
    tpu.vector_store %arg17[%c0_148, %c0_149], %258 {strides = array<i32>} : memref<8x64xf32, #tpu.memory_space<vmem>>, vector<8x64xf32>,
    %260 = arith.mulf %258, %235 : vector<8x64xf32>
    %c0_150 = arith.constant 0 : index
    %c0_151 = arith.constant 0 : index
    %261 = vector.load %arg18[%c0_150, %c0_151] : memref<8x64xf32, #tpu.memory_space<vmem>>, vector<8x64xf32>
    tpu.vector_store %arg18[%c0_150, %c0_151], %260 {strides = array<i32>} : memref<8x64xf32, #tpu.memory_space<vmem>>, vector<8x64xf32>,
    %cst_152 = arith.constant 0.000000e+00 : f32
    %262 = vector.broadcast %cst_152 : f32 to vector<16x64xf32>
    %c0_i32_153 = arith.constant 0 : i32
    %c8_i32_154 = arith.constant 8 : i32
    %263 = arith.addi %c0_i32_153, %c8_i32_154 : i32
    %c1_i32_155 = arith.constant 1 : i32
    %264 = scf.for %arg22 = %c0_i32_153 to %263 step %c1_i32_155 iter_args(%arg23 = %262) -> (vector<16x64xf32>)  : i32 {
      %560 = arith.index_cast %arg22 : i32 to index
      %c0_331 = arith.constant 0 : index
      %561 = vector.load %arg17[%560, %c0_331] : memref<8x64xf32, #tpu.memory_space<vmem>>, vector<1x64xf32>
      %562 = arith.index_cast %arg22 : i32 to index
      %c0_332 = arith.constant 0 : index
      %563 = vector.load %arg18[%562, %c0_332] : memref<8x64xf32, #tpu.memory_space<vmem>>, vector<1x64xf32>
      %564 = arith.index_cast %arg22 : i32 to index
      %c0_333 = arith.constant 0 : index
      %565 = vector.load %arg19[%564, %c0_333] : memref<8x16xf32, #tpu.memory_space<vmem>>, vector<1x16xf32>
      %566 = tpu.transpose %565, [1, 0] : vector<1x16xf32> -> vector<16x1xf32>
      %567 = arith.index_cast %arg22 : i32 to index
      %c0_334 = arith.constant 0 : index
      %568 = vector.load %arg20[%567, %c0_334] : memref<8x16xf32, #tpu.memory_space<vmem>>, vector<1x16xf32>
      %569 = vector.broadcast %561 : vector<1x64xf32> to vector<16x64xf32>
      %570 = arith.mulf %5, %569 : vector<16x64xf32>
      %571 = math.exp %570 : vector<16x64xf32>
      %572 = arith.mulf %571, %arg23 : vector<16x64xf32>
      %573 = vector.broadcast %566 : vector<16x1xf32> to vector<16x64xf32>
      %574 = vector.broadcast %563 : vector<1x64xf32> to vector<16x64xf32>
      %575 = arith.mulf %573, %574 : vector<16x64xf32>
      %576 = arith.addf %572, %575 : vector<16x64xf32>
      %cst_335 = arith.constant dense<0.000000e+00> : vector<1x64xf32>
      %577 = tpu.matmul %568, %576, %cst_335 {dimension_numbers = #tpu.dot_dimension_numbers<[1], [0], [0], [1], [0, 0, 1, 1], [], []>} : vector<1x16xf32>, vector<16x64xf32>, vector<1x64xf32> -> vector<1x64xf32>
      %578 = arith.index_cast %arg22 : i32 to index
      %c0_336 = arith.constant 0 : index
      %579 = vector.load %arg21[%578, %c0_336] : memref<8x64xf32, #tpu.memory_space<vmem>>, vector<1x64xf32>
      tpu.vector_store %arg21[%578, %c0_336], %577 {strides = array<i32>} : memref<8x64xf32, #tpu.memory_space<vmem>>, vector<1x64xf32>,
      scf.yield %576 : vector<16x64xf32>
    }
    %c8_i32_156 = arith.constant 8 : i32
    %c0_157 = arith.constant 0 : index
    %c0_158 = arith.constant 0 : index
    %265 = vector.load %arg21[%c0_157, %c0_158] : memref<8x64xf32, #tpu.memory_space<vmem>>, vector<8x64xf32>
    %266 = arith.mulf %17, %235 : vector<8x64xf32>
    %267 = arith.addf %265, %266 : vector<8x64xf32>
    %cst_159 = arith.constant 0.000000e+00 : f32
    %268 = vector.broadcast %cst_159 : f32 to vector<8x64xf32>
    %269 = arith.subf %268, %214 : vector<8x64xf32>
    %270 = math.exp %269 : vector<8x64xf32>
    %cst_160 = arith.constant 1.000000e+00 : f32
    %271 = vector.broadcast %cst_160 : f32 to vector<8x64xf32>
    %272 = arith.addf %271, %270 : vector<8x64xf32>
    %cst_161 = arith.constant 1.000000e+00 : f32
    %273 = vector.broadcast %cst_161 : f32 to vector<8x64xf32>
    %274 = arith.divf %273, %272 : vector<8x64xf32>
    %275 = arith.mulf %214, %274 : vector<8x64xf32>
    %276 = arith.mulf %267, %275 : vector<8x64xf32>
    %277 = arith.truncf %276 : vector<8x64xf32> to vector<8x64xbf16>
    %c0_162 = arith.constant 0 : index
    %c0_163 = arith.constant 0 : index
    %278 = vector.load %arg12[%c0_162, %c0_163] : memref<64x32xbf16, #tpu.memory_space<vmem>>, vector<64x32xbf16>
    %cst_164 = arith.constant dense<0.000000e+00> : vector<8x32xf32>
    %279 = tpu.matmul %277, %278, %cst_164 {dimension_numbers = #tpu.dot_dimension_numbers<[1], [0], [0], [1], [0, 0, 1, 1], [], []>} : vector<8x64xbf16>, vector<64x32xbf16>, vector<8x32xf32> -> vector<8x32xf32>
    %cst_165 = arith.constant 2.000000e+00 : f32
    %280 = vector.broadcast %cst_165 : f32 to vector<8x32xf32>
    %281 = arith.mulf %280, %198 : vector<8x32xf32>
    %282 = arith.addf %279, %281 : vector<8x32xf32>
    %283 = arith.mulf %282, %282 : vector<8x32xf32>
    %cst_166 = arith.constant dense<0.000000e+00> : vector<8xf32>
    %284 = vector.multi_reduction <add>, %283, %cst_166 [1] : vector<8x32xf32> to vector<8xf32>
    %285 = vector.shape_cast %284 : vector<8xf32> to vector<8x1xf32>
    %cst_167 = arith.constant 3.200000e+01 : f32
    %286 = vector.broadcast %cst_167 : f32 to vector<8x1xf32>
    %287 = arith.divf %285, %286 : vector<8x1xf32>
    %cst_168 = arith.constant 9.99999974E-6 : f32
    %288 = vector.broadcast %cst_168 : f32 to vector<8x1xf32>
    %289 = arith.addf %287, %288 : vector<8x1xf32>
    %290 = math.rsqrt %289 : vector<8x1xf32>
    %291 = vector.broadcast %290 : vector<8x1xf32> to vector<8x32xf32>
    %292 = arith.mulf %282, %291 : vector<8x32xf32>
    %293 = arith.mulf %292, %8 : vector<8x32xf32>
    %294 = arith.truncf %293 : vector<8x32xf32> to vector<8x32xbf16>
    %c0_169 = arith.constant 0 : index
    %c0_170 = arith.constant 0 : index
    %295 = vector.load %arg3[%c0_169, %c0_170] : memref<32x64xbf16, #tpu.memory_space<vmem>>, vector<32x64xbf16>
    %cst_171 = arith.constant dense<0.000000e+00> : vector<8x64xf32>
    %296 = tpu.matmul %294, %295, %cst_171 {dimension_numbers = #tpu.dot_dimension_numbers<[1], [0], [0], [1], [0, 0, 1, 1], [], []>} : vector<8x32xbf16>, vector<32x64xbf16>, vector<8x64xf32> -> vector<8x64xf32>
    %c0_172 = arith.constant 0 : index
    %c0_173 = arith.constant 0 : index
    %297 = vector.load %arg4[%c0_172, %c0_173] : memref<32x64xbf16, #tpu.memory_space<vmem>>, vector<32x64xbf16>
    %cst_174 = arith.constant dense<0.000000e+00> : vector<8x64xf32>
    %298 = tpu.matmul %294, %297, %cst_174 {dimension_numbers = #tpu.dot_dimension_numbers<[1], [0], [0], [1], [0, 0, 1, 1], [], []>} : vector<8x32xbf16>, vector<32x64xbf16>, vector<8x64xf32> -> vector<8x64xf32>
    %299 = tpu.concatenate %30, %296 in 0 : vector<3x64xf32>, vector<8x64xf32> -> vector<11x64xf32>
    %300 = vector.extract_strided_slice %299 {offsets = [0, 0], sizes = [8, 64], strides = [1, 1]} : vector<11x64xf32> to vector<8x64xf32>
    %301 = arith.mulf %300, %20 : vector<8x64xf32>
    %302 = arith.addf %11, %301 : vector<8x64xf32>
    %303 = vector.extract_strided_slice %299 {offsets = [1, 0], sizes = [8, 64], strides = [1, 1]} : vector<11x64xf32> to vector<8x64xf32>
    %304 = arith.mulf %303, %23 : vector<8x64xf32>
    %305 = arith.addf %302, %304 : vector<8x64xf32>
    %306 = vector.extract_strided_slice %299 {offsets = [2, 0], sizes = [8, 64], strides = [1, 1]} : vector<11x64xf32> to vector<8x64xf32>
    %307 = arith.mulf %306, %26 : vector<8x64xf32>
    %308 = arith.addf %305, %307 : vector<8x64xf32>
    %309 = vector.extract_strided_slice %299 {offsets = [3, 0], sizes = [8, 64], strides = [1, 1]} : vector<11x64xf32> to vector<8x64xf32>
    %310 = arith.mulf %309, %29 : vector<8x64xf32>
    %311 = arith.addf %308, %310 : vector<8x64xf32>
    %cst_175 = arith.constant 0.000000e+00 : f32
    %312 = vector.broadcast %cst_175 : f32 to vector<8x64xf32>
    %313 = arith.subf %312, %311 : vector<8x64xf32>
    %314 = math.exp %313 : vector<8x64xf32>
    %cst_176 = arith.constant 1.000000e+00 : f32
    %315 = vector.broadcast %cst_176 : f32 to vector<8x64xf32>
    %316 = arith.addf %315, %314 : vector<8x64xf32>
    %cst_177 = arith.constant 1.000000e+00 : f32
    %317 = vector.broadcast %cst_177 : f32 to vector<8x64xf32>
    %318 = arith.divf %317, %316 : vector<8x64xf32>
    %319 = arith.mulf %311, %318 : vector<8x64xf32>
    %320 = arith.truncf %319 : vector<8x64xf32> to vector<8x64xbf16>
    %c0_178 = arith.constant 0 : index
    %c0_179 = arith.constant 0 : index
    %321 = vector.load %arg7[%c0_178, %c0_179] : memref<64x40xbf16, #tpu.memory_space<vmem>>, vector<64x40xbf16>
    %cst_180 = arith.constant dense<0.000000e+00> : vector<8x40xf32>
    %322 = tpu.matmul %320, %321, %cst_180 {dimension_numbers = #tpu.dot_dimension_numbers<[1], [0], [0], [1], [0, 0, 1, 1], [], []>} : vector<8x64xbf16>, vector<64x40xbf16>, vector<8x40xf32> -> vector<8x40xf32>
    %c0_181 = arith.constant 0 : index
    %c0_182 = arith.constant 0 : index
    %323 = vector.load %arg16[%c0_181, %c0_182] : memref<8x40xf32, #tpu.memory_space<vmem>>, vector<8x40xf32>
    tpu.vector_store %arg16[%c0_181, %c0_182], %322 {strides = array<i32>} : memref<8x40xf32, #tpu.memory_space<vmem>>, vector<8x40xf32>,
    %c0_183 = arith.constant 0 : index
    %c0_184 = arith.constant 0 : index
    %324 = vector.load %arg16[%c0_183, %c0_184] : memref<8x40xf32, #tpu.memory_space<vmem>>, vector<8x8xf32>
    %c0_185 = arith.constant 0 : index
    %c8_186 = arith.constant 8 : index
    %325 = vector.load %arg16[%c0_185, %c8_186] : memref<8x40xf32, #tpu.memory_space<vmem>>, vector<8x16xf32>
    %c0_187 = arith.constant 0 : index
    %c0_188 = arith.constant 0 : index
    %326 = vector.load %arg19[%c0_187, %c0_188] : memref<8x16xf32, #tpu.memory_space<vmem>>, vector<8x16xf32>
    tpu.vector_store %arg19[%c0_187, %c0_188], %325 {strides = array<i32>} : memref<8x16xf32, #tpu.memory_space<vmem>>, vector<8x16xf32>,
    %c0_189 = arith.constant 0 : index
    %c24_190 = arith.constant 24 : index
    %327 = vector.load %arg16[%c0_189, %c24_190] : memref<8x40xf32, #tpu.memory_space<vmem>>, vector<8x16xf32>
    %c0_191 = arith.constant 0 : index
    %c0_192 = arith.constant 0 : index
    %328 = vector.load %arg20[%c0_191, %c0_192] : memref<8x16xf32, #tpu.memory_space<vmem>>, vector<8x16xf32>
    tpu.vector_store %arg20[%c0_191, %c0_192], %327 {strides = array<i32>} : memref<8x16xf32, #tpu.memory_space<vmem>>, vector<8x16xf32>,
    %329 = arith.truncf %324 : vector<8x8xf32> to vector<8x8xbf16>
    %c0_193 = arith.constant 0 : index
    %c0_194 = arith.constant 0 : index
    %330 = vector.load %arg8[%c0_193, %c0_194] : memref<8x64xbf16, #tpu.memory_space<vmem>>, vector<8x64xbf16>
    %cst_195 = arith.constant dense<0.000000e+00> : vector<8x64xf32>
    %331 = tpu.matmul %329, %330, %cst_195 {dimension_numbers = #tpu.dot_dimension_numbers<[1], [0], [0], [1], [0, 0, 1, 1], [], []>} : vector<8x8xbf16>, vector<8x64xbf16>, vector<8x64xf32> -> vector<8x64xf32>
    %332 = arith.addf %331, %14 : vector<8x64xf32>
    %cst_196 = arith.constant 0.000000e+00 : f32
    %333 = vector.broadcast %cst_196 : f32 to vector<8x64xf32>
    %334 = arith.maximumf %332, %333 : vector<8x64xf32>
    %335 = math.absf %332 : vector<8x64xf32>
    %cst_197 = arith.constant 0.000000e+00 : f32
    %336 = vector.broadcast %cst_197 : f32 to vector<8x64xf32>
    %337 = arith.subf %336, %335 : vector<8x64xf32>
    %338 = math.exp %337 : vector<8x64xf32>
    %cst_198 = arith.constant 1.000000e+00 : f32
    %339 = vector.broadcast %cst_198 : f32 to vector<8x64xf32>
    %340 = arith.addf %339, %338 : vector<8x64xf32>
    %341 = math.log %340 : vector<8x64xf32>
    %342 = arith.addf %334, %341 : vector<8x64xf32>
    %c0_199 = arith.constant 0 : index
    %c0_200 = arith.constant 0 : index
    %343 = vector.load %arg17[%c0_199, %c0_200] : memref<8x64xf32, #tpu.memory_space<vmem>>, vector<8x64xf32>
    tpu.vector_store %arg17[%c0_199, %c0_200], %342 {strides = array<i32>} : memref<8x64xf32, #tpu.memory_space<vmem>>, vector<8x64xf32>,
    %344 = arith.mulf %342, %319 : vector<8x64xf32>
    %c0_201 = arith.constant 0 : index
    %c0_202 = arith.constant 0 : index
    %345 = vector.load %arg18[%c0_201, %c0_202] : memref<8x64xf32, #tpu.memory_space<vmem>>, vector<8x64xf32>
    tpu.vector_store %arg18[%c0_201, %c0_202], %344 {strides = array<i32>} : memref<8x64xf32, #tpu.memory_space<vmem>>, vector<8x64xf32>,
    %cst_203 = arith.constant 0.000000e+00 : f32
    %346 = vector.broadcast %cst_203 : f32 to vector<16x64xf32>
    %c0_i32_204 = arith.constant 0 : i32
    %c8_i32_205 = arith.constant 8 : i32
    %347 = arith.addi %c0_i32_204, %c8_i32_205 : i32
    %c1_i32_206 = arith.constant 1 : i32
    %348 = scf.for %arg22 = %c0_i32_204 to %347 step %c1_i32_206 iter_args(%arg23 = %346) -> (vector<16x64xf32>)  : i32 {
      %560 = arith.index_cast %arg22 : i32 to index
      %c0_331 = arith.constant 0 : index
      %561 = vector.load %arg17[%560, %c0_331] : memref<8x64xf32, #tpu.memory_space<vmem>>, vector<1x64xf32>
      %562 = arith.index_cast %arg22 : i32 to index
      %c0_332 = arith.constant 0 : index
      %563 = vector.load %arg18[%562, %c0_332] : memref<8x64xf32, #tpu.memory_space<vmem>>, vector<1x64xf32>
      %564 = arith.index_cast %arg22 : i32 to index
      %c0_333 = arith.constant 0 : index
      %565 = vector.load %arg19[%564, %c0_333] : memref<8x16xf32, #tpu.memory_space<vmem>>, vector<1x16xf32>
      %566 = tpu.transpose %565, [1, 0] : vector<1x16xf32> -> vector<16x1xf32>
      %567 = arith.index_cast %arg22 : i32 to index
      %c0_334 = arith.constant 0 : index
      %568 = vector.load %arg20[%567, %c0_334] : memref<8x16xf32, #tpu.memory_space<vmem>>, vector<1x16xf32>
      %569 = vector.broadcast %561 : vector<1x64xf32> to vector<16x64xf32>
      %570 = arith.mulf %5, %569 : vector<16x64xf32>
      %571 = math.exp %570 : vector<16x64xf32>
      %572 = arith.mulf %571, %arg23 : vector<16x64xf32>
      %573 = vector.broadcast %566 : vector<16x1xf32> to vector<16x64xf32>
      %574 = vector.broadcast %563 : vector<1x64xf32> to vector<16x64xf32>
      %575 = arith.mulf %573, %574 : vector<16x64xf32>
      %576 = arith.addf %572, %575 : vector<16x64xf32>
      %cst_335 = arith.constant dense<0.000000e+00> : vector<1x64xf32>
      %577 = tpu.matmul %568, %576, %cst_335 {dimension_numbers = #tpu.dot_dimension_numbers<[1], [0], [0], [1], [0, 0, 1, 1], [], []>} : vector<1x16xf32>, vector<16x64xf32>, vector<1x64xf32> -> vector<1x64xf32>
      %578 = arith.index_cast %arg22 : i32 to index
      %c0_336 = arith.constant 0 : index
      %579 = vector.load %arg21[%578, %c0_336] : memref<8x64xf32, #tpu.memory_space<vmem>>, vector<1x64xf32>
      tpu.vector_store %arg21[%578, %c0_336], %577 {strides = array<i32>} : memref<8x64xf32, #tpu.memory_space<vmem>>, vector<1x64xf32>,
      scf.yield %576 : vector<16x64xf32>
    }
    %c8_i32_207 = arith.constant 8 : i32
    %c0_208 = arith.constant 0 : index
    %c0_209 = arith.constant 0 : index
    %349 = vector.load %arg21[%c0_208, %c0_209] : memref<8x64xf32, #tpu.memory_space<vmem>>, vector<8x64xf32>
    %350 = arith.mulf %17, %319 : vector<8x64xf32>
    %351 = arith.addf %349, %350 : vector<8x64xf32>
    %cst_210 = arith.constant 0.000000e+00 : f32
    %352 = vector.broadcast %cst_210 : f32 to vector<8x64xf32>
    %353 = arith.subf %352, %298 : vector<8x64xf32>
    %354 = math.exp %353 : vector<8x64xf32>
    %cst_211 = arith.constant 1.000000e+00 : f32
    %355 = vector.broadcast %cst_211 : f32 to vector<8x64xf32>
    %356 = arith.addf %355, %354 : vector<8x64xf32>
    %cst_212 = arith.constant 1.000000e+00 : f32
    %357 = vector.broadcast %cst_212 : f32 to vector<8x64xf32>
    %358 = arith.divf %357, %356 : vector<8x64xf32>
    %359 = arith.mulf %298, %358 : vector<8x64xf32>
    %360 = arith.mulf %351, %359 : vector<8x64xf32>
    %361 = arith.truncf %360 : vector<8x64xf32> to vector<8x64xbf16>
    %c0_213 = arith.constant 0 : index
    %c0_214 = arith.constant 0 : index
    %362 = vector.load %arg12[%c0_213, %c0_214] : memref<64x32xbf16, #tpu.memory_space<vmem>>, vector<64x32xbf16>
    %cst_215 = arith.constant dense<0.000000e+00> : vector<8x32xf32>
    %363 = tpu.matmul %361, %362, %cst_215 {dimension_numbers = #tpu.dot_dimension_numbers<[1], [0], [0], [1], [0, 0, 1, 1], [], []>} : vector<8x64xbf16>, vector<64x32xbf16>, vector<8x32xf32> -> vector<8x32xf32>
    %cst_216 = arith.constant 2.000000e+00 : f32
    %364 = vector.broadcast %cst_216 : f32 to vector<8x32xf32>
    %365 = arith.mulf %364, %282 : vector<8x32xf32>
    %366 = arith.addf %363, %365 : vector<8x32xf32>
    %367 = arith.mulf %366, %366 : vector<8x32xf32>
    %cst_217 = arith.constant dense<0.000000e+00> : vector<8xf32>
    %368 = vector.multi_reduction <add>, %367, %cst_217 [1] : vector<8x32xf32> to vector<8xf32>
    %369 = vector.shape_cast %368 : vector<8xf32> to vector<8x1xf32>
    %cst_218 = arith.constant 3.200000e+01 : f32
    %370 = vector.broadcast %cst_218 : f32 to vector<8x1xf32>
    %371 = arith.divf %369, %370 : vector<8x1xf32>
    %cst_219 = arith.constant 9.99999974E-6 : f32
    %372 = vector.broadcast %cst_219 : f32 to vector<8x1xf32>
    %373 = arith.addf %371, %372 : vector<8x1xf32>
    %374 = math.rsqrt %373 : vector<8x1xf32>
    %375 = vector.broadcast %374 : vector<8x1xf32> to vector<8x32xf32>
    %376 = arith.mulf %366, %375 : vector<8x32xf32>
    %377 = arith.mulf %376, %8 : vector<8x32xf32>
    %378 = arith.truncf %377 : vector<8x32xf32> to vector<8x32xbf16>
    %c0_220 = arith.constant 0 : index
    %c0_221 = arith.constant 0 : index
    %379 = vector.load %arg3[%c0_220, %c0_221] : memref<32x64xbf16, #tpu.memory_space<vmem>>, vector<32x64xbf16>
    %cst_222 = arith.constant dense<0.000000e+00> : vector<8x64xf32>
    %380 = tpu.matmul %378, %379, %cst_222 {dimension_numbers = #tpu.dot_dimension_numbers<[1], [0], [0], [1], [0, 0, 1, 1], [], []>} : vector<8x32xbf16>, vector<32x64xbf16>, vector<8x64xf32> -> vector<8x64xf32>
    %c0_223 = arith.constant 0 : index
    %c0_224 = arith.constant 0 : index
    %381 = vector.load %arg4[%c0_223, %c0_224] : memref<32x64xbf16, #tpu.memory_space<vmem>>, vector<32x64xbf16>
    %cst_225 = arith.constant dense<0.000000e+00> : vector<8x64xf32>
    %382 = tpu.matmul %378, %381, %cst_225 {dimension_numbers = #tpu.dot_dimension_numbers<[1], [0], [0], [1], [0, 0, 1, 1], [], []>} : vector<8x32xbf16>, vector<32x64xbf16>, vector<8x64xf32> -> vector<8x64xf32>
    %383 = tpu.concatenate %30, %380 in 0 : vector<3x64xf32>, vector<8x64xf32> -> vector<11x64xf32>
    %384 = vector.extract_strided_slice %383 {offsets = [0, 0], sizes = [8, 64], strides = [1, 1]} : vector<11x64xf32> to vector<8x64xf32>
    %385 = arith.mulf %384, %20 : vector<8x64xf32>
    %386 = arith.addf %11, %385 : vector<8x64xf32>
    %387 = vector.extract_strided_slice %383 {offsets = [1, 0], sizes = [8, 64], strides = [1, 1]} : vector<11x64xf32> to vector<8x64xf32>
    %388 = arith.mulf %387, %23 : vector<8x64xf32>
    %389 = arith.addf %386, %388 : vector<8x64xf32>
    %390 = vector.extract_strided_slice %383 {offsets = [2, 0], sizes = [8, 64], strides = [1, 1]} : vector<11x64xf32> to vector<8x64xf32>
    %391 = arith.mulf %390, %26 : vector<8x64xf32>
    %392 = arith.addf %389, %391 : vector<8x64xf32>
    %393 = vector.extract_strided_slice %383 {offsets = [3, 0], sizes = [8, 64], strides = [1, 1]} : vector<11x64xf32> to vector<8x64xf32>
    %394 = arith.mulf %393, %29 : vector<8x64xf32>
    %395 = arith.addf %392, %394 : vector<8x64xf32>
    %cst_226 = arith.constant 0.000000e+00 : f32
    %396 = vector.broadcast %cst_226 : f32 to vector<8x64xf32>
    %397 = arith.subf %396, %395 : vector<8x64xf32>
    %398 = math.exp %397 : vector<8x64xf32>
    %cst_227 = arith.constant 1.000000e+00 : f32
    %399 = vector.broadcast %cst_227 : f32 to vector<8x64xf32>
    %400 = arith.addf %399, %398 : vector<8x64xf32>
    %cst_228 = arith.constant 1.000000e+00 : f32
    %401 = vector.broadcast %cst_228 : f32 to vector<8x64xf32>
    %402 = arith.divf %401, %400 : vector<8x64xf32>
    %403 = arith.mulf %395, %402 : vector<8x64xf32>
    %404 = arith.truncf %403 : vector<8x64xf32> to vector<8x64xbf16>
    %c0_229 = arith.constant 0 : index
    %c0_230 = arith.constant 0 : index
    %405 = vector.load %arg7[%c0_229, %c0_230] : memref<64x40xbf16, #tpu.memory_space<vmem>>, vector<64x40xbf16>
    %cst_231 = arith.constant dense<0.000000e+00> : vector<8x40xf32>
    %406 = tpu.matmul %404, %405, %cst_231 {dimension_numbers = #tpu.dot_dimension_numbers<[1], [0], [0], [1], [0, 0, 1, 1], [], []>} : vector<8x64xbf16>, vector<64x40xbf16>, vector<8x40xf32> -> vector<8x40xf32>
    %c0_232 = arith.constant 0 : index
    %c0_233 = arith.constant 0 : index
    %407 = vector.load %arg16[%c0_232, %c0_233] : memref<8x40xf32, #tpu.memory_space<vmem>>, vector<8x40xf32>
    tpu.vector_store %arg16[%c0_232, %c0_233], %406 {strides = array<i32>} : memref<8x40xf32, #tpu.memory_space<vmem>>, vector<8x40xf32>,
    %c0_234 = arith.constant 0 : index
    %c0_235 = arith.constant 0 : index
    %408 = vector.load %arg16[%c0_234, %c0_235] : memref<8x40xf32, #tpu.memory_space<vmem>>, vector<8x8xf32>
    %c0_236 = arith.constant 0 : index
    %c8_237 = arith.constant 8 : index
    %409 = vector.load %arg16[%c0_236, %c8_237] : memref<8x40xf32, #tpu.memory_space<vmem>>, vector<8x16xf32>
    %c0_238 = arith.constant 0 : index
    %c0_239 = arith.constant 0 : index
    %410 = vector.load %arg19[%c0_238, %c0_239] : memref<8x16xf32, #tpu.memory_space<vmem>>, vector<8x16xf32>
    tpu.vector_store %arg19[%c0_238, %c0_239], %409 {strides = array<i32>} : memref<8x16xf32, #tpu.memory_space<vmem>>, vector<8x16xf32>,
    %c0_240 = arith.constant 0 : index
    %c24_241 = arith.constant 24 : index
    %411 = vector.load %arg16[%c0_240, %c24_241] : memref<8x40xf32, #tpu.memory_space<vmem>>, vector<8x16xf32>
    %c0_242 = arith.constant 0 : index
    %c0_243 = arith.constant 0 : index
    %412 = vector.load %arg20[%c0_242, %c0_243] : memref<8x16xf32, #tpu.memory_space<vmem>>, vector<8x16xf32>
    tpu.vector_store %arg20[%c0_242, %c0_243], %411 {strides = array<i32>} : memref<8x16xf32, #tpu.memory_space<vmem>>, vector<8x16xf32>,
    %413 = arith.truncf %408 : vector<8x8xf32> to vector<8x8xbf16>
    %c0_244 = arith.constant 0 : index
    %c0_245 = arith.constant 0 : index
    %414 = vector.load %arg8[%c0_244, %c0_245] : memref<8x64xbf16, #tpu.memory_space<vmem>>, vector<8x64xbf16>
    %cst_246 = arith.constant dense<0.000000e+00> : vector<8x64xf32>
    %415 = tpu.matmul %413, %414, %cst_246 {dimension_numbers = #tpu.dot_dimension_numbers<[1], [0], [0], [1], [0, 0, 1, 1], [], []>} : vector<8x8xbf16>, vector<8x64xbf16>, vector<8x64xf32> -> vector<8x64xf32>
    %416 = arith.addf %415, %14 : vector<8x64xf32>
    %cst_247 = arith.constant 0.000000e+00 : f32
    %417 = vector.broadcast %cst_247 : f32 to vector<8x64xf32>
    %418 = arith.maximumf %416, %417 : vector<8x64xf32>
    %419 = math.absf %416 : vector<8x64xf32>
    %cst_248 = arith.constant 0.000000e+00 : f32
    %420 = vector.broadcast %cst_248 : f32 to vector<8x64xf32>
    %421 = arith.subf %420, %419 : vector<8x64xf32>
    %422 = math.exp %421 : vector<8x64xf32>
    %cst_249 = arith.constant 1.000000e+00 : f32
    %423 = vector.broadcast %cst_249 : f32 to vector<8x64xf32>
    %424 = arith.addf %423, %422 : vector<8x64xf32>
    %425 = math.log %424 : vector<8x64xf32>
    %426 = arith.addf %418, %425 : vector<8x64xf32>
    %c0_250 = arith.constant 0 : index
    %c0_251 = arith.constant 0 : index
    %427 = vector.load %arg17[%c0_250, %c0_251] : memref<8x64xf32, #tpu.memory_space<vmem>>, vector<8x64xf32>
    tpu.vector_store %arg17[%c0_250, %c0_251], %426 {strides = array<i32>} : memref<8x64xf32, #tpu.memory_space<vmem>>, vector<8x64xf32>,
    %428 = arith.mulf %426, %403 : vector<8x64xf32>
    %c0_252 = arith.constant 0 : index
    %c0_253 = arith.constant 0 : index
    %429 = vector.load %arg18[%c0_252, %c0_253] : memref<8x64xf32, #tpu.memory_space<vmem>>, vector<8x64xf32>
    tpu.vector_store %arg18[%c0_252, %c0_253], %428 {strides = array<i32>} : memref<8x64xf32, #tpu.memory_space<vmem>>, vector<8x64xf32>,
    %cst_254 = arith.constant 0.000000e+00 : f32
    %430 = vector.broadcast %cst_254 : f32 to vector<16x64xf32>
    %c0_i32_255 = arith.constant 0 : i32
    %c8_i32_256 = arith.constant 8 : i32
    %431 = arith.addi %c0_i32_255, %c8_i32_256 : i32
    %c1_i32_257 = arith.constant 1 : i32
    %432 = scf.for %arg22 = %c0_i32_255 to %431 step %c1_i32_257 iter_args(%arg23 = %430) -> (vector<16x64xf32>)  : i32 {
      %560 = arith.index_cast %arg22 : i32 to index
      %c0_331 = arith.constant 0 : index
      %561 = vector.load %arg17[%560, %c0_331] : memref<8x64xf32, #tpu.memory_space<vmem>>, vector<1x64xf32>
      %562 = arith.index_cast %arg22 : i32 to index
      %c0_332 = arith.constant 0 : index
      %563 = vector.load %arg18[%562, %c0_332] : memref<8x64xf32, #tpu.memory_space<vmem>>, vector<1x64xf32>
      %564 = arith.index_cast %arg22 : i32 to index
      %c0_333 = arith.constant 0 : index
      %565 = vector.load %arg19[%564, %c0_333] : memref<8x16xf32, #tpu.memory_space<vmem>>, vector<1x16xf32>
      %566 = tpu.transpose %565, [1, 0] : vector<1x16xf32> -> vector<16x1xf32>
      %567 = arith.index_cast %arg22 : i32 to index
      %c0_334 = arith.constant 0 : index
      %568 = vector.load %arg20[%567, %c0_334] : memref<8x16xf32, #tpu.memory_space<vmem>>, vector<1x16xf32>
      %569 = vector.broadcast %561 : vector<1x64xf32> to vector<16x64xf32>
      %570 = arith.mulf %5, %569 : vector<16x64xf32>
      %571 = math.exp %570 : vector<16x64xf32>
      %572 = arith.mulf %571, %arg23 : vector<16x64xf32>
      %573 = vector.broadcast %566 : vector<16x1xf32> to vector<16x64xf32>
      %574 = vector.broadcast %563 : vector<1x64xf32> to vector<16x64xf32>
      %575 = arith.mulf %573, %574 : vector<16x64xf32>
      %576 = arith.addf %572, %575 : vector<16x64xf32>
      %cst_335 = arith.constant dense<0.000000e+00> : vector<1x64xf32>
      %577 = tpu.matmul %568, %576, %cst_335 {dimension_numbers = #tpu.dot_dimension_numbers<[1], [0], [0], [1], [0, 0, 1, 1], [], []>} : vector<1x16xf32>, vector<16x64xf32>, vector<1x64xf32> -> vector<1x64xf32>
      %578 = arith.index_cast %arg22 : i32 to index
      %c0_336 = arith.constant 0 : index
      %579 = vector.load %arg21[%578, %c0_336] : memref<8x64xf32, #tpu.memory_space<vmem>>, vector<1x64xf32>
      tpu.vector_store %arg21[%578, %c0_336], %577 {strides = array<i32>} : memref<8x64xf32, #tpu.memory_space<vmem>>, vector<1x64xf32>,
      scf.yield %576 : vector<16x64xf32>
    }
    %c8_i32_258 = arith.constant 8 : i32
    %c0_259 = arith.constant 0 : index
    %c0_260 = arith.constant 0 : index
    %433 = vector.load %arg21[%c0_259, %c0_260] : memref<8x64xf32, #tpu.memory_space<vmem>>, vector<8x64xf32>
    %434 = arith.mulf %17, %403 : vector<8x64xf32>
    %435 = arith.addf %433, %434 : vector<8x64xf32>
    %cst_261 = arith.constant 0.000000e+00 : f32
    %436 = vector.broadcast %cst_261 : f32 to vector<8x64xf32>
    %437 = arith.subf %436, %382 : vector<8x64xf32>
    %438 = math.exp %437 : vector<8x64xf32>
    %cst_262 = arith.constant 1.000000e+00 : f32
    %439 = vector.broadcast %cst_262 : f32 to vector<8x64xf32>
    %440 = arith.addf %439, %438 : vector<8x64xf32>
    %cst_263 = arith.constant 1.000000e+00 : f32
    %441 = vector.broadcast %cst_263 : f32 to vector<8x64xf32>
    %442 = arith.divf %441, %440 : vector<8x64xf32>
    %443 = arith.mulf %382, %442 : vector<8x64xf32>
    %444 = arith.mulf %435, %443 : vector<8x64xf32>
    %445 = arith.truncf %444 : vector<8x64xf32> to vector<8x64xbf16>
    %c0_264 = arith.constant 0 : index
    %c0_265 = arith.constant 0 : index
    %446 = vector.load %arg12[%c0_264, %c0_265] : memref<64x32xbf16, #tpu.memory_space<vmem>>, vector<64x32xbf16>
    %cst_266 = arith.constant dense<0.000000e+00> : vector<8x32xf32>
    %447 = tpu.matmul %445, %446, %cst_266 {dimension_numbers = #tpu.dot_dimension_numbers<[1], [0], [0], [1], [0, 0, 1, 1], [], []>} : vector<8x64xbf16>, vector<64x32xbf16>, vector<8x32xf32> -> vector<8x32xf32>
    %cst_267 = arith.constant 2.000000e+00 : f32
    %448 = vector.broadcast %cst_267 : f32 to vector<8x32xf32>
    %449 = arith.mulf %448, %366 : vector<8x32xf32>
    %450 = arith.addf %447, %449 : vector<8x32xf32>
    %451 = arith.mulf %450, %450 : vector<8x32xf32>
    %cst_268 = arith.constant dense<0.000000e+00> : vector<8xf32>
    %452 = vector.multi_reduction <add>, %451, %cst_268 [1] : vector<8x32xf32> to vector<8xf32>
    %453 = vector.shape_cast %452 : vector<8xf32> to vector<8x1xf32>
    %cst_269 = arith.constant 3.200000e+01 : f32
    %454 = vector.broadcast %cst_269 : f32 to vector<8x1xf32>
    %455 = arith.divf %453, %454 : vector<8x1xf32>
    %cst_270 = arith.constant 9.99999974E-6 : f32
    %456 = vector.broadcast %cst_270 : f32 to vector<8x1xf32>
    %457 = arith.addf %455, %456 : vector<8x1xf32>
    %458 = math.rsqrt %457 : vector<8x1xf32>
    %459 = vector.broadcast %458 : vector<8x1xf32> to vector<8x32xf32>
    %460 = arith.mulf %450, %459 : vector<8x32xf32>
    %461 = arith.mulf %460, %8 : vector<8x32xf32>
    %462 = arith.truncf %461 : vector<8x32xf32> to vector<8x32xbf16>
    %c0_271 = arith.constant 0 : index
    %c0_272 = arith.constant 0 : index
    %463 = vector.load %arg3[%c0_271, %c0_272] : memref<32x64xbf16, #tpu.memory_space<vmem>>, vector<32x64xbf16>
    %cst_273 = arith.constant dense<0.000000e+00> : vector<8x64xf32>
    %464 = tpu.matmul %462, %463, %cst_273 {dimension_numbers = #tpu.dot_dimension_numbers<[1], [0], [0], [1], [0, 0, 1, 1], [], []>} : vector<8x32xbf16>, vector<32x64xbf16>, vector<8x64xf32> -> vector<8x64xf32>
    %c0_274 = arith.constant 0 : index
    %c0_275 = arith.constant 0 : index
    %465 = vector.load %arg4[%c0_274, %c0_275] : memref<32x64xbf16, #tpu.memory_space<vmem>>, vector<32x64xbf16>
    %cst_276 = arith.constant dense<0.000000e+00> : vector<8x64xf32>
    %466 = tpu.matmul %462, %465, %cst_276 {dimension_numbers = #tpu.dot_dimension_numbers<[1], [0], [0], [1], [0, 0, 1, 1], [], []>} : vector<8x32xbf16>, vector<32x64xbf16>, vector<8x64xf32> -> vector<8x64xf32>
    %467 = tpu.concatenate %30, %464 in 0 : vector<3x64xf32>, vector<8x64xf32> -> vector<11x64xf32>
    %468 = vector.extract_strided_slice %467 {offsets = [0, 0], sizes = [8, 64], strides = [1, 1]} : vector<11x64xf32> to vector<8x64xf32>
    %469 = arith.mulf %468, %20 : vector<8x64xf32>
    %470 = arith.addf %11, %469 : vector<8x64xf32>
    %471 = vector.extract_strided_slice %467 {offsets = [1, 0], sizes = [8, 64], strides = [1, 1]} : vector<11x64xf32> to vector<8x64xf32>
    %472 = arith.mulf %471, %23 : vector<8x64xf32>
    %473 = arith.addf %470, %472 : vector<8x64xf32>
    %474 = vector.extract_strided_slice %467 {offsets = [2, 0], sizes = [8, 64], strides = [1, 1]} : vector<11x64xf32> to vector<8x64xf32>
    %475 = arith.mulf %474, %26 : vector<8x64xf32>
    %476 = arith.addf %473, %475 : vector<8x64xf32>
    %477 = vector.extract_strided_slice %467 {offsets = [3, 0], sizes = [8, 64], strides = [1, 1]} : vector<11x64xf32> to vector<8x64xf32>
    %478 = arith.mulf %477, %29 : vector<8x64xf32>
    %479 = arith.addf %476, %478 : vector<8x64xf32>
    %cst_277 = arith.constant 0.000000e+00 : f32
    %480 = vector.broadcast %cst_277 : f32 to vector<8x64xf32>
    %481 = arith.subf %480, %479 : vector<8x64xf32>
    %482 = math.exp %481 : vector<8x64xf32>
    %cst_278 = arith.constant 1.000000e+00 : f32
    %483 = vector.broadcast %cst_278 : f32 to vector<8x64xf32>
    %484 = arith.addf %483, %482 : vector<8x64xf32>
    %cst_279 = arith.constant 1.000000e+00 : f32
    %485 = vector.broadcast %cst_279 : f32 to vector<8x64xf32>
    %486 = arith.divf %485, %484 : vector<8x64xf32>
    %487 = arith.mulf %479, %486 : vector<8x64xf32>
    %488 = arith.truncf %487 : vector<8x64xf32> to vector<8x64xbf16>
    %c0_280 = arith.constant 0 : index
    %c0_281 = arith.constant 0 : index
    %489 = vector.load %arg7[%c0_280, %c0_281] : memref<64x40xbf16, #tpu.memory_space<vmem>>, vector<64x40xbf16>
    %cst_282 = arith.constant dense<0.000000e+00> : vector<8x40xf32>
    %490 = tpu.matmul %488, %489, %cst_282 {dimension_numbers = #tpu.dot_dimension_numbers<[1], [0], [0], [1], [0, 0, 1, 1], [], []>} : vector<8x64xbf16>, vector<64x40xbf16>, vector<8x40xf32> -> vector<8x40xf32>
    %c0_283 = arith.constant 0 : index
    %c0_284 = arith.constant 0 : index
    %491 = vector.load %arg16[%c0_283, %c0_284] : memref<8x40xf32, #tpu.memory_space<vmem>>, vector<8x40xf32>
    tpu.vector_store %arg16[%c0_283, %c0_284], %490 {strides = array<i32>} : memref<8x40xf32, #tpu.memory_space<vmem>>, vector<8x40xf32>,
    %c0_285 = arith.constant 0 : index
    %c0_286 = arith.constant 0 : index
    %492 = vector.load %arg16[%c0_285, %c0_286] : memref<8x40xf32, #tpu.memory_space<vmem>>, vector<8x8xf32>
    %c0_287 = arith.constant 0 : index
    %c8_288 = arith.constant 8 : index
    %493 = vector.load %arg16[%c0_287, %c8_288] : memref<8x40xf32, #tpu.memory_space<vmem>>, vector<8x16xf32>
    %c0_289 = arith.constant 0 : index
    %c0_290 = arith.constant 0 : index
    %494 = vector.load %arg19[%c0_289, %c0_290] : memref<8x16xf32, #tpu.memory_space<vmem>>, vector<8x16xf32>
    tpu.vector_store %arg19[%c0_289, %c0_290], %493 {strides = array<i32>} : memref<8x16xf32, #tpu.memory_space<vmem>>, vector<8x16xf32>,
    %c0_291 = arith.constant 0 : index
    %c24_292 = arith.constant 24 : index
    %495 = vector.load %arg16[%c0_291, %c24_292] : memref<8x40xf32, #tpu.memory_space<vmem>>, vector<8x16xf32>
    %c0_293 = arith.constant 0 : index
    %c0_294 = arith.constant 0 : index
    %496 = vector.load %arg20[%c0_293, %c0_294] : memref<8x16xf32, #tpu.memory_space<vmem>>, vector<8x16xf32>
    tpu.vector_store %arg20[%c0_293, %c0_294], %495 {strides = array<i32>} : memref<8x16xf32, #tpu.memory_space<vmem>>, vector<8x16xf32>,
    %497 = arith.truncf %492 : vector<8x8xf32> to vector<8x8xbf16>
    %c0_295 = arith.constant 0 : index
    %c0_296 = arith.constant 0 : index
    %498 = vector.load %arg8[%c0_295, %c0_296] : memref<8x64xbf16, #tpu.memory_space<vmem>>, vector<8x64xbf16>
    %cst_297 = arith.constant dense<0.000000e+00> : vector<8x64xf32>
    %499 = tpu.matmul %497, %498, %cst_297 {dimension_numbers = #tpu.dot_dimension_numbers<[1], [0], [0], [1], [0, 0, 1, 1], [], []>} : vector<8x8xbf16>, vector<8x64xbf16>, vector<8x64xf32> -> vector<8x64xf32>
    %500 = arith.addf %499, %14 : vector<8x64xf32>
    %cst_298 = arith.constant 0.000000e+00 : f32
    %501 = vector.broadcast %cst_298 : f32 to vector<8x64xf32>
    %502 = arith.maximumf %500, %501 : vector<8x64xf32>
    %503 = math.absf %500 : vector<8x64xf32>
    %cst_299 = arith.constant 0.000000e+00 : f32
    %504 = vector.broadcast %cst_299 : f32 to vector<8x64xf32>
    %505 = arith.subf %504, %503 : vector<8x64xf32>
    %506 = math.exp %505 : vector<8x64xf32>
    %cst_300 = arith.constant 1.000000e+00 : f32
    %507 = vector.broadcast %cst_300 : f32 to vector<8x64xf32>
    %508 = arith.addf %507, %506 : vector<8x64xf32>
    %509 = math.log %508 : vector<8x64xf32>
    %510 = arith.addf %502, %509 : vector<8x64xf32>
    %c0_301 = arith.constant 0 : index
    %c0_302 = arith.constant 0 : index
    %511 = vector.load %arg17[%c0_301, %c0_302] : memref<8x64xf32, #tpu.memory_space<vmem>>, vector<8x64xf32>
    tpu.vector_store %arg17[%c0_301, %c0_302], %510 {strides = array<i32>} : memref<8x64xf32, #tpu.memory_space<vmem>>, vector<8x64xf32>,
    %512 = arith.mulf %510, %487 : vector<8x64xf32>
    %c0_303 = arith.constant 0 : index
    %c0_304 = arith.constant 0 : index
    %513 = vector.load %arg18[%c0_303, %c0_304] : memref<8x64xf32, #tpu.memory_space<vmem>>, vector<8x64xf32>
    tpu.vector_store %arg18[%c0_303, %c0_304], %512 {strides = array<i32>} : memref<8x64xf32, #tpu.memory_space<vmem>>, vector<8x64xf32>,
    %cst_305 = arith.constant 0.000000e+00 : f32
    %514 = vector.broadcast %cst_305 : f32 to vector<16x64xf32>
    %c0_i32_306 = arith.constant 0 : i32
    %c8_i32_307 = arith.constant 8 : i32
    %515 = arith.addi %c0_i32_306, %c8_i32_307 : i32
    %c1_i32_308 = arith.constant 1 : i32
    %516 = scf.for %arg22 = %c0_i32_306 to %515 step %c1_i32_308 iter_args(%arg23 = %514) -> (vector<16x64xf32>)  : i32 {
      %560 = arith.index_cast %arg22 : i32 to index
      %c0_331 = arith.constant 0 : index
      %561 = vector.load %arg17[%560, %c0_331] : memref<8x64xf32, #tpu.memory_space<vmem>>, vector<1x64xf32>
      %562 = arith.index_cast %arg22 : i32 to index
      %c0_332 = arith.constant 0 : index
      %563 = vector.load %arg18[%562, %c0_332] : memref<8x64xf32, #tpu.memory_space<vmem>>, vector<1x64xf32>
      %564 = arith.index_cast %arg22 : i32 to index
      %c0_333 = arith.constant 0 : index
      %565 = vector.load %arg19[%564, %c0_333] : memref<8x16xf32, #tpu.memory_space<vmem>>, vector<1x16xf32>
      %566 = tpu.transpose %565, [1, 0] : vector<1x16xf32> -> vector<16x1xf32>
      %567 = arith.index_cast %arg22 : i32 to index
      %c0_334 = arith.constant 0 : index
      %568 = vector.load %arg20[%567, %c0_334] : memref<8x16xf32, #tpu.memory_space<vmem>>, vector<1x16xf32>
      %569 = vector.broadcast %561 : vector<1x64xf32> to vector<16x64xf32>
      %570 = arith.mulf %5, %569 : vector<16x64xf32>
      %571 = math.exp %570 : vector<16x64xf32>
      %572 = arith.mulf %571, %arg23 : vector<16x64xf32>
      %573 = vector.broadcast %566 : vector<16x1xf32> to vector<16x64xf32>
      %574 = vector.broadcast %563 : vector<1x64xf32> to vector<16x64xf32>
      %575 = arith.mulf %573, %574 : vector<16x64xf32>
      %576 = arith.addf %572, %575 : vector<16x64xf32>
      %cst_335 = arith.constant dense<0.000000e+00> : vector<1x64xf32>
      %577 = tpu.matmul %568, %576, %cst_335 {dimension_numbers = #tpu.dot_dimension_numbers<[1], [0], [0], [1], [0, 0, 1, 1], [], []>} : vector<1x16xf32>, vector<16x64xf32>, vector<1x64xf32> -> vector<1x64xf32>
      %578 = arith.index_cast %arg22 : i32 to index
      %c0_336 = arith.constant 0 : index
      %579 = vector.load %arg21[%578, %c0_336] : memref<8x64xf32, #tpu.memory_space<vmem>>, vector<1x64xf32>
      tpu.vector_store %arg21[%578, %c0_336], %577 {strides = array<i32>} : memref<8x64xf32, #tpu.memory_space<vmem>>, vector<1x64xf32>,
      scf.yield %576 : vector<16x64xf32>
    }
    %c8_i32_309 = arith.constant 8 : i32
    %c0_310 = arith.constant 0 : index
    %c0_311 = arith.constant 0 : index
    %517 = vector.load %arg21[%c0_310, %c0_311] : memref<8x64xf32, #tpu.memory_space<vmem>>, vector<8x64xf32>
    %518 = arith.mulf %17, %487 : vector<8x64xf32>
    %519 = arith.addf %517, %518 : vector<8x64xf32>
    %cst_312 = arith.constant 0.000000e+00 : f32
    %520 = vector.broadcast %cst_312 : f32 to vector<8x64xf32>
    %521 = arith.subf %520, %466 : vector<8x64xf32>
    %522 = math.exp %521 : vector<8x64xf32>
    %cst_313 = arith.constant 1.000000e+00 : f32
    %523 = vector.broadcast %cst_313 : f32 to vector<8x64xf32>
    %524 = arith.addf %523, %522 : vector<8x64xf32>
    %cst_314 = arith.constant 1.000000e+00 : f32
    %525 = vector.broadcast %cst_314 : f32 to vector<8x64xf32>
    %526 = arith.divf %525, %524 : vector<8x64xf32>
    %527 = arith.mulf %466, %526 : vector<8x64xf32>
    %528 = arith.mulf %519, %527 : vector<8x64xf32>
    %529 = arith.truncf %528 : vector<8x64xf32> to vector<8x64xbf16>
    %c0_315 = arith.constant 0 : index
    %c0_316 = arith.constant 0 : index
    %530 = vector.load %arg12[%c0_315, %c0_316] : memref<64x32xbf16, #tpu.memory_space<vmem>>, vector<64x32xbf16>
    %cst_317 = arith.constant dense<0.000000e+00> : vector<8x32xf32>
    %531 = tpu.matmul %529, %530, %cst_317 {dimension_numbers = #tpu.dot_dimension_numbers<[1], [0], [0], [1], [0, 0, 1, 1], [], []>} : vector<8x64xbf16>, vector<64x32xbf16>, vector<8x32xf32> -> vector<8x32xf32>
    %cst_318 = arith.constant 2.000000e+00 : f32
    %532 = vector.broadcast %cst_318 : f32 to vector<8x32xf32>
    %533 = arith.mulf %532, %450 : vector<8x32xf32>
    %534 = arith.addf %531, %533 : vector<8x32xf32>
    %c0_319 = arith.constant 0 : index
    %c0_320 = arith.constant 0 : index
    %535 = vector.load %arg13[%c0_319, %c0_320] : memref<1x32xf32, #tpu.memory_space<vmem>>, vector<1x32xf32>
    %c0_321 = arith.constant 0 : index
    %c0_322 = arith.constant 0 : index
    %536 = vector.load %arg14[%c0_321, %c0_322] : memref<1x32xf32, #tpu.memory_space<vmem>>, vector<1x32xf32>
    %cst_323 = arith.constant dense<0.000000e+00> : vector<8xf32>
    %537 = vector.multi_reduction <add>, %534, %cst_323 [1] : vector<8x32xf32> to vector<8xf32>
    %538 = vector.shape_cast %537 : vector<8xf32> to vector<8x1xf32>
    %cst_324 = arith.constant 3.200000e+01 : f32
    %539 = vector.broadcast %cst_324 : f32 to vector<8x1xf32>
    %540 = arith.divf %538, %539 : vector<8x1xf32>
    %541 = vector.broadcast %540 : vector<8x1xf32> to vector<8x32xf32>
    %542 = arith.subf %534, %541 : vector<8x32xf32>
    %543 = arith.mulf %542, %542 : vector<8x32xf32>
    %cst_325 = arith.constant dense<0.000000e+00> : vector<8xf32>
    %544 = vector.multi_reduction <add>, %543, %cst_325 [1] : vector<8x32xf32> to vector<8xf32>
    %545 = vector.shape_cast %544 : vector<8xf32> to vector<8x1xf32>
    %cst_326 = arith.constant 3.200000e+01 : f32
    %546 = vector.broadcast %cst_326 : f32 to vector<8x1xf32>
    %547 = arith.divf %545, %546 : vector<8x1xf32>
    %cst_327 = arith.constant 9.99999974E-6 : f32
    %548 = vector.broadcast %cst_327 : f32 to vector<8x1xf32>
    %549 = arith.addf %547, %548 : vector<8x1xf32>
    %550 = math.rsqrt %549 : vector<8x1xf32>
    %551 = vector.broadcast %550 : vector<8x1xf32> to vector<8x32xf32>
    %552 = arith.mulf %542, %551 : vector<8x32xf32>
    %553 = vector.broadcast %535 : vector<1x32xf32> to vector<8x32xf32>
    %554 = arith.mulf %552, %553 : vector<8x32xf32>
    %555 = vector.broadcast %536 : vector<1x32xf32> to vector<8x32xf32>
    %556 = arith.addf %554, %555 : vector<8x32xf32>
    %c0_328 = arith.constant 0 : index
    %c0_329 = arith.constant 0 : index
    %c0_330 = arith.constant 0 : index
    %557 = vector.load %arg15[%c0_328, %c0_329, %c0_330] : memref<1x8x32xf32, #tpu.memory_space<vmem>>, vector<1x8x32xf32>
    %558 = vector.shape_cast %557 : vector<1x8x32xf32> to vector<8x32xf32>
    %559 = vector.shape_cast %556 : vector<8x32xf32> to vector<1x8x32xf32>
    tpu.vector_store %arg15[%c0_328, %c0_329, %c0_330], %559 {strides = array<i32>} : memref<1x8x32xf32, #tpu.memory_space<vmem>>, vector<1x8x32xf32>,
    return
  }
  func.func @transform_0(%arg0: i32) -> (i32, i32, i32) {
    %c0_i32 = arith.constant 0 : i32
    %c0_i32_0 = arith.constant 0 : i32
    %c0_i32_1 = arith.constant 0 : i32
    return %arg0, %c0_i32, %c0_i32_0 : i32, i32, i32
  }
  func.func @transform_1(%arg0: i32) -> (i32, i32) {
    %c0_i32 = arith.constant 0 : i32
    %c0_i32_0 = arith.constant 0 : i32
    %c0_i32_1 = arith.constant 0 : i32
    return %c0_i32, %c0_i32_0 : i32, i32
  }
  func.func @transform_2(%arg0: i32) -> (i32, i32) {
    %c0_i32 = arith.constant 0 : i32
    %c0_i32_0 = arith.constant 0 : i32
    %c0_i32_1 = arith.constant 0 : i32
    return %c0_i32, %c0_i32_0 : i32, i32
  }
  func.func @transform_3(%arg0: i32) -> (i32, i32) {
    %c0_i32 = arith.constant 0 : i32
    %c0_i32_0 = arith.constant 0 : i32
    %c0_i32_1 = arith.constant 0 : i32
    return %c0_i32, %c0_i32_0 : i32, i32
  }
  func.func @transform_4(%arg0: i32) -> (i32, i32) {
    %c0_i32 = arith.constant 0 : i32
    %c0_i32_0 = arith.constant 0 : i32
    %c0_i32_1 = arith.constant 0 : i32
    return %c0_i32, %c0_i32_0 : i32, i32
  }
  func.func @transform_5(%arg0: i32) -> (i32, i32) {
    %c0_i32 = arith.constant 0 : i32
    %c0_i32_0 = arith.constant 0 : i32
    %c0_i32_1 = arith.constant 0 : i32
    return %c0_i32, %c0_i32_0 : i32, i32
  }
  func.func @transform_6(%arg0: i32) -> (i32, i32) {
    %c0_i32 = arith.constant 0 : i32
    %c0_i32_0 = arith.constant 0 : i32
    %c0_i32_1 = arith.constant 0 : i32
    return %c0_i32, %c0_i32_0 : i32, i32
  }
  func.func @transform_7(%arg0: i32) -> (i32, i32) {
    %c0_i32 = arith.constant 0 : i32
    %c0_i32_0 = arith.constant 0 : i32
    %c0_i32_1 = arith.constant 0 : i32
    return %c0_i32, %c0_i32_0 : i32, i32
  }
  func.func @transform_8(%arg0: i32) -> (i32, i32) {
    %c0_i32 = arith.constant 0 : i32
    %c0_i32_0 = arith.constant 0 : i32
    %c0_i32_1 = arith.constant 0 : i32
    return %c0_i32, %c0_i32_0 : i32, i32
  }
  func.func @transform_9(%arg0: i32) -> (i32, i32) {
    %c0_i32 = arith.constant 0 : i32
    %c0_i32_0 = arith.constant 0 : i32
    %c0_i32_1 = arith.constant 0 : i32
    return %c0_i32, %c0_i32_0 : i32, i32
  }
  func.func @transform_10(%arg0: i32) -> (i32, i32) {
    %c0_i32 = arith.constant 0 : i32
    %c0_i32_0 = arith.constant 0 : i32
    %c0_i32_1 = arith.constant 0 : i32
    return %c0_i32, %c0_i32_0 : i32, i32
  }
  func.func @transform_11(%arg0: i32) -> (i32, i32) {
    %c0_i32 = arith.constant 0 : i32
    %c0_i32_0 = arith.constant 0 : i32
    %c0_i32_1 = arith.constant 0 : i32
    return %c0_i32, %c0_i32_0 : i32, i32
  }
  func.func @transform_12(%arg0: i32) -> (i32, i32) {
    %c0_i32 = arith.constant 0 : i32
    %c0_i32_0 = arith.constant 0 : i32
    %c0_i32_1 = arith.constant 0 : i32
    return %c0_i32, %c0_i32_0 : i32, i32
  }
  func.func @transform_13(%arg0: i32) -> (i32, i32) {
    %c0_i32 = arith.constant 0 : i32
    %c0_i32_0 = arith.constant 0 : i32
    %c0_i32_1 = arith.constant 0 : i32
    return %c0_i32, %c0_i32_0 : i32, i32
  }
  func.func @transform_14(%arg0: i32) -> (i32, i32, i32) {
    %c0_i32 = arith.constant 0 : i32
    %c0_i32_0 = arith.constant 0 : i32
    %c0_i32_1 = arith.constant 0 : i32
    return %arg0, %c0_i32, %c0_i32_0 : i32, i32, i32
  }
}

module attributes {stable_mosaic.version = 11 : i64} {
  func.func @_shared_kernel(%arg0: i32, %arg1: memref<1x8x32xf32, #tpu.memory_space<vmem>>, %arg2: memref<1x8x32xf32, #tpu.memory_space<vmem>>, %arg3: memref<8x8xbf16, #tpu.memory_space<vmem>>, %arg4: memref<8x8xbf16, #tpu.memory_space<vmem>>, %arg5: memref<8x1xf32, #tpu.memory_space<vmem>>, %arg6: memref<32x128xbf16, #tpu.memory_space<vmem>>, %arg7: memref<32x64xbf16, #tpu.memory_space<vmem>>, %arg8: memref<32x64xbf16, #tpu.memory_space<vmem>>, %arg9: memref<128x32xbf16, #tpu.memory_space<vmem>>, %arg10: memref<8x1x16xf32, #tpu.memory_space<vmem>>, %arg11: memref<4x1x16xf32, #tpu.memory_space<vmem>>, %arg12: memref<1x32xf32, #tpu.memory_space<vmem>>, %arg13: memref<1x32xf32, #tpu.memory_space<vmem>>, %arg14: memref<32x128xbf16, #tpu.memory_space<vmem>>, %arg15: memref<1x128xf32, #tpu.memory_space<vmem>>, %arg16: memref<1x128xf32, #tpu.memory_space<vmem>>, %arg17: memref<1x128xf32, #tpu.memory_space<vmem>>, %arg18: memref<128x32xbf16, #tpu.memory_space<vmem>>, %arg19: memref<1x32xf32, #tpu.memory_space<vmem>>, %arg20: memref<32x32xbf16, #tpu.memory_space<vmem>>, %arg21: memref<1x32xf32, #tpu.memory_space<vmem>>, %arg22: memref<1x8x32xf32, #tpu.memory_space<vmem>>, %arg23: memref<8x128xf32, #tpu.memory_space<vmem>>, %arg24: memref<8x64xf32, #tpu.memory_space<vmem>>, %arg25: memref<8x64xf32, #tpu.memory_space<vmem>>) attributes {dimension_semantics = [#tpu.dimension_semantics<parallel>], iteration_bounds = array<i64: 2>, scalar_prefetch = 0 : i64, scratch_operands = 3 : i64, tpu.core_type = #tpu.core_type<tc>, window_params = [{transform_indices = @transform_0, window_bounds = array<i64: 1, 8, 32>}, {transform_indices = @transform_1, window_bounds = array<i64: 1, 8, 32>}, {pipeline_mode = #tpu.pipeline_mode<synchronous>, transform_indices = @transform_2, window_bounds = array<i64: 8, 8>}, {pipeline_mode = #tpu.pipeline_mode<synchronous>, transform_indices = @transform_3, window_bounds = array<i64: 8, 8>}, {pipeline_mode = #tpu.pipeline_mode<synchronous>, transform_indices = @transform_4, window_bounds = array<i64: 8, 1>}, {pipeline_mode = #tpu.pipeline_mode<synchronous>, transform_indices = @transform_5, window_bounds = array<i64: 32, 128>}, {pipeline_mode = #tpu.pipeline_mode<synchronous>, transform_indices = @transform_6, window_bounds = array<i64: 32, 64>}, {pipeline_mode = #tpu.pipeline_mode<synchronous>, transform_indices = @transform_7, window_bounds = array<i64: 32, 64>}, {pipeline_mode = #tpu.pipeline_mode<synchronous>, transform_indices = @transform_8, window_bounds = array<i64: 128, 32>}, {pipeline_mode = #tpu.pipeline_mode<synchronous>, transform_indices = @transform_9, window_bounds = array<i64: 8, 1, 16>}, {pipeline_mode = #tpu.pipeline_mode<synchronous>, transform_indices = @transform_10, window_bounds = array<i64: 4, 1, 16>}, {pipeline_mode = #tpu.pipeline_mode<synchronous>, transform_indices = @transform_11, window_bounds = array<i64: 1, 32>}, {pipeline_mode = #tpu.pipeline_mode<synchronous>, transform_indices = @transform_12, window_bounds = array<i64: 1, 32>}, {pipeline_mode = #tpu.pipeline_mode<synchronous>, transform_indices = @transform_13, window_bounds = array<i64: 32, 128>}, {pipeline_mode = #tpu.pipeline_mode<synchronous>, transform_indices = @transform_14, window_bounds = array<i64: 1, 128>}, {pipeline_mode = #tpu.pipeline_mode<synchronous>, transform_indices = @transform_15, window_bounds = array<i64: 1, 128>}, {pipeline_mode = #tpu.pipeline_mode<synchronous>, transform_indices = @transform_16, window_bounds = array<i64: 1, 128>}, {pipeline_mode = #tpu.pipeline_mode<synchronous>, transform_indices = @transform_17, window_bounds = array<i64: 128, 32>}, {pipeline_mode = #tpu.pipeline_mode<synchronous>, transform_indices = @transform_18, window_bounds = array<i64: 1, 32>}, {pipeline_mode = #tpu.pipeline_mode<synchronous>, transform_indices = @transform_19, window_bounds = array<i64: 32, 32>}, {pipeline_mode = #tpu.pipeline_mode<synchronous>, transform_indices = @transform_20, window_bounds = array<i64: 1, 32>}, {transform_indices = @transform_21, window_bounds = array<i64: 1, 8, 32>}]} {
    %c0 = arith.constant 0 : index
    %c0_0 = arith.constant 0 : index
    %c0_1 = arith.constant 0 : index
    %0 = vector.load %arg1[%c0, %c0_0, %c0_1] : memref<1x8x32xf32, #tpu.memory_space<vmem>>, vector<1x8x32xf32>
    %1 = vector.shape_cast %0 : vector<1x8x32xf32> to vector<8x32xf32>
    %c0_2 = arith.constant 0 : index
    %c0_3 = arith.constant 0 : index
    %c0_4 = arith.constant 0 : index
    %2 = vector.load %arg2[%c0_2, %c0_3, %c0_4] : memref<1x8x32xf32, #tpu.memory_space<vmem>>, vector<1x8x32xf32>
    %3 = vector.shape_cast %2 : vector<1x8x32xf32> to vector<8x32xf32>
    %c0_5 = arith.constant 0 : index
    %c0_6 = arith.constant 0 : index
    %4 = vector.load %arg3[%c0_5, %c0_6] : memref<8x8xbf16, #tpu.memory_space<vmem>>, vector<8x8xbf16>
    %5 = arith.truncf %1 : vector<8x32xf32> to vector<8x32xbf16>
    %cst = arith.constant dense<0.000000e+00> : vector<8x32xf32>
    %6 = tpu.matmul %4, %5, %cst {dimension_numbers = #tpu.dot_dimension_numbers<[1], [0], [0], [1], [0, 0, 1, 1], [], []>} : vector<8x8xbf16>, vector<8x32xbf16>, vector<8x32xf32> -> vector<8x32xf32>
    %c0_7 = arith.constant 0 : index
    %c0_8 = arith.constant 0 : index
    %7 = vector.load %arg4[%c0_7, %c0_8] : memref<8x8xbf16, #tpu.memory_space<vmem>>, vector<8x8xbf16>
    %8 = arith.truncf %3 : vector<8x32xf32> to vector<8x32xbf16>
    %cst_9 = arith.constant dense<0.000000e+00> : vector<8x32xf32>
    %9 = tpu.matmul %7, %8, %cst_9 {dimension_numbers = #tpu.dot_dimension_numbers<[1], [0], [0], [1], [0, 0, 1, 1], [], []>} : vector<8x8xbf16>, vector<8x32xbf16>, vector<8x32xf32> -> vector<8x32xf32>
    %10 = arith.addf %6, %9 : vector<8x32xf32>
    %c0_10 = arith.constant 0 : index
    %c0_11 = arith.constant 0 : index
    %11 = vector.load %arg5[%c0_10, %c0_11] : memref<8x1xf32, #tpu.memory_space<vmem>>, vector<8x1xf32>
    %12 = vector.broadcast %11 : vector<8x1xf32> to vector<8x32xf32>
    %13 = arith.addf %10, %12 : vector<8x32xf32>
    %14 = arith.truncf %13 : vector<8x32xf32> to vector<8x32xbf16>
    %c0_12 = arith.constant 0 : index
    %c0_13 = arith.constant 0 : index
    %15 = vector.load %arg6[%c0_12, %c0_13] : memref<32x128xbf16, #tpu.memory_space<vmem>>, vector<32x128xbf16>
    %cst_14 = arith.constant dense<0.000000e+00> : vector<8x128xf32>
    %16 = tpu.matmul %14, %15, %cst_14 {dimension_numbers = #tpu.dot_dimension_numbers<[1], [0], [0], [1], [0, 0, 1, 1], [], []>} : vector<8x32xbf16>, vector<32x128xbf16>, vector<8x128xf32> -> vector<8x128xf32>
    %c0_15 = arith.constant 0 : index
    %c0_16 = arith.constant 0 : index
    %17 = vector.load %arg23[%c0_15, %c0_16] : memref<8x128xf32, #tpu.memory_space<vmem>>, vector<8x128xf32>
    tpu.vector_store %arg23[%c0_15, %c0_16], %16 {strides = array<i32>} : memref<8x128xf32, #tpu.memory_space<vmem>>, vector<8x128xf32>,
    %c0_17 = arith.constant 0 : index
    %c0_18 = arith.constant 0 : index
    %18 = vector.load %arg7[%c0_17, %c0_18] : memref<32x64xbf16, #tpu.memory_space<vmem>>, vector<32x64xbf16>
    %cst_19 = arith.constant dense<0.000000e+00> : vector<8x64xf32>
    %19 = tpu.matmul %14, %18, %cst_19 {dimension_numbers = #tpu.dot_dimension_numbers<[1], [0], [0], [1], [0, 0, 1, 1], [], []>} : vector<8x32xbf16>, vector<32x64xbf16>, vector<8x64xf32> -> vector<8x64xf32>
    %c0_20 = arith.constant 0 : index
    %c0_21 = arith.constant 0 : index
    %20 = vector.load %arg24[%c0_20, %c0_21] : memref<8x64xf32, #tpu.memory_space<vmem>>, vector<8x64xf32>
    tpu.vector_store %arg24[%c0_20, %c0_21], %19 {strides = array<i32>} : memref<8x64xf32, #tpu.memory_space<vmem>>, vector<8x64xf32>,
    %c0_22 = arith.constant 0 : index
    %c0_23 = arith.constant 0 : index
    %21 = vector.load %arg8[%c0_22, %c0_23] : memref<32x64xbf16, #tpu.memory_space<vmem>>, vector<32x64xbf16>
    %cst_24 = arith.constant dense<0.000000e+00> : vector<8x64xf32>
    %22 = tpu.matmul %14, %21, %cst_24 {dimension_numbers = #tpu.dot_dimension_numbers<[1], [0], [0], [1], [0, 0, 1, 1], [], []>} : vector<8x32xbf16>, vector<32x64xbf16>, vector<8x64xf32> -> vector<8x64xf32>
    %c0_25 = arith.constant 0 : index
    %c0_26 = arith.constant 0 : index
    %23 = vector.load %arg25[%c0_25, %c0_26] : memref<8x64xf32, #tpu.memory_space<vmem>>, vector<8x64xf32>
    tpu.vector_store %arg25[%c0_25, %c0_26], %22 {strides = array<i32>} : memref<8x64xf32, #tpu.memory_space<vmem>>, vector<8x64xf32>,
    %c0_27 = arith.constant 0 : index
    %c0_28 = arith.constant 0 : index
    %24 = vector.load %arg24[%c0_27, %c0_28] : memref<8x64xf32, #tpu.memory_space<vmem>>, vector<8x16xf32>
    %25 = arith.mulf %24, %24 : vector<8x16xf32>
    %cst_29 = arith.constant dense<0.000000e+00> : vector<8xf32>
    %26 = vector.multi_reduction <add>, %25, %cst_29 [1] : vector<8x16xf32> to vector<8xf32>
    %27 = vector.shape_cast %26 : vector<8xf32> to vector<8x1xf32>
    %cst_30 = arith.constant 9.99999996E-13 : f32
    %28 = vector.broadcast %cst_30 : f32 to vector<8x1xf32>
    %29 = arith.addf %27, %28 : vector<8x1xf32>
    %30 = math.rsqrt %29 : vector<8x1xf32>
    %31 = vector.broadcast %30 : vector<8x1xf32> to vector<8x16xf32>
    %32 = arith.mulf %24, %31 : vector<8x16xf32>
    %c0_31 = arith.constant 0 : index
    %c0_32 = arith.constant 0 : index
    %c0_33 = arith.constant 0 : index
    %33 = vector.load %arg11[%c0_31, %c0_32, %c0_33] : memref<4x1x16xf32, #tpu.memory_space<vmem>>, vector<1x1x16xf32>
    %34 = vector.shape_cast %33 : vector<1x1x16xf32> to vector<1x16xf32>
    %35 = vector.broadcast %34 : vector<1x16xf32> to vector<8x16xf32>
    %36 = arith.mulf %32, %35 : vector<8x16xf32>
    %c0_34 = arith.constant 0 : index
    %c0_35 = arith.constant 0 : index
    %37 = vector.load %arg25[%c0_34, %c0_35] : memref<8x64xf32, #tpu.memory_space<vmem>>, vector<8x16xf32>
    %c0_36 = arith.constant 0 : index
    %c16 = arith.constant 16 : index
    %38 = vector.load %arg24[%c0_36, %c16] : memref<8x64xf32, #tpu.memory_space<vmem>>, vector<8x16xf32>
    %39 = arith.mulf %38, %38 : vector<8x16xf32>
    %cst_37 = arith.constant dense<0.000000e+00> : vector<8xf32>
    %40 = vector.multi_reduction <add>, %39, %cst_37 [1] : vector<8x16xf32> to vector<8xf32>
    %41 = vector.shape_cast %40 : vector<8xf32> to vector<8x1xf32>
    %cst_38 = arith.constant 9.99999996E-13 : f32
    %42 = vector.broadcast %cst_38 : f32 to vector<8x1xf32>
    %43 = arith.addf %41, %42 : vector<8x1xf32>
    %44 = math.rsqrt %43 : vector<8x1xf32>
    %45 = vector.broadcast %44 : vector<8x1xf32> to vector<8x16xf32>
    %46 = arith.mulf %38, %45 : vector<8x16xf32>
    %c1 = arith.constant 1 : index
    %c0_39 = arith.constant 0 : index
    %c0_40 = arith.constant 0 : index
    %47 = vector.load %arg11[%c1, %c0_39, %c0_40] : memref<4x1x16xf32, #tpu.memory_space<vmem>>, vector<1x1x16xf32>
    %48 = vector.shape_cast %47 : vector<1x1x16xf32> to vector<1x16xf32>
    %49 = vector.broadcast %48 : vector<1x16xf32> to vector<8x16xf32>
    %50 = arith.mulf %46, %49 : vector<8x16xf32>
    %c0_41 = arith.constant 0 : index
    %c16_42 = arith.constant 16 : index
    %51 = vector.load %arg25[%c0_41, %c16_42] : memref<8x64xf32, #tpu.memory_space<vmem>>, vector<8x16xf32>
    %c0_43 = arith.constant 0 : index
    %c32 = arith.constant 32 : index
    %52 = vector.load %arg24[%c0_43, %c32] : memref<8x64xf32, #tpu.memory_space<vmem>>, vector<8x16xf32>
    %53 = arith.mulf %52, %52 : vector<8x16xf32>
    %cst_44 = arith.constant dense<0.000000e+00> : vector<8xf32>
    %54 = vector.multi_reduction <add>, %53, %cst_44 [1] : vector<8x16xf32> to vector<8xf32>
    %55 = vector.shape_cast %54 : vector<8xf32> to vector<8x1xf32>
    %cst_45 = arith.constant 9.99999996E-13 : f32
    %56 = vector.broadcast %cst_45 : f32 to vector<8x1xf32>
    %57 = arith.addf %55, %56 : vector<8x1xf32>
    %58 = math.rsqrt %57 : vector<8x1xf32>
    %59 = vector.broadcast %58 : vector<8x1xf32> to vector<8x16xf32>
    %60 = arith.mulf %52, %59 : vector<8x16xf32>
    %c2 = arith.constant 2 : index
    %c0_46 = arith.constant 0 : index
    %c0_47 = arith.constant 0 : index
    %61 = vector.load %arg11[%c2, %c0_46, %c0_47] : memref<4x1x16xf32, #tpu.memory_space<vmem>>, vector<1x1x16xf32>
    %62 = vector.shape_cast %61 : vector<1x1x16xf32> to vector<1x16xf32>
    %63 = vector.broadcast %62 : vector<1x16xf32> to vector<8x16xf32>
    %64 = arith.mulf %60, %63 : vector<8x16xf32>
    %c0_48 = arith.constant 0 : index
    %c32_49 = arith.constant 32 : index
    %65 = vector.load %arg25[%c0_48, %c32_49] : memref<8x64xf32, #tpu.memory_space<vmem>>, vector<8x16xf32>
    %c0_50 = arith.constant 0 : index
    %c48 = arith.constant 48 : index
    %66 = vector.load %arg24[%c0_50, %c48] : memref<8x64xf32, #tpu.memory_space<vmem>>, vector<8x16xf32>
    %67 = arith.mulf %66, %66 : vector<8x16xf32>
    %cst_51 = arith.constant dense<0.000000e+00> : vector<8xf32>
    %68 = vector.multi_reduction <add>, %67, %cst_51 [1] : vector<8x16xf32> to vector<8xf32>
    %69 = vector.shape_cast %68 : vector<8xf32> to vector<8x1xf32>
    %cst_52 = arith.constant 9.99999996E-13 : f32
    %70 = vector.broadcast %cst_52 : f32 to vector<8x1xf32>
    %71 = arith.addf %69, %70 : vector<8x1xf32>
    %72 = math.rsqrt %71 : vector<8x1xf32>
    %73 = vector.broadcast %72 : vector<8x1xf32> to vector<8x16xf32>
    %74 = arith.mulf %66, %73 : vector<8x16xf32>
    %c3 = arith.constant 3 : index
    %c0_53 = arith.constant 0 : index
    %c0_54 = arith.constant 0 : index
    %75 = vector.load %arg11[%c3, %c0_53, %c0_54] : memref<4x1x16xf32, #tpu.memory_space<vmem>>, vector<1x1x16xf32>
    %76 = vector.shape_cast %75 : vector<1x1x16xf32> to vector<1x16xf32>
    %77 = vector.broadcast %76 : vector<1x16xf32> to vector<8x16xf32>
    %78 = arith.mulf %74, %77 : vector<8x16xf32>
    %c0_55 = arith.constant 0 : index
    %c48_56 = arith.constant 48 : index
    %79 = vector.load %arg25[%c0_55, %c48_56] : memref<8x64xf32, #tpu.memory_space<vmem>>, vector<8x16xf32>
    %c0_57 = arith.constant 0 : index
    %c0_58 = arith.constant 0 : index
    %80 = vector.load %arg23[%c0_57, %c0_58] : memref<8x128xf32, #tpu.memory_space<vmem>>, vector<8x16xf32>
    %81 = arith.mulf %80, %80 : vector<8x16xf32>
    %cst_59 = arith.constant dense<0.000000e+00> : vector<8xf32>
    %82 = vector.multi_reduction <add>, %81, %cst_59 [1] : vector<8x16xf32> to vector<8xf32>
    %83 = vector.shape_cast %82 : vector<8xf32> to vector<8x1xf32>
    %cst_60 = arith.constant 9.99999996E-13 : f32
    %84 = vector.broadcast %cst_60 : f32 to vector<8x1xf32>
    %85 = arith.addf %83, %84 : vector<8x1xf32>
    %86 = math.rsqrt %85 : vector<8x1xf32>
    %87 = vector.broadcast %86 : vector<8x1xf32> to vector<8x16xf32>
    %88 = arith.mulf %80, %87 : vector<8x16xf32>
    %c0_61 = arith.constant 0 : index
    %c0_62 = arith.constant 0 : index
    %c0_63 = arith.constant 0 : index
    %89 = vector.load %arg10[%c0_61, %c0_62, %c0_63] : memref<8x1x16xf32, #tpu.memory_space<vmem>>, vector<1x1x16xf32>
    %90 = vector.shape_cast %89 : vector<1x1x16xf32> to vector<1x16xf32>
    %91 = vector.broadcast %90 : vector<1x16xf32> to vector<8x16xf32>
    %92 = arith.mulf %88, %91 : vector<8x16xf32>
    %cst_64 = arith.constant dense<0.000000e+00> : vector<8x8xf32>
    %93 = tpu.matmul %92, %36, %cst_64 {dimension_numbers = #tpu.dot_dimension_numbers<[1], [1], [0], [0], [0, 0, 1, 0], [], []>} : vector<8x16xf32>, vector<8x16xf32>, vector<8x8xf32> -> vector<8x8xf32>
    %cst_65 = arith.constant 1.000000e+01 : f32
    %94 = vector.broadcast %cst_65 : f32 to vector<8x8xf32>
    %95 = arith.mulf %93, %94 : vector<8x8xf32>
    %cst_66 = arith.constant dense<0xFF800000> : vector<8xf32>
    %96 = vector.multi_reduction <maximumf>, %95, %cst_66 [1] : vector<8x8xf32> to vector<8xf32>
    %97 = vector.shape_cast %96 : vector<8xf32> to vector<8x1xf32>
    %98 = vector.broadcast %97 : vector<8x1xf32> to vector<8x8xf32>
    %99 = arith.subf %95, %98 : vector<8x8xf32>
    %100 = math.exp %99 : vector<8x8xf32>
    %cst_67 = arith.constant dense<0.000000e+00> : vector<8xf32>
    %101 = vector.multi_reduction <add>, %100, %cst_67 [1] : vector<8x8xf32> to vector<8xf32>
    %102 = vector.shape_cast %101 : vector<8xf32> to vector<8x1xf32>
    %103 = tpu.reciprocal %102 {approx = true} : vector<8x1xf32> -> vector<8x1xf32>
    %104 = vector.broadcast %103 : vector<8x1xf32> to vector<8x8xf32>
    %105 = arith.mulf %100, %104 : vector<8x8xf32>
    %cst_68 = arith.constant dense<0.000000e+00> : vector<8x16xf32>
    %106 = tpu.matmul %105, %37, %cst_68 {dimension_numbers = #tpu.dot_dimension_numbers<[1], [0], [0], [1], [0, 0, 1, 1], [], []>} : vector<8x8xf32>, vector<8x16xf32>, vector<8x16xf32> -> vector<8x16xf32>
    %c0_69 = arith.constant 0 : index
    %c16_70 = arith.constant 16 : index
    %107 = vector.load %arg23[%c0_69, %c16_70] : memref<8x128xf32, #tpu.memory_space<vmem>>, vector<8x16xf32>
    %108 = arith.mulf %107, %107 : vector<8x16xf32>
    %cst_71 = arith.constant dense<0.000000e+00> : vector<8xf32>
    %109 = vector.multi_reduction <add>, %108, %cst_71 [1] : vector<8x16xf32> to vector<8xf32>
    %110 = vector.shape_cast %109 : vector<8xf32> to vector<8x1xf32>
    %cst_72 = arith.constant 9.99999996E-13 : f32
    %111 = vector.broadcast %cst_72 : f32 to vector<8x1xf32>
    %112 = arith.addf %110, %111 : vector<8x1xf32>
    %113 = math.rsqrt %112 : vector<8x1xf32>
    %114 = vector.broadcast %113 : vector<8x1xf32> to vector<8x16xf32>
    %115 = arith.mulf %107, %114 : vector<8x16xf32>
    %c1_73 = arith.constant 1 : index
    %c0_74 = arith.constant 0 : index
    %c0_75 = arith.constant 0 : index
    %116 = vector.load %arg10[%c1_73, %c0_74, %c0_75] : memref<8x1x16xf32, #tpu.memory_space<vmem>>, vector<1x1x16xf32>
    %117 = vector.shape_cast %116 : vector<1x1x16xf32> to vector<1x16xf32>
    %118 = vector.broadcast %117 : vector<1x16xf32> to vector<8x16xf32>
    %119 = arith.mulf %115, %118 : vector<8x16xf32>
    %cst_76 = arith.constant dense<0.000000e+00> : vector<8x8xf32>
    %120 = tpu.matmul %119, %36, %cst_76 {dimension_numbers = #tpu.dot_dimension_numbers<[1], [1], [0], [0], [0, 0, 1, 0], [], []>} : vector<8x16xf32>, vector<8x16xf32>, vector<8x8xf32> -> vector<8x8xf32>
    %cst_77 = arith.constant 1.000000e+01 : f32
    %121 = vector.broadcast %cst_77 : f32 to vector<8x8xf32>
    %122 = arith.mulf %120, %121 : vector<8x8xf32>
    %cst_78 = arith.constant dense<0xFF800000> : vector<8xf32>
    %123 = vector.multi_reduction <maximumf>, %122, %cst_78 [1] : vector<8x8xf32> to vector<8xf32>
    %124 = vector.shape_cast %123 : vector<8xf32> to vector<8x1xf32>
    %125 = vector.broadcast %124 : vector<8x1xf32> to vector<8x8xf32>
    %126 = arith.subf %122, %125 : vector<8x8xf32>
    %127 = math.exp %126 : vector<8x8xf32>
    %cst_79 = arith.constant dense<0.000000e+00> : vector<8xf32>
    %128 = vector.multi_reduction <add>, %127, %cst_79 [1] : vector<8x8xf32> to vector<8xf32>
    %129 = vector.shape_cast %128 : vector<8xf32> to vector<8x1xf32>
    %130 = tpu.reciprocal %129 {approx = true} : vector<8x1xf32> -> vector<8x1xf32>
    %131 = vector.broadcast %130 : vector<8x1xf32> to vector<8x8xf32>
    %132 = arith.mulf %127, %131 : vector<8x8xf32>
    %cst_80 = arith.constant dense<0.000000e+00> : vector<8x16xf32>
    %133 = tpu.matmul %132, %37, %cst_80 {dimension_numbers = #tpu.dot_dimension_numbers<[1], [0], [0], [1], [0, 0, 1, 1], [], []>} : vector<8x8xf32>, vector<8x16xf32>, vector<8x16xf32> -> vector<8x16xf32>
    %c0_81 = arith.constant 0 : index
    %c32_82 = arith.constant 32 : index
    %134 = vector.load %arg23[%c0_81, %c32_82] : memref<8x128xf32, #tpu.memory_space<vmem>>, vector<8x16xf32>
    %135 = arith.mulf %134, %134 : vector<8x16xf32>
    %cst_83 = arith.constant dense<0.000000e+00> : vector<8xf32>
    %136 = vector.multi_reduction <add>, %135, %cst_83 [1] : vector<8x16xf32> to vector<8xf32>
    %137 = vector.shape_cast %136 : vector<8xf32> to vector<8x1xf32>
    %cst_84 = arith.constant 9.99999996E-13 : f32
    %138 = vector.broadcast %cst_84 : f32 to vector<8x1xf32>
    %139 = arith.addf %137, %138 : vector<8x1xf32>
    %140 = math.rsqrt %139 : vector<8x1xf32>
    %141 = vector.broadcast %140 : vector<8x1xf32> to vector<8x16xf32>
    %142 = arith.mulf %134, %141 : vector<8x16xf32>
    %c2_85 = arith.constant 2 : index
    %c0_86 = arith.constant 0 : index
    %c0_87 = arith.constant 0 : index
    %143 = vector.load %arg10[%c2_85, %c0_86, %c0_87] : memref<8x1x16xf32, #tpu.memory_space<vmem>>, vector<1x1x16xf32>
    %144 = vector.shape_cast %143 : vector<1x1x16xf32> to vector<1x16xf32>
    %145 = vector.broadcast %144 : vector<1x16xf32> to vector<8x16xf32>
    %146 = arith.mulf %142, %145 : vector<8x16xf32>
    %cst_88 = arith.constant dense<0.000000e+00> : vector<8x8xf32>
    %147 = tpu.matmul %146, %50, %cst_88 {dimension_numbers = #tpu.dot_dimension_numbers<[1], [1], [0], [0], [0, 0, 1, 0], [], []>} : vector<8x16xf32>, vector<8x16xf32>, vector<8x8xf32> -> vector<8x8xf32>
    %cst_89 = arith.constant 1.000000e+01 : f32
    %148 = vector.broadcast %cst_89 : f32 to vector<8x8xf32>
    %149 = arith.mulf %147, %148 : vector<8x8xf32>
    %cst_90 = arith.constant dense<0xFF800000> : vector<8xf32>
    %150 = vector.multi_reduction <maximumf>, %149, %cst_90 [1] : vector<8x8xf32> to vector<8xf32>
    %151 = vector.shape_cast %150 : vector<8xf32> to vector<8x1xf32>
    %152 = vector.broadcast %151 : vector<8x1xf32> to vector<8x8xf32>
    %153 = arith.subf %149, %152 : vector<8x8xf32>
    %154 = math.exp %153 : vector<8x8xf32>
    %cst_91 = arith.constant dense<0.000000e+00> : vector<8xf32>
    %155 = vector.multi_reduction <add>, %154, %cst_91 [1] : vector<8x8xf32> to vector<8xf32>
    %156 = vector.shape_cast %155 : vector<8xf32> to vector<8x1xf32>
    %157 = tpu.reciprocal %156 {approx = true} : vector<8x1xf32> -> vector<8x1xf32>
    %158 = vector.broadcast %157 : vector<8x1xf32> to vector<8x8xf32>
    %159 = arith.mulf %154, %158 : vector<8x8xf32>
    %cst_92 = arith.constant dense<0.000000e+00> : vector<8x16xf32>
    %160 = tpu.matmul %159, %51, %cst_92 {dimension_numbers = #tpu.dot_dimension_numbers<[1], [0], [0], [1], [0, 0, 1, 1], [], []>} : vector<8x8xf32>, vector<8x16xf32>, vector<8x16xf32> -> vector<8x16xf32>
    %c0_93 = arith.constant 0 : index
    %c48_94 = arith.constant 48 : index
    %161 = vector.load %arg23[%c0_93, %c48_94] : memref<8x128xf32, #tpu.memory_space<vmem>>, vector<8x16xf32>
    %162 = arith.mulf %161, %161 : vector<8x16xf32>
    %cst_95 = arith.constant dense<0.000000e+00> : vector<8xf32>
    %163 = vector.multi_reduction <add>, %162, %cst_95 [1] : vector<8x16xf32> to vector<8xf32>
    %164 = vector.shape_cast %163 : vector<8xf32> to vector<8x1xf32>
    %cst_96 = arith.constant 9.99999996E-13 : f32
    %165 = vector.broadcast %cst_96 : f32 to vector<8x1xf32>
    %166 = arith.addf %164, %165 : vector<8x1xf32>
    %167 = math.rsqrt %166 : vector<8x1xf32>
    %168 = vector.broadcast %167 : vector<8x1xf32> to vector<8x16xf32>
    %169 = arith.mulf %161, %168 : vector<8x16xf32>
    %c3_97 = arith.constant 3 : index
    %c0_98 = arith.constant 0 : index
    %c0_99 = arith.constant 0 : index
    %170 = vector.load %arg10[%c3_97, %c0_98, %c0_99] : memref<8x1x16xf32, #tpu.memory_space<vmem>>, vector<1x1x16xf32>
    %171 = vector.shape_cast %170 : vector<1x1x16xf32> to vector<1x16xf32>
    %172 = vector.broadcast %171 : vector<1x16xf32> to vector<8x16xf32>
    %173 = arith.mulf %169, %172 : vector<8x16xf32>
    %cst_100 = arith.constant dense<0.000000e+00> : vector<8x8xf32>
    %174 = tpu.matmul %173, %50, %cst_100 {dimension_numbers = #tpu.dot_dimension_numbers<[1], [1], [0], [0], [0, 0, 1, 0], [], []>} : vector<8x16xf32>, vector<8x16xf32>, vector<8x8xf32> -> vector<8x8xf32>
    %cst_101 = arith.constant 1.000000e+01 : f32
    %175 = vector.broadcast %cst_101 : f32 to vector<8x8xf32>
    %176 = arith.mulf %174, %175 : vector<8x8xf32>
    %cst_102 = arith.constant dense<0xFF800000> : vector<8xf32>
    %177 = vector.multi_reduction <maximumf>, %176, %cst_102 [1] : vector<8x8xf32> to vector<8xf32>
    %178 = vector.shape_cast %177 : vector<8xf32> to vector<8x1xf32>
    %179 = vector.broadcast %178 : vector<8x1xf32> to vector<8x8xf32>
    %180 = arith.subf %176, %179 : vector<8x8xf32>
    %181 = math.exp %180 : vector<8x8xf32>
    %cst_103 = arith.constant dense<0.000000e+00> : vector<8xf32>
    %182 = vector.multi_reduction <add>, %181, %cst_103 [1] : vector<8x8xf32> to vector<8xf32>
    %183 = vector.shape_cast %182 : vector<8xf32> to vector<8x1xf32>
    %184 = tpu.reciprocal %183 {approx = true} : vector<8x1xf32> -> vector<8x1xf32>
    %185 = vector.broadcast %184 : vector<8x1xf32> to vector<8x8xf32>
    %186 = arith.mulf %181, %185 : vector<8x8xf32>
    %cst_104 = arith.constant dense<0.000000e+00> : vector<8x16xf32>
    %187 = tpu.matmul %186, %51, %cst_104 {dimension_numbers = #tpu.dot_dimension_numbers<[1], [0], [0], [1], [0, 0, 1, 1], [], []>} : vector<8x8xf32>, vector<8x16xf32>, vector<8x16xf32> -> vector<8x16xf32>
    %c0_105 = arith.constant 0 : index
    %c64 = arith.constant 64 : index
    %188 = vector.load %arg23[%c0_105, %c64] : memref<8x128xf32, #tpu.memory_space<vmem>>, vector<8x16xf32>
    %189 = arith.mulf %188, %188 : vector<8x16xf32>
    %cst_106 = arith.constant dense<0.000000e+00> : vector<8xf32>
    %190 = vector.multi_reduction <add>, %189, %cst_106 [1] : vector<8x16xf32> to vector<8xf32>
    %191 = vector.shape_cast %190 : vector<8xf32> to vector<8x1xf32>
    %cst_107 = arith.constant 9.99999996E-13 : f32
    %192 = vector.broadcast %cst_107 : f32 to vector<8x1xf32>
    %193 = arith.addf %191, %192 : vector<8x1xf32>
    %194 = math.rsqrt %193 : vector<8x1xf32>
    %195 = vector.broadcast %194 : vector<8x1xf32> to vector<8x16xf32>
    %196 = arith.mulf %188, %195 : vector<8x16xf32>
    %c4 = arith.constant 4 : index
    %c0_108 = arith.constant 0 : index
    %c0_109 = arith.constant 0 : index
    %197 = vector.load %arg10[%c4, %c0_108, %c0_109] : memref<8x1x16xf32, #tpu.memory_space<vmem>>, vector<1x1x16xf32>
    %198 = vector.shape_cast %197 : vector<1x1x16xf32> to vector<1x16xf32>
    %199 = vector.broadcast %198 : vector<1x16xf32> to vector<8x16xf32>
    %200 = arith.mulf %196, %199 : vector<8x16xf32>
    %cst_110 = arith.constant dense<0.000000e+00> : vector<8x8xf32>
    %201 = tpu.matmul %200, %64, %cst_110 {dimension_numbers = #tpu.dot_dimension_numbers<[1], [1], [0], [0], [0, 0, 1, 0], [], []>} : vector<8x16xf32>, vector<8x16xf32>, vector<8x8xf32> -> vector<8x8xf32>
    %cst_111 = arith.constant 1.000000e+01 : f32
    %202 = vector.broadcast %cst_111 : f32 to vector<8x8xf32>
    %203 = arith.mulf %201, %202 : vector<8x8xf32>
    %cst_112 = arith.constant dense<0xFF800000> : vector<8xf32>
    %204 = vector.multi_reduction <maximumf>, %203, %cst_112 [1] : vector<8x8xf32> to vector<8xf32>
    %205 = vector.shape_cast %204 : vector<8xf32> to vector<8x1xf32>
    %206 = vector.broadcast %205 : vector<8x1xf32> to vector<8x8xf32>
    %207 = arith.subf %203, %206 : vector<8x8xf32>
    %208 = math.exp %207 : vector<8x8xf32>
    %cst_113 = arith.constant dense<0.000000e+00> : vector<8xf32>
    %209 = vector.multi_reduction <add>, %208, %cst_113 [1] : vector<8x8xf32> to vector<8xf32>
    %210 = vector.shape_cast %209 : vector<8xf32> to vector<8x1xf32>
    %211 = tpu.reciprocal %210 {approx = true} : vector<8x1xf32> -> vector<8x1xf32>
    %212 = vector.broadcast %211 : vector<8x1xf32> to vector<8x8xf32>
    %213 = arith.mulf %208, %212 : vector<8x8xf32>
    %cst_114 = arith.constant dense<0.000000e+00> : vector<8x16xf32>
    %214 = tpu.matmul %213, %65, %cst_114 {dimension_numbers = #tpu.dot_dimension_numbers<[1], [0], [0], [1], [0, 0, 1, 1], [], []>} : vector<8x8xf32>, vector<8x16xf32>, vector<8x16xf32> -> vector<8x16xf32>
    %c0_115 = arith.constant 0 : index
    %c80 = arith.constant 80 : index
    %215 = vector.load %arg23[%c0_115, %c80] : memref<8x128xf32, #tpu.memory_space<vmem>>, vector<8x16xf32>
    %216 = arith.mulf %215, %215 : vector<8x16xf32>
    %cst_116 = arith.constant dense<0.000000e+00> : vector<8xf32>
    %217 = vector.multi_reduction <add>, %216, %cst_116 [1] : vector<8x16xf32> to vector<8xf32>
    %218 = vector.shape_cast %217 : vector<8xf32> to vector<8x1xf32>
    %cst_117 = arith.constant 9.99999996E-13 : f32
    %219 = vector.broadcast %cst_117 : f32 to vector<8x1xf32>
    %220 = arith.addf %218, %219 : vector<8x1xf32>
    %221 = math.rsqrt %220 : vector<8x1xf32>
    %222 = vector.broadcast %221 : vector<8x1xf32> to vector<8x16xf32>
    %223 = arith.mulf %215, %222 : vector<8x16xf32>
    %c5 = arith.constant 5 : index
    %c0_118 = arith.constant 0 : index
    %c0_119 = arith.constant 0 : index
    %224 = vector.load %arg10[%c5, %c0_118, %c0_119] : memref<8x1x16xf32, #tpu.memory_space<vmem>>, vector<1x1x16xf32>
    %225 = vector.shape_cast %224 : vector<1x1x16xf32> to vector<1x16xf32>
    %226 = vector.broadcast %225 : vector<1x16xf32> to vector<8x16xf32>
    %227 = arith.mulf %223, %226 : vector<8x16xf32>
    %cst_120 = arith.constant dense<0.000000e+00> : vector<8x8xf32>
    %228 = tpu.matmul %227, %64, %cst_120 {dimension_numbers = #tpu.dot_dimension_numbers<[1], [1], [0], [0], [0, 0, 1, 0], [], []>} : vector<8x16xf32>, vector<8x16xf32>, vector<8x8xf32> -> vector<8x8xf32>
    %cst_121 = arith.constant 1.000000e+01 : f32
    %229 = vector.broadcast %cst_121 : f32 to vector<8x8xf32>
    %230 = arith.mulf %228, %229 : vector<8x8xf32>
    %cst_122 = arith.constant dense<0xFF800000> : vector<8xf32>
    %231 = vector.multi_reduction <maximumf>, %230, %cst_122 [1] : vector<8x8xf32> to vector<8xf32>
    %232 = vector.shape_cast %231 : vector<8xf32> to vector<8x1xf32>
    %233 = vector.broadcast %232 : vector<8x1xf32> to vector<8x8xf32>
    %234 = arith.subf %230, %233 : vector<8x8xf32>
    %235 = math.exp %234 : vector<8x8xf32>
    %cst_123 = arith.constant dense<0.000000e+00> : vector<8xf32>
    %236 = vector.multi_reduction <add>, %235, %cst_123 [1] : vector<8x8xf32> to vector<8xf32>
    %237 = vector.shape_cast %236 : vector<8xf32> to vector<8x1xf32>
    %238 = tpu.reciprocal %237 {approx = true} : vector<8x1xf32> -> vector<8x1xf32>
    %239 = vector.broadcast %238 : vector<8x1xf32> to vector<8x8xf32>
    %240 = arith.mulf %235, %239 : vector<8x8xf32>
    %cst_124 = arith.constant dense<0.000000e+00> : vector<8x16xf32>
    %241 = tpu.matmul %240, %65, %cst_124 {dimension_numbers = #tpu.dot_dimension_numbers<[1], [0], [0], [1], [0, 0, 1, 1], [], []>} : vector<8x8xf32>, vector<8x16xf32>, vector<8x16xf32> -> vector<8x16xf32>
    %c0_125 = arith.constant 0 : index
    %c96 = arith.constant 96 : index
    %242 = vector.load %arg23[%c0_125, %c96] : memref<8x128xf32, #tpu.memory_space<vmem>>, vector<8x16xf32>
    %243 = arith.mulf %242, %242 : vector<8x16xf32>
    %cst_126 = arith.constant dense<0.000000e+00> : vector<8xf32>
    %244 = vector.multi_reduction <add>, %243, %cst_126 [1] : vector<8x16xf32> to vector<8xf32>
    %245 = vector.shape_cast %244 : vector<8xf32> to vector<8x1xf32>
    %cst_127 = arith.constant 9.99999996E-13 : f32
    %246 = vector.broadcast %cst_127 : f32 to vector<8x1xf32>
    %247 = arith.addf %245, %246 : vector<8x1xf32>
    %248 = math.rsqrt %247 : vector<8x1xf32>
    %249 = vector.broadcast %248 : vector<8x1xf32> to vector<8x16xf32>
    %250 = arith.mulf %242, %249 : vector<8x16xf32>
    %c6 = arith.constant 6 : index
    %c0_128 = arith.constant 0 : index
    %c0_129 = arith.constant 0 : index
    %251 = vector.load %arg10[%c6, %c0_128, %c0_129] : memref<8x1x16xf32, #tpu.memory_space<vmem>>, vector<1x1x16xf32>
    %252 = vector.shape_cast %251 : vector<1x1x16xf32> to vector<1x16xf32>
    %253 = vector.broadcast %252 : vector<1x16xf32> to vector<8x16xf32>
    %254 = arith.mulf %250, %253 : vector<8x16xf32>
    %cst_130 = arith.constant dense<0.000000e+00> : vector<8x8xf32>
    %255 = tpu.matmul %254, %78, %cst_130 {dimension_numbers = #tpu.dot_dimension_numbers<[1], [1], [0], [0], [0, 0, 1, 0], [], []>} : vector<8x16xf32>, vector<8x16xf32>, vector<8x8xf32> -> vector<8x8xf32>
    %cst_131 = arith.constant 1.000000e+01 : f32
    %256 = vector.broadcast %cst_131 : f32 to vector<8x8xf32>
    %257 = arith.mulf %255, %256 : vector<8x8xf32>
    %cst_132 = arith.constant dense<0xFF800000> : vector<8xf32>
    %258 = vector.multi_reduction <maximumf>, %257, %cst_132 [1] : vector<8x8xf32> to vector<8xf32>
    %259 = vector.shape_cast %258 : vector<8xf32> to vector<8x1xf32>
    %260 = vector.broadcast %259 : vector<8x1xf32> to vector<8x8xf32>
    %261 = arith.subf %257, %260 : vector<8x8xf32>
    %262 = math.exp %261 : vector<8x8xf32>
    %cst_133 = arith.constant dense<0.000000e+00> : vector<8xf32>
    %263 = vector.multi_reduction <add>, %262, %cst_133 [1] : vector<8x8xf32> to vector<8xf32>
    %264 = vector.shape_cast %263 : vector<8xf32> to vector<8x1xf32>
    %265 = tpu.reciprocal %264 {approx = true} : vector<8x1xf32> -> vector<8x1xf32>
    %266 = vector.broadcast %265 : vector<8x1xf32> to vector<8x8xf32>
    %267 = arith.mulf %262, %266 : vector<8x8xf32>
    %cst_134 = arith.constant dense<0.000000e+00> : vector<8x16xf32>
    %268 = tpu.matmul %267, %79, %cst_134 {dimension_numbers = #tpu.dot_dimension_numbers<[1], [0], [0], [1], [0, 0, 1, 1], [], []>} : vector<8x8xf32>, vector<8x16xf32>, vector<8x16xf32> -> vector<8x16xf32>
    %c0_135 = arith.constant 0 : index
    %c112 = arith.constant 112 : index
    %269 = vector.load %arg23[%c0_135, %c112] : memref<8x128xf32, #tpu.memory_space<vmem>>, vector<8x16xf32>
    %270 = arith.mulf %269, %269 : vector<8x16xf32>
    %cst_136 = arith.constant dense<0.000000e+00> : vector<8xf32>
    %271 = vector.multi_reduction <add>, %270, %cst_136 [1] : vector<8x16xf32> to vector<8xf32>
    %272 = vector.shape_cast %271 : vector<8xf32> to vector<8x1xf32>
    %cst_137 = arith.constant 9.99999996E-13 : f32
    %273 = vector.broadcast %cst_137 : f32 to vector<8x1xf32>
    %274 = arith.addf %272, %273 : vector<8x1xf32>
    %275 = math.rsqrt %274 : vector<8x1xf32>
    %276 = vector.broadcast %275 : vector<8x1xf32> to vector<8x16xf32>
    %277 = arith.mulf %269, %276 : vector<8x16xf32>
    %c7 = arith.constant 7 : index
    %c0_138 = arith.constant 0 : index
    %c0_139 = arith.constant 0 : index
    %278 = vector.load %arg10[%c7, %c0_138, %c0_139] : memref<8x1x16xf32, #tpu.memory_space<vmem>>, vector<1x1x16xf32>
    %279 = vector.shape_cast %278 : vector<1x1x16xf32> to vector<1x16xf32>
    %280 = vector.broadcast %279 : vector<1x16xf32> to vector<8x16xf32>
    %281 = arith.mulf %277, %280 : vector<8x16xf32>
    %cst_140 = arith.constant dense<0.000000e+00> : vector<8x8xf32>
    %282 = tpu.matmul %281, %78, %cst_140 {dimension_numbers = #tpu.dot_dimension_numbers<[1], [1], [0], [0], [0, 0, 1, 0], [], []>} : vector<8x16xf32>, vector<8x16xf32>, vector<8x8xf32> -> vector<8x8xf32>
    %cst_141 = arith.constant 1.000000e+01 : f32
    %283 = vector.broadcast %cst_141 : f32 to vector<8x8xf32>
    %284 = arith.mulf %282, %283 : vector<8x8xf32>
    %cst_142 = arith.constant dense<0xFF800000> : vector<8xf32>
    %285 = vector.multi_reduction <maximumf>, %284, %cst_142 [1] : vector<8x8xf32> to vector<8xf32>
    %286 = vector.shape_cast %285 : vector<8xf32> to vector<8x1xf32>
    %287 = vector.broadcast %286 : vector<8x1xf32> to vector<8x8xf32>
    %288 = arith.subf %284, %287 : vector<8x8xf32>
    %289 = math.exp %288 : vector<8x8xf32>
    %cst_143 = arith.constant dense<0.000000e+00> : vector<8xf32>
    %290 = vector.multi_reduction <add>, %289, %cst_143 [1] : vector<8x8xf32> to vector<8xf32>
    %291 = vector.shape_cast %290 : vector<8xf32> to vector<8x1xf32>
    %292 = tpu.reciprocal %291 {approx = true} : vector<8x1xf32> -> vector<8x1xf32>
    %293 = vector.broadcast %292 : vector<8x1xf32> to vector<8x8xf32>
    %294 = arith.mulf %289, %293 : vector<8x8xf32>
    %cst_144 = arith.constant dense<0.000000e+00> : vector<8x16xf32>
    %295 = tpu.matmul %294, %79, %cst_144 {dimension_numbers = #tpu.dot_dimension_numbers<[1], [0], [0], [1], [0, 0, 1, 1], [], []>} : vector<8x8xf32>, vector<8x16xf32>, vector<8x16xf32> -> vector<8x16xf32>
    %296 = tpu.concatenate %106, %133, %160, %187, %214, %241, %268, %295 in 1 : vector<8x16xf32>, vector<8x16xf32>, vector<8x16xf32>, vector<8x16xf32>, vector<8x16xf32>, vector<8x16xf32>, vector<8x16xf32>, vector<8x16xf32> -> vector<8x128xf32>
    %297 = arith.truncf %296 : vector<8x128xf32> to vector<8x128xbf16>
    %c0_145 = arith.constant 0 : index
    %c0_146 = arith.constant 0 : index
    %298 = vector.load %arg9[%c0_145, %c0_146] : memref<128x32xbf16, #tpu.memory_space<vmem>>, vector<128x32xbf16>
    %cst_147 = arith.constant dense<0.000000e+00> : vector<8x32xf32>
    %299 = tpu.matmul %297, %298, %cst_147 {dimension_numbers = #tpu.dot_dimension_numbers<[1], [0], [0], [1], [0, 0, 1, 1], [], []>} : vector<8x128xbf16>, vector<128x32xbf16>, vector<8x32xf32> -> vector<8x32xf32>
    %c0_148 = arith.constant 0 : index
    %c0_149 = arith.constant 0 : index
    %300 = vector.load %arg12[%c0_148, %c0_149] : memref<1x32xf32, #tpu.memory_space<vmem>>, vector<1x32xf32>
    %c0_150 = arith.constant 0 : index
    %c0_151 = arith.constant 0 : index
    %301 = vector.load %arg13[%c0_150, %c0_151] : memref<1x32xf32, #tpu.memory_space<vmem>>, vector<1x32xf32>
    %cst_152 = arith.constant dense<0.000000e+00> : vector<8xf32>
    %302 = vector.multi_reduction <add>, %299, %cst_152 [1] : vector<8x32xf32> to vector<8xf32>
    %303 = vector.shape_cast %302 : vector<8xf32> to vector<8x1xf32>
    %cst_153 = arith.constant 3.200000e+01 : f32
    %304 = vector.broadcast %cst_153 : f32 to vector<8x1xf32>
    %305 = arith.divf %303, %304 : vector<8x1xf32>
    %306 = vector.broadcast %305 : vector<8x1xf32> to vector<8x32xf32>
    %307 = arith.subf %299, %306 : vector<8x32xf32>
    %308 = arith.mulf %307, %307 : vector<8x32xf32>
    %cst_154 = arith.constant dense<0.000000e+00> : vector<8xf32>
    %309 = vector.multi_reduction <add>, %308, %cst_154 [1] : vector<8x32xf32> to vector<8xf32>
    %310 = vector.shape_cast %309 : vector<8xf32> to vector<8x1xf32>
    %cst_155 = arith.constant 3.200000e+01 : f32
    %311 = vector.broadcast %cst_155 : f32 to vector<8x1xf32>
    %312 = arith.divf %310, %311 : vector<8x1xf32>
    %cst_156 = arith.constant 9.99999974E-6 : f32
    %313 = vector.broadcast %cst_156 : f32 to vector<8x1xf32>
    %314 = arith.addf %312, %313 : vector<8x1xf32>
    %315 = math.rsqrt %314 : vector<8x1xf32>
    %316 = vector.broadcast %315 : vector<8x1xf32> to vector<8x32xf32>
    %317 = arith.mulf %307, %316 : vector<8x32xf32>
    %318 = vector.broadcast %300 : vector<1x32xf32> to vector<8x32xf32>
    %319 = arith.mulf %317, %318 : vector<8x32xf32>
    %320 = vector.broadcast %301 : vector<1x32xf32> to vector<8x32xf32>
    %321 = arith.addf %319, %320 : vector<8x32xf32>
    %322 = arith.truncf %321 : vector<8x32xf32> to vector<8x32xbf16>
    %c0_157 = arith.constant 0 : index
    %c0_158 = arith.constant 0 : index
    %323 = vector.load %arg14[%c0_157, %c0_158] : memref<32x128xbf16, #tpu.memory_space<vmem>>, vector<32x128xbf16>
    %cst_159 = arith.constant dense<0.000000e+00> : vector<8x128xf32>
    %324 = tpu.matmul %322, %323, %cst_159 {dimension_numbers = #tpu.dot_dimension_numbers<[1], [0], [0], [1], [0, 0, 1, 1], [], []>} : vector<8x32xbf16>, vector<32x128xbf16>, vector<8x128xf32> -> vector<8x128xf32>
    %c0_160 = arith.constant 0 : index
    %c0_161 = arith.constant 0 : index
    %325 = vector.load %arg15[%c0_160, %c0_161] : memref<1x128xf32, #tpu.memory_space<vmem>>, vector<1x128xf32>
    %326 = vector.broadcast %325 : vector<1x128xf32> to vector<8x128xf32>
    %327 = arith.addf %324, %326 : vector<8x128xf32>
    %cst_162 = arith.constant 0.000000e+00 : f32
    %328 = vector.broadcast %cst_162 : f32 to vector<8x128xf32>
    %329 = arith.subf %328, %327 : vector<8x128xf32>
    %330 = math.exp %329 : vector<8x128xf32>
    %cst_163 = arith.constant 1.000000e+00 : f32
    %331 = vector.broadcast %cst_163 : f32 to vector<8x128xf32>
    %332 = arith.addf %331, %330 : vector<8x128xf32>
    %cst_164 = arith.constant 1.000000e+00 : f32
    %333 = vector.broadcast %cst_164 : f32 to vector<8x128xf32>
    %334 = arith.divf %333, %332 : vector<8x128xf32>
    %335 = arith.mulf %327, %334 : vector<8x128xf32>
    %c0_165 = arith.constant 0 : index
    %c0_166 = arith.constant 0 : index
    %336 = vector.load %arg16[%c0_165, %c0_166] : memref<1x128xf32, #tpu.memory_space<vmem>>, vector<1x128xf32>
    %c0_167 = arith.constant 0 : index
    %c0_168 = arith.constant 0 : index
    %337 = vector.load %arg17[%c0_167, %c0_168] : memref<1x128xf32, #tpu.memory_space<vmem>>, vector<1x128xf32>
    %cst_169 = arith.constant dense<0.000000e+00> : vector<8xf32>
    %338 = vector.multi_reduction <add>, %335, %cst_169 [1] : vector<8x128xf32> to vector<8xf32>
    %339 = vector.shape_cast %338 : vector<8xf32> to vector<8x1xf32>
    %cst_170 = arith.constant 1.280000e+02 : f32
    %340 = vector.broadcast %cst_170 : f32 to vector<8x1xf32>
    %341 = arith.divf %339, %340 : vector<8x1xf32>
    %342 = vector.broadcast %341 : vector<8x1xf32> to vector<8x128xf32>
    %343 = arith.subf %335, %342 : vector<8x128xf32>
    %344 = arith.mulf %343, %343 : vector<8x128xf32>
    %cst_171 = arith.constant dense<0.000000e+00> : vector<8xf32>
    %345 = vector.multi_reduction <add>, %344, %cst_171 [1] : vector<8x128xf32> to vector<8xf32>
    %346 = vector.shape_cast %345 : vector<8xf32> to vector<8x1xf32>
    %cst_172 = arith.constant 1.280000e+02 : f32
    %347 = vector.broadcast %cst_172 : f32 to vector<8x1xf32>
    %348 = arith.divf %346, %347 : vector<8x1xf32>
    %cst_173 = arith.constant 9.99999974E-6 : f32
    %349 = vector.broadcast %cst_173 : f32 to vector<8x1xf32>
    %350 = arith.addf %348, %349 : vector<8x1xf32>
    %351 = math.rsqrt %350 : vector<8x1xf32>
    %352 = vector.broadcast %351 : vector<8x1xf32> to vector<8x128xf32>
    %353 = arith.mulf %343, %352 : vector<8x128xf32>
    %354 = vector.broadcast %336 : vector<1x128xf32> to vector<8x128xf32>
    %355 = arith.mulf %353, %354 : vector<8x128xf32>
    %356 = vector.broadcast %337 : vector<1x128xf32> to vector<8x128xf32>
    %357 = arith.addf %355, %356 : vector<8x128xf32>
    %358 = arith.truncf %357 : vector<8x128xf32> to vector<8x128xbf16>
    %c0_174 = arith.constant 0 : index
    %c0_175 = arith.constant 0 : index
    %359 = vector.load %arg18[%c0_174, %c0_175] : memref<128x32xbf16, #tpu.memory_space<vmem>>, vector<128x32xbf16>
    %cst_176 = arith.constant dense<0.000000e+00> : vector<8x32xf32>
    %360 = tpu.matmul %358, %359, %cst_176 {dimension_numbers = #tpu.dot_dimension_numbers<[1], [0], [0], [1], [0, 0, 1, 1], [], []>} : vector<8x128xbf16>, vector<128x32xbf16>, vector<8x32xf32> -> vector<8x32xf32>
    %c0_177 = arith.constant 0 : index
    %c0_178 = arith.constant 0 : index
    %361 = vector.load %arg19[%c0_177, %c0_178] : memref<1x32xf32, #tpu.memory_space<vmem>>, vector<1x32xf32>
    %362 = vector.broadcast %361 : vector<1x32xf32> to vector<8x32xf32>
    %363 = arith.addf %360, %362 : vector<8x32xf32>
    %c0_179 = arith.constant 0 : index
    %c0_180 = arith.constant 0 : index
    %364 = vector.load %arg12[%c0_179, %c0_180] : memref<1x32xf32, #tpu.memory_space<vmem>>, vector<1x32xf32>
    %c0_181 = arith.constant 0 : index
    %c0_182 = arith.constant 0 : index
    %365 = vector.load %arg13[%c0_181, %c0_182] : memref<1x32xf32, #tpu.memory_space<vmem>>, vector<1x32xf32>
    %cst_183 = arith.constant dense<0.000000e+00> : vector<8xf32>
    %366 = vector.multi_reduction <add>, %363, %cst_183 [1] : vector<8x32xf32> to vector<8xf32>
    %367 = vector.shape_cast %366 : vector<8xf32> to vector<8x1xf32>
    %cst_184 = arith.constant 3.200000e+01 : f32
    %368 = vector.broadcast %cst_184 : f32 to vector<8x1xf32>
    %369 = arith.divf %367, %368 : vector<8x1xf32>
    %370 = vector.broadcast %369 : vector<8x1xf32> to vector<8x32xf32>
    %371 = arith.subf %363, %370 : vector<8x32xf32>
    %372 = arith.mulf %371, %371 : vector<8x32xf32>
    %cst_185 = arith.constant dense<0.000000e+00> : vector<8xf32>
    %373 = vector.multi_reduction <add>, %372, %cst_185 [1] : vector<8x32xf32> to vector<8xf32>
    %374 = vector.shape_cast %373 : vector<8xf32> to vector<8x1xf32>
    %cst_186 = arith.constant 3.200000e+01 : f32
    %375 = vector.broadcast %cst_186 : f32 to vector<8x1xf32>
    %376 = arith.divf %374, %375 : vector<8x1xf32>
    %cst_187 = arith.constant 9.99999974E-6 : f32
    %377 = vector.broadcast %cst_187 : f32 to vector<8x1xf32>
    %378 = arith.addf %376, %377 : vector<8x1xf32>
    %379 = math.rsqrt %378 : vector<8x1xf32>
    %380 = vector.broadcast %379 : vector<8x1xf32> to vector<8x32xf32>
    %381 = arith.mulf %371, %380 : vector<8x32xf32>
    %382 = vector.broadcast %364 : vector<1x32xf32> to vector<8x32xf32>
    %383 = arith.mulf %381, %382 : vector<8x32xf32>
    %384 = vector.broadcast %365 : vector<1x32xf32> to vector<8x32xf32>
    %385 = arith.addf %383, %384 : vector<8x32xf32>
    %386 = arith.truncf %385 : vector<8x32xf32> to vector<8x32xbf16>
    %c0_188 = arith.constant 0 : index
    %c0_189 = arith.constant 0 : index
    %387 = vector.load %arg20[%c0_188, %c0_189] : memref<32x32xbf16, #tpu.memory_space<vmem>>, vector<32x32xbf16>
    %cst_190 = arith.constant dense<0.000000e+00> : vector<8x32xf32>
    %388 = tpu.matmul %386, %387, %cst_190 {dimension_numbers = #tpu.dot_dimension_numbers<[1], [0], [0], [1], [0, 0, 1, 1], [], []>} : vector<8x32xbf16>, vector<32x32xbf16>, vector<8x32xf32> -> vector<8x32xf32>
    %c0_191 = arith.constant 0 : index
    %c0_192 = arith.constant 0 : index
    %389 = vector.load %arg21[%c0_191, %c0_192] : memref<1x32xf32, #tpu.memory_space<vmem>>, vector<1x32xf32>
    %390 = vector.broadcast %389 : vector<1x32xf32> to vector<8x32xf32>
    %391 = arith.addf %388, %390 : vector<8x32xf32>
    %c0_193 = arith.constant 0 : index
    %c0_194 = arith.constant 0 : index
    %c0_195 = arith.constant 0 : index
    %392 = vector.load %arg22[%c0_193, %c0_194, %c0_195] : memref<1x8x32xf32, #tpu.memory_space<vmem>>, vector<1x8x32xf32>
    %393 = vector.shape_cast %392 : vector<1x8x32xf32> to vector<8x32xf32>
    %394 = vector.shape_cast %391 : vector<8x32xf32> to vector<1x8x32xf32>
    tpu.vector_store %arg22[%c0_193, %c0_194, %c0_195], %394 {strides = array<i32>} : memref<1x8x32xf32, #tpu.memory_space<vmem>>, vector<1x8x32xf32>,
    return
  }
  func.func @transform_0(%arg0: i32) -> (i32, i32, i32) {
    %c0_i32 = arith.constant 0 : i32
    %c0_i32_0 = arith.constant 0 : i32
    %c0_i32_1 = arith.constant 0 : i32
    return %arg0, %c0_i32, %c0_i32_0 : i32, i32, i32
  }
  func.func @transform_1(%arg0: i32) -> (i32, i32, i32) {
    %c0_i32 = arith.constant 0 : i32
    %c0_i32_0 = arith.constant 0 : i32
    %c0_i32_1 = arith.constant 0 : i32
    return %arg0, %c0_i32, %c0_i32_0 : i32, i32, i32
  }
  func.func @transform_2(%arg0: i32) -> (i32, i32) {
    %c0_i32 = arith.constant 0 : i32
    %c0_i32_0 = arith.constant 0 : i32
    %c0_i32_1 = arith.constant 0 : i32
    return %c0_i32, %c0_i32_0 : i32, i32
  }
  func.func @transform_3(%arg0: i32) -> (i32, i32) {
    %c0_i32 = arith.constant 0 : i32
    %c0_i32_0 = arith.constant 0 : i32
    %c0_i32_1 = arith.constant 0 : i32
    return %c0_i32, %c0_i32_0 : i32, i32
  }
  func.func @transform_4(%arg0: i32) -> (i32, i32) {
    %c0_i32 = arith.constant 0 : i32
    %c0_i32_0 = arith.constant 0 : i32
    %c0_i32_1 = arith.constant 0 : i32
    return %c0_i32, %c0_i32_0 : i32, i32
  }
  func.func @transform_5(%arg0: i32) -> (i32, i32) {
    %c0_i32 = arith.constant 0 : i32
    %c0_i32_0 = arith.constant 0 : i32
    %c0_i32_1 = arith.constant 0 : i32
    return %c0_i32, %c0_i32_0 : i32, i32
  }
  func.func @transform_6(%arg0: i32) -> (i32, i32) {
    %c0_i32 = arith.constant 0 : i32
    %c0_i32_0 = arith.constant 0 : i32
    %c0_i32_1 = arith.constant 0 : i32
    return %c0_i32, %c0_i32_0 : i32, i32
  }
  func.func @transform_7(%arg0: i32) -> (i32, i32) {
    %c0_i32 = arith.constant 0 : i32
    %c0_i32_0 = arith.constant 0 : i32
    %c0_i32_1 = arith.constant 0 : i32
    return %c0_i32, %c0_i32_0 : i32, i32
  }
  func.func @transform_8(%arg0: i32) -> (i32, i32) {
    %c0_i32 = arith.constant 0 : i32
    %c0_i32_0 = arith.constant 0 : i32
    %c0_i32_1 = arith.constant 0 : i32
    return %c0_i32, %c0_i32_0 : i32, i32
  }
  func.func @transform_9(%arg0: i32) -> (i32, i32, i32) {
    %c0_i32 = arith.constant 0 : i32
    %c0_i32_0 = arith.constant 0 : i32
    %c0_i32_1 = arith.constant 0 : i32
    %c0_i32_2 = arith.constant 0 : i32
    return %c0_i32, %c0_i32_0, %c0_i32_1 : i32, i32, i32
  }
  func.func @transform_10(%arg0: i32) -> (i32, i32, i32) {
    %c0_i32 = arith.constant 0 : i32
    %c0_i32_0 = arith.constant 0 : i32
    %c0_i32_1 = arith.constant 0 : i32
    %c0_i32_2 = arith.constant 0 : i32
    return %c0_i32, %c0_i32_0, %c0_i32_1 : i32, i32, i32
  }
  func.func @transform_11(%arg0: i32) -> (i32, i32) {
    %c0_i32 = arith.constant 0 : i32
    %c0_i32_0 = arith.constant 0 : i32
    %c0_i32_1 = arith.constant 0 : i32
    return %c0_i32, %c0_i32_0 : i32, i32
  }
  func.func @transform_12(%arg0: i32) -> (i32, i32) {
    %c0_i32 = arith.constant 0 : i32
    %c0_i32_0 = arith.constant 0 : i32
    %c0_i32_1 = arith.constant 0 : i32
    return %c0_i32, %c0_i32_0 : i32, i32
  }
  func.func @transform_13(%arg0: i32) -> (i32, i32) {
    %c0_i32 = arith.constant 0 : i32
    %c0_i32_0 = arith.constant 0 : i32
    %c0_i32_1 = arith.constant 0 : i32
    return %c0_i32, %c0_i32_0 : i32, i32
  }
  func.func @transform_14(%arg0: i32) -> (i32, i32) {
    %c0_i32 = arith.constant 0 : i32
    %c0_i32_0 = arith.constant 0 : i32
    %c0_i32_1 = arith.constant 0 : i32
    return %c0_i32, %c0_i32_0 : i32, i32
  }
  func.func @transform_15(%arg0: i32) -> (i32, i32) {
    %c0_i32 = arith.constant 0 : i32
    %c0_i32_0 = arith.constant 0 : i32
    %c0_i32_1 = arith.constant 0 : i32
    return %c0_i32, %c0_i32_0 : i32, i32
  }
  func.func @transform_16(%arg0: i32) -> (i32, i32) {
    %c0_i32 = arith.constant 0 : i32
    %c0_i32_0 = arith.constant 0 : i32
    %c0_i32_1 = arith.constant 0 : i32
    return %c0_i32, %c0_i32_0 : i32, i32
  }
  func.func @transform_17(%arg0: i32) -> (i32, i32) {
    %c0_i32 = arith.constant 0 : i32
    %c0_i32_0 = arith.constant 0 : i32
    %c0_i32_1 = arith.constant 0 : i32
    return %c0_i32, %c0_i32_0 : i32, i32
  }
  func.func @transform_18(%arg0: i32) -> (i32, i32) {
    %c0_i32 = arith.constant 0 : i32
    %c0_i32_0 = arith.constant 0 : i32
    %c0_i32_1 = arith.constant 0 : i32
    return %c0_i32, %c0_i32_0 : i32, i32
  }
  func.func @transform_19(%arg0: i32) -> (i32, i32) {
    %c0_i32 = arith.constant 0 : i32
    %c0_i32_0 = arith.constant 0 : i32
    %c0_i32_1 = arith.constant 0 : i32
    return %c0_i32, %c0_i32_0 : i32, i32
  }
  func.func @transform_20(%arg0: i32) -> (i32, i32) {
    %c0_i32 = arith.constant 0 : i32
    %c0_i32_0 = arith.constant 0 : i32
    %c0_i32_1 = arith.constant 0 : i32
    return %c0_i32, %c0_i32_0 : i32, i32
  }
  func.func @transform_21(%arg0: i32) -> (i32, i32, i32) {
    %c0_i32 = arith.constant 0 : i32
    %c0_i32_0 = arith.constant 0 : i32
    %c0_i32_1 = arith.constant 0 : i32
    return %arg0, %c0_i32, %c0_i32_0 : i32, i32, i32
  }
}

</mosaic_0001>

<bundles_post_ra>
// kernel: zamba_forward.13
= control target key start
LH: loop header
LB: loop body
LE: loop exit
PB: predicated region body
PF: predicated region fallthrough
CT: control target
= control target key end

     0   :  { %vm19_vm0 = vcmask 261120   ;;  %s167_s0 = inlined_call_operand.vmem [shape: f32[16,32], index: 0, kind: input, shape index: {}]   ;;  %s168_s1 = inlined_call_operand.vmem [shape: f32[1,32], index: 1, kind: input, shape index: {}]   ;;  %s169_s2 = inlined_call_operand.vmem [shape: f32[1,32], index: 2, kind: input, shape index: {}]   ;;  %s170_s3 = inlined_call_operand.hbm [shape: f32[16,32], index: 3, kind: output, shape index: {}]  }
   0x1   :  { %v15_v0 = vld [vmem:[%s167_s0] sm:$0xff]  ;;  %v16_v1 = vld [vmem:[%s167_s0 + $0x8] sm:$0xff] }
   0x2   :  { %8 = vsyncpa [#allocation3], 0  ;;  %v20_v2 = vsel %vm19_vm0, %v15_v0, 0.0  ;;  %v23_v3 = vsel %vm19_vm0, %v16_v1, 0.0  ;;  %v81_v21 = vld [vmem:[%s168_s1] ss:$0 sm:$0xff] }
   0x3   :  { %21 = vadd.xlane.f32.xlu0 %v20_v2  ;;  %v82_v23 = vld [vmem:[%s169_s2] ss:$0 sm:$0xff]  ;;  %s114_s19 = smov [#allocation2]  }
   0x4   :  { %s70_s20 = sshll.u32 %s114_s19, 4  ;;  %s71_s20 = int_to_ptr.vmem [resolvable:$true] %s70_s20 }
   0x5   :  { %s90_s21 = scalar_lea.vmem %s71_s20, 256  ;;  %p95_p1 = scmp.lt.s32.totalorder %s71_s20, %s71_s20 }
   0x6   :  { %p91_p0 = scmp.ne.s32.totalorder %s71_s20, %s90_s21  ;;  %p96_p2 = scmp.lt.s32.totalorder %s90_s21, %s90_s21 }
   0x7   :  { %24 = vadd.xlane.f32.xlu0 %v23_v3 }
   0x8   :  { %p97_p3 = por %p96_p2, %p95_p1 }
   0xa   :  { %p98_p4 = pnand %p97_p3, %p91_p0 }
  0x90   :  { %v22_v4 = vpop.xlane.xlu0 %21 }
  0x91   :  { %v27_v5 = vmul.f32 0.03125, %v22_v4 }
  0x93   :  { %v29_v6 = vsub.f32 %v15_v0, %v27_v5 }
  0x94   :  { %v25_v7 = vpop.xlane.xlu0 %24 }
  0x95   :  { %v28_v8 = vmul.f32 0.03125, %v25_v7  ;;  %v31_v9 = vmul.f32 %v29_v6, %v29_v6 }
  0x97   :  { %v30_v10 = vsub.f32 %v16_v1, %v28_v8  ;;  %v33_v11 = vsel %vm19_vm0, %v31_v9, 0.0 }
  0x98   :  { %34 = vadd.xlane.f32.xlu1 %v33_v11 }
  0x99   :  { %v32_v12 = vmul.f32 %v30_v10, %v30_v10 }
  0x9b   :  { %v36_v13 = vsel %vm19_vm0, %v32_v12, 0.0 }
  0x9c   :  { %37 = vadd.xlane.f32.xlu1 %v36_v13 }
 0x125   :  { %v35_v14 = vpop.xlane.xlu1 %34 }
 0x126   :  { %v39_v15 = vmul.f32 0.03125, %v35_v14 }
 0x128   :  { %v41_v16 = vadd.f32 1e-05, %v39_v15 }
 0x129   :  { %v38_v17 = vpop.xlane.xlu1 %37 }
 0x12a   :  { %86 = vrsqrt.f32 %v41_v16  ;;  %v40_v18 = vmul.f32 0.03125, %v38_v17 }
 0x12c   :  { %v42_v19 = vadd.f32 1e-05, %v40_v18 }
 0x12e   :  { %88 = vrsqrt.f32 %v42_v19 }
 0x134   :  { %v87_v20 = vpop.eup %86 }
 0x135   :  { %v45_v22 = vmul.f32 %v87_v20, %v29_v6 }
 0x137   :  { %v53_v24 = vmul.f32 %v81_v21, %v45_v22 }
 0x138   :  { %v89_v25 = vpop.eup %88 }
 0x139   :  { %v46_v26 = vmul.f32 %v89_v25, %v30_v10  ;;  %v61_v27 = vadd.f32 %v82_v23, %v53_v24 }
 0x13b   :  { %v54_v28 = vmul.f32 %v81_v21, %v46_v26  ;;  %63 = vst.msk [vmem:[#allocation2] sm:$0xff] %vm19_vm0, %v61_v27 }
 0x13d   :  { %v62_v29 = vadd.f32 %v82_v23, %v54_v28 }
 0x13f   :  { %64 = vst.msk [vmem:[#allocation2 + $0x8] sm:$0xff] %vm19_vm0, %v62_v29 }
 0x140   :  { %101 = shalt.err (!%p98_p4)
}
 0x141   :  { %s102_s22 = scalar_lea.hbm %s170_s3, 256 }
 0x142   :  { %p103_p5 = scmp.ne.s32.totalorder %s170_s3, %s102_s22  ;;  %p106_p6 = scmp.lt.u32.totalorder %s102_s22, %s170_s3 }
 0x144   :  { %p108_p7 = pnand %p106_p6, %p103_p5 }
 0x146   :  { %111 = shalt.err (!%p108_p7)
}
 0x147   :  { %s115_s27 = smov 128   ;;  %s116_s28 = smov 8  }
 0x148   :  { %76 = dma.vmem_to_hbm [thread:$0]  %s71_s20, 256, %s170_s3, [#allocation3], %s115_s27, %s115_s27, %s116_s28  }
 0x149   :  { %112 = dma.done.wait [#allocation3], 256  }
 0x14a   :  { %113 = vsyncadd [#allocation3], 4294967040 }
 0x14b   :  { %80 = vsyncpa [#allocation3], 1 }

// kernel: zamba_forward.7
= control target key start
LH: loop header
LB: loop body
LE: loop exit
PB: predicated region body
PF: predicated region fallthrough
CT: control target
= control target key end

     0   :  { %vm18_vm0 = vcmask 261120   ;;  %s118_s0 = inlined_call_operand.vmem [shape: f32[16,32], index: 0, kind: input, shape index: {}]   ;;  %s119_s1 = inlined_call_operand.vmem [shape: f32[1,32], index: 1, kind: input, shape index: {}]   ;;  %s120_s2 = inlined_call_operand.vmem [shape: f32[1,32], index: 2, kind: input, shape index: {}]   ;;  %s121_s3 = inlined_call_operand.vmem [shape: f32[16,32], index: 3, kind: output, shape index: {}]  }
   0x1   :  { %v14_v0 = vld [vmem:[%s118_s0] sm:$0xff]  ;;  %v15_v1 = vld [vmem:[%s118_s0 + $0x8] sm:$0xff] }
   0x2   :  { %v19_v2 = vsel %vm18_vm0, %v14_v0, 0.0  ;;  %v22_v3 = vsel %vm18_vm0, %v15_v1, 0.0  ;;  %v68_v21 = vld [vmem:[%s119_s1] ss:$0 sm:$0xff] }
   0x3   :  { %20 = vadd.xlane.f32.xlu0 %v19_v2  ;;  %v69_v23 = vld [vmem:[%s120_s2] ss:$0 sm:$0xff] }
   0x7   :  { %23 = vadd.xlane.f32.xlu0 %v22_v3 }
  0x90   :  { %v21_v4 = vpop.xlane.xlu0 %20 }
  0x91   :  { %v26_v5 = vmul.f32 0.03125, %v21_v4 }
  0x93   :  { %v28_v6 = vsub.f32 %v14_v0, %v26_v5 }
  0x94   :  { %v24_v7 = vpop.xlane.xlu0 %23 }
  0x95   :  { %v27_v8 = vmul.f32 0.03125, %v24_v7  ;;  %v30_v9 = vmul.f32 %v28_v6, %v28_v6 }
  0x97   :  { %v29_v10 = vsub.f32 %v15_v1, %v27_v8  ;;  %v32_v11 = vsel %vm18_vm0, %v30_v9, 0.0 }
  0x98   :  { %33 = vadd.xlane.f32.xlu1 %v32_v11 }
  0x99   :  { %v31_v12 = vmul.f32 %v29_v10, %v29_v10 }
  0x9b   :  { %v35_v13 = vsel %vm18_vm0, %v31_v12, 0.0 }
  0x9c   :  { %36 = vadd.xlane.f32.xlu1 %v35_v13 }
 0x125   :  { %v34_v14 = vpop.xlane.xlu1 %33 }
 0x126   :  { %v38_v15 = vmul.f32 0.03125, %v34_v14 }
 0x128   :  { %v40_v16 = vadd.f32 1e-05, %v38_v15 }
 0x129   :  { %v37_v17 = vpop.xlane.xlu1 %36 }
 0x12a   :  { %70 = vrsqrt.f32 %v40_v16  ;;  %v39_v18 = vmul.f32 0.03125, %v37_v17 }
 0x12c   :  { %v41_v19 = vadd.f32 1e-05, %v39_v18 }
 0x12e   :  { %72 = vrsqrt.f32 %v41_v19 }
 0x134   :  { %v71_v20 = vpop.eup %70 }
 0x135   :  { %v44_v22 = vmul.f32 %v71_v20, %v28_v6 }
 0x137   :  { %v52_v24 = vmul.f32 %v68_v21, %v44_v22 }
 0x138   :  { %v73_v25 = vpop.eup %72 }
 0x139   :  { %v60_v26 = vadd.f32 %v69_v23, %v52_v24  ;;  %v45_v27 = vmul.f32 %v73_v25, %v29_v10 }
 0x13b   :  { %62 = vst.msk [vmem:[%s121_s3] sm:$0xff] %vm18_vm0, %v60_v26  ;;  %v53_v28 = vmul.f32 %v68_v21, %v45_v27 }
 0x13d   :  { %v61_v29 = vadd.f32 %v69_v23, %v53_v28 }
 0x13f   :  { %63 = vst.msk [vmem:[%s121_s3 + $0x8] sm:$0xff] %vm18_vm0, %v61_v29 }

// kernel: zamba_forward.9
= control target key start
LH: loop header
LB: loop body
LE: loop exit
PB: predicated region body
PF: predicated region fallthrough
CT: control target
= control target key end

     0   :  { %s4056_s0 = inlined_call_operand.vmem [shape: f32[2,8,32], index: 0, kind: input, shape index: {}]   ;;  %s4057_s1 = inlined_call_operand.vmem [shape: f32[2,8,32], index: 1, kind: input, shape index: {}]   ;;  %s4058_s2 = inlined_call_operand.vmem [shape: bf16[8,8], index: 2, kind: input, shape index: {}]   ;;  %s4059_s3 = inlined_call_operand.vmem [shape: bf16[8,8], index: 3, kind: input, shape index: {}]   ;;  %s4060_s4 = inlined_call_operand.vmem [shape: f32[8,1], index: 4, kind: input, shape index: {}]   ;;  %s4061_s5 = inlined_call_operand.vmem [shape: bf16[32,128], index: 5, kind: input, shape index: {}]   ;;  %s4062_s6 = inlined_call_operand.vmem [shape: bf16[32,64], index: 6, kind: input, shape index: {}]   ;;  %s4063_s7 = inlined_call_operand.vmem [shape: bf16[32,64], index: 7, kind: input, shape index: {}]   ;;  %s4064_s8 = inlined_call_operand.vmem [shape: bf16[128,32], index: 8, kind: input, shape index: {}]   ;;  %s4065_s9 = inlined_call_operand.vmem [shape: f32[8,1,16], index: 9, kind: input, shape index: {}]   ;;  %s4066_s10 = inlined_call_operand.vmem [shape: f32[4,1,16], index: 10, kind: input, shape index: {}]   ;;  %s4067_s11 = inlined_call_operand.vmem [shape: f32[1,32], index: 11, kind: input, shape index: {}]   ;;  %s4068_s12 = inlined_call_operand.vmem [shape: f32[1,32], index: 12, kind: input, shape index: {}]   ;;  %s4069_s13 = inlined_call_operand.vmem [shape: bf16[32,128], index: 13, kind: input, shape index: {}]   ;;  %s4070_s14 = inlined_call_operand.vmem [shape: f32[1,128], index: 14, kind: input, shape index: {}]   ;;  %s4071_s15 = inlined_call_operand.vmem [shape: f32[1,128], index: 15, kind: input, shape index: {}]   ;;  %s4072_s16 = inlined_call_operand.vmem [shape: f32[1,128], index: 16, kind: input, shape index: {}]   ;;  %s4073_s17 = inlined_call_operand.vmem [shape: bf16[128,32], index: 17, kind: input, shape index: {}]   ;;  %s4074_s18 = inlined_call_operand.vmem [shape: f32[1,32], index: 18, kind: input, shape index: {}]   ;;  %s4075_s19 = inlined_call_operand.vmem [shape: bf16[32,32], index: 19, kind: input, shape index: {}]   ;;  %s4076_s20 = inlined_call_operand.vmem [shape: f32[1,32], index: 20, kind: input, shape index: {}]   ;;  %s4077_s21 = inlined_call_operand.vmem [shape: f32[2,8,32], index: 21, kind: output, shape index: {}]  }
   0x1   :  { %4080 = sst [smem:[#allocation6_spill]] %s4056_s0 }
   0x2   :  { %4081 = sst [smem:[#allocation7_spill]] %s4057_s1 }
   0x3   :  { %4082 = sst [smem:[#allocation8_spill]] %s4058_s2  ;;  %s3608_s2 = smov 0  }
   0x4   :  { %4083 = sst [smem:[#allocation9_spill]] %s4059_s3 }
   0x5   :  { %4084 = sst [smem:[#allocation10_spill]] %s4060_s4 }
   0x6   :  { %4085 = sst [smem:[#allocation11_spill]] %s4061_s5 }
   0x7 LB: > { %4086 = sst [smem:[#allocation5_spill]] %s3486_s2  ;;  %s3032_s25 = sadd.s32 4294967295, %s3486_s2   ;;  %s3486_s2 = sphi %s3608_s2, %s31_s2  }
   0x8   : > { %p3036_p0 = scmp.ge.s32.totalorder %s3486_s2, 1  ;;  %p595_p1 = scmp.lt.s32.totalorder %s3486_s2, 3 }
   0xa   : > { %p596_p2 = pnand %p3036_p0, %p595_p1 }
   0xb   : > { %p657_p3 = scmp.lt.s32.totalorder (!%p596_p2), %s3032_s25, 1  ;;  %v3488_v0 = vmov (!%p596_p2), 0.0   ;;  %s4087_s3 = sld [smem:[#allocation10_spill]] (!%p596_p2)  ;;  %vm3489_vm0 = vmmov (!%p596_p2), 0   ;;  %v3490_v2 = vmov (!%p596_p2), 0   ;;  %vm680_vm1 = vcmask (!%p596_p2), 1043456  }
   0xc   : > { %599 = sbr.rel (%p596_p2) target bundleno = 3618 (0xe22), region = 104  ;;  %3197 = vmatprep.subr.bf16.mxu0 (!%p596_p2), %v3488_v0  ;;  %3203 = vmatprep.subr.bf16.mxu1 (!%p596_p2), %v3488_v0  ;;  %s4088_s4 = sld [smem:[#allocation7_spill]] (!%p596_p2)  ;;  %vm676_vm2 = vcmask (!%p596_p2), 64512   ;;  %v3389_v12 = vld [vmem:[%s4062_s6] sm:$0xff] (!%p596_p2)   ;;  %v3391_v14 = vld [vmem:[%s4062_s6 + $0x8] sm:$0xff] (!%p596_p2)   ;;  %vm794_vm3 = vcmask (!%p596_p2), 261120  }
   0xd   : > { %3199 = vmatprep.mubr.msk.bf16.mxu0 (!%p596_p2), %vm3489_vm0, %v3488_v0  ;;  %3205 = vmatprep.mubr.msk.bf16.mxu1 (!%p596_p2), %vm3489_vm0, %v3488_v0  ;;  %s4089_s23 = sld [smem:[#allocation6_spill]] (!%p596_p2)  ;;  %s4090_s26 = sld [smem:[#allocation9_spill]] (!%p596_p2)  ;;  %v3053_v15 = vld [vmem:[%s4066_s10 + $0x1] ss:$0 sm:$0xff] (!%p596_p2)  ;;  %v3068_v17 = vld [vmem:[%s4065_s9 + $0x2] ss:$0 sm:$0xff] (!%p596_p2) }
   0xe   : > { %3387 = vset.pattern.permute.xlu0 (!%p596_p2), %v3490_v2  ;;  %s4091_s2 = sld [smem:[#allocation8_spill]] (!%p596_p2)  ;;  %s4092_s0 = sld [smem:[#allocation11_spill]] (!%p596_p2)  ;;  %v3063_v16 = vld [vmem:[%s4065_s9 + $0x1] ss:$0 sm:$0xff] (!%p596_p2)  ;;  %v3073_v18 = vld [vmem:[%s4065_s9 + $0x3] ss:$0 sm:$0xff] (!%p596_p2) }
   0xf   : > { %s3492_s5 = smov (!%p596_p2), 32   ;;  %v3055_v19 = vld [vmem:[%s4066_s10 + $0x2] ss:$0 sm:$0xff] (!%p596_p2)  ;;  %v3393_v33 = vld [vmem:[%s4063_s7 + $0x8] sm:$0xff] (!%p596_p2)   ;;  %vm895_vm4 = vcmask (!%p596_p2), 523264   ;;  %s3494_s29 = smov (!%p596_p2), 96  }
  0x10   : > { %v3392_v31 = vld [vmem:[%s4063_s7] sm:$0xff] (!%p596_p2)   ;;  %vm956_vm5 = vcmask (!%p596_p2), 130048   ;;  %vm2526_vm6 = vcmask (!%p596_p2), 392192   ;;  %vm2529_vm7 = vcmask (!%p596_p2), 654336   ;;  %vm2531_vm8 = vcmask (!%p596_p2), 785408  }
  0x11   : > { %v770_v1 = vld [vmem:[%s4087_s3] sm:$0xff] (!%p596_p2)  ;;  %vm2533_vm9 = vcmask (!%p596_p2), 916480  }
  0x12   : > { %773 = vperm.xlu0 (!%p596_p2), %3387, %v770_v1   ;;  %v3083_v49 = vld [vmem:[%s4065_s9 + $0x5] ss:$0 sm:$0xff] (!%p596_p2)  ;;  %v3078_v50 = vld [vmem:[%s4065_s9 + $0x4] ss:$0 sm:$0xff] (!%p596_p2) }
  0x13   : > { %s4095_s25 = smov (!%p657_p3, %s3032_s25), 1  ;;  %v674_v7 = vld [vmem:[%s4090_s26] sm:$0xf]  ;;  %s3491_s26 = smov 16  }
  0x14   : > { %s3625_s28 = sshll.u32 %s4095_s25, 3  ;;  %v672_v8 = vld [vmem:[%s4091_s2] sm:$0xf]  ;;  %v3390_v13 = vld [vmem:[%s4092_s0 + $0x8] sm:$0xff]   ;;  %989 = vrot.lane.b32.xlu1 %v3053_v15, %s3491_s26  ;;  %s3495_s2 = smov 112  }
  0x15   : > { %s664_s30 = scalar_lea.vmem %s4088_s4, %s3625_s28  ;;  %s660_s1 = scalar_lea.vmem %s4089_s23, %s3625_s28  ;;  %v3388_v11 = vld [vmem:[%s4092_s0] sm:$0xff]  }
  0x16   : > { %v671_v3 = vld [vmem:[%s664_s30] sm:$0xff]  ;;  %1227 = vrot.lane.b32.xlu0 %v3063_v16, %s3491_s26  ;;  %s3496_s4 = smov 80   ;;  %s3497_s30 = smov 64  }
  0x17   : > { %v670_v4 = vld [vmem:[%s660_s1] sm:$0xff]  ;;  %v675_v5 = vpack.c.bf16 %v671_v3, %v671_v3  ;;  %s3493_s1 = smov 48  }
  0x18   : > { %v673_v6 = vpack.c.bf16 %v670_v4, %v670_v4  ;;  %1407 = vrot.lane.b32.xlu1 %v3068_v17, %s3492_s5  ;;  %v3093_v16 = vld [vmem:[%s4065_s9 + $0x7] ss:$0 sm:$0xff] }
  0x19   : > { %v682_v9 = vsel %vm680_vm1, %v675_v5, 0 }
  0x1a   : > { %v728_v10 = vsel %vm680_vm1, %v673_v6, 0  ;;  %3198 = vmatpush3.bf16.msra.mxu0 %v682_v9  ;;  %1596 = vrot.lane.b32.xlu0 %v3073_v18, %s3493_s1 }
  0x1b   : > { %3204 = vmatpush3.bf16.msra.mxu1 %v728_v10  ;;  %3209 = vmatprep.subr.bf16.mxu0 %v3488_v0 }
  0x1c   : > { %3217 = vmatprep.subr.bf16.mxu1 %v3488_v0  ;;  %1009 = vrot.lane.b32.xlu1 %v3055_v19, %s3492_s5 }
  0x1d   : > { %3200 = vmatmul.mubr.msk.bf16.vlgmr.msra.gmra.mrb[0].mxu0 %vm676_vm2, %v674_v7 }
  0x1e   : > { %3206 = vmatmul.mubr.msk.bf16.vlgmr.msra.gmra.mrb[0].mxu1 %vm676_vm2, %v672_v8  ;;  %3213 = vmatprep.mubr.msk.bf16.mxu0 %vm3489_vm0, %v3488_v0 }
  0x1f   : > { %3221 = vmatprep.mubr.msk.bf16.mxu1 %vm3489_vm0, %v3488_v0  ;;  %3210 = vmatpush3.bf16.msra.mxu0 %v3388_v11  ;;  %v3088_v11 = vld [vmem:[%s4065_s9 + $0x6] ss:$0 sm:$0xff] }
  0x20   : > { %3218 = vmatpush3.bf16.msra.mxu1 %v3389_v12  ;;  %3211 = vmatprep.subr.bf16.mxu0 %v3488_v0  ;;  %v3057_v12 = vld [vmem:[%s4066_s10 + $0x3] ss:$0 sm:$0xff] }
  0x21   : > { %3219 = vmatprep.subr.bf16.mxu1 %v3488_v0 }
  0x23   : > { %3212 = vmatpush3.bf16.msra.mxu0 %v3390_v13 }
  0x24   : > { %3220 = vmatpush3.bf16.msra.mxu1 %v3391_v14  ;;  %3225 = vmatprep.subr.bf16.mxu0 %v3488_v0 }
  0x25   : > { %3233 = vmatprep.subr.mxu1 %v3488_v0 }
  0x86   : > { %v3739_v51 = vpop.permute.xlu1 %989 }
  0x8a   : > { %v3741_v52 = vpop.permute.xlu1 %1407 }
  0x8e   : > { %v3745_v54 = vpop.permute.xlu1 %1009 }
  0x91   : > { %v774_v20 = vpop.permute.xlu0 %773 }
  0x95   : > { %v3743_v53 = vpop.permute.xlu0 %1227 }
  0x99   : > { %v3747_v55 = vpop.permute.xlu0 %1596 }
  0xf0   : > { %v718_v21 = vpop.f32.mrb[0].mxu0 }
  0xf1   : > { %v764_v22 = vpop.f32.mrb[0].mxu1  ;;  %v3201_v24 = vpop.f32.mrb[1].mxu0 }
  0xf2   : > { %v765_v23 = vadd.f32 %v764_v22, %v718_v21  ;;  %v3207_v25 = vpop.f32.mrb[1].mxu1  ;;  %v721_v26 = vpop.f32.mrb[2].mxu0 }
  0xf3   : > { %v767_v27 = vpop.f32.mrb[2].mxu1  ;;  %v3202_v29 = vpop.f32.mrb[3].mxu0 }
  0xf4   : > { %v776_v28 = vadd.f32 %v774_v20, %v765_v23  ;;  %v3208_v30 = vpop.f32.mrb[3].mxu1 }
  0xf6   : > { %v777_v32 = vpack.c.bf16 %v776_v28, %v776_v28 }
  0xf8   : > { %3214 = vmatmul.mubr.msk.bf16.vlgmr.msra.gmra.mrb[4].mxu0 %vm794_vm3, %v777_v32  ;;  %3222 = vmatmul.mubr.msk.bf16.vlgmr.msra.gmra.mrb[4].mxu1 %vm794_vm3, %v777_v32 }
  0xf9   : > { %3226 = vmatpush3.bf16.msra.mxu0 %v3392_v31  ;;  %3229 = vmatprep.mubr.msk.bf16.mxu0 %vm3489_vm0, %v3488_v0 }
  0xfa   : > { %3227 = vmatprep.subr.bf16.mxu0 %v3488_v0  ;;  %3235 = vmatprep.mubr.msk.f32.mxu1 %vm3489_vm0, %v3488_v0 }
  0xfd   : > { %3228 = vmatpush3.bf16.msra.mxu0 %v3393_v33 }
  0xfe   : > { %3243 = vmatprep.subr.mxu0 %v3488_v0 }
 0x100   : > { %3230 = vmatmul.mubr.msk.bf16.vlgmr.msra.gmra.mrb[8].mxu0 %vm794_vm3, %v777_v32 }
 0x101   : > { %3245 = vmatprep.mubr.msk.f32.mxu0 %vm3489_vm0, %v3488_v0 }
 0x1cb   : > { %v3702_v34 = vpop.f32.mrb[4].mxu0  ;;  %v889_v35 = vpop.f32.mrb[4].mxu1 }
 0x1cc   : > { %v3706_v36 = vmul.f32 %v3702_v34, %v3702_v34  ;;  %896 = vst.msk [vmem:[#allocation3] sm:$0xff] %vm895_vm4, %v889_v35  ;;  %v3215_v37 = vpop.f32.mrb[5].mxu0  ;;  %v3223_v38 = vpop.f32.mrb[5].mxu1 }
 0x1cd   : > { %v835_v39 = vpop.f32.mrb[6].mxu0  ;;  %v892_v40 = vpop.f32.mrb[6].mxu1 }
 0x1ce   : > { %1391 = vrot.lane.b32.xlu1 %v3706_v36, %s3494_s29  ;;  %1211 = vrot.lane.b32.xlu0 %v3706_v36, %s3495_s2  ;;  %v3216_v41 = vpop.f32.mrb[7].mxu0  ;;  %v3224_v42 = vpop.f32.mrb[7].mxu1  ;;  %v1035_v17 = vsel %vm956_vm5, %v3706_v36, 0.0 }
 0x1d2   : > { %1948 = vrot.lane.b32.xlu1 %v3706_v36, %s3493_s1  ;;  %1580 = vrot.lane.b32.xlu0 %v3706_v36, %s3496_s4 }
 0x1d3   : > { %v947_v43 = vpop.f32.mrb[8].mxu0  ;;  %v3718_v46 = vld [vmem:[#allocation3] sm:$0xff] }
 0x1d4   : > { %953 = vst.msk [vmem:[#allocation4] sm:$0xff] %vm895_vm4, %v947_v43  ;;  %v3231_v44 = vpop.f32.mrb[9].mxu0  ;;  %v955_v48 = vmul.f32 %v3718_v46, %v3718_v46 }
 0x1d5   : > { %v950_v45 = vpop.f32.mrb[10].mxu0 }
 0x1d6   : > { %2128 = vrot.lane.b32.xlu1 %v3706_v36, %s3492_s5  ;;  %1760 = vrot.lane.b32.xlu0 %v3706_v36, %s3497_s30  ;;  %v3232_v47 = vpop.f32.mrb[11].mxu0  ;;  %v957_v15 = vsel %vm956_vm5, %v955_v48, 0.0 }
 0x1da   : > { %2316 = vrot.lane.b32.xlu0 %v3706_v36, %s3491_s26  ;;  %973 = vrot.lane.b32.xlu1 %v955_v48, %s3495_s2 }
 0x1de   : > { %1013 = vrot.lane.b32.xlu0 %v955_v48, %s3496_s4  ;;  %993 = vrot.lane.b32.xlu1 %v955_v48, %s3494_s29 }
 0x1e2   : > { %1964 = vrot.lane.b32.xlu1 %v3083_v49, %s3496_s4  ;;  %1776 = vrot.lane.b32.xlu0 %v3078_v50, %s3497_s30 }
 0x240   : > { %v1392_v56 = vpop.permute.xlu1 %1391  ;;  %v1212_v57 = vpop.permute.xlu0 %1211 }
 0x241   : > { %v1394_v58 = vsel %vm956_vm5, %v1392_v56, 0.0  ;;  %v1214_v59 = vsel %vm956_vm5, %v1212_v57, 0.0 }
 0x242   : > { %1395 = vadd.xlane.f32.xlu0 %v1394_v58  ;;  %1215 = vadd.xlane.f32.xlu1 %v1214_v59 }
 0x244   : > { %v1949_v60 = vpop.permute.xlu1 %1948  ;;  %v1581_v61 = vpop.permute.xlu0 %1580 }
 0x245   : > { %v1951_v62 = vsel %vm956_vm5, %v1949_v60, 0.0  ;;  %v1583_v63 = vsel %vm956_vm5, %v1581_v61, 0.0 }
 0x246   : > { %1952 = vadd.xlane.f32.xlu0 %v1951_v62  ;;  %1584 = vadd.xlane.f32.xlu1 %v1583_v63 }
 0x248   : > { %v2129_v1 = vpop.permute.xlu1 %2128  ;;  %v1761_v2 = vpop.permute.xlu0 %1760 }
 0x249   : > { %v2131_v3 = vsel %vm956_vm5, %v2129_v1, 0.0  ;;  %v1763_v4 = vsel %vm956_vm5, %v1761_v2, 0.0 }
 0x24a   : > { %2132 = vadd.xlane.f32.xlu0 %v2131_v3  ;;  %1764 = vadd.xlane.f32.xlu1 %v1763_v4 }
 0x24c   : > { %v2317_v5 = vpop.permute.xlu0 %2316  ;;  %v974_v6 = vpop.permute.xlu1 %973 }
 0x24d   : > { %v2319_v7 = vsel %vm956_vm5, %v2317_v5, 0.0  ;;  %v976_v8 = vsel %vm956_vm5, %v974_v6, 0.0 }
 0x24e   : > { %2320 = vadd.xlane.f32.xlu1 %v2319_v7  ;;  %977 = vadd.xlane.f32.xlu0 %v976_v8 }
 0x250   : > { %v994_v9 = vpop.permute.xlu1 %993  ;;  %v1014_v13 = vpop.permute.xlu0 %1013 }
 0x251   : > { %v996_v10 = vsel %vm956_vm5, %v994_v9, 0.0  ;;  %v1016_v14 = vsel %vm956_vm5, %v1014_v13, 0.0  ;;  %v3051_v13 = vld [vmem:[%s4066_s10] ss:$0 sm:$0xff] }
 0x252   : > { %997 = vadd.xlane.f32.xlu0 %v996_v10 }
 0x254   : > { %v1965_v18 = vpop.permute.xlu1 %1964  ;;  %v1777_v19 = vpop.permute.xlu0 %1776 }
 0x25f   : > { %2144 = vrot.lane.b32.xlu1 %v3088_v11, %s3494_s29 }
 0x268   : > { %1029 = vrot.lane.b32.xlu0 %v3057_v12, %s3493_s1 }
 0x283   : > { %1017 = vadd.xlane.f32.xlu1 %v1016_v14 }
 0x287   : > { %958 = vadd.xlane.f32.xlu0 %v957_v15 }
 0x294   : > { %2332 = vrot.lane.b32.xlu1 %v3093_v16, %s3495_s2 }
 0x2b8   : > { %1036 = vadd.xlane.f32.xlu1 %v1035_v17 }
 0x2cf   : > { %v1396_v20 = vpop.xlane.xlu0 %1395  ;;  %v1216_v21 = vpop.xlane.xlu1 %1215 }
 0x2d0   : > { %v1397_v22 = vadd.f32 1e-12, %v1396_v20  ;;  %v1217_v23 = vadd.f32 1e-12, %v1216_v21 }
 0x2d2   : > { %3414 = vrsqrt.f32 %v1397_v22 }
 0x2d3   : > { %3416 = vrsqrt.f32 %v1217_v23  ;;  %v1953_v24 = vpop.xlane.xlu0 %1952  ;;  %v1585_v25 = vpop.xlane.xlu1 %1584 }
 0x2d4   : > { %v1586_v26 = vadd.f32 1e-12, %v1585_v25  ;;  %v1954_v35 = vadd.f32 1e-12, %v1953_v24  ;;  %v3815_v24 = vld [vmem:[#allocation4] sm:$0xff] }
 0x2d6   : > { %3418 = vrsqrt.f32 %v1586_v26 }
 0x2d7   : > { %v2133_v27 = vpop.xlane.xlu0 %2132  ;;  %v1765_v28 = vpop.xlane.xlu1 %1764 }
 0x2d8   : > { %v1766_v29 = vadd.f32 1e-12, %v1765_v28  ;;  %v2134_v42 = vadd.f32 1e-12, %v2133_v27 }
 0x2da   : > { %3420 = vrsqrt.f32 %v1766_v29 }
 0x2db   : > { %v978_v30 = vpop.xlane.xlu0 %977  ;;  %v2321_v61 = vpop.xlane.xlu1 %2320 }
 0x2dc   : > { %v3415_v31 = vpop.eup %3414  ;;  %v979_v32 = vadd.f32 1e-12, %v978_v30  ;;  %v2322_v4 = vadd.f32 1e-12, %v2321_v61 }
 0x2dd   : > { %v3417_v33 = vpop.eup %3416  ;;  %v1399_v40 = vmul.f32 %v3415_v31, %v3702_v34 }
 0x2de   : > { %3422 = vrsqrt.f32 %v979_v32  ;;  %v1219_v36 = vmul.f32 %v3417_v33, %v3702_v34 }
 0x2df   : > { %v998_v37 = vpop.xlane.xlu0 %997  ;;  %3424 = vrsqrt.f32 %v1954_v35  ;;  %v1410_v43 = vmul.f32 %v3741_v52, %v1399_v40 }
 0x2e0   : > { %v999_v38 = vadd.f32 1e-12, %v998_v37  ;;  %v1230_v39 = vmul.f32 %v3743_v53, %v1219_v36  ;;  %v3419_v41 = vpop.eup %3418 }
 0x2e1   : > { %v1588_v44 = vmul.f32 %v3419_v41, %v3702_v34 }
 0x2e2   : > { %3426 = vrsqrt.f32 %v999_v38  ;;  %1232 = vrot.lane.b32.xlu0 %v1230_v39, %s3495_s2 }
 0x2e3   : > { %3428 = vrsqrt.f32 %v2134_v42  ;;  %v1599_v48 = vmul.f32 %v3747_v55, %v1588_v44  ;;  %v1030_v2 = vpop.permute.xlu0 %1029 }
 0x2e4   : > { %v3421_v45 = vpop.eup %3420 }
 0x2e5   : > { %v1768_v49 = vmul.f32 %v3421_v45, %v3702_v34 }
 0x2e6   : > { %1412 = vrot.lane.b32.xlu0 %v1410_v43, %s3494_s29 }
 0x2e7   : > { %v1779_v52 = vmul.f32 %v1777_v19, %v1768_v49 }
 0x2e8   : > { %v3423_v47 = vpop.eup %3422 }
 0x2e9   : > { %v981_v50 = vmul.f32 %v3423_v47, %v3718_v46  ;;  %v3425_v53 = vpop.eup %3424 }
 0x2ea   : > { %1601 = vrot.lane.b32.xlu0 %v1599_v48, %s3496_s4  ;;  %v1956_v55 = vmul.f32 %v3425_v53, %v3702_v34 }
 0x2eb   : > { %v992_v56 = vmul.f32 %v3739_v51, %v981_v50  ;;  %v2145_v51 = vpop.permute.xlu1 %2144 }
 0x2ec   : > { %v3427_v57 = vpop.eup %3426  ;;  %v1967_v63 = vmul.f32 %v1965_v18, %v1956_v55 }
 0x2ed   : > { %1415 = vrot.lane.b32.xlu1 %v992_v56, %s3495_s2  ;;  %v1001_v58 = vmul.f32 %v3427_v57, %v3718_v46  ;;  %v3429_v60 = vpop.eup %3428 }
 0x2ee   : > { %1781 = vrot.lane.b32.xlu0 %v1779_v52, %s3497_s30  ;;  %v2136_v62 = vmul.f32 %v3429_v60, %v3702_v34 }
 0x2ef   : > { %v1012_v59 = vmul.f32 %v3745_v54, %v1001_v58 }
 0x2f0   : > { %v2147_v1 = vmul.f32 %v2145_v51, %v2136_v62 }
 0x2f1   : > { %1784 = vrot.lane.b32.xlu1 %v1012_v59, %s3494_s29 }
 0x2f5   : > { %1969 = vrot.lane.b32.xlu1 %v1967_v63, %s3493_s1 }
 0x2f9   : > { %2149 = vrot.lane.b32.xlu1 %v2147_v1, %s3492_s5 }
 0x310   : > { %v1018_v3 = vpop.xlane.xlu1 %1017 }
 0x311   : > { %v1019_v5 = vadd.f32 1e-12, %v1018_v3 }
 0x313   : > { %3430 = vrsqrt.f32 %v1019_v5 }
 0x314   : > { %v959_v54 = vpop.xlane.xlu0 %958  ;;  %3432 = vrsqrt.f32 %v2322_v4  ;;  %v2333_v12 = vpop.permute.xlu1 %2332 }
 0x315   : > { %v960_v6 = vadd.f32 1e-12, %v959_v54 }
 0x317   : > { %3434 = vrsqrt.f32 %v960_v6 }
 0x31d   : > { %v3431_v7 = vpop.eup %3430 }
 0x31e   : > { %v1021_v8 = vmul.f32 %v3431_v7, %v3718_v46  ;;  %v3433_v9 = vpop.eup %3432 }
 0x31f   : > { %v2324_v14 = vmul.f32 %v3433_v9, %v3702_v34 }
 0x320   : > { %v1032_v10 = vmul.f32 %v1030_v2, %v1021_v8 }
 0x321   : > { %v3435_v11 = vpop.eup %3434  ;;  %v2335_v16 = vmul.f32 %v2333_v12, %v2324_v14 }
 0x322   : > { %v962_v15 = vmul.f32 %v3435_v11, %v3718_v46  ;;  %2152 = vrot.lane.b32.xlu0 %v1032_v10, %s3496_s4  ;;  %v3058_v46 = vld [vmem:[%s4065_s9] ss:$0 sm:$0xff] }
 0x324   : > { %v970_v17 = vmul.f32 %v3051_v13, %v962_v15 }
 0x326   : > { %2337 = vrot.lane.b32.xlu0 %v2335_v16, %s3491_s26  ;;  %3234 = vmatpush3.xpose.msk.msra.mxu1 %vm956_vm5, %v970_v17 }
 0x327   : > { %3244 = vmatpush3.xpose.msk.msra.mxu0 %vm956_vm5, %v970_v17  ;;  %3238 = vmatprep.subr.mxu1 %v3488_v0 }
 0x328   : > { %3253 = vmatprep.subr.mxu0 %v3488_v0 }
 0x345   : > { %v1037_v18 = vpop.xlane.xlu1 %1036 }
 0x346   : > { %v1038_v19 = vadd.f32 1e-12, %v1037_v18 }
 0x348   : > { %3436 = vrsqrt.f32 %v1038_v19 }
 0x352   : > { %v3437_v20 = vpop.eup %3436 }
 0x353   : > { %v1040_v21 = vmul.f32 %v3437_v20, %v3702_v34 }
 0x354   : > { %v1233_v22 = vpop.permute.xlu0 %1232 }
 0x355   : > { %3246 = vmatmul.mubr.msk.f32.vlgmr.msra.gmra.mrb[12].mxu0 %vm956_vm5, %v1233_v22  ;;  %v1048_v23 = vmul.f32 %v3058_v46, %v1040_v21 }
 0x356   : > { %3255 = vmatprep.mubr.msk.f32.mxu0 %vm3489_vm0, %v3488_v0 }
 0x357   : > { %3236 = vmatmul.mubr.msk.f32.vlgmr.msra.gmra.mrb[8].mxu1 %vm956_vm5, %v1048_v23 }
 0x358   : > { %3239 = vmatpush3.msra.mxu1 %v3815_v24  ;;  %3240 = vmatprep.mubr.msk.f32.mxu1 %vm3489_vm0, %v3488_v0  ;;  %v1413_v25 = vpop.permute.xlu0 %1412 }
 0x359   : > { %3248 = vmatprep.subr.mxu1 %v3488_v0 }
 0x35c   : > { %v1602_v26 = vpop.permute.xlu0 %1601 }
 0x35f   : > { %v1416_v34 = vpop.permute.xlu1 %1415 }
 0x360   : > { %3254 = vmatpush3.xpose.msk.msra.mxu0 %vm956_vm5, %v1416_v34  ;;  %v1782_v28 = vpop.permute.xlu0 %1781 }
 0x361   : > { %3263 = vmatprep.subr.mxu0 %v3488_v0 }
 0x363   : > { %3256 = vmatmul.mubr.msk.f32.vlgmr.msra.gmra.mrb[14].mxu0 %vm956_vm5, %v1413_v25  ;;  %v1785_v27 = vpop.permute.xlu1 %1784 }
 0x364   : > { %3264 = vmatpush3.xpose.msk.msra.mxu0 %vm956_vm5, %v1416_v34  ;;  %3265 = vmatprep.mubr.msk.f32.mxu0 %vm3489_vm0, %v3488_v0 }
 0x365   : > { %3273 = vmatprep.subr.mxu0 %v3488_v0 }
 0x367   : > { %3266 = vmatmul.mubr.msk.f32.vlgmr.msra.gmra.mrb[16].mxu0 %vm956_vm5, %v1602_v26  ;;  %v1970_v29 = vpop.permute.xlu1 %1969 }
 0x368   : > { %3274 = vmatpush3.xpose.msk.msra.mxu0 %vm956_vm5, %v1785_v27  ;;  %3275 = vmatprep.mubr.msk.f32.mxu0 %vm3489_vm0, %v3488_v0 }
 0x369   : > { %3283 = vmatprep.subr.mxu0 %v3488_v0 }
 0x36b   : > { %3276 = vmatmul.mubr.msk.f32.vlgmr.msra.gmra.mrb[18].mxu0 %vm956_vm5, %v1782_v28  ;;  %v2150_v31 = vpop.permute.xlu1 %2149 }
 0x36c   : > { %3284 = vmatpush3.xpose.msk.msra.mxu0 %vm956_vm5, %v1785_v27  ;;  %3285 = vmatprep.mubr.msk.f32.mxu0 %vm3489_vm0, %v3488_v0 }
 0x36d   : > { %3293 = vmatprep.subr.mxu0 %v3488_v0 }
 0x36f   : > { %3286 = vmatmul.mubr.msk.f32.vlgmr.msra.gmra.mrb[20].mxu0 %vm956_vm5, %v1970_v29 }
 0x370   : > { %3295 = vmatprep.mubr.msk.f32.mxu0 %vm3489_vm0, %v3488_v0 }
 0x394   : > { %v2153_v30 = vpop.permute.xlu0 %2152 }
 0x395   : > { %3294 = vmatpush3.xpose.msk.msra.mxu0 %vm956_vm5, %v2153_v30 }
 0x396   : > { %3303 = vmatprep.subr.mxu0 %v3488_v0 }
 0x398   : > { %3296 = vmatmul.mubr.msk.f32.vlgmr.msra.gmra.mrb[22].mxu0 %vm956_vm5, %v2150_v31  ;;  %v2338_v32 = vpop.permute.xlu0 %2337 }
 0x399   : > { %3304 = vmatpush3.xpose.msk.msra.mxu0 %vm956_vm5, %v2153_v30  ;;  %3305 = vmatprep.mubr.msk.f32.mxu0 %vm3489_vm0, %v3488_v0 }
 0x39a   : > { %3313 = vmatprep.subr.bf16.mxu0 %v3488_v0 }
 0x39c   : > { %3306 = vmatmul.mubr.msk.f32.vlgmr.msra.gmra.mrb[24].mxu0 %vm956_vm5, %v2338_v32 }
 0x39d   : > { %3329 = vmatprep.mubr.msk.bf16.mxu0 %vm3489_vm0, %v3488_v0 }
 0x428   : > { %v1302_v33 = vpop.f32.mrb[12].mxu0 }
 0x429   : > { %v1306_v35 = vmul.f32 10.0, %v1302_v33  ;;  %v3247_v36 = vpop.f32.mrb[13].mxu0 }
 0x42a   : > { %v1121_v37 = vpop.f32.mrb[8].mxu1 }
 0x42b   : > { %v1125_v38 = vmul.f32 10.0, %v1121_v37  ;;  %v1307_v39 = vsel %vm676_vm2, %v1306_v35, -inf  ;;  %v3237_v40 = vpop.f32.mrb[9].mxu1 }
 0x42c   : > { %1308 = vmax.xlane.f32.xlu0 %v1307_v39 }
 0x42d   : > { %v1126_v41 = vsel %vm676_vm2, %v1125_v38, -inf }
 0x42e   : > { %1127 = vmax.xlane.f32.xlu1 %v1126_v41 }
 0x436   : > { %v1487_v42 = vpop.f32.mrb[14].mxu0 }
 0x437   : > { %v1491_v43 = vmul.f32 10.0, %v1487_v42  ;;  %v3257_v44 = vpop.f32.mrb[15].mxu0 }
 0x439   : > { %v1492_v45 = vsel %vm676_vm2, %v1491_v43, -inf }
 0x43a   : > { %1493 = vmax.xlane.f32.xlu0 %v1492_v45  ;;  %v1671_v47 = vpop.f32.mrb[16].mxu0 }
 0x43b   : > { %v1675_v48 = vmul.f32 10.0, %v1671_v47  ;;  %v3267_v49 = vpop.f32.mrb[17].mxu0 }
 0x43d   : > { %v1676_v50 = vsel %vm676_vm2, %v1675_v48, -inf }
 0x43e   : > { %v1856_v53 = vpop.f32.mrb[18].mxu0  ;;  %1677 = vmax.xlane.f32.xlu1 %v1676_v50 }
 0x43f   : > { %v1860_v56 = vmul.f32 10.0, %v1856_v53  ;;  %v3277_v57 = vpop.f32.mrb[19].mxu0 }
 0x441   : > { %v1861_v52 = vsel %vm676_vm2, %v1860_v56, -inf }
 0x442   : > { %1862 = vmax.xlane.f32.xlu0 %v1861_v52  ;;  %v2039_v58 = vpop.f32.mrb[20].mxu0 }
 0x443   : > { %v2043_v59 = vmul.f32 10.0, %v2039_v58  ;;  %v3287_v55 = vpop.f32.mrb[21].mxu0 }
 0x445   : > { %v2044_v60 = vsel %vm676_vm2, %v2043_v59, -inf }
 0x446   : > { %2045 = vmax.xlane.f32.xlu1 %v2044_v60 }
 0x46b   : > { %v2224_v61 = vpop.f32.mrb[22].mxu0 }
 0x46c   : > { %v2228_v62 = vmul.f32 10.0, %v2224_v61  ;;  %v3297_v63 = vpop.f32.mrb[23].mxu0 }
 0x46e   : > { %v2229_v51 = vsel %vm676_vm2, %v2228_v62, -inf }
 0x46f   : > { %2230 = vmax.xlane.f32.xlu0 %v2229_v51  ;;  %v2407_v1 = vpop.f32.mrb[24].mxu0 }
 0x470   : > { %v2411_v2 = vmul.f32 10.0, %v2407_v1  ;;  %v3307_v3 = vpop.f32.mrb[25].mxu0 }
 0x472   : > { %v2412_v4 = vsel %vm676_vm2, %v2411_v2, -inf }
 0x473   : > { %2413 = vmax.xlane.f32.xlu1 %v2412_v4 }
 0x4b9   : > { %v1309_v5 = vpop.xlane.xlu0 %1308 }
 0x4ba   : > { %v1310_v54 = vsub.f32 %v1306_v35, %v1309_v5 }
 0x4bb   : > { %v1128_v6 = vpop.xlane.xlu1 %1127 }
 0x4bc   : > { %v1311_v7 = vmul.f32 1.442695, %v1310_v54  ;;  %v1129_v8 = vsub.f32 %v1125_v38, %v1128_v6 }
 0x4be   : > { %3438 = vpow2.f32 %v1311_v7  ;;  %v1130_v9 = vmul.f32 1.442695, %v1129_v8  ;;  %v3394_v8 = vld [vmem:[%s4064_s8] sm:$0xff]  }
 0x4bf   : > { %3314 = vmatpush3.bf16.msra.mxu0 %v3394_v8 }
 0x4c0   : > { %3440 = vpow2.f32 %v1130_v9  ;;  %v3395_v9 = vld [vmem:[%s4064_s8 + $0x8] sm:$0xff]   ;;  %3315 = vmatprep.subr.bf16.mxu0 %v3488_v0 }
 0x4c3   : > { %3316 = vmatpush3.bf16.msra.mxu0 %v3395_v9 }
 0x4c4   : > { %3317 = vmatprep.subr.bf16.mxu0 %v3488_v0 }
 0x4c7   : > { %v1494_v10 = vpop.xlane.xlu0 %1493 }
 0x4c8   : > { %v3439_v11 = vpop.eup %3438  ;;  %v1495_v12 = vsub.f32 %v1491_v43, %v1494_v10 }
 0x4c9   : > { %v1313_v13 = vsel %vm676_vm2, %v3439_v11, 0.0 }
 0x4ca   : > { %v3441_v14 = vpop.eup %3440  ;;  %v1496_v15 = vmul.f32 1.442695, %v1495_v12  ;;  %1314 = vadd.xlane.f32.xlu1 %v1313_v13 }
 0x4cb   : > { %v1678_v16 = vpop.xlane.xlu1 %1677  ;;  %v1132_v17 = vsel %vm676_vm2, %v3441_v14, 0.0 }
 0x4cc   : > { %3442 = vpow2.f32 %v1496_v15  ;;  %v1679_v18 = vsub.f32 %v1675_v48, %v1678_v16  ;;  %1133 = vadd.xlane.f32.xlu0 %v1132_v17  ;;  %v3397_v15 = vld [vmem:[%s4064_s8 + $0x18] sm:$0xff]   ;;  %v3398_v16 = vld [vmem:[%s4064_s8 + $0x20] sm:$0xff]   ;;  %v3399_v17 = vld [vmem:[%s4064_s8 + $0x28] sm:$0xff]  }
 0x4ce   : > { %v1680_v19 = vmul.f32 1.442695, %v1679_v18 }
 0x4cf   : > { %v1863_v20 = vpop.xlane.xlu0 %1862 }
 0x4d0   : > { %3444 = vpow2.f32 %v1680_v19  ;;  %v1864_v46 = vsub.f32 %v1860_v56, %v1863_v20  ;;  %v3400_v20 = vld [vmem:[%s4064_s8 + $0x30] sm:$0xff]  }
 0x4d2   : > { %v1865_v21 = vmul.f32 1.442695, %v1864_v46 }
 0x4d3   : > { %v2046_v22 = vpop.xlane.xlu1 %2045 }
 0x4d4   : > { %3446 = vpow2.f32 %v1865_v21  ;;  %v2047_v23 = vsub.f32 %v2043_v59, %v2046_v22  ;;  %v3401_v22 = vld [vmem:[%s4064_s8 + $0x38] sm:$0xff]  }
 0x4d6   : > { %v3443_v25 = vpop.eup %3442  ;;  %v2048_v34 = vmul.f32 1.442695, %v2047_v23 }
 0x4d7   : > { %v1498_v26 = vsel %vm676_vm2, %v3443_v25, 0.0 }
 0x4d8   : > { %3448 = vpow2.f32 %v2048_v34  ;;  %1499 = vadd.xlane.f32.xlu0 %v1498_v26 }
 0x4da   : > { %v3445_v27 = vpop.eup %3444 }
 0x4db   : > { %v1682_v28 = vsel %vm676_vm2, %v3445_v27, 0.0 }
 0x4dc   : > { %1683 = vadd.xlane.f32.xlu1 %v1682_v28 }
 0x4de   : > { %v3863_v29 = vpop.eup %3446 }
 0x4df   : > { %v1867_v30 = vsel %vm676_vm2, %v3863_v29, 0.0 }
 0x4e0   : > { %1868 = vadd.xlane.f32.xlu0 %v1867_v30 }
 0x4e2   : > { %v3867_v31 = vpop.eup %3448 }
 0x4e3   : > { %v2050_v32 = vsel %vm676_vm2, %v3867_v31, 0.0 }
 0x4e4   : > { %2051 = vadd.xlane.f32.xlu1 %v2050_v32 }
 0x4f5   : > { %1872 = vrot.lane.b32.xlu1 %v3815_v24, %s3494_s29 }
 0x4fc   : > { %v2231_v33 = vpop.xlane.xlu0 %2230 }
 0x4fd   : > { %v2232_v35 = vsub.f32 %v2228_v62, %v2231_v33 }
 0x4ff   : > { %v2233_v36 = vmul.f32 1.442695, %v2232_v35 }
 0x500   : > { %v2414_v37 = vpop.xlane.xlu1 %2413 }
 0x501   : > { %3450 = vpow2.f32 %v2233_v36  ;;  %v2415_v38 = vsub.f32 %v2411_v2, %v2414_v37 }
 0x503   : > { %v2416_v39 = vmul.f32 1.442695, %v2415_v38 }
 0x505   : > { %3452 = vpow2.f32 %v2416_v39 }
 0x50b   : > { %v3873_v40 = vpop.eup %3450 }
 0x50c   : > { %v2235_v41 = vsel %vm676_vm2, %v3873_v40, 0.0 }
 0x50d   : > { %2236 = vadd.xlane.f32.xlu0 %v2235_v41 }
 0x50f   : > { %v3877_v42 = vpop.eup %3452 }
 0x510   : > { %v2418_v43 = vsel %vm676_vm2, %v3877_v42, 0.0 }
 0x519   : > { %2419 = vadd.xlane.f32.xlu1 %v2418_v43 }
 0x523   : > { %1504 = vrot.lane.b32.xlu0 %v3815_v24, %s3495_s2 }
 0x52a   : > { %2240 = vrot.lane.b32.xlu1 %v3815_v24, %s3496_s4 }
 0x557   : > { %v1315_v44 = vpop.xlane.xlu1 %1314 }
 0x559   : > { %v1134_v45 = vpop.xlane.xlu0 %1133 }
 0x55a   : > { %3454 = vrcp.f32 %v1134_v45 }
 0x55b   : > { %3456 = vrcp.f32 %v1315_v44 }
 0x564   : > { %v3455_v47 = vpop.eup %3454 }
 0x565   : > { %v1136_v48 = vmul.f32 %v3455_v47, %v3441_v14  ;;  %v3457_v49 = vpop.eup %3456  ;;  %v1500_v53 = vpop.xlane.xlu0 %1499  ;;  %v3396_v14 = vld [vmem:[%s4064_s8 + $0x10] sm:$0xff]  }
 0x566   : > { %v1317_v50 = vmul.f32 %v3457_v49, %v3439_v11  ;;  %3458 = vrcp.f32 %v1500_v53  ;;  %3318 = vmatpush3.bf16.msra.mxu0 %v3396_v14 }
 0x567   : > { %3241 = vmatmul.mubr.msk.f32.vlgmr.msra.gmra.mrb[10].mxu1 %vm676_vm2, %v1136_v48  ;;  %3319 = vmatprep.subr.bf16.mxu0 %v3488_v0 }
 0x568   : > { %3249 = vmatpush3.msra.mxu1 %v3815_v24  ;;  %3250 = vmatprep.mubr.msk.f32.mxu1 %vm3489_vm0, %v3488_v0 }
 0x569   : > { %3258 = vmatprep.subr.mxu1 %v3488_v0  ;;  %v1684_v56 = vpop.xlane.xlu1 %1683 }
 0x56a   : > { %3460 = vrcp.f32 %v1684_v56  ;;  %3320 = vmatpush3.bf16.msra.mxu0 %v3397_v15 }
 0x56b   : > { %3251 = vmatmul.mubr.msk.f32.vlgmr.msra.gmra.mrb[12].mxu1 %vm676_vm2, %v1317_v50  ;;  %3321 = vmatprep.subr.bf16.mxu0 %v3488_v0 }
 0x56c   : > { %3260 = vmatprep.mubr.msk.f32.mxu1 %vm3489_vm0, %v3488_v0 }
 0x56d   : > { %v1869_v57 = vpop.xlane.xlu0 %1868 }
 0x56e   : > { %3462 = vrcp.f32 %v1869_v57  ;;  %3322 = vmatpush3.bf16.msra.mxu0 %v3398_v16 }
 0x56f   : > { %3323 = vmatprep.subr.bf16.mxu0 %v3488_v0 }
 0x570   : > { %v3459_v24 = vpop.eup %3458 }
 0x571   : > { %v2052_v52 = vpop.xlane.xlu1 %2051  ;;  %v1502_v59 = vmul.f32 %v3459_v24, %v3443_v25 }
 0x572   : > { %3464 = vrcp.f32 %v2052_v52  ;;  %3324 = vmatpush3.bf16.msra.mxu0 %v3399_v17 }
 0x573   : > { %3325 = vmatprep.subr.bf16.mxu0 %v3488_v0 }
 0x574   : > { %v3461_v60 = vpop.eup %3460 }
 0x575   : > { %v1686_v61 = vmul.f32 %v3461_v60, %v3445_v27  ;;  %v1873_v62 = vpop.permute.xlu1 %1872  ;;  %v3403_v60 = vld [vmem:[%s4069_s13 + $0x8] sm:$0xff]  }
 0x576   : > { %3326 = vmatpush3.bf16.msra.mxu0 %v3400_v20 }
 0x577   : > { %3327 = vmatprep.subr.bf16.mxu0 %v3488_v0 }
 0x578   : > { %v3463_v63 = vpop.eup %3462 }
 0x579   : > { %v1871_v51 = vmul.f32 %v3463_v63, %v3863_v29 }
 0x57a   : > { %3328 = vmatpush3.bf16.msra.mxu0 %v3401_v22 }
 0x57b   : > { %3361 = vmatprep.subr.bf16.mxu0 %v3488_v0 }
 0x57c   : > { %v3465_v2 = vpop.eup %3464 }
 0x57d   : > { %v2054_v3 = vmul.f32 %v3465_v2, %v3867_v31 }
 0x59a   : > { %v2237_v58 = vpop.xlane.xlu0 %2236 }
 0x59b   : > { %3466 = vrcp.f32 %v2237_v58 }
 0x59e   : > { %v1505_v55 = vpop.permute.xlu0 %1504 }
 0x59f   : > { %3259 = vmatpush3.msra.mxu1 %v1505_v55 }
 0x5a0   : > { %3261 = vmatmul.mubr.msk.f32.vlgmr.msra.gmra.mrb[14].mxu1 %vm676_vm2, %v1502_v59  ;;  %3268 = vmatprep.subr.mxu1 %v3488_v0 }
 0x5a1   : > { %3269 = vmatpush3.msra.mxu1 %v1505_v55  ;;  %3270 = vmatprep.mubr.msk.f32.mxu1 %vm3489_vm0, %v3488_v0  ;;  %v3402_v55 = vld [vmem:[%s4069_s13] sm:$0xff]  }
 0x5a2   : > { %3278 = vmatprep.subr.mxu1 %v3488_v0 }
 0x5a4   : > { %3271 = vmatmul.mubr.msk.f32.vlgmr.msra.gmra.mrb[16].mxu1 %vm676_vm2, %v1686_v61 }
 0x5a5   : > { %3279 = vmatpush3.msra.mxu1 %v1873_v62  ;;  %3280 = vmatprep.mubr.msk.f32.mxu1 %vm3489_vm0, %v3488_v0  ;;  %v3467_v5 = vpop.eup %3466 }
 0x5a6   : > { %v2420_v1 = vpop.xlane.xlu1 %2419  ;;  %3288 = vmatprep.subr.mxu1 %v3488_v0  ;;  %v2239_v54 = vmul.f32 %v3467_v5, %v3873_v40 }
 0x5a7   : > { %3468 = vrcp.f32 %v2420_v1  ;;  %v3978_v1 = vld [vmem:[%s4067_s11] ss:$0 sm:$0xff] }
 0x5a8   : > { %3281 = vmatmul.mubr.msk.f32.vlgmr.msra.gmra.mrb[18].mxu1 %vm676_vm2, %v1871_v51 }
 0x5a9   : > { %3289 = vmatpush3.msra.mxu1 %v1873_v62  ;;  %3290 = vmatprep.mubr.msk.f32.mxu1 %vm3489_vm0, %v3488_v0 }
 0x5aa   : > { %v2241_v4 = vpop.permute.xlu1 %2240  ;;  %3298 = vmatprep.subr.mxu1 %v3488_v0 }
 0x5ac   : > { %3291 = vmatmul.mubr.msk.f32.vlgmr.msra.gmra.mrb[20].mxu1 %vm676_vm2, %v2054_v3  ;;  %v3983_v3 = vld [vmem:[%s4068_s12] ss:$0 sm:$0xff] }
 0x5ad   : > { %3299 = vmatpush3.msra.mxu1 %v2241_v4  ;;  %3300 = vmatprep.mubr.msk.f32.mxu1 %vm3489_vm0, %v3488_v0 }
 0x5ae   : > { %3308 = vmatprep.subr.mxu1 %v3488_v0 }
 0x5b0   : > { %3301 = vmatmul.mubr.msk.f32.vlgmr.msra.gmra.mrb[22].mxu1 %vm676_vm2, %v2239_v54 }
 0x5b1   : > { %v3469_v6 = vpop.eup %3468  ;;  %3309 = vmatpush3.msra.mxu1 %v2241_v4  ;;  %3310 = vmatprep.mubr.msk.f32.mxu1 %vm3489_vm0, %v3488_v0 }
 0x5b2   : > { %v2422_v7 = vmul.f32 %v3469_v6, %v3877_v42  ;;  %3333 = vmatprep.subr.bf16.mxu1 %v3488_v0  ;;  %v3107_v6 = vld [vmem:[%s4070_s14] ss:$0 sm:$0xff] }
 0x5b4   : > { %3311 = vmatmul.mubr.msk.f32.vlgmr.msra.gmra.mrb[24].mxu1 %vm676_vm2, %v2422_v7 }
 0x5b5   : > { %3337 = vmatprep.mubr.msk.bf16.mxu1 %vm3489_vm0, %v3488_v0  ;;  %3334 = vmatpush3.bf16.msra.mxu1 %v3402_v55 }
 0x5b6   : > { %3335 = vmatprep.subr.bf16.mxu1 %v3488_v0 }
 0x5b9   : > { %3336 = vmatpush3.bf16.msra.mxu1 %v3403_v60 }
 0x5ba   : > { %3341 = vmatprep.subr.bf16.mxu1 %v3488_v0 }
 0x63a   : > { %v1206_v10 = vpop.f32.mrb[10].mxu1 }
 0x63b   : > { %v3242_v11 = vpop.f32.mrb[11].mxu1 }
 0x63e   : > { %v1387_v12 = vpop.f32.mrb[12].mxu1 }
 0x63f   : > { %2497 = vrot.lane.b32.xlu0 %v1387_v12, %s3491_s26  ;;  %v3252_v13 = vpop.f32.mrb[13].mxu1 }
 0x673   : > { %v1576_v18 = vpop.f32.mrb[14].mxu1 }
 0x674   : > { %2501 = vrot.lane.b32.xlu1 %v1576_v18, %s3492_s5  ;;  %v3262_v19 = vpop.f32.mrb[15].mxu1  ;;  %v3404_v18 = vld [vmem:[%s4073_s17] sm:$0xff]  }
 0x675   : > { %v3405_v19 = vld [vmem:[%s4073_s17 + $0x8] sm:$0xff]  }
 0x677   : > { %v1756_v46 = vpop.f32.mrb[16].mxu1 }
 0x678   : > { %2505 = vrot.lane.b32.xlu0 %v1756_v46, %s3493_s1  ;;  %v3272_v21 = vpop.f32.mrb[17].mxu1  ;;  %s668_s1 = scalar_lea.vmem %s4077_s21, %s3625_s28 }
 0x67b   : > { %v1944_v23 = vpop.f32.mrb[18].mxu1 }
 0x67c   : > { %2509 = vrot.lane.b32.xlu1 %v1944_v23, %s3497_s30  ;;  %v3282_v25 = vpop.f32.mrb[19].mxu1  ;;  %v3406_v23 = vld [vmem:[%s4073_s17 + $0x10] sm:$0xff]  }
 0x67d   : > { %v3407_v25 = vld [vmem:[%s4073_s17 + $0x18] sm:$0xff]  }
 0x67f   : > { %v2124_v34 = vpop.f32.mrb[20].mxu1 }
 0x680   : > { %2513 = vrot.lane.b32.xlu0 %v2124_v34, %s3496_s4  ;;  %v3292_v26 = vpop.f32.mrb[21].mxu1  ;;  %v3408_v34 = vld [vmem:[%s4073_s17 + $0x20] sm:$0xff]  }
 0x681   : > { %v3409_v26 = vld [vmem:[%s4073_s17 + $0x28] sm:$0xff]  }
 0x683   : > { %v2312_v27 = vpop.f32.mrb[22].mxu1 }
 0x684   : > { %2517 = vrot.lane.b32.xlu1 %v2312_v27, %s3494_s29  ;;  %v3302_v28 = vpop.f32.mrb[23].mxu1  ;;  %v3410_v27 = vld [vmem:[%s4073_s17 + $0x30] sm:$0xff]  }
 0x685   : > { %v3411_v28 = vld [vmem:[%s4073_s17 + $0x38] sm:$0xff]  }
 0x687   : > { %v2492_v29 = vpop.f32.mrb[24].mxu1 }
 0x688   : > { %2521 = vrot.lane.b32.xlu0 %v2492_v29, %s3495_s2  ;;  %v3312_v30 = vpop.f32.mrb[25].mxu1 }
 0x6b1   : > { %v2498_v31 = vpop.permute.xlu0 %2497 }
 0x6b2   : > { %v2524_v36 = vsel %vm956_vm5, %v1206_v10, %v2498_v31 }
 0x6e6   : > { %v2502_v32 = vpop.permute.xlu1 %2501 }
 0x6e7   : > { %v2525_v37 = vsel %vm794_vm3, %v2524_v36, %v2502_v32  ;;  %v3112_v36 = vld [vmem:[%s4072_s16] ss:$0 sm:$0xff] }
 0x6ea   : > { %v2506_v33 = vpop.permute.xlu0 %2505 }
 0x6eb   : > { %v2527_v39 = vsel %vm2526_vm6, %v2525_v37, %v2506_v33  ;;  %v3111_v33 = vld [vmem:[%s4071_s15] ss:$0 sm:$0xff] }
 0x6ee   : > { %v2510_v35 = vpop.permute.xlu1 %2509 }
 0x6ef   : > { %v2528_v41 = vsel %vm895_vm4, %v2527_v39, %v2510_v35 }
 0x6f2   : > { %v2514_v38 = vpop.permute.xlu0 %2513 }
 0x6f3   : > { %v2530_v42 = vsel %vm2529_vm7, %v2528_v41, %v2514_v38 }
 0x6f6   : > { %v2518_v40 = vpop.permute.xlu1 %2517 }
 0x6f7   : > { %v2532_v43 = vsel %vm2531_vm8, %v2530_v42, %v2518_v40  ;;  %v3113_v40 = vld [vmem:[%s4074_s18] ss:$0 sm:$0xff] }
 0x6fa   : > { %v2522_v44 = vpop.permute.xlu0 %2521 }
 0x6fb   : > { %v2534_v45 = vsel %vm2533_vm9, %v2532_v43, %v2522_v44 }
 0x6fc   : > { %v2535_v47 = vpack.c.bf16 %v2534_v45, %v2534_v45 }
 0x6fe   : > { %3330 = vmatmul.mubr.bf16.vlgmr.msra.gmra.mrb[28].mxu0 %v2535_v47 }
 0x6ff   : > { %3365 = vmatprep.mubr.msk.bf16.mxu0 %vm3489_vm0, %v3488_v0 }
 0x7d1   : > { %v2634_v48 = vpop.f32.mrb[28].mxu0 }
 0x7d2   : > { %v3331_v49 = vpop.f32.mrb[29].mxu0  ;;  %v2642_v50 = vsel %vm794_vm3, %v2634_v48, 0.0 }
 0x7d3   : > { %2643 = vadd.xlane.f32.xlu1 %v2642_v50  ;;  %v2637_v53 = vpop.f32.mrb[30].mxu0 }
 0x7d4   : > { %v3332_v56 = vpop.f32.mrb[31].mxu0 }
 0x860   : > { %v2644_v57 = vpop.xlane.xlu1 %2643 }
 0x861   : > { %v2646_v52 = vmul.f32 0.03125, %v2644_v57  ;;  %v3412_v57 = vld [vmem:[%s4075_s19] sm:$0xff]  }
 0x862   : > { %3362 = vmatpush3.bf16.msra.mxu0 %v3412_v57 }
 0x863   : > { %v2647_v58 = vsub.f32 %v2634_v48, %v2646_v52  ;;  %v3413_v52 = vld [vmem:[%s4075_s19 + $0x8] sm:$0xff]   ;;  %3363 = vmatprep.subr.bf16.mxu0 %v3488_v0 }
 0x865   : > { %v2648_v24 = vmul.f32 %v2647_v58, %v2647_v58 }
 0x866   : > { %3364 = vmatpush3.bf16.msra.mxu0 %v3413_v52 }
 0x867   : > { %v2649_v59 = vsel %vm794_vm3, %v2648_v24, 0.0 }
 0x868   : > { %2650 = vadd.xlane.f32.xlu0 %v2649_v59 }
 0x8f5   : > { %v2651_v61 = vpop.xlane.xlu0 %2650 }
 0x8f6   : > { %v2652_v62 = vmul.f32 0.03125, %v2651_v61 }
 0x8f8   : > { %v2653_v63 = vadd.f32 1e-05, %v2652_v62 }
 0x8fa   : > { %3470 = vrsqrt.f32 %v2653_v63 }
 0x904   : > { %v3471_v51 = vpop.eup %3470 }
 0x905   : > { %v2655_v2 = vmul.f32 %v3471_v51, %v2647_v58  ;;  %v3122_v51 = vld [vmem:[%s4076_s20] ss:$0 sm:$0xff] }
 0x907   : > { %v2662_v4 = vmul.f32 %v3978_v1, %v2655_v2 }
 0x909   : > { %v2669_v5 = vadd.f32 %v3983_v3, %v2662_v4 }
 0x90b   : > { %v2670_v54 = vpack.c.bf16 %v2669_v5, %v2669_v5 }
 0x90d   : > { %3338 = vmatmul.mubr.msk.bf16.vlgmr.msra.gmra.mrb[28].mxu1 %vm794_vm3, %v2670_v54 }
 0x90e   : > { %3357 = vmatprep.mubr.msk.bf16.mxu1 %vm3489_vm0, %v3488_v0  ;;  %3342 = vmatpush3.bf16.msra.mxu1 %v3404_v18 }
 0x90f   : > { %3343 = vmatprep.subr.bf16.mxu1 %v3488_v0 }
 0x912   : > { %3344 = vmatpush3.bf16.msra.mxu1 %v3405_v19 }
 0x913   : > { %3345 = vmatprep.subr.bf16.mxu1 %v3488_v0 }
 0x916   : > { %3346 = vmatpush3.bf16.msra.mxu1 %v3406_v23 }
 0x917   : > { %3347 = vmatprep.subr.bf16.mxu1 %v3488_v0 }
 0x91a   : > { %3348 = vmatpush3.bf16.msra.mxu1 %v3407_v25 }
 0x91b   : > { %3349 = vmatprep.subr.bf16.mxu1 %v3488_v0 }
 0x91e   : > { %3350 = vmatpush3.bf16.msra.mxu1 %v3408_v34 }
 0x91f   : > { %3351 = vmatprep.subr.bf16.mxu1 %v3488_v0 }
 0x922   : > { %3352 = vmatpush3.bf16.msra.mxu1 %v3409_v26 }
 0x923   : > { %3353 = vmatprep.subr.bf16.mxu1 %v3488_v0 }
 0x926   : > { %3354 = vmatpush3.bf16.msra.mxu1 %v3410_v27 }
 0x927   : > { %3355 = vmatprep.subr.bf16.mxu1 %v3488_v0 }
 0x92a   : > { %3356 = vmatpush3.bf16.msra.mxu1 %v3411_v28 }
 0x9e0   : > { %v2731_v7 = vpop.f32.mrb[28].mxu1 }
 0x9e1   : > { %v2732_v8 = vadd.f32 %v3107_v6, %v2731_v7  ;;  %v3339_v9 = vpop.f32.mrb[29].mxu1 }
 0x9e2   : > { %v2734_v10 = vpop.f32.mrb[30].mxu1 }
 0x9e3   : > { %v2737_v11 = vsub.f32 0.0, %v2732_v8  ;;  %v3340_v12 = vpop.f32.mrb[31].mxu1 }
 0x9e5   : > { %v2738_v13 = vmul.f32 1.442695, %v2737_v11 }
 0x9e7   : > { %3472 = vpow2.f32 %v2738_v13 }
 0x9f1   : > { %v3473_v14 = vpop.eup %3472 }
 0x9f2   : > { %v2740_v15 = vadd.f32 1.0, %v3473_v14 }
 0x9f4   : > { %3474 = vrcp.f32 %v2740_v15 }
 0x9fe   : > { %v3475_v16 = vpop.eup %3474 }
 0x9ff   : > { %v2743_v17 = vmul.f32 %v3475_v16, %v2732_v8 }
 0xa01   : > { %2746 = vadd.xlane.f32.xlu0 %v2743_v17 }
 0xa8e   : > { %v2747_v20 = vpop.xlane.xlu0 %2746 }
 0xa8f   : > { %v2749_v46 = vmul.f32 0.0078125, %v2747_v20 }
 0xa91   : > { %v2750_v21 = vsub.f32 %v2743_v17, %v2749_v46 }
 0xa93   : > { %v2751_v22 = vmul.f32 %v2750_v21, %v2750_v21 }
 0xa95   : > { %2752 = vadd.xlane.f32.xlu1 %v2751_v22 }
 0xb22   : > { %v2753_v29 = vpop.xlane.xlu1 %2752 }
 0xb23   : > { %v2754_v30 = vmul.f32 0.0078125, %v2753_v29 }
 0xb25   : > { %v2755_v31 = vadd.f32 1e-05, %v2754_v30 }
 0xb27   : > { %3476 = vrsqrt.f32 %v2755_v31 }
 0xb31   : > { %v3477_v32 = vpop.eup %3476 }
 0xb32   : > { %v2757_v35 = vmul.f32 %v3477_v32, %v2750_v21 }
 0xb34   : > { %v2764_v37 = vmul.f32 %v3111_v33, %v2757_v35 }
 0xb36   : > { %v2771_v38 = vadd.f32 %v3112_v36, %v2764_v37 }
 0xb38   : > { %v2772_v39 = vpack.c.bf16 %v2771_v38, %v2771_v38 }
 0xb3a   : > { %3358 = vmatmul.mubr.bf16.vlgmr.msra.gmra.mrb[32].mxu1 %v2772_v39 }
 0xc0d   : > { %v2878_v41 = vpop.f32.mrb[32].mxu1 }
 0xc0e   : > { %v2879_v42 = vadd.f32 %v3113_v40, %v2878_v41  ;;  %v3359_v43 = vpop.f32.mrb[33].mxu1 }
 0xc0f   : > { %v2881_v44 = vpop.f32.mrb[34].mxu1 }
 0xc10   : > { %v3360_v45 = vpop.f32.mrb[35].mxu1  ;;  %v2884_v47 = vsel %vm794_vm3, %v2879_v42, 0.0 }
 0xc11   : > { %2885 = vadd.xlane.f32.xlu0 %v2884_v47 }
 0xc9e   : > { %v2886_v48 = vpop.xlane.xlu0 %2885 }
 0xc9f   : > { %v2887_v49 = vmul.f32 0.03125, %v2886_v48 }
 0xca1   : > { %v2888_v50 = vsub.f32 %v2879_v42, %v2887_v49 }
 0xca3   : > { %v2889_v53 = vmul.f32 %v2888_v50, %v2888_v50 }
 0xca5   : > { %v2890_v56 = vsel %vm794_vm3, %v2889_v53, 0.0 }
 0xca6   : > { %2891 = vadd.xlane.f32.xlu1 %v2890_v56 }
 0xd33   : > { %v2892_v58 = vpop.xlane.xlu1 %2891 }
 0xd34   : > { %v2893_v24 = vmul.f32 0.03125, %v2892_v58 }
 0xd36   : > { %v2894_v59 = vadd.f32 1e-05, %v2893_v24 }
 0xd38   : > { %3478 = vrsqrt.f32 %v2894_v59 }
 0xd42   : > { %v3479_v55 = vpop.eup %3478 }
 0xd43   : > { %v2896_v60 = vmul.f32 %v3479_v55, %v2888_v50 }
 0xd45   : > { %v2897_v61 = vmul.f32 %v3978_v1, %v2896_v60 }
 0xd47   : > { %v2898_v62 = vadd.f32 %v3983_v3, %v2897_v61 }
 0xd49   : > { %v2899_v63 = vpack.c.bf16 %v2898_v62, %v2898_v62 }
 0xd4b   : > { %3366 = vmatmul.mubr.msk.bf16.vlgmr.msra.gmra.mrb[32].mxu0 %vm794_vm3, %v2899_v63 }
 0xe1e   : > { %v2960_v0 = vpop.f32.mrb[32].mxu0 }
 0xe1f   : > { %v2961_v2 = vadd.f32 %v3122_v51, %v2960_v0  ;;  %v3367_v4 = vpop.f32.mrb[33].mxu0 }
 0xe20   : > { %v2963_v5 = vpop.f32.mrb[34].mxu0 }
 0xe21   : > { %2966 = vst.msk [vmem:[%s668_s1] sm:$0xff] %vm794_vm3, %v2961_v2  ;;  %v3368_v1 = vpop.f32.mrb[35].mxu0 }
 0xe22 PF: > { %s4093_s29 = sld [smem:[#allocation5_spill]] }
 0xe28   : > { %s31_s2 = sadd.s32 1, %s4093_s29  }
 0xe29   : > { %p28_p4 = scmp.ge.s32.totalorder %s31_s2, 4  }
 0xe2b   :  { %30 = sbr.rel (!%p28_p4) target bundleno = 7 (0x7), region = 147 }

// kernel: zamba_forward.8
= control target key start
LH: loop header
LB: loop body
LE: loop exit
PB: predicated region body
PF: predicated region fallthrough
CT: control target
= control target key end

     0   :  { %s5281_s29 = smov 0   ;;  %s6104_s0 = inlined_call_operand.vmem [shape: f32[2,8,32], index: 0, kind: input, shape index: {}]   ;;  %s6105_s1 = inlined_call_operand.vmem [shape: f32[1,32], index: 1, kind: input, shape index: {}]   ;;  %s6106_s2 = inlined_call_operand.vmem [shape: bf16[32,64], index: 2, kind: input, shape index: {}]   ;;  %s6107_s3 = inlined_call_operand.vmem [shape: bf16[32,64], index: 3, kind: input, shape index: {}]   ;;  %s6108_s4 = inlined_call_operand.vmem [shape: f32[4,64], index: 4, kind: input, shape index: {}]   ;;  %s6109_s5 = inlined_call_operand.vmem [shape: f32[1,64], index: 5, kind: input, shape index: {}]   ;;  %s6110_s6 = inlined_call_operand.vmem [shape: bf16[64,40], index: 6, kind: input, shape index: {}]   ;;  %s6111_s7 = inlined_call_operand.vmem [shape: bf16[8,64], index: 7, kind: input, shape index: {}]   ;;  %s6112_s8 = inlined_call_operand.vmem [shape: f32[1,64], index: 8, kind: input, shape index: {}]   ;;  %s6113_s9 = inlined_call_operand.vmem [shape: f32[16,64], index: 9, kind: input, shape index: {}]   ;;  %s6114_s10 = inlined_call_operand.vmem [shape: f32[1,64], index: 10, kind: input, shape index: {}]   ;;  %s6115_s11 = inlined_call_operand.vmem [shape: bf16[64,32], index: 11, kind: input, shape index: {}]   ;;  %s6116_s12 = inlined_call_operand.vmem [shape: f32[1,32], index: 12, kind: input, shape index: {}]   ;;  %s6117_s13 = inlined_call_operand.vmem [shape: f32[1,32], index: 13, kind: input, shape index: {}]   ;;  %s6118_s14 = inlined_call_operand.vmem [shape: f32[2,8,32], index: 14, kind: output, shape index: {}]  }
   0x1 LB: > { %s4047_s30 = sadd.s32 4294967295, %s5104_s29   ;;  %p4051_p0 = scmp.ge.s32.totalorder %s5104_s29, 1  ;;  %s5104_s29 = sphi %s5281_s29, %s24_s29  }
   0x2   : > { %p411_p1 = scmp.lt.s32.totalorder %s5104_s29, 3 }
   0x4   : > { %p412_p2 = pnand %p4051_p0, %p411_p1 }
   0x5   : > { %p455_p3 = scmp.lt.s32.totalorder (!%p412_p2), %s4047_s30, 1  ;;  %vm522_vm0 = vcmask (!%p412_p2), 261120   ;;  %v465_v3 = vld [vmem:[%s6113_s9] sm:$0xff] (!%p412_p2)  ;;  %v466_v4 = vld [vmem:[%s6113_s9 + $0x8] sm:$0xff] (!%p412_p2)  ;;  %v5178_v8 = vmov (!%p412_p2), 0.0   ;;  %vm5179_vm1 = vmmov (!%p412_p2), 0  }
   0x6   : > { %415 = sbr.rel (%p412_p2) target bundleno = 9985 (0x2701), region = 76  ;;  %v5311_v5 = vld [vmem:[%s6114_s10] ss:$0 sm:$0xff] (!%p412_p2)  ;;  %v467_v6 = vmul.f32 (!%p412_p2), 1.442695, %v465_v3  ;;  %4312 = vmatprep.subr.bf16.mxu0 (!%p412_p2), %v5178_v8  ;;  %4320 = vmatprep.subr.bf16.mxu1 (!%p412_p2), %v5178_v8  ;;  %v4830_v11 = vld [vmem:[%s6106_s2 + $0x8] sm:$0xff] (!%p412_p2)  }
   0x7   : > { %v469_v7 = vmul.f32 (!%p412_p2), 1.442695, %v466_v4  ;;  %v4828_v9 = vld [vmem:[%s6106_s2] sm:$0xff] (!%p412_p2)   ;;  %4316 = vmatprep.mubr.msk.bf16.mxu0 (!%p412_p2), %vm5179_vm1, %v5178_v8  ;;  %4324 = vmatprep.mubr.msk.bf16.mxu1 (!%p412_p2), %vm5179_vm1, %v5178_v8  ;;  %v4831_v12 = vld [vmem:[%s6107_s3 + $0x8] sm:$0xff] (!%p412_p2)   ;;  %v4834_v27 = vld [vmem:[%s6110_s6 + $0x10] sm:$0xff] (!%p412_p2)   ;;  %vm651_vm2 = vcmask (!%p412_p2), 1042432  }
   0x8   : > { %v4829_v10 = vld [vmem:[%s6107_s3] sm:$0xff] (!%p412_p2)   ;;  %4836 = vpow2.f32 (!%p412_p2), %v467_v6  ;;  %4313 = vmatpush3.bf16.msra.mxu0 (!%p412_p2), %v4828_v9  ;;  %v4833_v26 = vld [vmem:[%s6110_s6 + $0x8] sm:$0xff] (!%p412_p2)   ;;  %v4835_v28 = vld [vmem:[%s6110_s6 + $0x18] sm:$0xff] (!%p412_p2)   ;;  %vm659_vm3 = vcmask (!%p412_p2), 1046528   ;;  %vm669_vm4 = vcmask (!%p412_p2), 1045504   ;;  %vm679_vm5 = vcmask (!%p412_p2), 1044480  }
   0x9   : > { %4321 = vmatpush3.bf16.msra.mxu1 (!%p412_p2), %v4829_v10  ;;  %4838 = vpow2.f32 (!%p412_p2), %v469_v7  ;;  %4314 = vmatprep.subr.bf16.mxu0 (!%p412_p2), %v5178_v8  ;;  %v5342_v21 = vld [vmem:[%s6105_s1] ss:$0 sm:$0xff] (!%p412_p2)  ;;  %v5370_v29 = vld [vmem:[%s6108_s4 + $0x1] ss:$0 sm:$0xff] (!%p412_p2)  ;;  %v5375_v30 = vld [vmem:[%s6108_s4 + $0x2] ss:$0 sm:$0xff] (!%p412_p2) }
   0xa   : > { %4322 = vmatprep.subr.bf16.mxu1 (!%p412_p2), %v5178_v8  ;;  %v4832_v25 = vld [vmem:[%s6110_s6] sm:$0xff] (!%p412_p2)   ;;  %vm725_vm6 = vcmask (!%p412_p2), 523264   ;;  %vm790_vm7 = vcmask (!%p412_p2), 1043456   ;;  %vm769_vm8 = vcmask (!%p412_p2), 326656   ;;  %vm786_vm9 = vcmask (!%p412_p2), 64512   ;;  %s5181_s16 = smov (!%p412_p2), 120  }
   0xb   : > { %v5380_v31 = vld [vmem:[%s6108_s4 + $0x3] ss:$0 sm:$0xff] (!%p412_p2)  ;;  %v5387_v34 = vld [vmem:[%s6108_s4] ss:$0 sm:$0xff] (!%p412_p2)  ;;  %vm776_vm10 = vcmask (!%p412_p2), 130048   ;;  %s5430_s19 = smov (!%p412_p2), 0  }
   0xc   : > { %4315 = vmatpush3.bf16.msra.mxu0 (!%p412_p2), %v4830_v11  ;;  %v5392_v40 = vld [vmem:[%s6109_s5] ss:$0 sm:$0xff] (!%p412_p2) }
   0xd   : > { %s6120_s30 = smov (!%p455_p3, %s4047_s30), 1  ;;  %4323 = vmatpush3.bf16.msra.mxu1 %v4831_v12  ;;  %4328 = vmatprep.subr.bf16.mxu0 %v5178_v8  ;;  %v785_v10 = vld [vmem:[%s6111_s7] sm:$0xf] }
   0xe   : > { %s4052_s15 = sshll.u32 %s6120_s30, 3  ;;  %4340 = vmatprep.subr.bf16.mxu1 %v5178_v8  ;;  %v792_v11 = vsel %vm790_vm7, %v785_v10, 0 }
   0xf   : > { %s458_s18 = scalar_lea.vmem %s6104_s0, %s4052_s15  ;;  %s5295_s21 = scalar_lea.vmem %s6118_s14, %s4052_s15 }
  0x10   : > { %v5297_v0 = vld [vmem:[%s458_s18] sm:$0xff]  ;;  %s5180_s15 = smov 104  }
  0x11   : > { %v521_v1 = vmul.f32 %v5297_v0, %v5297_v0 }
  0x12   : > { %v4837_v13 = vpop.eup %4836 }
  0x13   : > { %v523_v2 = vsel %vm522_vm0, %v521_v1, 0.0  ;;  %v4839_v14 = vpop.eup %4838  ;;  %v5335_v15 = vsub.f32 0.0, %v4837_v13 }
  0x14   : > { %524 = vadd.xlane.f32.xlu0 %v523_v2  ;;  %v5337_v16 = vsub.f32 0.0, %v4839_v14 }
  0xa1   : > { %v525_v17 = vpop.xlane.xlu0 %524 }
  0xa2   : > { %v527_v18 = vmul.f32 0.03125, %v525_v17 }
  0xa4   : > { %v528_v19 = vadd.f32 1e-05, %v527_v18 }
  0xa6   : > { %4840 = vrsqrt.f32 %v528_v19 }
  0xb0   : > { %v4841_v20 = vpop.eup %4840 }
  0xb1   : > { %v530_v22 = vmul.f32 %v4841_v20, %v5297_v0 }
  0xb3   : > { %v531_v23 = vmul.f32 %v5342_v21, %v530_v22 }
  0xb5   : > { %v532_v24 = vpack.c.bf16 %v531_v23, %v531_v23  ;;  %v5424_v23 = vld [vmem:[%s6112_s8] ss:$0 sm:$0xff] }
  0xb7   : > { %4317 = vmatmul.mubr.msk.bf16.vlgmr.msra.gmra.mrb[0].mxu0 %vm522_vm0, %v532_v24  ;;  %4325 = vmatmul.mubr.msk.bf16.vlgmr.msra.gmra.mrb[0].mxu1 %vm522_vm0, %v532_v24 }
  0xb8   : > { %4336 = vmatprep.mubr.msk.bf16.mxu0 %vm5179_vm1, %v5178_v8  ;;  %4342 = vmatprep.mubr.msk.bf16.mxu1 %vm5179_vm1, %v5178_v8 }
  0xb9   : > { %4329 = vmatpush3.bf16.msra.mxu0 %v4832_v25  ;;  %4341 = vmatpush3.bf16.msra.mxu1 %v792_v11 }
  0xba   : > { %4330 = vmatprep.subr.bf16.mxu0 %v5178_v8 }
  0xbd   : > { %4331 = vmatpush3.bf16.msra.mxu0 %v4833_v26 }
  0xbe   : > { %4332 = vmatprep.subr.bf16.mxu0 %v5178_v8 }
  0xc1   : > { %4333 = vmatpush3.bf16.msra.mxu0 %v4834_v27 }
  0xc2   : > { %4334 = vmatprep.subr.bf16.mxu0 %v5178_v8 }
  0xc5   : > { %4335 = vmatpush3.bf16.msra.mxu0 %v4835_v28 }
 0x18a   : > { %v586_v32 = vpop.f32.mrb[0].mxu0  ;;  %v5382_v33 = vpop.f32.mrb[0].mxu1 }
 0x18b   : > { %v649_v35 = vrot.slane %v586_v32, 5  ;;  %v4318_v36 = vpop.f32.mrb[1].mxu0  ;;  %v4326_v37 = vpop.f32.mrb[1].mxu1 }
 0x18c   : > { %v589_v38 = vpop.f32.mrb[2].mxu0  ;;  %v645_v39 = vpop.f32.mrb[2].mxu1 }
 0x18d   : > { %v652_v41 = vsel %vm651_vm2, 0.0, %v649_v35  ;;  %v656_v42 = vmul.f32 %v5370_v29, %v649_v35  ;;  %v666_v43 = vmul.f32 %v5375_v30, %v649_v35  ;;  %v676_v44 = vmul.f32 %v5380_v31, %v649_v35  ;;  %v4319_v45 = vpop.f32.mrb[3].mxu0  ;;  %v4327_v46 = vpop.f32.mrb[3].mxu1 }
 0x18e   : > { %v653_v47 = vmul.f32 %v5387_v34, %v652_v41  ;;  %v655_v48 = vmul.f32 %v5370_v29, %v652_v41  ;;  %v665_v49 = vmul.f32 %v5375_v30, %v652_v41  ;;  %v675_v50 = vmul.f32 %v5380_v31, %v652_v41 }
 0x18f   : > { %v661_v51 = vrot.slane %v656_v42, 1  ;;  %v671_v55 = vrot.slane %v666_v43, 2  ;;  %v681_v58 = vrot.slane %v676_v44, 3  ;;  %v5106_v45 = vmov 0.0  }
 0x190   : > { %v654_v52 = vadd.f32 %v5392_v40, %v653_v47  ;;  %v660_v53 = vrot.slane %v655_v48, 1  ;;  %v670_v54 = vrot.slane %v665_v49, 2  ;;  %v680_v57 = vrot.slane %v675_v50, 3 }
 0x191   : > { %v5110_v46 = vmov 0.0  }
 0x192   : > { %v662_v56 = vsel %vm659_vm3, %v660_v53, %v661_v51  ;;  %v672_v60 = vsel %vm669_vm4, %v670_v54, %v671_v55  ;;  %v682_v62 = vsel %vm679_vm5, %v680_v57, %v681_v58 }
 0x193   : > { %v664_v59 = vadd.f32 %v662_v56, %v654_v52 }
 0x195   : > { %v674_v61 = vadd.f32 %v672_v60, %v664_v59 }
 0x197   : > { %v684_v63 = vadd.f32 %v682_v62, %v674_v61 }
 0x199   : > { %v685_v1 = vsub.f32 0.0, %v684_v63 }
 0x19b   : > { %v686_v2 = vmul.f32 1.442695, %v685_v1 }
 0x19d   : > { %4842 = vpow2.f32 %v686_v2 }
 0x1a7   : > { %v4843_v3 = vpop.eup %4842 }
 0x1a8   : > { %v688_v4 = vadd.f32 1.0, %v4843_v3 }
 0x1aa   : > { %4844 = vrcp.f32 %v688_v4 }
 0x1b4   : > { %v4845_v6 = vpop.eup %4844 }
 0x1b5   : > { %v5406_v7 = vmul.f32 %v4845_v6, %v684_v63 }
 0x1b7   : > { %v692_v9 = vpack.c.bf16 %v5406_v7, %v5406_v7 }
 0x1b9   : > { %4337 = vmatmul.mubr.msk.bf16.vlgmr.msra.gmra.mrb[4].mxu0 %vm725_vm6, %v692_v9 }
 0x28c   : > { %v763_v12 = vpop.f32.mrb[4].mxu0 }
 0x28d   : > { %770 = vst.msk [vmem:[#allocation2] sm:$0xff] %vm769_vm8, %v763_v12  ;;  %v4338_v13 = vpop.f32.mrb[5].mxu0 }
 0x28e   : > { %v766_v14 = vpop.f32.mrb[6].mxu0 }
 0x28f   : > { %v4339_v17 = vpop.f32.mrb[7].mxu0 }
 0x294   : > { %v778_v18 = vld [vmem:[#allocation2] sm:$0xff] }
 0x295   : > { %780 = vrot.lane.b32.xlu1 %v778_v18, %s5180_s15  ;;  %773 = vrot.lane.b32.xlu0 %v778_v18, %s5181_s16  ;;  %v784_v19 = vpack.c.bf16 %v778_v18, %v778_v18 }
 0x297   : > { %4343 = vmatmul.mubr.msk.bf16.vlgmr.msra.gmra.mrb[4].mxu1 %vm786_vm9, %v784_v19 }
 0x307   : > { %v781_v20 = vpop.permute.xlu1 %780  ;;  %v774_v22 = vpop.permute.xlu0 %773 }
 0x308   : > { %783 = vst.msk [vmem:[#allocation6] sm:$0xff] %vm776_vm10, %v781_v20  ;;  %777 = vst.msk [vmem:[#allocation5] sm:$0xff] %vm776_vm10, %v774_v22 }
 0x36a   : > { %v828_v24 = vpop.f32.mrb[4].mxu1 }
 0x36b   : > { %v829_v25 = vadd.f32 %v5424_v23, %v828_v24  ;;  %v4344_v26 = vpop.f32.mrb[5].mxu1 }
 0x36c   : > { %v831_v27 = vpop.f32.mrb[6].mxu1 }
 0x36d   : > { %v835_v28 = vand.u32 2147483647, %v829_v25  ;;  %v4345_v32 = vpop.f32.mrb[7].mxu1  ;;  %v834_v41 = vmax.f32 %v829_v25, 0.0 }
 0x36f   : > { %v836_v35 = vsub.f32 0.0, %v835_v28 }
 0x371   : > { %v837_v36 = vmul.f32 1.442695, %v836_v35 }
 0x373   : > { %4846 = vpow2.f32 %v837_v36 }
 0x37d   : > { %v4847_v37 = vpop.eup %4846 }
 0x37e   : > { %v839_v38 = vadd.f32 1.0, %v4847_v37 }
 0x380   : > { %4848 = vlog2.f32 %v839_v38 }
 0x38a   : > { %v4849_v39 = vpop.eup %4848 }
 0x38b   : > { %v841_v42 = vmul.f32 0.6931472, %v4849_v39 }
 0x38d   : > { %v842_v43 = vadd.f32 %v841_v42, %v834_v41 }
 0x38f   : > { %843 = vst.msk [vmem:[#allocation3] sm:$0xff] %vm725_vm6, %v842_v43  ;;  %v844_v44 = vmul.f32 %v842_v43, %v5406_v7 }
 0x391   : > { %845 = vst.msk [vmem:[#allocation4] sm:$0xff] %vm725_vm6, %v844_v44 }
 0x392 LB: >> { %v5182_v47 = vmov 0   ;;  %s858_s20 = scalar_lea.vmem [#allocation5], %s5116_s19  ;;  %v5183_v51 = vmov 0.0|0.0   ;;  %vm5184_vm11 = vmmov 0   ;;  %v5185_v52 = vmov 0.0   ;;  %s854_s22 = scalar_lea.vmem [#allocation3], %s5116_s19  ;;  %s5116_s19 = sphi %s5430_s19, %s851_s19   ;;  %v5112_v46 = vphi %v5110_v46, %v922_v46   ;;  %v5108_v45 = vphi %v5106_v45, %v923_v45  }
 0x393   : >> { %4851 = vset.pattern.permute.xlu1 %v5182_v47  ;;  %v859_v48 = vld [vmem:[%s858_s20] sm:$0x1]  ;;  %4630 = vmatprep.subr.bf16.mxu0 %v5183_v51  ;;  %s856_s23 = scalar_lea.vmem [#allocation4], %s5116_s19  ;;  %s892_s24 = scalar_lea.vmem [#allocation6], %s5116_s19  ;;  %vm998_vm12 = vcmask 516096  }
 0x394   : >> { %860 = vxpose.xlu0.b32.start.end [1/1] (short) (narrow) %v859_v48, 16  ;;  %4350 = vmatprep.mubr.msk.f32.mxu0 %vm5184_vm11, %v5185_v52  ;;  %v893_v6 = vld [vmem:[%s892_s24] sm:$0x1]  ;;  %s997_s25 = scalar_lea.vmem [#allocation7], %s5116_s19  ;;  %s851_s19 = sadd.s32 1, %s5116_s19  }
 0x395   : >> { %p848_p4 = scmp.ge.s32.totalorder %s851_s19, 8  }
 0x396   : >> { %v4074_v53 = vld [vmem:[%s854_s22] ss:$0 sm:$0xff]  ;;  %v1003_v12 = vsub.f32 (%p848_p4), 0.0, %v5382_v33  ;;  %4365 = vmatprep.subr.bf16.mxu1 (%p848_p4), %v5178_v8  ;;  %4369 = vmatprep.mubr.msk.bf16.mxu1 (%p848_p4), %vm5179_vm1, %v5178_v8  ;;  %v4857_v13 = vld [vmem:[%s6115_s11 + $0x8] sm:$0xff] (%p848_p4)   ;;  %v4858_v14 = vld [vmem:[%s6115_s11 + $0x10] sm:$0xff] (%p848_p4)   ;;  %v1001_v22 = vmul.f32 (%p848_p4), %v5311_v5, %v5406_v7  ;;  %v1020_v35 = vmul.f32 (%p848_p4), 2.0, %v5297_v0 }
 0x397   : >> { %v898_v54 = vmul.f32 %v4074_v53, %v5335_v15  ;;  %v899_v55 = vmul.f32 %v4074_v53, %v5337_v16  ;;  %v4856_v11 = vld [vmem:[%s6115_s11] sm:$0xff] (%p848_p4)   ;;  %v4859_v18 = vld [vmem:[%s6115_s11 + $0x18] sm:$0xff] (%p848_p4)   ;;  %v4861_v0 = vld [vmem:[%s6106_s2 + $0x8] sm:$0xff] (%p848_p4)   ;;  %s5554_s28 = smov (%p848_p4), 0  }
 0x398   : >> { %v4075_v61 = vld [vmem:[%s856_s23] ss:$0 sm:$0xff]  ;;  %v1004_v17 = vmul.f32 (%p848_p4), 1.442695, %v1003_v12  ;;  %v4863_v51 = vld [vmem:[%s6107_s3 + $0x8] sm:$0xff] (%p848_p4)  }
 0x399   : >> { %v900_v56 = vmul.f32 1.442695, %v898_v54  ;;  %v902_v57 = vmul.f32 1.442695, %v899_v55  ;;  %v4860_v42 = vld [vmem:[%s6106_s2] sm:$0xff] (%p848_p4)   ;;  %v4865_v53 = vld [vmem:[%s6110_s6 + $0x8] sm:$0xff] (%p848_p4)  }
 0x39a   : > { %4366 = vmatpush3.bf16.msra.mxu1 (%p848_p4), %v4860_v42  ;;  %v4864_v52 = vld [vmem:[%s6110_s6] sm:$0xff] (%p848_p4)   ;;  %v4866_v54 = vld [vmem:[%s6110_s6 + $0x10] sm:$0xff] (%p848_p4)   ;;  %v4867_v55 = vld [vmem:[%s6110_s6 + $0x18] sm:$0xff] (%p848_p4)  }
 0x39b   : >> { %4852 = vpow2.f32 %v900_v56  ;;  %4367 = vmatprep.subr.bf16.mxu1 (%p848_p4), %v5178_v8  ;;  %v1343_v42 = vld [vmem:[%s6111_s7] sm:$0xf] (%p848_p4) }
 0x39c   : >> { %4854 = vpow2.f32 %v902_v57 }
 0x39d   : > { %4868 = vpow2.f32 (%p848_p4), %v1004_v17 }
 0x39e   : > { %4368 = vmatpush3.bf16.msra.mxu1 (%p848_p4), %v4861_v0  ;;  %v1348_v0 = vsel (%p848_p4), %vm790_vm7, %v1343_v42, 0 }
 0x39f   : > { %4373 = vmatprep.subr.bf16.mxu1 (%p848_p4), %v5178_v8 }
 0x3a5   : >> { %v4853_v58 = vpop.eup %4852 }
 0x3a6   : >> { %v4855_v59 = vpop.eup %4854  ;;  %v904_v62 = vmul.f32 %v5112_v46, %v4853_v58 }
 0x3a7   : >> { %v905_v1 = vmul.f32 %v5108_v45, %v4855_v59  ;;  %v4869_v19 = vpop.eup (%p848_p4), %4868 }
 0x3a8   : > { %v1006_v20 = vadd.f32 (%p848_p4), 1.0, %v4869_v19 }
 0x3aa   : > { %4870 = vrcp.f32 (%p848_p4), %v1006_v20 }
 0x3b4   : > { %v4871_v26 = vpop.eup (%p848_p4), %4870 }
 0x3b5   : > { %v1009_v27 = vmul.f32 (%p848_p4), %v4871_v26, %v5382_v33 }
 0x3bd   : >> { %4850 = vset.pattern.permute.xlu0 %v5182_v47 }
 0x414   : >> { %v876_v49 = vpop.trf.xlu0 }
 0x415   : >> { %908 = vperm.xlu0 %4850, %v876_v49   ;;  %v4862_v49 = vld [vmem:[%s6107_s3] sm:$0xff] (%p848_p4)  }
 0x418   : >> { %v877_v50 = vpop.trf.xlu0 }
 0x419   : >> { %913 = vperm.xlu1 %4851, %v877_v50  }
 0x494   : >> { %v909_v60 = vpop.permute.xlu0 %908 }
 0x495   : >> { %v920_v63 = vmul.f32 %v4075_v61, %v909_v60 }
 0x497   : >> { %v922_v46 = vadd.f32 %v920_v63, %v904_v62  }
 0x498   : >> { %v914_v2 = vpop.permute.xlu1 %913 }
 0x499   : >> { %v921_v3 = vmul.f32 %v4075_v61, %v914_v2 }
 0x49b   : >> { %v923_v45 = vadd.f32 %v921_v3, %v905_v1  }
 0x49d   : >> { %v4631_v4 = vpack.c.bf16 %v923_v45, %v922_v46 }
 0x49f   : >> { %4632 = vmatpush3.bf16.msra.mxu0 %v4631_v4 }
 0x4a0   : > { %4353 = vmatprep.subr.bf16.mxu0 (%p848_p4), %v5178_v8 }
 0x4a2   : >> { %4351 = vmatmul.mubr.msk.f32.vlgmr.msra.gmra.mrb[0].mxu0 %vm776_vm10, %v893_v6 }
 0x4a3   : > { %4361 = vmatprep.mubr.msk.bf16.mxu0 (%p848_p4), %vm5179_vm1, %v5178_v8  ;;  %4354 = vmatpush3.bf16.msra.mxu0 (%p848_p4), %v4856_v11 }
 0x4a4   : > { %4355 = vmatprep.subr.bf16.mxu0 (%p848_p4), %v5178_v8 }
 0x4a7   : > { %4356 = vmatpush3.bf16.msra.mxu0 (%p848_p4), %v4857_v13 }
 0x4a8   : > { %4357 = vmatprep.subr.bf16.mxu0 (%p848_p4), %v5178_v8 }
 0x4ab   : > { %4358 = vmatpush3.bf16.msra.mxu0 (%p848_p4), %v4858_v14 }
 0x4ac   : > { %4359 = vmatprep.subr.bf16.mxu0 (%p848_p4), %v5178_v8 }
 0x4af   : > { %4360 = vmatpush3.bf16.msra.mxu0 (%p848_p4), %v4859_v18 }
 0x4b0   : > { %4381 = vmatprep.subr.bf16.mxu0 (%p848_p4), %v5178_v8 }
 0x570   : > { %850 = sbr.rel (!%p848_p4) target bundleno = 914 (0x392), region = 178 }
 0x575   : >> { %v993_v9 = vpop.f32.mrb[0].mxu0 }
 0x576   : >> { %999 = vst.msk [vmem:[%s997_s25] sm:$0x1] %vm998_vm12, %v993_v9  ;;  %v4352_v10 = vpop.f32.mrb[1].mxu0 }
 0x57d   : > { %v1000_v24 = vld [vmem:[#allocation7] sm:$0xff] }
 0x57e   : > { %v1002_v25 = vadd.f32 %v1001_v22, %v1000_v24 }
 0x580   : > { %v1010_v28 = vmul.f32 %v1009_v27, %v1002_v25 }
 0x582   : > { %v1011_v32 = vpack.c.bf16 %v1010_v28, %v1010_v28 }
 0x584   : > { %4362 = vmatmul.mubr.msk.bf16.vlgmr.msra.gmra.mrb[0].mxu0 %vm725_vm6, %v1011_v32 }
 0x585   : > { %4389 = vmatprep.mubr.msk.bf16.mxu0 %vm5179_vm1, %v5178_v8  ;;  %4382 = vmatpush3.bf16.msra.mxu0 %v4864_v52 }
 0x586   : > { %4383 = vmatprep.subr.bf16.mxu0 %v5178_v8 }
 0x589   : > { %4384 = vmatpush3.bf16.msra.mxu0 %v4865_v53 }
 0x58a   : > { %4385 = vmatprep.subr.bf16.mxu0 %v5178_v8 }
 0x58d   : > { %4386 = vmatpush3.bf16.msra.mxu0 %v4866_v54 }
 0x58e   : > { %4387 = vmatprep.subr.bf16.mxu0 %v5178_v8 }
 0x591   : > { %4388 = vmatpush3.bf16.msra.mxu0 %v4867_v55 }
 0x657   : > { %v1082_v36 = vpop.f32.mrb[0].mxu0 }
 0x658   : > { %v5477_v37 = vadd.f32 %v1082_v36, %v1020_v35  ;;  %v4363_v38 = vpop.f32.mrb[1].mxu0 }
 0x659   : > { %v1085_v39 = vpop.f32.mrb[2].mxu0 }
 0x65a   : > { %v4364_v7 = vpop.f32.mrb[3].mxu0  ;;  %v1088_v41 = vmul.f32 %v5477_v37, %v5477_v37 }
 0x65c   : > { %v1089_v33 = vsel %vm522_vm0, %v1088_v41, 0.0 }
 0x65d   : > { %1090 = vadd.xlane.f32.xlu0 %v1089_v33 }
 0x6ea   : > { %v1091_v43 = vpop.xlane.xlu0 %1090 }
 0x6eb   : > { %v1092_v44 = vmul.f32 0.03125, %v1091_v43 }
 0x6ed   : > { %v1093_v45 = vadd.f32 1e-05, %v1092_v44 }
 0x6ef   : > { %4872 = vrsqrt.f32 %v1093_v45 }
 0x6f9   : > { %v4873_v46 = vpop.eup %4872 }
 0x6fa   : > { %v1095_v47 = vmul.f32 %v4873_v46, %v5477_v37 }
 0x6fc   : > { %v1096_v48 = vmul.f32 %v5342_v21, %v1095_v47 }
 0x6fe   : > { %v1097_v50 = vpack.c.bf16 %v1096_v48, %v1096_v48 }
 0x700   : > { %4370 = vmatmul.mubr.msk.bf16.vlgmr.msra.gmra.mrb[0].mxu1 %vm522_vm0, %v1097_v50 }
 0x701   : > { %4374 = vmatpush3.bf16.msra.mxu1 %v4862_v49  ;;  %4377 = vmatprep.mubr.msk.bf16.mxu1 %vm5179_vm1, %v5178_v8 }
 0x702   : > { %4375 = vmatprep.subr.bf16.mxu1 %v5178_v8 }
 0x705   : > { %4376 = vmatpush3.bf16.msra.mxu1 %v4863_v51 }
 0x706   : > { %4393 = vmatprep.subr.bf16.mxu1 %v5178_v8 }
 0x708   : > { %4378 = vmatmul.mubr.msk.bf16.vlgmr.msra.gmra.mrb[4].mxu1 %vm522_vm0, %v1097_v50 }
 0x709   : > { %4395 = vmatprep.mubr.msk.bf16.mxu1 %vm5179_vm1, %v5178_v8  ;;  %4394 = vmatpush3.bf16.msra.mxu1 %v1348_v0 }
 0x7d3   : > { %v1151_v56 = vpop.f32.mrb[0].mxu1 }
 0x7d4   : > { %v1214_v57 = vrot.slane %v1151_v56, 5  ;;  %v4371_v58 = vpop.f32.mrb[1].mxu1 }
 0x7d5   : > { %v1154_v59 = vpop.f32.mrb[2].mxu1 }
 0x7d6   : > { %v1216_v60 = vsel %vm651_vm2, 0.0, %v1214_v57  ;;  %v1220_v61 = vmul.f32 %v5370_v29, %v1214_v57  ;;  %v1229_v62 = vmul.f32 %v5375_v30, %v1214_v57  ;;  %v1238_v63 = vmul.f32 %v5380_v31, %v1214_v57  ;;  %v4372_v1 = vpop.f32.mrb[3].mxu1 }
 0x7d7   : > { %v1217_v2 = vmul.f32 %v5387_v34, %v1216_v60  ;;  %v1219_v3 = vmul.f32 %v5370_v29, %v1216_v60  ;;  %v1228_v4 = vmul.f32 %v5375_v30, %v1216_v60  ;;  %v1237_v6 = vmul.f32 %v5380_v31, %v1216_v60 }
 0x7d8   : > { %v1224_v9 = vrot.slane %v1220_v61, 1  ;;  %v1233_v13 = vrot.slane %v1229_v62, 2  ;;  %v1242_v18 = vrot.slane %v1238_v63, 3 }
 0x7d9   : > { %v1218_v10 = vadd.f32 %v5392_v40, %v1217_v2  ;;  %v1223_v11 = vrot.slane %v1219_v3, 1  ;;  %v1232_v12 = vrot.slane %v1228_v4, 2  ;;  %v1241_v17 = vrot.slane %v1237_v6, 3 }
 0x7da   : > { %v5118_v3 = vmov 0.0   ;;  %v5122_v4 = vmov 0.0  }
 0x7db   : > { %v1225_v14 = vsel %vm659_vm3, %v1223_v11, %v1224_v9  ;;  %v5531_v19 = vpop.f32.mrb[4].mxu1  ;;  %v1234_v24 = vsel %vm669_vm4, %v1232_v12, %v1233_v13  ;;  %v1243_v28 = vsel %vm679_vm5, %v1241_v17, %v1242_v18 }
 0x7dc   : > { %v1227_v20 = vadd.f32 %v1225_v14, %v1218_v10  ;;  %v4379_v22 = vpop.f32.mrb[5].mxu1 }
 0x7dd   : > { %v1210_v25 = vpop.f32.mrb[6].mxu1 }
 0x7de   : > { %v1236_v26 = vadd.f32 %v1234_v24, %v1227_v20  ;;  %v4380_v27 = vpop.f32.mrb[7].mxu1 }
 0x7e0   : > { %v1245_v32 = vadd.f32 %v1243_v28, %v1236_v26 }
 0x7e2   : > { %v1246_v35 = vsub.f32 0.0, %v1245_v32 }
 0x7e4   : > { %v1247_v36 = vmul.f32 1.442695, %v1246_v35 }
 0x7e6   : > { %4874 = vpow2.f32 %v1247_v36 }
 0x7f0   : > { %v4875_v38 = vpop.eup %4874 }
 0x7f1   : > { %v1249_v39 = vadd.f32 1.0, %v4875_v38 }
 0x7f3   : > { %4876 = vrcp.f32 %v1249_v39 }
 0x7fd   : > { %v4877_v7 = vpop.eup %4876 }
 0x7fe   : > { %v5535_v41 = vmul.f32 %v4877_v7, %v1245_v32 }
 0x800   : > { %v1253_v33 = vpack.c.bf16 %v5535_v41, %v5535_v41 }
 0x802   : > { %4390 = vmatmul.mubr.msk.bf16.vlgmr.msra.gmra.mrb[4].mxu0 %vm725_vm6, %v1253_v33 }
 0x8d5   : > { %v1323_v43 = vpop.f32.mrb[4].mxu0 }
 0x8d6   : > { %1329 = vst.msk [vmem:[#allocation2] sm:$0xff] %vm769_vm8, %v1323_v43  ;;  %v4391_v44 = vpop.f32.mrb[5].mxu0 }
 0x8d7   : > { %v1326_v45 = vpop.f32.mrb[6].mxu0 }
 0x8d8   : > { %v4392_v46 = vpop.f32.mrb[7].mxu0 }
 0x8dd   : > { %v1336_v47 = vld [vmem:[#allocation2] sm:$0xff] }
 0x8de   : > { %1338 = vrot.lane.b32.xlu1 %v1336_v47, %s5180_s15  ;;  %1332 = vrot.lane.b32.xlu0 %v1336_v47, %s5181_s16  ;;  %v1342_v48 = vpack.c.bf16 %v1336_v47, %v1336_v47 }
 0x8e0   : > { %4396 = vmatmul.mubr.msk.bf16.vlgmr.msra.gmra.mrb[8].mxu1 %vm786_vm9, %v1342_v48 }
 0x950   : > { %v1339_v49 = vpop.permute.xlu1 %1338  ;;  %v1333_v50 = vpop.permute.xlu0 %1332 }
 0x951   : > { %1341 = vst.msk [vmem:[#allocation6] sm:$0xff] %vm776_vm10, %v1339_v49  ;;  %1335 = vst.msk [vmem:[#allocation5] sm:$0xff] %vm776_vm10, %v1333_v50 }
 0x9b3   : > { %v1384_v51 = vpop.f32.mrb[8].mxu1 }
 0x9b4   : > { %v1385_v52 = vadd.f32 %v5424_v23, %v1384_v51  ;;  %v4397_v53 = vpop.f32.mrb[9].mxu1 }
 0x9b5   : > { %v1387_v54 = vpop.f32.mrb[10].mxu1 }
 0x9b6   : > { %v1391_v55 = vand.u32 2147483647, %v1385_v52  ;;  %v4398_v56 = vpop.f32.mrb[11].mxu1  ;;  %v1390_v62 = vmax.f32 %v1385_v52, 0.0 }
 0x9b8   : > { %v1392_v57 = vsub.f32 0.0, %v1391_v55 }
 0x9ba   : > { %v1393_v58 = vmul.f32 1.442695, %v1392_v57 }
 0x9bc   : > { %4878 = vpow2.f32 %v1393_v58 }
 0x9c6   : > { %v4879_v59 = vpop.eup %4878 }
 0x9c7   : > { %v1395_v60 = vadd.f32 1.0, %v4879_v59 }
 0x9c9   : > { %4880 = vlog2.f32 %v1395_v60 }
 0x9d3   : > { %v4881_v61 = vpop.eup %4880 }
 0x9d4   : > { %v1397_v63 = vmul.f32 0.6931472, %v4881_v61 }
 0x9d6   : > { %v1398_v1 = vadd.f32 %v1397_v63, %v1390_v62 }
 0x9d8   : > { %1399 = vst.msk [vmem:[#allocation3] sm:$0xff] %vm725_vm6, %v1398_v1  ;;  %v1400_v2 = vmul.f32 %v1398_v1, %v5535_v41 }
 0x9da   : > { %1401 = vst.msk [vmem:[#allocation4] sm:$0xff] %vm725_vm6, %v1400_v2 }
 0x9db LB: >> { %v5186_v6 = vmov 0   ;;  %s1414_s30 = scalar_lea.vmem [#allocation5], %s5128_s28  ;;  %v5187_v12 = vmov 0.0|0.0   ;;  %vm5188_vm13 = vmmov 0   ;;  %v5189_v13 = vmov 0.0   ;;  %s1410_s17 = scalar_lea.vmem [#allocation3], %s5128_s28  ;;  %s5128_s28 = sphi %s5554_s28, %s1407_s28   ;;  %v5124_v4 = vphi %v5122_v4, %v1478_v4   ;;  %v5120_v3 = vphi %v5118_v3, %v1479_v3  }
 0x9dc   : >> { %4883 = vset.pattern.permute.xlu1 %v5186_v6  ;;  %v1415_v9 = vld [vmem:[%s1414_s30] sm:$0x1]  ;;  %4633 = vmatprep.subr.bf16.mxu0 %v5187_v12  ;;  %s1412_s18 = scalar_lea.vmem [#allocation4], %s5128_s28  ;;  %s1448_s19 = scalar_lea.vmem [#allocation6], %s5128_s28 }
 0x9dd   : >> { %1416 = vxpose.xlu0.b32.start.end [1/1] (short) (narrow) %v1415_v9, 16  ;;  %4403 = vmatprep.mubr.msk.f32.mxu0 %vm5188_vm13, %v5189_v13  ;;  %v1449_v7 = vld [vmem:[%s1448_s19] sm:$0x1]  ;;  %s1553_s20 = scalar_lea.vmem [#allocation7], %s5128_s28  ;;  %s1407_s28 = sadd.s32 1, %s5128_s28  }
 0x9de   : >> { %p1404_p5 = scmp.ge.s32.totalorder %s1407_s28, 8  }
 0x9df   : >> { %v4094_v14 = vld [vmem:[%s1410_s17] ss:$0 sm:$0xff]  ;;  %v1559_v43 = vsub.f32 (%p1404_p5), 0.0, %v5531_v19  ;;  %4418 = vmatprep.subr.bf16.mxu1 (%p1404_p5), %v5178_v8  ;;  %4422 = vmatprep.mubr.msk.bf16.mxu1 (%p1404_p5), %vm5179_vm1, %v5178_v8  ;;  %v4889_v44 = vld [vmem:[%s6115_s11 + $0x8] sm:$0xff] (%p1404_p5)   ;;  %v4890_v45 = vld [vmem:[%s6115_s11 + $0x10] sm:$0xff] (%p1404_p5)   ;;  %v1557_v50 = vmul.f32 (%p1404_p5), %v5311_v5, %v5535_v41  ;;  %v1576_v57 = vmul.f32 (%p1404_p5), 2.0, %v5477_v37 }
 0x9e0   : >> { %v1454_v17 = vmul.f32 %v4094_v14, %v5335_v15  ;;  %v1455_v18 = vmul.f32 %v4094_v14, %v5337_v16  ;;  %v4888_v0 = vld [vmem:[%s6115_s11] sm:$0xff] (%p1404_p5)   ;;  %v4891_v47 = vld [vmem:[%s6115_s11 + $0x18] sm:$0xff] (%p1404_p5)   ;;  %v4893_v37 = vld [vmem:[%s6106_s2 + $0x8] sm:$0xff] (%p1404_p5)   ;;  %s5678_s24 = smov (%p1404_p5), 0  }
 0x9e1   : >> { %v4095_v27 = vld [vmem:[%s1412_s18] ss:$0 sm:$0xff]  ;;  %v1560_v46 = vmul.f32 (%p1404_p5), 1.442695, %v1559_v43  ;;  %v4895_v12 = vld [vmem:[%s6107_s3 + $0x8] sm:$0xff] (%p1404_p5)  }
 0x9e2   : >> { %v1456_v20 = vmul.f32 1.442695, %v1454_v17  ;;  %v1458_v22 = vmul.f32 1.442695, %v1455_v18  ;;  %v4892_v63 = vld [vmem:[%s6106_s2] sm:$0xff] (%p1404_p5)   ;;  %v4897_v14 = vld [vmem:[%s6110_s6 + $0x8] sm:$0xff] (%p1404_p5)  }
 0x9e3   : > { %4419 = vmatpush3.bf16.msra.mxu1 (%p1404_p5), %v4892_v63  ;;  %v4896_v13 = vld [vmem:[%s6110_s6] sm:$0xff] (%p1404_p5)   ;;  %v4898_v17 = vld [vmem:[%s6110_s6 + $0x10] sm:$0xff] (%p1404_p5)   ;;  %v4899_v18 = vld [vmem:[%s6110_s6 + $0x18] sm:$0xff] (%p1404_p5)  }
 0x9e4   : >> { %4884 = vpow2.f32 %v1456_v20  ;;  %4420 = vmatprep.subr.bf16.mxu1 (%p1404_p5), %v5178_v8  ;;  %v1899_v63 = vld [vmem:[%s6111_s7] sm:$0xf] (%p1404_p5) }
 0x9e5   : >> { %4886 = vpow2.f32 %v1458_v22 }
 0x9e6   : > { %4900 = vpow2.f32 (%p1404_p5), %v1560_v46 }
 0x9e7   : > { %4421 = vmatpush3.bf16.msra.mxu1 (%p1404_p5), %v4893_v37  ;;  %v1904_v37 = vsel (%p1404_p5), %vm790_vm7, %v1899_v63, 0 }
 0x9e8   : > { %4426 = vmatprep.subr.bf16.mxu1 (%p1404_p5), %v5178_v8 }
 0x9ee   : >> { %v4885_v24 = vpop.eup %4884 }
 0x9ef   : >> { %v4887_v25 = vpop.eup %4886  ;;  %v1460_v28 = vmul.f32 %v5124_v4, %v4885_v24 }
 0x9f0   : >> { %v1461_v35 = vmul.f32 %v5120_v3, %v4887_v25  ;;  %v4901_v48 = vpop.eup (%p1404_p5), %4900 }
 0x9f1   : > { %v1562_v49 = vadd.f32 (%p1404_p5), 1.0, %v4901_v48 }
 0x9f3   : > { %4902 = vrcp.f32 (%p1404_p5), %v1562_v49 }
 0x9fd   : > { %v4903_v53 = vpop.eup (%p1404_p5), %4902 }
 0x9fe   : > { %v1565_v54 = vmul.f32 (%p1404_p5), %v4903_v53, %v5531_v19 }
 0xa06   : >> { %4882 = vset.pattern.permute.xlu0 %v5186_v6 }
 0xa5d   : >> { %v1432_v10 = vpop.trf.xlu0 }
 0xa5e   : >> { %1464 = vperm.xlu0 %4882, %v1432_v10   ;;  %v4894_v10 = vld [vmem:[%s6107_s3] sm:$0xff] (%p1404_p5)  }
 0xa61   : >> { %v1433_v11 = vpop.trf.xlu0 }
 0xa62   : >> { %1469 = vperm.xlu1 %4883, %v1433_v11  }
 0xadd   : >> { %v1465_v26 = vpop.permute.xlu0 %1464 }
 0xade   : >> { %v1476_v32 = vmul.f32 %v4095_v27, %v1465_v26 }
 0xae0   : >> { %v1478_v4 = vadd.f32 %v1476_v32, %v1460_v28  }
 0xae1   : >> { %v1470_v36 = vpop.permute.xlu1 %1469 }
 0xae2   : >> { %v1477_v38 = vmul.f32 %v4095_v27, %v1470_v36 }
 0xae4   : >> { %v1479_v3 = vadd.f32 %v1477_v38, %v1461_v35  }
 0xae6   : >> { %v4634_v39 = vpack.c.bf16 %v1479_v3, %v1478_v4 }
 0xae8   : >> { %4635 = vmatpush3.bf16.msra.mxu0 %v4634_v39 }
 0xae9   : > { %4406 = vmatprep.subr.bf16.mxu0 (%p1404_p5), %v5178_v8 }
 0xaeb   : >> { %4404 = vmatmul.mubr.msk.f32.vlgmr.msra.gmra.mrb[0].mxu0 %vm776_vm10, %v1449_v7 }
 0xaec   : > { %4414 = vmatprep.mubr.msk.bf16.mxu0 (%p1404_p5), %vm5179_vm1, %v5178_v8  ;;  %4407 = vmatpush3.bf16.msra.mxu0 (%p1404_p5), %v4888_v0 }
 0xaed   : > { %4408 = vmatprep.subr.bf16.mxu0 (%p1404_p5), %v5178_v8 }
 0xaf0   : > { %4409 = vmatpush3.bf16.msra.mxu0 (%p1404_p5), %v4889_v44 }
 0xaf1   : > { %4410 = vmatprep.subr.bf16.mxu0 (%p1404_p5), %v5178_v8 }
 0xaf4   : > { %4411 = vmatpush3.bf16.msra.mxu0 (%p1404_p5), %v4890_v45 }
 0xaf5   : > { %4412 = vmatprep.subr.bf16.mxu0 (%p1404_p5), %v5178_v8 }
 0xaf8   : > { %4413 = vmatpush3.bf16.msra.mxu0 (%p1404_p5), %v4891_v47 }
 0xaf9   : > { %4434 = vmatprep.subr.bf16.mxu0 (%p1404_p5), %v5178_v8 }
 0xbb9   : > { %1406 = sbr.rel (!%p1404_p5) target bundleno = 2523 (0x9db), region = 189 }
 0xbbe   : >> { %v1549_v33 = vpop.f32.mrb[0].mxu0 }
 0xbbf   : >> { %1555 = vst.msk [vmem:[%s1553_s20] sm:$0x1] %vm998_vm12, %v1549_v33  ;;  %v4405_v42 = vpop.f32.mrb[1].mxu0 }
 0xbc6   : > { %v1556_v51 = vld [vmem:[#allocation7] sm:$0xff] }
 0xbc7   : > { %v1558_v52 = vadd.f32 %v1557_v50, %v1556_v51 }
 0xbc9   : > { %v1566_v55 = vmul.f32 %v1565_v54, %v1558_v52 }
 0xbcb   : > { %v1567_v56 = vpack.c.bf16 %v1566_v55, %v1566_v55 }
 0xbcd   : > { %4415 = vmatmul.mubr.msk.bf16.vlgmr.msra.gmra.mrb[0].mxu0 %vm725_vm6, %v1567_v56 }
 0xbce   : > { %4442 = vmatprep.mubr.msk.bf16.mxu0 %vm5179_vm1, %v5178_v8  ;;  %4435 = vmatpush3.bf16.msra.mxu0 %v4896_v13 }
 0xbcf   : > { %4436 = vmatprep.subr.bf16.mxu0 %v5178_v8 }
 0xbd2   : > { %4437 = vmatpush3.bf16.msra.mxu0 %v4897_v14 }
 0xbd3   : > { %4438 = vmatprep.subr.bf16.mxu0 %v5178_v8 }
 0xbd6   : > { %4439 = vmatpush3.bf16.msra.mxu0 %v4898_v17 }
 0xbd7   : > { %4440 = vmatprep.subr.bf16.mxu0 %v5178_v8 }
 0xbda   : > { %4441 = vmatpush3.bf16.msra.mxu0 %v4899_v18 }
 0xca0   : > { %v1638_v58 = vpop.f32.mrb[0].mxu0 }
 0xca1   : > { %v5601_v59 = vadd.f32 %v1638_v58, %v1576_v57  ;;  %v4416_v60 = vpop.f32.mrb[1].mxu0 }
 0xca2   : > { %v1641_v61 = vpop.f32.mrb[2].mxu0 }
 0xca3   : > { %v4417_v41 = vpop.f32.mrb[3].mxu0  ;;  %v1644_v62 = vmul.f32 %v5601_v59, %v5601_v59 }
 0xca5   : > { %v1645_v19 = vsel %vm522_vm0, %v1644_v62, 0.0 }
 0xca6   : > { %1646 = vadd.xlane.f32.xlu0 %v1645_v19 }
 0xd33   : > { %v1647_v1 = vpop.xlane.xlu0 %1646 }
 0xd34   : > { %v1648_v2 = vmul.f32 0.03125, %v1647_v1 }
 0xd36   : > { %v1649_v3 = vadd.f32 1e-05, %v1648_v2 }
 0xd38   : > { %4904 = vrsqrt.f32 %v1649_v3 }
 0xd42   : > { %v4905_v4 = vpop.eup %4904 }
 0xd43   : > { %v1651_v6 = vmul.f32 %v4905_v4, %v5601_v59 }
 0xd45   : > { %v1652_v9 = vmul.f32 %v5342_v21, %v1651_v6 }
 0xd47   : > { %v1653_v11 = vpack.c.bf16 %v1652_v9, %v1652_v9 }
 0xd49   : > { %4423 = vmatmul.mubr.msk.bf16.vlgmr.msra.gmra.mrb[0].mxu1 %vm522_vm0, %v1653_v11 }
 0xd4a   : > { %4427 = vmatpush3.bf16.msra.mxu1 %v4894_v10  ;;  %4430 = vmatprep.mubr.msk.bf16.mxu1 %vm5179_vm1, %v5178_v8 }
 0xd4b   : > { %4428 = vmatprep.subr.bf16.mxu1 %v5178_v8 }
 0xd4e   : > { %4429 = vmatpush3.bf16.msra.mxu1 %v4895_v12 }
 0xd4f   : > { %4446 = vmatprep.subr.bf16.mxu1 %v5178_v8 }
 0xd51   : > { %4431 = vmatmul.mubr.msk.bf16.vlgmr.msra.gmra.mrb[4].mxu1 %vm522_vm0, %v1653_v11 }
 0xd52   : > { %4448 = vmatprep.mubr.msk.bf16.mxu1 %vm5179_vm1, %v5178_v8  ;;  %4447 = vmatpush3.bf16.msra.mxu1 %v1904_v37 }
 0xe1c   : > { %v1707_v20 = vpop.f32.mrb[0].mxu1 }
 0xe1d   : > { %v1770_v22 = vrot.slane %v1707_v20, 5  ;;  %v4424_v24 = vpop.f32.mrb[1].mxu1 }
 0xe1e   : > { %v1710_v25 = vpop.f32.mrb[2].mxu1 }
 0xe1f   : > { %v1772_v26 = vsel %vm651_vm2, 0.0, %v1770_v22  ;;  %v1776_v27 = vmul.f32 %v5370_v29, %v1770_v22  ;;  %v1785_v28 = vmul.f32 %v5375_v30, %v1770_v22  ;;  %v1794_v32 = vmul.f32 %v5380_v31, %v1770_v22  ;;  %v4425_v35 = vpop.f32.mrb[3].mxu1 }
 0xe20   : > { %v1773_v36 = vmul.f32 %v5387_v34, %v1772_v26  ;;  %v1775_v38 = vmul.f32 %v5370_v29, %v1772_v26  ;;  %v1784_v39 = vmul.f32 %v5375_v30, %v1772_v26  ;;  %v1793_v7 = vmul.f32 %v5380_v31, %v1772_v26 }
 0xe21   : > { %v1780_v33 = vrot.slane %v1776_v27, 1  ;;  %v1789_v44 = vrot.slane %v1785_v28, 2  ;;  %v1798_v47 = vrot.slane %v1794_v32, 3 }
 0xe22   : > { %v1774_v42 = vadd.f32 %v5392_v40, %v1773_v36  ;;  %v1779_v0 = vrot.slane %v1775_v38, 1  ;;  %v1788_v43 = vrot.slane %v1784_v39, 2  ;;  %v1797_v46 = vrot.slane %v1793_v7, 3 }
 0xe23   : > { %v5130_v38 = vmov 0.0   ;;  %v5134_v39 = vmov 0.0  }
 0xe24   : > { %v1781_v45 = vsel %vm659_vm3, %v1779_v0, %v1780_v33  ;;  %v5655_v48 = vpop.f32.mrb[4].mxu1  ;;  %v1790_v51 = vsel %vm669_vm4, %v1788_v43, %v1789_v44  ;;  %v1799_v55 = vsel %vm679_vm5, %v1797_v46, %v1798_v47 }
 0xe25   : > { %v1783_v49 = vadd.f32 %v1781_v45, %v1774_v42  ;;  %v4432_v50 = vpop.f32.mrb[5].mxu1 }
 0xe26   : > { %v1766_v52 = vpop.f32.mrb[6].mxu1 }
 0xe27   : > { %v1792_v53 = vadd.f32 %v1790_v51, %v1783_v49  ;;  %v4433_v54 = vpop.f32.mrb[7].mxu1 }
 0xe29   : > { %v1801_v56 = vadd.f32 %v1799_v55, %v1792_v53 }
 0xe2b   : > { %v1802_v57 = vsub.f32 0.0, %v1801_v56 }
 0xe2d   : > { %v1803_v58 = vmul.f32 1.442695, %v1802_v57 }
 0xe2f   : > { %4906 = vpow2.f32 %v1803_v58 }
 0xe39   : > { %v4907_v60 = vpop.eup %4906 }
 0xe3a   : > { %v1805_v61 = vadd.f32 1.0, %v4907_v60 }
 0xe3c   : > { %4908 = vrcp.f32 %v1805_v61 }
 0xe46   : > { %v4909_v41 = vpop.eup %4908 }
 0xe47   : > { %v5659_v62 = vmul.f32 %v4909_v41, %v1801_v56 }
 0xe49   : > { %v1809_v19 = vpack.c.bf16 %v5659_v62, %v5659_v62 }
 0xe4b   : > { %4443 = vmatmul.mubr.msk.bf16.vlgmr.msra.gmra.mrb[4].mxu0 %vm725_vm6, %v1809_v19 }
 0xf1e   : > { %v1879_v1 = vpop.f32.mrb[4].mxu0 }
 0xf1f   : > { %1885 = vst.msk [vmem:[#allocation2] sm:$0xff] %vm769_vm8, %v1879_v1  ;;  %v4444_v2 = vpop.f32.mrb[5].mxu0 }
 0xf20   : > { %v1882_v3 = vpop.f32.mrb[6].mxu0 }
 0xf21   : > { %v4445_v4 = vpop.f32.mrb[7].mxu0 }
 0xf26   : > { %v1892_v6 = vld [vmem:[#allocation2] sm:$0xff] }
 0xf27   : > { %1894 = vrot.lane.b32.xlu1 %v1892_v6, %s5180_s15  ;;  %1888 = vrot.lane.b32.xlu0 %v1892_v6, %s5181_s16  ;;  %v1898_v9 = vpack.c.bf16 %v1892_v6, %v1892_v6 }
 0xf29   : > { %4449 = vmatmul.mubr.msk.bf16.vlgmr.msra.gmra.mrb[8].mxu1 %vm786_vm9, %v1898_v9 }
 0xf99   : > { %v1895_v10 = vpop.permute.xlu1 %1894  ;;  %v1889_v11 = vpop.permute.xlu0 %1888 }
 0xf9a   : > { %1897 = vst.msk [vmem:[#allocation6] sm:$0xff] %vm776_vm10, %v1895_v10  ;;  %1891 = vst.msk [vmem:[#allocation5] sm:$0xff] %vm776_vm10, %v1889_v11 }
 0xffc   : > { %v1940_v12 = vpop.f32.mrb[8].mxu1 }
 0xffd   : > { %v1941_v13 = vadd.f32 %v5424_v23, %v1940_v12  ;;  %v4450_v14 = vpop.f32.mrb[9].mxu1 }
 0xffe   : > { %v1943_v17 = vpop.f32.mrb[10].mxu1 }
 0xfff   : > { %v1947_v18 = vand.u32 2147483647, %v1941_v13  ;;  %v4451_v20 = vpop.f32.mrb[11].mxu1  ;;  %v1946_v28 = vmax.f32 %v1941_v13, 0.0 }
0x1001   : > { %v1948_v22 = vsub.f32 0.0, %v1947_v18 }
0x1003   : > { %v1949_v24 = vmul.f32 1.442695, %v1948_v22 }
0x1005   : > { %4910 = vpow2.f32 %v1949_v24 }
0x100f   : > { %v4911_v25 = vpop.eup %4910 }
0x1010   : > { %v1951_v26 = vadd.f32 1.0, %v4911_v25 }
0x1012   : > { %4912 = vlog2.f32 %v1951_v26 }
0x101c   : > { %v4913_v27 = vpop.eup %4912 }
0x101d   : > { %v1953_v32 = vmul.f32 0.6931472, %v4913_v27 }
0x101f   : > { %v1954_v35 = vadd.f32 %v1953_v32, %v1946_v28 }
0x1021   : > { %1955 = vst.msk [vmem:[#allocation3] sm:$0xff] %vm725_vm6, %v1954_v35  ;;  %v1956_v36 = vmul.f32 %v1954_v35, %v5659_v62 }
0x1023   : > { %1957 = vst.msk [vmem:[#allocation4] sm:$0xff] %vm725_vm6, %v1956_v36 }
0x1024 LB: >> { %v5190_v7 = vmov 0   ;;  %s1970_s25 = scalar_lea.vmem [#allocation5], %s5140_s24  ;;  %v5191_v43 = vmov 0.0|0.0   ;;  %vm5192_vm14 = vmmov 0   ;;  %v5193_v44 = vmov 0.0   ;;  %s1966_s26 = scalar_lea.vmem [#allocation3], %s5140_s24  ;;  %s5140_s24 = sphi %s5678_s24, %s1963_s24   ;;  %v5136_v39 = vphi %v5134_v39, %v2034_v39   ;;  %v5132_v38 = vphi %v5130_v38, %v2035_v38  }
0x1025   : >> { %4915 = vset.pattern.permute.xlu1 %v5190_v7  ;;  %v1971_v33 = vld [vmem:[%s1970_s25] sm:$0x1]  ;;  %4636 = vmatprep.subr.bf16.mxu0 %v5191_v43  ;;  %s1968_s27 = scalar_lea.vmem [#allocation4], %s5140_s24  ;;  %s2004_s28 = scalar_lea.vmem [#allocation6], %s5140_s24 }
0x1026   : >> { %1972 = vxpose.xlu0.b32.start.end [1/1] (short) (narrow) %v1971_v33, 16  ;;  %4456 = vmatprep.mubr.msk.f32.mxu0 %vm5192_vm14, %v5193_v44  ;;  %v2005_v41 = vld [vmem:[%s2004_s28] sm:$0x1]  ;;  %s2109_s30 = scalar_lea.vmem [#allocation7], %s5140_s24  ;;  %s1963_s24 = sadd.s32 1, %s5140_s24  }
0x1027   : >> { %p1960_p6 = scmp.ge.s32.totalorder %s1963_s24, 8  }
0x1028   : >> { %v4114_v45 = vld [vmem:[%s1966_s26] ss:$0 sm:$0xff]  ;;  %v2115_v1 = vsub.f32 (%p1960_p6), 0.0, %v5655_v48  ;;  %4471 = vmatprep.subr.bf16.mxu1 (%p1960_p6), %v5178_v8  ;;  %4475 = vmatprep.mubr.msk.bf16.mxu1 (%p1960_p6), %vm5179_vm1, %v5178_v8  ;;  %v4921_v2 = vld [vmem:[%s6115_s11 + $0x8] sm:$0xff] (%p1960_p6)   ;;  %v4922_v3 = vld [vmem:[%s6115_s11 + $0x10] sm:$0xff] (%p1960_p6)   ;;  %v2113_v11 = vmul.f32 (%p1960_p6), %v5311_v5, %v5659_v62  ;;  %v2132_v22 = vmul.f32 (%p1960_p6), 2.0, %v5601_v59 }
0x1029   : >> { %v2010_v46 = vmul.f32 %v4114_v45, %v5335_v15  ;;  %v2011_v47 = vmul.f32 %v4114_v45, %v5337_v16  ;;  %v4920_v37 = vld [vmem:[%s6115_s11] sm:$0xff] (%p1960_p6)   ;;  %v4923_v6 = vld [vmem:[%s6115_s11 + $0x18] sm:$0xff] (%p1960_p6)   ;;  %v4925_v59 = vld [vmem:[%s6106_s2 + $0x8] sm:$0xff] (%p1960_p6)   ;;  %s5802_s19 = smov (%p1960_p6), 0  }
0x102a   : >> { %v4115_v54 = vld [vmem:[%s1968_s27] ss:$0 sm:$0xff]  ;;  %v2116_v4 = vmul.f32 (%p1960_p6), 1.442695, %v2115_v1  ;;  %v4927_v43 = vld [vmem:[%s6107_s3 + $0x8] sm:$0xff] (%p1960_p6)  }
0x102b   : >> { %v2012_v49 = vmul.f32 1.442695, %v2010_v46  ;;  %v2014_v50 = vmul.f32 1.442695, %v2011_v47  ;;  %v4924_v32 = vld [vmem:[%s6106_s2] sm:$0xff] (%p1960_p6)   ;;  %v4929_v45 = vld [vmem:[%s6110_s6 + $0x8] sm:$0xff] (%p1960_p6)  }
0x102c   : > { %4472 = vmatpush3.bf16.msra.mxu1 (%p1960_p6), %v4924_v32  ;;  %v4928_v44 = vld [vmem:[%s6110_s6] sm:$0xff] (%p1960_p6)   ;;  %v4930_v46 = vld [vmem:[%s6110_s6 + $0x10] sm:$0xff] (%p1960_p6)   ;;  %v4931_v47 = vld [vmem:[%s6110_s6 + $0x18] sm:$0xff] (%p1960_p6)  }
0x102d   : >> { %4916 = vpow2.f32 %v2012_v49  ;;  %4473 = vmatprep.subr.bf16.mxu1 (%p1960_p6), %v5178_v8  ;;  %v2455_v32 = vld [vmem:[%s6111_s7] sm:$0xf] (%p1960_p6) }
0x102e   : >> { %4918 = vpow2.f32 %v2014_v50 }
0x102f   : > { %4932 = vpow2.f32 (%p1960_p6), %v2116_v4 }
0x1030   : > { %4474 = vmatpush3.bf16.msra.mxu1 (%p1960_p6), %v4925_v59  ;;  %v2460_v59 = vsel (%p1960_p6), %vm790_vm7, %v2455_v32, 0 }
0x1031   : > { %4479 = vmatprep.subr.bf16.mxu1 (%p1960_p6), %v5178_v8 }
0x1037   : >> { %v4917_v51 = vpop.eup %4916 }
0x1038   : >> { %v4919_v52 = vpop.eup %4918  ;;  %v2016_v55 = vmul.f32 %v5136_v39, %v4917_v51 }
0x1039   : >> { %v2017_v57 = vmul.f32 %v5132_v38, %v4919_v52  ;;  %v4933_v9 = vpop.eup (%p1960_p6), %4932 }
0x103a   : > { %v2118_v10 = vadd.f32 (%p1960_p6), 1.0, %v4933_v9 }
0x103c   : > { %4934 = vrcp.f32 (%p1960_p6), %v2118_v10 }
0x1046   : > { %v4935_v14 = vpop.eup (%p1960_p6), %4934 }
0x1047   : > { %v2121_v17 = vmul.f32 (%p1960_p6), %v4935_v14, %v5655_v48 }
0x104f   : >> { %4914 = vset.pattern.permute.xlu0 %v5190_v7 }
0x10a6   : >> { %v1988_v42 = vpop.trf.xlu0 }
0x10a7   : >> { %2020 = vperm.xlu0 %4914, %v1988_v42   ;;  %v4926_v42 = vld [vmem:[%s6107_s3] sm:$0xff] (%p1960_p6)  }
0x10aa   : >> { %v1989_v0 = vpop.trf.xlu0 }
0x10ab   : >> { %2025 = vperm.xlu1 %4915, %v1989_v0  }
0x1126   : >> { %v2021_v53 = vpop.permute.xlu0 %2020 }
0x1127   : >> { %v2032_v56 = vmul.f32 %v4115_v54, %v2021_v53 }
0x1129   : >> { %v2034_v39 = vadd.f32 %v2032_v56, %v2016_v55  }
0x112a   : >> { %v2026_v58 = vpop.permute.xlu1 %2025 }
0x112b   : >> { %v2033_v60 = vmul.f32 %v4115_v54, %v2026_v58 }
0x112d   : >> { %v2035_v38 = vadd.f32 %v2033_v60, %v2017_v57  }
0x112f   : >> { %v4637_v61 = vpack.c.bf16 %v2035_v38, %v2034_v39 }
0x1131   : >> { %4638 = vmatpush3.bf16.msra.mxu0 %v4637_v61 }
0x1132   : > { %4459 = vmatprep.subr.bf16.mxu0 (%p1960_p6), %v5178_v8 }
0x1134   : >> { %4457 = vmatmul.mubr.msk.f32.vlgmr.msra.gmra.mrb[0].mxu0 %vm776_vm10, %v2005_v41 }
0x1135   : > { %4467 = vmatprep.mubr.msk.bf16.mxu0 (%p1960_p6), %vm5179_vm1, %v5178_v8  ;;  %4460 = vmatpush3.bf16.msra.mxu0 (%p1960_p6), %v4920_v37 }
0x1136   : > { %4461 = vmatprep.subr.bf16.mxu0 (%p1960_p6), %v5178_v8 }
0x1139   : > { %4462 = vmatpush3.bf16.msra.mxu0 (%p1960_p6), %v4921_v2 }
0x113a   : > { %4463 = vmatprep.subr.bf16.mxu0 (%p1960_p6), %v5178_v8 }
0x113d   : > { %4464 = vmatpush3.bf16.msra.mxu0 (%p1960_p6), %v4922_v3 }
0x113e   : > { %4465 = vmatprep.subr.bf16.mxu0 (%p1960_p6), %v5178_v8 }
0x1141   : > { %4466 = vmatpush3.bf16.msra.mxu0 (%p1960_p6), %v4923_v6 }
0x1142   : > { %4487 = vmatprep.subr.bf16.mxu0 (%p1960_p6), %v5178_v8 }
0x1202   : > { %1962 = sbr.rel (!%p1960_p6) target bundleno = 4132 (0x1024), region = 200 }
0x1207   : >> { %v2105_v19 = vpop.f32.mrb[0].mxu0 }
0x1208   : >> { %2111 = vst.msk [vmem:[%s2109_s30] sm:$0x1] %vm998_vm12, %v2105_v19  ;;  %v4458_v63 = vpop.f32.mrb[1].mxu0 }
0x120f   : > { %v2112_v12 = vld [vmem:[#allocation7] sm:$0xff] }
0x1210   : > { %v2114_v13 = vadd.f32 %v2113_v11, %v2112_v12 }
0x1212   : > { %v2122_v18 = vmul.f32 %v2121_v17, %v2114_v13 }
0x1214   : > { %v2123_v20 = vpack.c.bf16 %v2122_v18, %v2122_v18 }
0x1216   : > { %4468 = vmatmul.mubr.msk.bf16.vlgmr.msra.gmra.mrb[0].mxu0 %vm725_vm6, %v2123_v20 }
0x1217   : > { %4495 = vmatprep.mubr.msk.bf16.mxu0 %vm5179_vm1, %v5178_v8  ;;  %4488 = vmatpush3.bf16.msra.mxu0 %v4928_v44 }
0x1218   : > { %4489 = vmatprep.subr.bf16.mxu0 %v5178_v8 }
0x121b   : > { %4490 = vmatpush3.bf16.msra.mxu0 %v4929_v45 }
0x121c   : > { %4491 = vmatprep.subr.bf16.mxu0 %v5178_v8 }
0x121f   : > { %4492 = vmatpush3.bf16.msra.mxu0 %v4930_v46 }
0x1220   : > { %4493 = vmatprep.subr.bf16.mxu0 %v5178_v8 }
0x1223   : > { %4494 = vmatpush3.bf16.msra.mxu0 %v4931_v47 }
0x12e9   : > { %v2194_v24 = vpop.f32.mrb[0].mxu0 }
0x12ea   : > { %v5725_v25 = vadd.f32 %v2194_v24, %v2132_v22  ;;  %v4469_v26 = vpop.f32.mrb[1].mxu0 }
0x12eb   : > { %v2197_v27 = vpop.f32.mrb[2].mxu0 }
0x12ec   : > { %v4470_v62 = vpop.f32.mrb[3].mxu0  ;;  %v2200_v28 = vmul.f32 %v5725_v25, %v5725_v25 }
0x12ee   : > { %v2201_v48 = vsel %vm522_vm0, %v2200_v28, 0.0 }
0x12ef   : > { %2202 = vadd.xlane.f32.xlu0 %v2201_v48 }
0x137c   : > { %v2203_v35 = vpop.xlane.xlu0 %2202 }
0x137d   : > { %v2204_v36 = vmul.f32 0.03125, %v2203_v35 }
0x137f   : > { %v2205_v38 = vadd.f32 1e-05, %v2204_v36 }
0x1381   : > { %4936 = vrsqrt.f32 %v2205_v38 }
0x138b   : > { %v4937_v39 = vpop.eup %4936 }
0x138c   : > { %v2207_v7 = vmul.f32 %v4937_v39, %v5725_v25 }
0x138e   : > { %v2208_v33 = vmul.f32 %v5342_v21, %v2207_v7 }
0x1390   : > { %v2209_v0 = vpack.c.bf16 %v2208_v33, %v2208_v33 }
0x1392   : > { %4476 = vmatmul.mubr.msk.bf16.vlgmr.msra.gmra.mrb[0].mxu1 %vm522_vm0, %v2209_v0 }
0x1393   : > { %4480 = vmatpush3.bf16.msra.mxu1 %v4926_v42  ;;  %4483 = vmatprep.mubr.msk.bf16.mxu1 %vm5179_vm1, %v5178_v8 }
0x1394   : > { %4481 = vmatprep.subr.bf16.mxu1 %v5178_v8 }
0x1397   : > { %4482 = vmatpush3.bf16.msra.mxu1 %v4927_v43 }
0x1398   : > { %4499 = vmatprep.subr.bf16.mxu1 %v5178_v8 }
0x139a   : > { %4484 = vmatmul.mubr.msk.bf16.vlgmr.msra.gmra.mrb[4].mxu1 %vm522_vm0, %v2209_v0 }
0x139b   : > { %4501 = vmatprep.mubr.msk.bf16.mxu1 %vm5179_vm1, %v5178_v8  ;;  %4500 = vmatpush3.bf16.msra.mxu1 %v2460_v59 }
0x1465   : > { %v2263_v49 = vpop.f32.mrb[0].mxu1 }
0x1466   : > { %v2326_v50 = vrot.slane %v2263_v49, 5  ;;  %v4477_v51 = vpop.f32.mrb[1].mxu1 }
0x1467   : > { %v2266_v52 = vpop.f32.mrb[2].mxu1 }
0x1468   : > { %v2328_v53 = vsel %vm651_vm2, 0.0, %v2326_v50  ;;  %v2332_v54 = vmul.f32 %v5370_v29, %v2326_v50  ;;  %v2341_v55 = vmul.f32 %v5375_v30, %v2326_v50  ;;  %v2350_v56 = vmul.f32 %v5380_v31, %v2326_v50  ;;  %v4478_v57 = vpop.f32.mrb[3].mxu1 }
0x1469   : > { %v2329_v58 = vmul.f32 %v5387_v34, %v2328_v53  ;;  %v2331_v60 = vmul.f32 %v5370_v29, %v2328_v53  ;;  %v2340_v61 = vmul.f32 %v5375_v30, %v2328_v53  ;;  %v2349_v41 = vmul.f32 %v5380_v31, %v2328_v53 }
0x146a   : > { %v2336_v19 = vrot.slane %v2332_v54, 1  ;;  %v2345_v2 = vrot.slane %v2341_v55, 2  ;;  %v2354_v6 = vrot.slane %v2350_v56, 3 }
0x146b   : > { %v2330_v63 = vadd.f32 %v5392_v40, %v2329_v58  ;;  %v2335_v37 = vrot.slane %v2331_v60, 1  ;;  %v2344_v1 = vrot.slane %v2340_v61, 2  ;;  %v2353_v4 = vrot.slane %v2349_v41, 3 }
0x146c   : > { %v5142_v60 = vmov 0.0   ;;  %v5146_v61 = vmov 0.0  }
0x146d   : > { %v2337_v3 = vsel %vm659_vm3, %v2335_v37, %v2336_v19  ;;  %v5779_v9 = vpop.f32.mrb[4].mxu1  ;;  %v2346_v12 = vsel %vm669_vm4, %v2344_v1, %v2345_v2  ;;  %v2355_v18 = vsel %vm679_vm5, %v2353_v4, %v2354_v6 }
0x146e   : > { %v2339_v10 = vadd.f32 %v2337_v3, %v2330_v63  ;;  %v4485_v11 = vpop.f32.mrb[5].mxu1 }
0x146f   : > { %v2322_v13 = vpop.f32.mrb[6].mxu1 }
0x1470   : > { %v2348_v14 = vadd.f32 %v2346_v12, %v2339_v10  ;;  %v4486_v17 = vpop.f32.mrb[7].mxu1 }
0x1472   : > { %v2357_v20 = vadd.f32 %v2355_v18, %v2348_v14 }
0x1474   : > { %v2358_v22 = vsub.f32 0.0, %v2357_v20 }
0x1476   : > { %v2359_v24 = vmul.f32 1.442695, %v2358_v22 }
0x1478   : > { %4938 = vpow2.f32 %v2359_v24 }
0x1482   : > { %v4939_v26 = vpop.eup %4938 }
0x1483   : > { %v2361_v27 = vadd.f32 1.0, %v4939_v26 }
0x1485   : > { %4940 = vrcp.f32 %v2361_v27 }
0x148f   : > { %v4941_v62 = vpop.eup %4940 }
0x1490   : > { %v5783_v28 = vmul.f32 %v4941_v62, %v2357_v20 }
0x1492   : > { %v2365_v48 = vpack.c.bf16 %v5783_v28, %v5783_v28 }
0x1494   : > { %4496 = vmatmul.mubr.msk.bf16.vlgmr.msra.gmra.mrb[4].mxu0 %vm725_vm6, %v2365_v48 }
0x1567   : > { %v2435_v35 = vpop.f32.mrb[4].mxu0 }
0x1568   : > { %2441 = vst.msk [vmem:[#allocation2] sm:$0xff] %vm769_vm8, %v2435_v35  ;;  %v4497_v36 = vpop.f32.mrb[5].mxu0 }
0x1569   : > { %v2438_v38 = vpop.f32.mrb[6].mxu0 }
0x156a   : > { %v4498_v39 = vpop.f32.mrb[7].mxu0 }
0x156f   : > { %v2448_v7 = vld [vmem:[#allocation2] sm:$0xff] }
0x1570   : > { %2450 = vrot.lane.b32.xlu1 %v2448_v7, %s5180_s15  ;;  %2444 = vrot.lane.b32.xlu0 %v2448_v7, %s5181_s16  ;;  %v2454_v33 = vpack.c.bf16 %v2448_v7, %v2448_v7 }
0x1572   : > { %4502 = vmatmul.mubr.msk.bf16.vlgmr.msra.gmra.mrb[8].mxu1 %vm786_vm9, %v2454_v33 }
0x15e2   : > { %v2451_v42 = vpop.permute.xlu1 %2450  ;;  %v2445_v0 = vpop.permute.xlu0 %2444 }
0x15e3   : > { %2453 = vst.msk [vmem:[#allocation6] sm:$0xff] %vm776_vm10, %v2451_v42  ;;  %2447 = vst.msk [vmem:[#allocation5] sm:$0xff] %vm776_vm10, %v2445_v0 }
0x1645   : > { %v2496_v43 = vpop.f32.mrb[8].mxu1 }
0x1646   : > { %v2497_v44 = vadd.f32 %v5424_v23, %v2496_v43  ;;  %v4503_v45 = vpop.f32.mrb[9].mxu1 }
0x1647   : > { %v2499_v46 = vpop.f32.mrb[10].mxu1 }
0x1648   : > { %v2503_v47 = vand.u32 2147483647, %v2497_v44  ;;  %v4504_v49 = vpop.f32.mrb[11].mxu1  ;;  %v2502_v55 = vmax.f32 %v2497_v44, 0.0 }
0x164a   : > { %v2504_v50 = vsub.f32 0.0, %v2503_v47 }
0x164c   : > { %v2505_v51 = vmul.f32 1.442695, %v2504_v50 }
0x164e   : > { %4942 = vpow2.f32 %v2505_v51 }
0x1658   : > { %v4943_v52 = vpop.eup %4942 }
0x1659   : > { %v2507_v53 = vadd.f32 1.0, %v4943_v52 }
0x165b   : > { %4944 = vlog2.f32 %v2507_v53 }
0x1665   : > { %v4945_v54 = vpop.eup %4944 }
0x1666   : > { %v2509_v56 = vmul.f32 0.6931472, %v4945_v54 }
0x1668   : > { %v2510_v57 = vadd.f32 %v2509_v56, %v2502_v55 }
0x166a   : > { %2511 = vst.msk [vmem:[#allocation3] sm:$0xff] %vm725_vm6, %v2510_v57  ;;  %v2512_v58 = vmul.f32 %v2510_v57, %v5783_v28 }
0x166c   : > { %2513 = vst.msk [vmem:[#allocation4] sm:$0xff] %vm725_vm6, %v2512_v58 }
0x166d LB: >> { %v5194_v41 = vmov 0   ;;  %s2526_s20 = scalar_lea.vmem [#allocation5], %s5152_s19  ;;  %v5195_v1 = vmov 0.0|0.0   ;;  %vm5196_vm15 = vmmov 0   ;;  %v5197_v2 = vmov 0.0   ;;  %s2522_s22 = scalar_lea.vmem [#allocation3], %s5152_s19  ;;  %s5152_s19 = sphi %s5802_s19, %s2519_s19   ;;  %v5148_v61 = vphi %v5146_v61, %v2590_v61   ;;  %v5144_v60 = vphi %v5142_v60, %v2591_v60  }
0x166e   : >> { %4947 = vset.pattern.permute.xlu1 %v5194_v41  ;;  %v2527_v19 = vld [vmem:[%s2526_s20] sm:$0x1]  ;;  %4639 = vmatprep.subr.bf16.mxu0 %v5195_v1  ;;  %s2524_s23 = scalar_lea.vmem [#allocation4], %s5152_s19  ;;  %s2560_s24 = scalar_lea.vmem [#allocation6], %s5152_s19 }
0x166f   : >> { %2528 = vxpose.xlu0.b32.start.end [1/1] (short) (narrow) %v2527_v19, 16  ;;  %4509 = vmatprep.mubr.msk.f32.mxu0 %vm5196_vm15, %v5197_v2  ;;  %v2561_v62 = vld [vmem:[%s2560_s24] sm:$0x1]  ;;  %s2665_s25 = scalar_lea.vmem [#allocation7], %s5152_s19  ;;  %s2519_s19 = sadd.s32 1, %s5152_s19  }
0x1670   : >> { %p2516_p7 = scmp.ge.s32.totalorder %s2519_s19, 8  }
0x1671   : >> { %v4134_v3 = vld [vmem:[%s2522_s22] ss:$0 sm:$0xff]  ;;  %v2671_v35 = vsub.f32 (%p2516_p7), 0.0, %v5779_v9  ;;  %4524 = vmatprep.subr.bf16.mxu1 (%p2516_p7), %v5178_v8  ;;  %4528 = vmatprep.mubr.msk.bf16.mxu1 (%p2516_p7), %vm5179_vm1, %v5178_v8  ;;  %v4953_v36 = vld [vmem:[%s6115_s11 + $0x8] sm:$0xff] (%p2516_p7)   ;;  %v4954_v38 = vld [vmem:[%s6115_s11 + $0x10] sm:$0xff] (%p2516_p7)   ;;  %v2669_v0 = vmul.f32 (%p2516_p7), %v5311_v5, %v5783_v28  ;;  %v2688_v50 = vmul.f32 (%p2516_p7), 2.0, %v5725_v25 }
0x1672   : >> { %v2566_v4 = vmul.f32 %v4134_v3, %v5335_v15  ;;  %v2567_v6 = vmul.f32 %v4134_v3, %v5337_v16  ;;  %v4952_v59 = vld [vmem:[%s6115_s11] sm:$0xff] (%p2516_p7)   ;;  %v4955_v7 = vld [vmem:[%s6115_s11 + $0x18] sm:$0xff] (%p2516_p7)   ;;  %v4957_v25 = vld [vmem:[%s6106_s2 + $0x8] sm:$0xff] (%p2516_p7)   ;;  %s5926_s28 = smov (%p2516_p7), 0  }
0x1673   : >> { %v4135_v17 = vld [vmem:[%s2524_s23] ss:$0 sm:$0xff]  ;;  %v2672_v39 = vmul.f32 (%p2516_p7), 1.442695, %v2671_v35  ;;  %v4959_v1 = vld [vmem:[%s6107_s3 + $0x8] sm:$0xff] (%p2516_p7)  }
0x1674   : >> { %v2568_v10 = vmul.f32 1.442695, %v2566_v4  ;;  %v2570_v11 = vmul.f32 1.442695, %v2567_v6  ;;  %v4956_v56 = vld [vmem:[%s6106_s2] sm:$0xff] (%p2516_p7)   ;;  %v4961_v3 = vld [vmem:[%s6110_s6 + $0x8] sm:$0xff] (%p2516_p7)  }
0x1675   : > { %4525 = vmatpush3.bf16.msra.mxu1 (%p2516_p7), %v4956_v56  ;;  %v4960_v2 = vld [vmem:[%s6110_s6] sm:$0xff] (%p2516_p7)   ;;  %v4962_v4 = vld [vmem:[%s6110_s6 + $0x10] sm:$0xff] (%p2516_p7)   ;;  %v4963_v6 = vld [vmem:[%s6110_s6 + $0x18] sm:$0xff] (%p2516_p7)  }
0x1676   : >> { %4948 = vpow2.f32 %v2568_v10  ;;  %4526 = vmatprep.subr.bf16.mxu1 (%p2516_p7), %v5178_v8  ;;  %v3011_v56 = vld [vmem:[%s6111_s7] sm:$0xf] (%p2516_p7) }
0x1677   : >> { %4950 = vpow2.f32 %v2570_v11 }
0x1678   : > { %4964 = vpow2.f32 (%p2516_p7), %v2672_v39 }
0x1679   : > { %4527 = vmatpush3.bf16.msra.mxu1 (%p2516_p7), %v4957_v25  ;;  %v3016_v25 = vsel (%p2516_p7), %vm790_vm7, %v3011_v56, 0 }
0x167a   : > { %4532 = vmatprep.subr.bf16.mxu1 (%p2516_p7), %v5178_v8 }
0x1680   : >> { %v4949_v12 = vpop.eup %4948 }
0x1681   : >> { %v4951_v13 = vpop.eup %4950  ;;  %v2572_v18 = vmul.f32 %v5148_v61, %v4949_v12 }
0x1682   : >> { %v2573_v22 = vmul.f32 %v5144_v60, %v4951_v13  ;;  %v4965_v33 = vpop.eup (%p2516_p7), %4964 }
0x1683   : > { %v2674_v42 = vadd.f32 (%p2516_p7), 1.0, %v4965_v33 }
0x1685   : > { %4966 = vrcp.f32 (%p2516_p7), %v2674_v42 }
0x168f   : > { %v4967_v45 = vpop.eup (%p2516_p7), %4966 }
0x1690   : > { %v2677_v46 = vmul.f32 (%p2516_p7), %v4967_v45, %v5779_v9 }
0x1698   : >> { %4946 = vset.pattern.permute.xlu0 %v5194_v41 }
0x16ef   : >> { %v2544_v63 = vpop.trf.xlu0 }
0x16f0   : >> { %2576 = vperm.xlu0 %4946, %v2544_v63   ;;  %v4958_v63 = vld [vmem:[%s6107_s3] sm:$0xff] (%p2516_p7)  }
0x16f3   : >> { %v2545_v37 = vpop.trf.xlu0 }
0x16f4   : >> { %2581 = vperm.xlu1 %4947, %v2545_v37  }
0x176f   : >> { %v2577_v14 = vpop.permute.xlu0 %2576 }
0x1770   : >> { %v2588_v20 = vmul.f32 %v4135_v17, %v2577_v14 }
0x1772   : >> { %v2590_v61 = vadd.f32 %v2588_v20, %v2572_v18  }
0x1773   : >> { %v2582_v24 = vpop.permute.xlu1 %2581 }
0x1774   : >> { %v2589_v26 = vmul.f32 %v4135_v17, %v2582_v24 }
0x1776   : >> { %v2591_v60 = vadd.f32 %v2589_v26, %v2573_v22  }
0x1778   : >> { %v4640_v27 = vpack.c.bf16 %v2591_v60, %v2590_v61 }
0x177a   : >> { %4641 = vmatpush3.bf16.msra.mxu0 %v4640_v27 }
0x177b   : > { %4512 = vmatprep.subr.bf16.mxu0 (%p2516_p7), %v5178_v8 }
0x177d   : >> { %4510 = vmatmul.mubr.msk.f32.vlgmr.msra.gmra.mrb[0].mxu0 %vm776_vm10, %v2561_v62 }
0x177e   : > { %4520 = vmatprep.mubr.msk.bf16.mxu0 (%p2516_p7), %vm5179_vm1, %v5178_v8  ;;  %4513 = vmatpush3.bf16.msra.mxu0 (%p2516_p7), %v4952_v59 }
0x177f   : > { %4514 = vmatprep.subr.bf16.mxu0 (%p2516_p7), %v5178_v8 }
0x1782   : > { %4515 = vmatpush3.bf16.msra.mxu0 (%p2516_p7), %v4953_v36 }
0x1783   : > { %4516 = vmatprep.subr.bf16.mxu0 (%p2516_p7), %v5178_v8 }
0x1786   : > { %4517 = vmatpush3.bf16.msra.mxu0 (%p2516_p7), %v4954_v38 }
0x1787   : > { %4518 = vmatprep.subr.bf16.mxu0 (%p2516_p7), %v5178_v8 }
0x178a   : > { %4519 = vmatpush3.bf16.msra.mxu0 (%p2516_p7), %v4955_v7 }
0x178b   : > { %4540 = vmatprep.subr.bf16.mxu0 (%p2516_p7), %v5178_v8 }
0x184b   : > { %2518 = sbr.rel (!%p2516_p7) target bundleno = 5741 (0x166d), region = 211 }
0x1850   : >> { %v2661_v48 = vpop.f32.mrb[0].mxu0 }
0x1851   : >> { %2667 = vst.msk [vmem:[%s2665_s25] sm:$0x1] %vm998_vm12, %v2661_v48  ;;  %v4511_v32 = vpop.f32.mrb[1].mxu0 }
0x1858   : > { %v2668_v43 = vld [vmem:[#allocation7] sm:$0xff] }
0x1859   : > { %v2670_v44 = vadd.f32 %v2669_v0, %v2668_v43 }
0x185b   : > { %v2678_v47 = vmul.f32 %v2677_v46, %v2670_v44 }
0x185d   : > { %v2679_v49 = vpack.c.bf16 %v2678_v47, %v2678_v47 }
0x185f   : > { %4521 = vmatmul.mubr.msk.bf16.vlgmr.msra.gmra.mrb[0].mxu0 %vm725_vm6, %v2679_v49 }
0x1860   : > { %4548 = vmatprep.mubr.msk.bf16.mxu0 %vm5179_vm1, %v5178_v8  ;;  %4541 = vmatpush3.bf16.msra.mxu0 %v4960_v2 }
0x1861   : > { %4542 = vmatprep.subr.bf16.mxu0 %v5178_v8 }
0x1864   : > { %4543 = vmatpush3.bf16.msra.mxu0 %v4961_v3 }
0x1865   : > { %4544 = vmatprep.subr.bf16.mxu0 %v5178_v8 }
0x1868   : > { %4545 = vmatpush3.bf16.msra.mxu0 %v4962_v4 }
0x1869   : > { %4546 = vmatprep.subr.bf16.mxu0 %v5178_v8 }
0x186c   : > { %4547 = vmatpush3.bf16.msra.mxu0 %v4963_v6 }
0x1932   : > { %v2750_v51 = vpop.f32.mrb[0].mxu0 }
0x1933   : > { %v5849_v52 = vadd.f32 %v2750_v51, %v2688_v50  ;;  %v4522_v53 = vpop.f32.mrb[1].mxu0 }
0x1934   : > { %v2753_v54 = vpop.f32.mrb[2].mxu0 }
0x1935   : > { %v4523_v28 = vpop.f32.mrb[3].mxu0  ;;  %v2756_v55 = vmul.f32 %v5849_v52, %v5849_v52 }
0x1937   : > { %v2757_v9 = vsel %vm522_vm0, %v2756_v55, 0.0 }
0x1938   : > { %2758 = vadd.xlane.f32.xlu0 %v2757_v9 }
0x19c5   : > { %v2759_v57 = vpop.xlane.xlu0 %2758 }
0x19c6   : > { %v2760_v58 = vmul.f32 0.03125, %v2759_v57 }
0x19c8   : > { %v2761_v60 = vadd.f32 1e-05, %v2760_v58 }
0x19ca   : > { %4968 = vrsqrt.f32 %v2761_v60 }
0x19d4   : > { %v4969_v61 = vpop.eup %4968 }
0x19d5   : > { %v2763_v41 = vmul.f32 %v4969_v61, %v5849_v52 }
0x19d7   : > { %v2764_v19 = vmul.f32 %v5342_v21, %v2763_v41 }
0x19d9   : > { %v2765_v37 = vpack.c.bf16 %v2764_v19, %v2764_v19 }
0x19db   : > { %4529 = vmatmul.mubr.msk.bf16.vlgmr.msra.gmra.mrb[0].mxu1 %vm522_vm0, %v2765_v37 }
0x19dc   : > { %4533 = vmatpush3.bf16.msra.mxu1 %v4958_v63  ;;  %4536 = vmatprep.mubr.msk.bf16.mxu1 %vm5179_vm1, %v5178_v8 }
0x19dd   : > { %4534 = vmatprep.subr.bf16.mxu1 %v5178_v8 }
0x19e0   : > { %4535 = vmatpush3.bf16.msra.mxu1 %v4959_v1 }
0x19e1   : > { %4552 = vmatprep.subr.bf16.mxu1 %v5178_v8 }
0x19e3   : > { %4537 = vmatmul.mubr.msk.bf16.vlgmr.msra.gmra.mrb[4].mxu1 %vm522_vm0, %v2765_v37 }
0x19e4   : > { %4554 = vmatprep.mubr.msk.bf16.mxu1 %vm5179_vm1, %v5178_v8  ;;  %4553 = vmatpush3.bf16.msra.mxu1 %v3016_v25 }
0x1aae   : > { %v2819_v10 = vpop.f32.mrb[0].mxu1 }
0x1aaf   : > { %v2882_v11 = vrot.slane %v2819_v10, 5  ;;  %v4530_v12 = vpop.f32.mrb[1].mxu1 }
0x1ab0   : > { %v2822_v13 = vpop.f32.mrb[2].mxu1 }
0x1ab1   : > { %v2884_v14 = vsel %vm651_vm2, 0.0, %v2882_v11  ;;  %v2888_v17 = vmul.f32 %v5370_v29, %v2882_v11  ;;  %v2897_v18 = vmul.f32 %v5375_v30, %v2882_v11  ;;  %v2906_v20 = vmul.f32 %v5380_v31, %v2882_v11  ;;  %v4531_v22 = vpop.f32.mrb[3].mxu1 }
0x1ab2   : > { %v2885_v24 = vmul.f32 %v5387_v34, %v2884_v14  ;;  %v2887_v26 = vmul.f32 %v5370_v29, %v2884_v14  ;;  %v2896_v27 = vmul.f32 %v5375_v30, %v2884_v14  ;;  %v2905_v62 = vmul.f32 %v5380_v31, %v2884_v14 }
0x1ab3   : > { %v2892_v48 = vrot.slane %v2888_v17, 1  ;;  %v2901_v36 = vrot.slane %v2897_v18, 2  ;;  %v2910_v7 = vrot.slane %v2906_v20, 3 }
0x1ab4   : > { %v2886_v32 = vadd.f32 %v5392_v40, %v2885_v24  ;;  %v2891_v59 = vrot.slane %v2887_v26, 1  ;;  %v2900_v35 = vrot.slane %v2896_v27, 2  ;;  %v2909_v39 = vrot.slane %v2905_v62, 3 }
0x1ab5   : > { %v5154_v26 = vmov 0.0   ;;  %v5158_v27 = vmov 0.0  }
0x1ab6   : > { %v2893_v38 = vsel %vm659_vm3, %v2891_v59, %v2892_v48  ;;  %v5903_v33 = vpop.f32.mrb[4].mxu1  ;;  %v2902_v43 = vsel %vm669_vm4, %v2900_v35, %v2901_v36  ;;  %v2911_v47 = vsel %vm679_vm5, %v2909_v39, %v2910_v7 }
0x1ab7   : > { %v2895_v42 = vadd.f32 %v2893_v38, %v2886_v32  ;;  %v4538_v0 = vpop.f32.mrb[5].mxu1 }
0x1ab8   : > { %v2878_v44 = vpop.f32.mrb[6].mxu1 }
0x1ab9   : > { %v2904_v45 = vadd.f32 %v2902_v43, %v2895_v42  ;;  %v4539_v46 = vpop.f32.mrb[7].mxu1 }
0x1abb   : > { %v2913_v49 = vadd.f32 %v2911_v47, %v2904_v45 }
0x1abd   : > { %v2914_v50 = vsub.f32 0.0, %v2913_v49 }
0x1abf   : > { %v2915_v51 = vmul.f32 1.442695, %v2914_v50 }
0x1ac1   : > { %4970 = vpow2.f32 %v2915_v51 }
0x1acb   : > { %v4971_v53 = vpop.eup %4970 }
0x1acc   : > { %v2917_v54 = vadd.f32 1.0, %v4971_v53 }
0x1ace   : > { %4972 = vrcp.f32 %v2917_v54 }
0x1ad8   : > { %v4973_v28 = vpop.eup %4972 }
0x1ad9   : > { %v5907_v55 = vmul.f32 %v4973_v28, %v2913_v49 }
0x1adb   : > { %v2921_v9 = vpack.c.bf16 %v5907_v55, %v5907_v55 }
0x1add   : > { %4549 = vmatmul.mubr.msk.bf16.vlgmr.msra.gmra.mrb[4].mxu0 %vm725_vm6, %v2921_v9 }
0x1bb0   : > { %v2991_v57 = vpop.f32.mrb[4].mxu0 }
0x1bb1   : > { %2997 = vst.msk [vmem:[#allocation2] sm:$0xff] %vm769_vm8, %v2991_v57  ;;  %v4550_v58 = vpop.f32.mrb[5].mxu0 }
0x1bb2   : > { %v2994_v60 = vpop.f32.mrb[6].mxu0 }
0x1bb3   : > { %v4551_v61 = vpop.f32.mrb[7].mxu0 }
0x1bb8   : > { %v3004_v41 = vld [vmem:[#allocation2] sm:$0xff] }
0x1bb9   : > { %3006 = vrot.lane.b32.xlu1 %v3004_v41, %s5180_s15  ;;  %3000 = vrot.lane.b32.xlu0 %v3004_v41, %s5181_s16  ;;  %v3010_v19 = vpack.c.bf16 %v3004_v41, %v3004_v41 }
0x1bbb   : > { %4555 = vmatmul.mubr.msk.bf16.vlgmr.msra.gmra.mrb[8].mxu1 %vm786_vm9, %v3010_v19 }
0x1c2b   : > { %v3007_v63 = vpop.permute.xlu1 %3006  ;;  %v3001_v37 = vpop.permute.xlu0 %3000 }
0x1c2c   : > { %3009 = vst.msk [vmem:[#allocation6] sm:$0xff] %vm776_vm10, %v3007_v63  ;;  %3003 = vst.msk [vmem:[#allocation5] sm:$0xff] %vm776_vm10, %v3001_v37 }
0x1c8e   : > { %v3052_v1 = vpop.f32.mrb[8].mxu1 }
0x1c8f   : > { %v3053_v2 = vadd.f32 %v5424_v23, %v3052_v1  ;;  %v4556_v3 = vpop.f32.mrb[9].mxu1 }
0x1c90   : > { %v3055_v4 = vpop.f32.mrb[10].mxu1 }
0x1c91   : > { %v3059_v6 = vand.u32 2147483647, %v3053_v2  ;;  %v4557_v10 = vpop.f32.mrb[11].mxu1  ;;  %v3058_v18 = vmax.f32 %v3053_v2, 0.0 }
0x1c93   : > { %v3060_v11 = vsub.f32 0.0, %v3059_v6 }
0x1c95   : > { %v3061_v12 = vmul.f32 1.442695, %v3060_v11 }
0x1c97   : > { %4974 = vpow2.f32 %v3061_v12 }
0x1ca1   : > { %v4975_v13 = vpop.eup %4974 }
0x1ca2   : > { %v3063_v14 = vadd.f32 1.0, %v4975_v13 }
0x1ca4   : > { %4976 = vlog2.f32 %v3063_v14 }
0x1cae   : > { %v4977_v17 = vpop.eup %4976 }
0x1caf   : > { %v3065_v20 = vmul.f32 0.6931472, %v4977_v17 }
0x1cb1   : > { %v3066_v22 = vadd.f32 %v3065_v20, %v3058_v18 }
0x1cb3   : > { %3067 = vst.msk [vmem:[#allocation3] sm:$0xff] %vm725_vm6, %v3066_v22  ;;  %v3068_v24 = vmul.f32 %v3066_v22, %v5907_v55 }
0x1cb5   : > { %3069 = vst.msk [vmem:[#allocation4] sm:$0xff] %vm725_vm6, %v3068_v24 }
0x1cb6 LB: >> { %v5198_v62 = vmov 0   ;;  %s3082_s30 = scalar_lea.vmem [#allocation5], %s5164_s28  ;;  %v5199_v35 = vmov 0.0|0.0   ;;  %vm5200_vm11 = vmmov 0   ;;  %v5201_v36 = vmov 0.0   ;;  %s3078_s17 = scalar_lea.vmem [#allocation3], %s5164_s28  ;;  %s5164_s28 = sphi %s5926_s28, %s3075_s28   ;;  %v5160_v27 = vphi %v5158_v27, %v3146_v27   ;;  %v5156_v26 = vphi %v5154_v26, %v3147_v26  }
0x1cb7   : >> { %4979 = vset.pattern.permute.xlu1 %v5198_v62  ;;  %v3083_v48 = vld [vmem:[%s3082_s30] sm:$0x1]  ;;  %4642 = vmatprep.subr.bf16.mxu0 %v5199_v35  ;;  %s3080_s18 = scalar_lea.vmem [#allocation4], %s5164_s28  ;;  %s3116_s19 = scalar_lea.vmem [#allocation6], %s5164_s28 }
0x1cb8   : >> { %3084 = vxpose.xlu0.b32.start.end [1/1] (short) (narrow) %v3083_v48, 16  ;;  %4562 = vmatprep.mubr.msk.f32.mxu0 %vm5200_vm11, %v5201_v36  ;;  %v3117_v28 = vld [vmem:[%s3116_s19] sm:$0x1]  ;;  %s3221_s20 = scalar_lea.vmem [#allocation7], %s5164_s28  ;;  %s3075_s28 = sadd.s32 1, %s5164_s28  }
0x1cb9   : >> { %p3072_p8 = scmp.ge.s32.totalorder %s3075_s28, 8  }
0x1cba   : >> { %v4154_v38 = vld [vmem:[%s3078_s17] ss:$0 sm:$0xff]  ;;  %v3227_v57 = vsub.f32 (%p3072_p8), 0.0, %v5903_v33  ;;  %4577 = vmatprep.subr.bf16.mxu1 (%p3072_p8), %v5178_v8  ;;  %4581 = vmatprep.mubr.msk.bf16.mxu1 (%p3072_p8), %vm5179_vm1, %v5178_v8  ;;  %v4985_v58 = vld [vmem:[%s6115_s11 + $0x8] sm:$0xff] (%p3072_p8)   ;;  %v4986_v60 = vld [vmem:[%s6115_s11 + $0x10] sm:$0xff] (%p3072_p8)   ;;  %v3225_v37 = vmul.f32 (%p3072_p8), %v5311_v5, %v5907_v55  ;;  %v3244_v11 = vmul.f32 (%p3072_p8), 2.0, %v5849_v52 }
0x1cbb   : >> { %v3122_v39 = vmul.f32 %v4154_v38, %v5335_v15  ;;  %v3123_v7 = vmul.f32 %v4154_v38, %v5337_v16  ;;  %v4984_v25 = vld [vmem:[%s6115_s11] sm:$0xff] (%p3072_p8)   ;;  %v4987_v41 = vld [vmem:[%s6115_s11 + $0x18] sm:$0xff] (%p3072_p8)   ;;  %v4989_v52 = vld [vmem:[%s6106_s2 + $0x8] sm:$0xff] (%p3072_p8)  }
0x1cbc   : >> { %v4155_v46 = vld [vmem:[%s3080_s18] ss:$0 sm:$0xff]  ;;  %v3228_v61 = vmul.f32 (%p3072_p8), 1.442695, %v3227_v57  ;;  %v4991_v35 = vld [vmem:[%s6107_s3 + $0x8] sm:$0xff] (%p3072_p8)   ;;  %v4994_v38 = vld [vmem:[%s6110_s6 + $0x10] sm:$0xff] (%p3072_p8)  }
0x1cbd   : >> { %v3124_v42 = vmul.f32 1.442695, %v3122_v39  ;;  %v3126_v0 = vmul.f32 1.442695, %v3123_v7  ;;  %v4988_v20 = vld [vmem:[%s6106_s2] sm:$0xff] (%p3072_p8)   ;;  %v4993_v36 = vld [vmem:[%s6110_s6 + $0x8] sm:$0xff] (%p3072_p8)  }
0x1cbe   : > { %4578 = vmatpush3.bf16.msra.mxu1 (%p3072_p8), %v4988_v20  ;;  %v4995_v39 = vld [vmem:[%s6110_s6 + $0x18] sm:$0xff] (%p3072_p8)  }
0x1cbf   : >> { %4980 = vpow2.f32 %v3124_v42  ;;  %4579 = vmatprep.subr.bf16.mxu1 (%p3072_p8), %v5178_v8 }
0x1cc0   : >> { %4982 = vpow2.f32 %v3126_v0 }
0x1cc1   : > { %4996 = vpow2.f32 (%p3072_p8), %v3228_v61 }
0x1cc2   : > { %4580 = vmatpush3.bf16.msra.mxu1 (%p3072_p8), %v4989_v52 }
0x1cc3   : > { %4585 = vmatprep.subr.bf16.mxu1 (%p3072_p8), %v5178_v8 }
0x1cc9   : >> { %v4981_v43 = vpop.eup %4980 }
0x1cca   : >> { %v4983_v44 = vpop.eup %4982  ;;  %v3128_v47 = vmul.f32 %v5160_v27, %v4981_v43 }
0x1ccb   : >> { %v3129_v50 = vmul.f32 %v5156_v26, %v4983_v44  ;;  %v4997_v19 = vpop.eup (%p3072_p8), %4996 }
0x1ccc   : > { %v3230_v63 = vadd.f32 (%p3072_p8), 1.0, %v4997_v19 }
0x1cce   : > { %4998 = vrcp.f32 (%p3072_p8), %v3230_v63 }
0x1cd8   : > { %v4999_v3 = vpop.eup (%p3072_p8), %4998 }
0x1cd9   : > { %v3233_v4 = vmul.f32 (%p3072_p8), %v4999_v3, %v5903_v33 }
0x1ce1   : >> { %4978 = vset.pattern.permute.xlu0 %v5198_v62 }
0x1d38   : >> { %v3100_v32 = vpop.trf.xlu0 }
0x1d39   : >> { %3132 = vperm.xlu0 %4978, %v3100_v32   ;;  %v4990_v32 = vld [vmem:[%s6107_s3] sm:$0xff] (%p3072_p8)  }
0x1d3c   : >> { %v3101_v59 = vpop.trf.xlu0 }
0x1d3d   : >> { %3137 = vperm.xlu1 %4979, %v3101_v59  }
0x1db8   : >> { %v3133_v45 = vpop.permute.xlu0 %3132 }
0x1db9   : >> { %v3144_v49 = vmul.f32 %v4155_v46, %v3133_v45 }
0x1dbb   : >> { %v3146_v27 = vadd.f32 %v3144_v49, %v3128_v47  }
0x1dbc   : >> { %v3138_v51 = vpop.permute.xlu1 %3137 }
0x1dbd   : >> { %v3145_v53 = vmul.f32 %v4155_v46, %v3138_v51 }
0x1dbf   : >> { %v3147_v26 = vadd.f32 %v3145_v53, %v3129_v50  }
0x1dc1   : >> { %v4643_v54 = vpack.c.bf16 %v3147_v26, %v3146_v27 }
0x1dc3   : >> { %4644 = vmatpush3.bf16.msra.mxu0 %v4643_v54 }
0x1dc4   : > { %4565 = vmatprep.subr.bf16.mxu0 (%p3072_p8), %v5178_v8 }
0x1dc6   : >> { %4563 = vmatmul.mubr.msk.f32.vlgmr.msra.gmra.mrb[0].mxu0 %vm776_vm10, %v3117_v28 }
0x1dc7   : > { %4573 = vmatprep.mubr.msk.bf16.mxu0 (%p3072_p8), %vm5179_vm1, %v5178_v8  ;;  %4566 = vmatpush3.bf16.msra.mxu0 (%p3072_p8), %v4984_v25 }
0x1dc8   : > { %4567 = vmatprep.subr.bf16.mxu0 (%p3072_p8), %v5178_v8 }
0x1dcb   : > { %4568 = vmatpush3.bf16.msra.mxu0 (%p3072_p8), %v4985_v58 }
0x1dcc   : > { %4569 = vmatprep.subr.bf16.mxu0 (%p3072_p8), %v5178_v8 }
0x1dcf   : > { %4570 = vmatpush3.bf16.msra.mxu0 (%p3072_p8), %v4986_v60 }
0x1dd0   : > { %4571 = vmatprep.subr.bf16.mxu0 (%p3072_p8), %v5178_v8 }
0x1dd3   : > { %4572 = vmatpush3.bf16.msra.mxu0 (%p3072_p8), %v4987_v41 }
0x1dd4   : > { %4593 = vmatprep.subr.bf16.mxu0 (%p3072_p8), %v5178_v8 }
0x1e94   : > { %3074 = sbr.rel (!%p3072_p8) target bundleno = 7350 (0x1cb6), region = 222 }
0x1e99   : >> { %v3217_v9 = vpop.f32.mrb[0].mxu0 }
0x1e9a   : >> { %3223 = vst.msk [vmem:[%s3221_s20] sm:$0x1] %vm998_vm12, %v3217_v9  ;;  %v4564_v56 = vpop.f32.mrb[1].mxu0 }
0x1ea1   : > { %v3224_v1 = vld [vmem:[#allocation7] sm:$0xff] }
0x1ea2   : > { %v3226_v2 = vadd.f32 %v3225_v37, %v3224_v1 }
0x1ea4   : > { %v3234_v6 = vmul.f32 %v3233_v4, %v3226_v2 }
0x1ea6   : > { %v3235_v10 = vpack.c.bf16 %v3234_v6, %v3234_v6 }
0x1ea8   : > { %4574 = vmatmul.mubr.msk.bf16.vlgmr.msra.gmra.mrb[0].mxu0 %vm725_vm6, %v3235_v10 }
0x1ea9   : > { %4601 = vmatprep.mubr.msk.bf16.mxu0 %vm5179_vm1, %v5178_v8 }
0x1f7b   : > { %v3306_v12 = vpop.f32.mrb[0].mxu0 }
0x1f7c   : > { %v5973_v13 = vadd.f32 %v3306_v12, %v3244_v11  ;;  %v4575_v14 = vpop.f32.mrb[1].mxu0  ;;  %v3567_v12 = vld [vmem:[%s6111_s7] sm:$0xf] }
0x1f7d   : > { %v3309_v17 = vpop.f32.mrb[2].mxu0  ;;  %v3572_v14 = vsel %vm790_vm7, %v3567_v12, 0 }
0x1f7e   : > { %v4576_v55 = vpop.f32.mrb[3].mxu0  ;;  %v3312_v18 = vmul.f32 %v5973_v13, %v5973_v13 }
0x1f80   : > { %v3313_v33 = vsel %vm522_vm0, %v3312_v18, 0.0 }
0x1f81   : > { %3314 = vadd.xlane.f32.xlu0 %v3313_v33 }
0x200e   : > { %v3315_v22 = vpop.xlane.xlu0 %3314 }
0x200f   : > { %v3316_v24 = vmul.f32 0.03125, %v3315_v22 }
0x2011   : > { %v3317_v26 = vadd.f32 1e-05, %v3316_v24 }
0x2013   : > { %5000 = vrsqrt.f32 %v3317_v26 }
0x201d   : > { %v5001_v27 = vpop.eup %5000 }
0x201e   : > { %v3319_v62 = vmul.f32 %v5001_v27, %v5973_v13 }
0x2020   : > { %v3320_v48 = vmul.f32 %v5342_v21, %v3319_v62  ;;  %v4992_v21 = vld [vmem:[%s6110_s6] sm:$0xff]  }
0x2021   : > { %4594 = vmatpush3.bf16.msra.mxu0 %v4992_v21 }
0x2022   : > { %v3321_v59 = vpack.c.bf16 %v3320_v48, %v3320_v48  ;;  %4595 = vmatprep.subr.bf16.mxu0 %v5178_v8 }
0x2024   : > { %4582 = vmatmul.mubr.msk.bf16.vlgmr.msra.gmra.mrb[0].mxu1 %vm522_vm0, %v3321_v59 }
0x2025   : > { %4586 = vmatpush3.bf16.msra.mxu1 %v4990_v32  ;;  %4589 = vmatprep.mubr.msk.bf16.mxu1 %vm5179_vm1, %v5178_v8 }
0x2026   : > { %4587 = vmatprep.subr.bf16.mxu1 %v5178_v8  ;;  %4596 = vmatpush3.bf16.msra.mxu0 %v4993_v36 }
0x2027   : > { %4597 = vmatprep.subr.bf16.mxu0 %v5178_v8 }
0x2029   : > { %4588 = vmatpush3.bf16.msra.mxu1 %v4991_v35 }
0x202a   : > { %4605 = vmatprep.subr.bf16.mxu1 %v5178_v8  ;;  %4598 = vmatpush3.bf16.msra.mxu0 %v4994_v38 }
0x202b   : > { %4599 = vmatprep.subr.bf16.mxu0 %v5178_v8 }
0x202c   : > { %4590 = vmatmul.mubr.msk.bf16.vlgmr.msra.gmra.mrb[4].mxu1 %vm522_vm0, %v3321_v59 }
0x202d   : > { %4607 = vmatprep.mubr.msk.bf16.mxu1 %vm5179_vm1, %v5178_v8  ;;  %4606 = vmatpush3.bf16.msra.mxu1 %v3572_v14 }
0x202e   : > { %4600 = vmatpush3.bf16.msra.mxu0 %v4995_v39 }
0x20f7   : > { %v3375_v7 = vpop.f32.mrb[0].mxu1 }
0x20f8   : > { %v3438_v42 = vrot.slane %v3375_v7, 5  ;;  %v4583_v0 = vpop.f32.mrb[1].mxu1 }
0x20f9   : > { %v3378_v43 = vpop.f32.mrb[2].mxu1 }
0x20fa   : > { %v3440_v44 = vsel %vm651_vm2, 0.0, %v3438_v42  ;;  %v3444_v45 = vmul.f32 %v5370_v29, %v3438_v42  ;;  %v3453_v46 = vmul.f32 %v5375_v30, %v3438_v42  ;;  %v3462_v47 = vmul.f32 %v5380_v31, %v3438_v42  ;;  %v4584_v49 = vpop.f32.mrb[3].mxu1 }
0x20fb   : > { %v3441_v50 = vmul.f32 %v5387_v34, %v3440_v44  ;;  %v3443_v51 = vmul.f32 %v5370_v29, %v3440_v44  ;;  %v3452_v53 = vmul.f32 %v5375_v30, %v3440_v44  ;;  %v3461_v54 = vmul.f32 %v5380_v31, %v3440_v44 }
0x20fc   : > { %v3448_v28 = vrot.slane %v3444_v45, 1  ;;  %v3457_v57 = vrot.slane %v3453_v46, 2  ;;  %v3466_v61 = vrot.slane %v3462_v47, 3  ;;  %v5170_v44 = vmov 0.0  }
0x20fd   : > { %v3442_v9 = vadd.f32 %v5392_v40, %v3441_v50  ;;  %v3447_v56 = vrot.slane %v3443_v51, 1  ;;  %v3456_v25 = vrot.slane %v3452_v53, 2  ;;  %v3465_v60 = vrot.slane %v3461_v54, 3 }
0x20ff   : > { %v3449_v58 = vsel %vm659_vm3, %v3447_v56, %v3448_v28  ;;  %v6027_v41 = vpop.f32.mrb[4].mxu1  ;;  %v3458_v29 = vsel %vm669_vm4, %v3456_v25, %v3457_v57  ;;  %v3467_v31 = vsel %vm679_vm5, %v3465_v60, %v3466_v61 }
0x2100   : > { %v3451_v19 = vadd.f32 %v3449_v58, %v3442_v9  ;;  %v4591_v34 = vpop.f32.mrb[5].mxu1 }
0x2101   : > { %v3434_v63 = vpop.f32.mrb[6].mxu1 }
0x2102   : > { %v3460_v30 = vadd.f32 %v3458_v29, %v3451_v19  ;;  %v4592_v37 = vpop.f32.mrb[7].mxu1 }
0x2104   : > { %v3469_v1 = vadd.f32 %v3467_v31, %v3460_v30 }
0x2106   : > { %v3470_v40 = vsub.f32 0.0, %v3469_v1 }
0x2108   : > { %v3471_v2 = vmul.f32 1.442695, %v3470_v40 }
0x210a   : > { %5002 = vpow2.f32 %v3471_v2 }
0x2114   : > { %v5003_v3 = vpop.eup %5002 }
0x2115   : > { %v3473_v4 = vadd.f32 1.0, %v5003_v3 }
0x2117   : > { %5004 = vrcp.f32 %v3473_v4 }
0x2121   : > { %v5005_v6 = vpop.eup %5004 }
0x2122   : > { %v6031_v10 = vmul.f32 %v5005_v6, %v3469_v1 }
0x2124   : > { %v3477_v11 = vpack.c.bf16 %v6031_v10, %v6031_v10 }
0x2126   : > { %4602 = vmatmul.mubr.msk.bf16.vlgmr.msra.gmra.mrb[4].mxu0 %vm725_vm6, %v3477_v11 }
0x21f9   : > { %v3547_v17 = vpop.f32.mrb[4].mxu0 }
0x21fa   : > { %3553 = vst.msk [vmem:[#allocation2] sm:$0xff] %vm769_vm8, %v3547_v17  ;;  %v4603_v55 = vpop.f32.mrb[5].mxu0 }
0x21fb   : > { %v3550_v18 = vpop.f32.mrb[6].mxu0 }
0x21fc   : > { %v4604_v33 = vpop.f32.mrb[7].mxu0 }
0x2201   : > { %v3560_v20 = vld [vmem:[#allocation2] sm:$0xff] }
0x2202   : > { %3562 = vrot.lane.b32.xlu1 %v3560_v20, %s5180_s15  ;;  %3556 = vrot.lane.b32.xlu0 %v3560_v20, %s5181_s16  ;;  %v3566_v52 = vpack.c.bf16 %v3560_v20, %v3560_v20  ;;  %s6050_s15 = smov 0  }
0x2204   : > { %4608 = vmatmul.mubr.msk.bf16.vlgmr.msra.gmra.mrb[8].mxu1 %vm786_vm9, %v3566_v52 }
0x2274   : > { %v3563_v22 = vpop.permute.xlu1 %3562  ;;  %v3557_v24 = vpop.permute.xlu0 %3556 }
0x2275   : > { %3565 = vst.msk [vmem:[#allocation6] sm:$0xff] %vm776_vm10, %v3563_v22  ;;  %3559 = vst.msk [vmem:[#allocation5] sm:$0xff] %vm776_vm10, %v3557_v24 }
0x22d7   : > { %v3608_v26 = vpop.f32.mrb[8].mxu1 }
0x22d8   : > { %v3609_v27 = vadd.f32 %v5424_v23, %v3608_v26  ;;  %v4609_v62 = vpop.f32.mrb[9].mxu1  ;;  %v5166_v23 = vmov 0.0  }
0x22d9   : > { %v3611_v48 = vpop.f32.mrb[10].mxu1 }
0x22da   : > { %v3615_v32 = vand.u32 2147483647, %v3609_v27  ;;  %v4610_v59 = vpop.f32.mrb[11].mxu1  ;;  %v3614_v7 = vmax.f32 %v3609_v27, 0.0 }
0x22dc   : > { %v3616_v35 = vsub.f32 0.0, %v3615_v32 }
0x22de   : > { %v3617_v21 = vmul.f32 1.442695, %v3616_v35 }
0x22e0   : > { %5006 = vpow2.f32 %v3617_v21 }
0x22ea   : > { %v5007_v36 = vpop.eup %5006 }
0x22eb   : > { %v3619_v38 = vadd.f32 1.0, %v5007_v36 }
0x22ed   : > { %5008 = vlog2.f32 %v3619_v38 }
0x22f7   : > { %v5009_v39 = vpop.eup %5008 }
0x22f8   : > { %v3621_v42 = vmul.f32 0.6931472, %v5009_v39 }
0x22fa   : > { %v3622_v0 = vadd.f32 %v3621_v42, %v3614_v7 }
0x22fc   : > { %3623 = vst.msk [vmem:[#allocation3] sm:$0xff] %vm725_vm6, %v3622_v0  ;;  %v3624_v43 = vmul.f32 %v3622_v0, %v6031_v10 }
0x22fe   : > { %3625 = vst.msk [vmem:[#allocation4] sm:$0xff] %vm725_vm6, %v3624_v43 }
0x22ff LB: >> { %v5202_v45 = vmov 0   ;;  %s3638_s16 = scalar_lea.vmem [#allocation5], %s5176_s15  ;;  %v5203_v50 = vmov 0.0|0.0   ;;  %vm5204_vm2 = vmmov 0   ;;  %v5205_v51 = vmov 0.0   ;;  %s3634_s24 = scalar_lea.vmem [#allocation3], %s5176_s15  ;;  %s5176_s15 = sphi %s6050_s15, %s3631_s15   ;;  %v5172_v44 = vphi %v5170_v44, %v3702_v44   ;;  %v5168_v23 = vphi %v5166_v23, %v3703_v23  }
0x2300   : >> { %5011 = vset.pattern.permute.xlu1 %v5202_v45  ;;  %v3639_v46 = vld [vmem:[%s3638_s16] sm:$0x1]  ;;  %4645 = vmatprep.subr.bf16.mxu0 %v5203_v50  ;;  %s3636_s25 = scalar_lea.vmem [#allocation4], %s5176_s15  ;;  %s3672_s26 = scalar_lea.vmem [#allocation6], %s5176_s15 }
0x2301   : >> { %3640 = vxpose.xlu0.b32.start.end [1/1] (short) (narrow) %v3639_v46, 16  ;;  %4615 = vmatprep.mubr.msk.f32.mxu0 %vm5204_vm2, %v5205_v51  ;;  %v3673_v37 = vld [vmem:[%s3672_s26] sm:$0x1]  ;;  %s3777_s27 = scalar_lea.vmem [#allocation7], %s5176_s15  ;;  %s3631_s15 = sadd.s32 1, %s5176_s15  }
0x2302   : >> { %p3628_p9 = scmp.ge.s32.totalorder %s3631_s15, 8  }
0x2303   : >> { %v4174_v53 = vld [vmem:[%s3634_s24] ss:$0 sm:$0xff]  ;;  %v3783_v2 = vsub.f32 (%p3628_p9), 0.0, %v6027_v41  ;;  %v5017_v3 = vld [vmem:[%s6115_s11 + $0x8] sm:$0xff] (%p3628_p9)   ;;  %v3781_v12 = vmul.f32 (%p3628_p9), %v5311_v5, %v6031_v10  ;;  %v3800_v52 = vmul.f32 (%p3628_p9), 2.0, %v5973_v13 }
0x2304   : >> { %v3678_v54 = vmul.f32 %v4174_v53, %v5335_v15  ;;  %v3679_v28 = vmul.f32 %v4174_v53, %v5337_v16  ;;  %v5016_v40 = vld [vmem:[%s6115_s11] sm:$0xff] (%p3628_p9)   ;;  %v5018_v15 = vld [vmem:[%s6115_s11 + $0x10] sm:$0xff] (%p3628_p9)   ;;  %v5019_v16 = vld [vmem:[%s6115_s11 + $0x18] sm:$0xff] (%p3628_p9)  }
0x2305   : >> { %v4175_v60 = vld [vmem:[%s3636_s25] ss:$0 sm:$0xff]  ;;  %v3784_v4 = vmul.f32 (%p3628_p9), 1.442695, %v3783_v2 }
0x2306   : >> { %v3680_v9 = vmul.f32 1.442695, %v3678_v54  ;;  %v3682_v56 = vmul.f32 1.442695, %v3679_v28  ;;  %v4182_v36 = vld [vmem:[%s6116_s12] ss:$0 sm:$0xff] (%p3628_p9) }
0x2307   : > { %v4183_v39 = vld [vmem:[%s6117_s13] ss:$0 sm:$0xff] (%p3628_p9) }
0x2308   : >> { %5012 = vpow2.f32 %v3680_v9 }
0x2309   : >> { %5014 = vpow2.f32 %v3682_v56 }
0x230a   : > { %5020 = vpow2.f32 (%p3628_p9), %v3784_v4 }
0x2312   : >> { %v5013_v25 = vpop.eup %5012 }
0x2313   : >> { %v5015_v57 = vpop.eup %5014  ;;  %v3684_v61 = vmul.f32 %v5172_v44, %v5013_v25 }
0x2314   : >> { %v3685_v34 = vmul.f32 %v5168_v23, %v5015_v57  ;;  %v5021_v6 = vpop.eup (%p3628_p9), %5020 }
0x2315   : > { %v3786_v11 = vadd.f32 (%p3628_p9), 1.0, %v5021_v6 }
0x2317   : > { %5022 = vrcp.f32 (%p3628_p9), %v3786_v11 }
0x2321   : > { %v5023_v55 = vpop.eup (%p3628_p9), %5022 }
0x2322   : > { %v3789_v18 = vmul.f32 (%p3628_p9), %v5023_v55, %v6027_v41 }
0x232a   : >> { %5010 = vset.pattern.permute.xlu0 %v5202_v45 }
0x2381   : >> { %v3656_v47 = vpop.trf.xlu0 }
0x2382   : >> { %3688 = vperm.xlu0 %5010, %v3656_v47  }
0x2385   : >> { %v3657_v49 = vpop.trf.xlu0 }
0x2386   : >> { %3693 = vperm.xlu1 %5011, %v3657_v49  }
0x2401   : >> { %v3689_v58 = vpop.permute.xlu0 %3688 }
0x2402   : >> { %v3700_v19 = vmul.f32 %v4175_v60, %v3689_v58 }
0x2404   : >> { %v3702_v44 = vadd.f32 %v3700_v19, %v3684_v61  }
0x2405   : >> { %v3694_v29 = vpop.permute.xlu1 %3693 }
0x2406   : >> { %v3701_v63 = vmul.f32 %v4175_v60, %v3694_v29 }
0x2408   : >> { %v3703_v23 = vadd.f32 %v3701_v63, %v3685_v34  }
0x240a   : >> { %v4646_v30 = vpack.c.bf16 %v3703_v23, %v3702_v44 }
0x240c   : >> { %4647 = vmatpush3.bf16.msra.mxu0 %v4646_v30 }
0x240d   : > { %4618 = vmatprep.subr.bf16.mxu0 (%p3628_p9), %v5178_v8 }
0x240f   : >> { %4616 = vmatmul.mubr.msk.f32.vlgmr.msra.gmra.mrb[0].mxu0 %vm776_vm10, %v3673_v37 }
0x2410   : > { %4626 = vmatprep.mubr.msk.bf16.mxu0 (%p3628_p9), %vm5179_vm1, %v5178_v8  ;;  %4619 = vmatpush3.bf16.msra.mxu0 (%p3628_p9), %v5016_v40 }
0x2411   : > { %4620 = vmatprep.subr.bf16.mxu0 (%p3628_p9), %v5178_v8 }
0x2414   : > { %4621 = vmatpush3.bf16.msra.mxu0 (%p3628_p9), %v5017_v3 }
0x2415   : > { %4622 = vmatprep.subr.bf16.mxu0 (%p3628_p9), %v5178_v8 }
0x2418   : > { %4623 = vmatpush3.bf16.msra.mxu0 (%p3628_p9), %v5018_v15 }
0x2419   : > { %4624 = vmatprep.subr.bf16.mxu0 (%p3628_p9), %v5178_v8 }
0x241c   : > { %4625 = vmatpush3.bf16.msra.mxu0 (%p3628_p9), %v5019_v16 }
0x24dd   : > { %3630 = sbr.rel (!%p3628_p9) target bundleno = 8959 (0x22ff), region = 233 }
0x24e2   : >> { %v3773_v31 = vpop.f32.mrb[0].mxu0 }
0x24e3   : >> { %3779 = vst.msk [vmem:[%s3777_s27] sm:$0x1] %vm998_vm12, %v3773_v31  ;;  %v4617_v1 = vpop.f32.mrb[1].mxu0 }
0x24ea   : > { %v3780_v14 = vld [vmem:[#allocation7] sm:$0xff] }
0x24eb   : > { %v3782_v17 = vadd.f32 %v3781_v12, %v3780_v14 }
0x24ed   : > { %v3790_v33 = vmul.f32 %v3789_v18, %v3782_v17 }
0x24ef   : > { %v3791_v20 = vpack.c.bf16 %v3790_v33, %v3790_v33 }
0x24f1   : > { %4627 = vmatmul.mubr.msk.bf16.vlgmr.msra.gmra.mrb[0].mxu0 %vm725_vm6, %v3791_v20 }
0x25c4   : > { %v3862_v22 = vpop.f32.mrb[0].mxu0 }
0x25c5   : > { %v3863_v8 = vadd.f32 %v3862_v22, %v3800_v52  ;;  %v4628_v24 = vpop.f32.mrb[1].mxu0 }
0x25c6   : > { %v3865_v26 = vpop.f32.mrb[2].mxu0 }
0x25c7   : > { %v4629_v27 = vpop.f32.mrb[3].mxu0  ;;  %v3870_v62 = vsel %vm522_vm0, %v3863_v8, 0.0 }
0x25c8   : > { %3871 = vadd.xlane.f32.xlu0 %v3870_v62 }
0x2655   : > { %v3872_v5 = vpop.xlane.xlu0 %3871 }
0x2656   : > { %v3873_v10 = vmul.f32 0.03125, %v3872_v5 }
0x2658   : > { %v3874_v48 = vsub.f32 %v3863_v8, %v3873_v10 }
0x265a   : > { %v3875_v32 = vmul.f32 %v3874_v48, %v3874_v48 }
0x265c   : > { %v3876_v41 = vsel %vm522_vm0, %v3875_v32, 0.0 }
0x265d   : > { %3877 = vadd.xlane.f32.xlu0 %v3876_v41 }
0x26ea   : > { %v3878_v59 = vpop.xlane.xlu0 %3877 }
0x26eb   : > { %v3879_v35 = vmul.f32 0.03125, %v3878_v59 }
0x26ed   : > { %v3880_v21 = vadd.f32 1e-05, %v3879_v35 }
0x26ef   : > { %5024 = vrsqrt.f32 %v3880_v21 }
0x26f9   : > { %v5025_v13 = vpop.eup %5024 }
0x26fa   : > { %v3882_v38 = vmul.f32 %v5025_v13, %v3874_v48 }
0x26fc   : > { %v3889_v7 = vmul.f32 %v4182_v36, %v3882_v38 }
0x26fe   : > { %v3896_v42 = vadd.f32 %v4183_v39, %v3889_v7 }
0x2700   : > { %3897 = vst.msk [vmem:[%s5295_s21] sm:$0xff] %vm522_vm0, %v3896_v42 }
0x2701 PF: > { %s24_s29 = sadd.s32 1, %s5104_s29  }
0x2702   : > { %p21_p10 = scmp.ge.s32.totalorder %s24_s29, 4  }
0x2704   :  { %23 = sbr.rel (!%p21_p10) target bundleno = 1 (0x1), region = 244 }

</bundles_post_ra>
